<compile_context>
chip_gen: v7x
topology: tpu7x:2x2x1
jax: 0.10.0
libtpu: 0.0.40
codegen_flags: <defaults>
</compile_context>

<pallas_src>
import jax
import jax.numpy as jnp
from jax.experimental import pallas as pl
from jax.experimental.pallas import tpu as pltpu

# ----------------------------------------------------------------------------
# Scaled-down configuration (structure identical to the reference module;
# original: context_scale=10, pad=2000, k=64, embeddings=384, channels=128).
# ----------------------------------------------------------------------------
CONTEXT_SCALE = 10
PAD_NODES = 80                               # reference: 2000
K = 4                                        # reference: 64
EMBEDDINGS = 16                              # reference: 384
CHANNELS = 32                                # reference: 128 (must be % 8 == 0)
KERNEL_W = (K * EMBEDDINGS) // CHANNELS      # reference: 192
SEQ = PAD_NODES // CONTEXT_SCALE             # reference: 200
NUM_HEADS = CHANNELS // 8
NUM_GROUPS = NUM_HEADS // 2
HEAD_DIM = CHANNELS // NUM_HEADS
GROUP_SIZE = SEQ // NUM_GROUPS
FF_DIM = CHANNELS * 4
NUM_DIFFUSION_STEPS = 2                      # reference default: 10 per block
DEPTH = 2                                    # reference default: 3 blocks
NUM_TLAYERS = 3                              # hard-coded 3 transformer layers per block
BATCH = 2
NODES = 7                                    # < PAD_NODES -> padding branch taken

MATMUL_DTYPE = jnp.bfloat16                  # bf16 operands, f32 accumulation

assert CHANNELS % 8 == 0
assert SEQ % NUM_GROUPS == 0
assert (K * EMBEDDINGS) % KERNEL_W == 0


def _broadcast_spec(shape):
    """BlockSpec covering the whole array, same block for every grid step."""
    zeros = (0,) * len(shape)
    return pl.BlockSpec(shape, lambda *_, z=zeros: z)


# ----------------------------------------------------------------------------
# Pallas kernel: strided conv (kernel == stride) over VALID patch rows only.
# Input block keeps the natural node-row layout (lane dim = CHANNELS*KERNEL_W);
# output block is lane-dense (seq_tile, CHANNELS).
# ----------------------------------------------------------------------------
def _conv_kernel(x_ref, wt_ref, p_ref, b_ref, o_ref):
    # x_ref:  (1, S_TILE, CONTEXT_SCALE, CHANNELS*KERNEL_W)
    # wt_ref: (CONTEXT_SCALE, CHANNELS*KERNEL_W)   conv weight tiled along lanes
    # p_ref:  (CHANNELS*KERNEL_W, CHANNELS)        0/1 segment-sum matrix
    # b_ref:  (1, 1)                               conv bias
    x = x_ref[0]                                    # (S_TILE, CS, C*KW)
    prod = x * wt_ref[...][None, :, :]              # VPU, lane-dense
    summed = jnp.sum(prod, axis=1)                  # (S_TILE, C*KW) sublane reduce over CS
    out = jnp.dot(summed, p_ref[...], preferred_element_type=jnp.float32)
    o_ref[0] = out + b_ref[0, 0]                    # (S_TILE, CHANNELS), CHANNELS on lanes


def conv_project(x_flat, conv_w, conv_b):
    """x_flat: (B, nodes, K*EMB) -> (B, SEQ, CHANNELS), matching Conv2d(kernel=stride)."""
    B, nodes, ckw = x_flat.shape
    nv = -(-nodes // CONTEXT_SCALE)                 # number of valid seq rows
    s_tile = nv if nv < 8 else 8
    nv_pad = -(-nv // s_tile) * s_tile
    pad_rows = nv_pad * CONTEXT_SCALE - nodes
    if pad_rows:
        x_flat = jnp.concatenate(
            [x_flat, jnp.zeros((B, pad_rows, ckw), x_flat.dtype)], axis=1)
    x4 = x_flat.reshape(B, nv_pad, CONTEXT_SCALE, ckw)   # free view reshape, no transpose

    w_tiled = jnp.tile(conv_w, (1, CHANNELS))            # (CS, C*KW): [i, c*KW+j] = w[i, j]
    seg = (jnp.arange(ckw)[:, None] // KERNEL_W ==
           jnp.arange(CHANNELS)[None, :]).astype(jnp.float32)   # (C*KW, C)
    b2 = conv_b.reshape(1, 1).astype(jnp.float32)

    n_tiles = nv_pad // s_tile
    valid = pl.pallas_call(
        _conv_kernel,
        out_shape=jax.ShapeDtypeStruct((B, nv_pad, CHANNELS), jnp.float32),
        grid=(B, n_tiles),
        in_specs=[
            pl.BlockSpec((1, s_tile, CONTEXT_SCALE, ckw), lambda b, t: (b, t, 0, 0)),
            pl.BlockSpec((CONTEXT_SCALE, ckw), lambda b, t: (0, 0)),
            pl.BlockSpec((ckw, CHANNELS), lambda b, t: (0, 0)),
            pl.BlockSpec((1, 1), lambda b, t: (0, 0)),
        ],
        out_specs=pl.BlockSpec((1, s_tile, CHANNELS), lambda b, t: (b, t, 0)),
        compiler_params=pltpu.CompilerParams(
            dimension_semantics=("parallel", "parallel")),
    )(x4, w_tiled, seg, b2)

    rows = min(nv_pad, SEQ)
    out = valid[:, :rows, :]
    if rows < SEQ:
        # zero-padded patches produce exactly the bias -> fill remaining rows in glue.
        bias_fill = jnp.broadcast_to(
            conv_b.reshape(1, 1, 1).astype(jnp.float32), (B, SEQ - rows, CHANNELS))
        out = jnp.concatenate([out, bias_fill], axis=1)
    return out


# ----------------------------------------------------------------------------
# Pallas kernel: one diffusion step of a block = 3 fused TransformerLayers.
# adaLN outputs are precomputed in glue (depend only on c) and passed in.
# ----------------------------------------------------------------------------
def _block_kernel(x_ref, ada_ref,
                  wqkv_ref, bqkv_ref, wout_ref, bout_ref,
                  wff1_ref, bff1_ref, wff2_ref, bff2_ref,
                  o_ref):
    C = CHANNELS
    D = HEAD_DIM
    GS = GROUP_SIZE
    x = x_ref[0]                                    # (SEQ, C) float32

    def layer_norm(v):                              # LayerNorm, no affine, eps=1e-6
        m = jnp.mean(v, axis=-1, keepdims=True)
        var = jnp.mean((v - m) ** 2, axis=-1, keepdims=True)
        return (v - m) * jax.lax.rsqrt(var + 1e-6)

    inv_sqrt_d = 1.0 / (D ** 0.5)

    for l in range(NUM_TLAYERS):
        ada = ada_ref[l]                            # (SEQ, 6C)
        shift_msa = ada[:, 0 * C:1 * C]
        scale_msa = ada[:, 1 * C:2 * C]
        gate_msa = ada[:, 2 * C:3 * C]
        shift_mlp = ada[:, 3 * C:4 * C]
        scale_mlp = ada[:, 4 * C:5 * C]
        gate_mlp = ada[:, 5 * C:6 * C]

        # ---- attention branch: x + gate * Attn(modulate(LN(x))) ----
        h = layer_norm(x) * (1.0 + scale_msa) + shift_msa
        qkv = jnp.dot(h.astype(MATMUL_DTYPE), wqkv_ref[l],
                      preferred_element_type=jnp.float32) + bqkv_ref[l]
        q = qkv[:, 0 * C:1 * C]
        k = qkv[:, 1 * C:2 * C]
        v = qkv[:, 2 * C:3 * C]

        # Grouped attention: per head, batch the NUM_GROUPS block-diagonal groups
        # into one einsum (no full SEQxSEQ scores, no mask).
        head_outs = []
        for hh in range(NUM_HEADS):
            qh = q[:, hh * D:(hh + 1) * D].reshape(NUM_GROUPS, GS, D)
            kh = k[:, hh * D:(hh + 1) * D].reshape(NUM_GROUPS, GS, D)
            vh = v[:, hh * D:(hh + 1) * D].reshape(NUM_GROUPS, GS, D)
            s = jnp.einsum('gqd,gkd->gqk', qh, kh,
                           preferred_element_type=jnp.float32) * inv_sqrt_d
            s = s - jnp.max(s, axis=-1, keepdims=True)
            p = jnp.exp(s)
            p = p * pl.reciprocal(jnp.sum(p, axis=-1, keepdims=True), approx=True)
            oh = jnp.einsum('gqk,gkd->gqd', p, vh,
                            preferred_element_type=jnp.float32)
            head_outs.append(oh.reshape(SEQ, D))
        attn = jnp.concatenate(head_outs, axis=-1)            # (SEQ, C)
        attn = jnp.dot(attn.astype(MATMUL_DTYPE), wout_ref[l],
                       preferred_element_type=jnp.float32) + bout_ref[l]

        x = x + gate_msa * attn
        x = layer_norm(x)                                     # reference: x = self.norm1(x)

        # ---- feedforward branch: x + gate * MLP(modulate(LN(x))) ----
        h2 = layer_norm(x) * (1.0 + scale_mlp) + shift_mlp
        ff = jnp.dot(h2.astype(MATMUL_DTYPE), wff1_ref[l],
                     preferred_element_type=jnp.float32) + bff1_ref[l]
        ff = jnp.maximum(ff, 0.0)
        ff = jnp.dot(ff.astype(MATMUL_DTYPE), wff2_ref[l],
                     preferred_element_type=jnp.float32) + bff2_ref[l]

        x = x + gate_mlp * ff
        x = layer_norm(x)                                     # reference: x = self.norm2(x)

    o_ref[0] = x


def transformer_block_step(x, ada, block):
    """One diffusion step of one block: 3 fused transformer layers.

    x: (B, SEQ, CHANNELS); ada: (NUM_TLAYERS, SEQ, 6*CHANNELS) precomputed adaLN.
    """
    B = x.shape[0]
    args = (x, ada,
            block["w_qkv"], block["b_qkv"],
            block["w_out"], block["b_out"],
            block["w_ff1"], block["b_ff1"],
            block["w_ff2"], block["b_ff2"])
    in_specs = [pl.BlockSpec((1, SEQ, CHANNELS), lambda i: (i, 0, 0))]
    for a in args[1:]:
        in_specs.append(_broadcast_spec(a.shape))

    return pl.pallas_call(
        _block_kernel,
        out_shape=jax.ShapeDtypeStruct((B, SEQ, CHANNELS), jnp.float32),
        grid=(B,),
        in_specs=in_specs,
        out_specs=pl.BlockSpec((1, SEQ, CHANNELS), lambda i: (i, 0, 0)),
        compiler_params=pltpu.CompilerParams(dimension_semantics=("parallel",)),
    )(*args)


# ----------------------------------------------------------------------------
# Deterministic parameter initialization (synthetic; shapes follow __init__).
# Per-block layer weights are stacked over the 3 layers for the fused kernel.
# ----------------------------------------------------------------------------
def _init_linear_stack(key, n, fan_in, fan_out):
    k1, k2 = jax.random.split(key)
    w = jax.random.normal(k1, (n, fan_in, fan_out), jnp.float32) * (1.0 / jnp.sqrt(fan_in))
    b = jax.random.normal(k2, (n, 1, fan_out), jnp.float32) * 0.01
    return w, b


def init_params(key):
    keys = jax.random.split(key, 3)
    params = {
        "conv_w": jax.random.normal(keys[0], (CONTEXT_SCALE, KERNEL_W), jnp.float32) * 0.1,
        "conv_b": jax.random.normal(keys[1], (1,), jnp.float32) * 0.01,
        "blocks": [],
    }
    bkeys = jax.random.split(keys[2], DEPTH)
    for d in range(DEPTH):
        bk = jax.random.split(bkeys[d], 7)
        w_qkv, b_qkv = _init_linear_stack(bk[0], NUM_TLAYERS, CHANNELS, 3 * CHANNELS)
        w_out, b_out = _init_linear_stack(bk[1], NUM_TLAYERS, CHANNELS, CHANNELS)
        w_ff1, b_ff1 = _init_linear_stack(bk[2], NUM_TLAYERS, CHANNELS, FF_DIM)
        w_ff2, b_ff2 = _init_linear_stack(bk[3], NUM_TLAYERS, FF_DIM, CHANNELS)
        w_ada, b_ada = _init_linear_stack(bk[4], NUM_TLAYERS, CHANNELS, 6 * CHANNELS)
        block = {
            "time_embeddings": jax.random.normal(
                bk[5], (NUM_DIFFUSION_STEPS, SEQ, CHANNELS), jnp.float32) * 0.1,
            "noise_scale": jnp.linspace(1.0, 0.01, NUM_DIFFUSION_STEPS, dtype=jnp.float32),
            # adaLN weights stay f32 (used in glue); matmul weights in bf16.
            "w_ada": w_ada, "b_ada": b_ada,
            "w_qkv": w_qkv.astype(MATMUL_DTYPE), "b_qkv": b_qkv,
            "w_out": w_out.astype(MATMUL_DTYPE), "b_out": b_out,
            "w_ff1": w_ff1.astype(MATMUL_DTYPE), "b_ff1": b_ff1,
            "w_ff2": w_ff2.astype(MATMUL_DTYPE), "b_ff2": b_ff2,
        }
        params["blocks"].append(block)
    return params


# ----------------------------------------------------------------------------
# Forward pass (eval path: training=False, no ground_truth / loss branch)
# ----------------------------------------------------------------------------
@jax.jit
def genetic_diffusion_forward(x, params, noise_key):
    # x: (B, NODES, K, EMBEDDINGS)
    B, nodes, kk, emb = x.shape
    x = x.reshape(B, nodes, kk * emb)
    x = conv_project(x, params["conv_w"], params["conv_b"])     # (B, SEQ, CHANNELS)

    for d, block in enumerate(params["blocks"]):
        # adaLN depends only on the time embeddings -> precompute for all steps/layers.
        te = block["time_embeddings"]                           # (T, SEQ, C)
        te_silu = te * jax.nn.sigmoid(te)
        ada_all = (jnp.einsum('tsc,lcf->tlsf', te_silu, block["w_ada"])
                   + block["b_ada"][None])                      # (T, L, SEQ, 6C)

        for step in range(NUM_DIFFUSION_STEPS):
            nk = jax.random.fold_in(noise_key, d * NUM_DIFFUSION_STEPS + step)
            noise = jax.random.normal(nk, x.shape, x.dtype) * block["noise_scale"][step]
            x = x + noise                                       # x_1 = x_1 + noise
            x = transformer_block_step(x, ada_all[step], block)
    return x


if __name__ == "__main__":
    key = jax.random.PRNGKey(0)
    k_x, k_params, k_noise = jax.random.split(key, 3)

    x = jax.random.normal(k_x, (BATCH, NODES, K, EMBEDDINGS), jnp.float32)
    params = init_params(k_params)

    out = genetic_diffusion_forward(x, params, k_noise)
    out = jax.block_until_ready(out)

    assert out.shape == (BATCH, SEQ, CHANNELS), out.shape
    assert bool(jnp.all(jnp.isfinite(out)))
    # TODO(synk): training branch (F.mse_loss against conv-projected ground_truth) not implemented.
    print("KERNEL_OK")
</pallas_src>

<mosaic_0001>
module attributes {stable_mosaic.version = 11 : i64} {
  func.func @_conv_kernel(%arg0: i32, %arg1: i32, %arg2: memref<1x1x10x64xf32, #tpu.memory_space<vmem>>, %arg3: memref<10x64xf32, #tpu.memory_space<vmem>>, %arg4: memref<64x32xf32, #tpu.memory_space<vmem>>, %arg5: memref<1x1xf32, #tpu.memory_space<vmem>>, %arg6: memref<1x1x32xf32, #tpu.memory_space<vmem>>) attributes {dimension_semantics = [#tpu.dimension_semantics<parallel>, #tpu.dimension_semantics<parallel>], iteration_bounds = array<i64: 2, 1>, scalar_prefetch = 0 : i64, scratch_operands = 0 : i64, tpu.core_type = #tpu.core_type<tc>, window_params = [{transform_indices = @transform_0, window_bounds = array<i64: 1, 1, 10, 64>}, {pipeline_mode = #tpu.pipeline_mode<synchronous>, transform_indices = @transform_1, window_bounds = array<i64: 10, 64>}, {pipeline_mode = #tpu.pipeline_mode<synchronous>, transform_indices = @transform_2, window_bounds = array<i64: 64, 32>}, {pipeline_mode = #tpu.pipeline_mode<synchronous>, transform_indices = @transform_3, window_bounds = array<i64: 1, 1>}, {transform_indices = @transform_4, window_bounds = array<i64: 1, 1, 32>}]} {
    %c0 = arith.constant 0 : index
    %c0_0 = arith.constant 0 : index
    %c0_1 = arith.constant 0 : index
    %c0_2 = arith.constant 0 : index
    %0 = vector.load %arg2[%c0, %c0_0, %c0_1, %c0_2] : memref<1x1x10x64xf32, #tpu.memory_space<vmem>>, vector<1x1x10x64xf32>
    %1 = vector.shape_cast %0 : vector<1x1x10x64xf32> to vector<1x10x64xf32>
    %c0_3 = arith.constant 0 : index
    %c0_4 = arith.constant 0 : index
    %2 = vector.load %arg3[%c0_3, %c0_4] : memref<10x64xf32, #tpu.memory_space<vmem>>, vector<10x64xf32>
    %3 = vector.shape_cast %2 : vector<10x64xf32> to vector<1x10x64xf32>
    %4 = arith.mulf %1, %3 : vector<1x10x64xf32>
    %cst = arith.constant dense<0.000000e+00> : vector<1x64xf32>
    %5 = vector.multi_reduction <add>, %4, %cst [1] : vector<1x10x64xf32> to vector<1x64xf32>
    %c0_5 = arith.constant 0 : index
    %c0_6 = arith.constant 0 : index
    %6 = vector.load %arg4[%c0_5, %c0_6] : memref<64x32xf32, #tpu.memory_space<vmem>>, vector<64x32xf32>
    %cst_7 = arith.constant dense<0.000000e+00> : vector<1x32xf32>
    %7 = tpu.matmul %5, %6, %cst_7 {dimension_numbers = #tpu.dot_dimension_numbers<[1], [0], [0], [1], [0, 0, 1, 1], [], []>} : vector<1x64xf32>, vector<64x32xf32>, vector<1x32xf32> -> vector<1x32xf32>
    %c0_8 = arith.constant 0 : index
    %c0_9 = arith.constant 0 : index
    %8 = vector.load %arg5[%c0_8, %c0_9] : memref<1x1xf32, #tpu.memory_space<vmem>>, vector<1x1xf32>
    %9 = vector.extract %8[0, 0] : f32 from vector<1x1xf32>
    %10 = vector.broadcast %9 : f32 to vector<1x32xf32>
    %11 = arith.addf %7, %10 : vector<1x32xf32>
    %c0_10 = arith.constant 0 : index
    %c0_11 = arith.constant 0 : index
    %c0_12 = arith.constant 0 : index
    %12 = vector.load %arg6[%c0_10, %c0_11, %c0_12] : memref<1x1x32xf32, #tpu.memory_space<vmem>>, vector<1x1x32xf32>
    %13 = vector.shape_cast %12 : vector<1x1x32xf32> to vector<1x32xf32>
    %14 = vector.shape_cast %11 : vector<1x32xf32> to vector<1x1x32xf32>
    tpu.vector_store %arg6[%c0_10, %c0_11, %c0_12], %14 {strides = array<i32>} : memref<1x1x32xf32, #tpu.memory_space<vmem>>, vector<1x1x32xf32>,
    return
  }
  func.func @transform_0(%arg0: i32, %arg1: i32) -> (i32, i32, i32, i32) {
    %c0_i32 = arith.constant 0 : i32
    %c0_i32_0 = arith.constant 0 : i32
    %c0_i32_1 = arith.constant 0 : i32
    return %arg0, %arg1, %c0_i32, %c0_i32_0 : i32, i32, i32, i32
  }
  func.func @transform_1(%arg0: i32, %arg1: i32) -> (i32, i32) {
    %c0_i32 = arith.constant 0 : i32
    %c0_i32_0 = arith.constant 0 : i32
    %c0_i32_1 = arith.constant 0 : i32
    return %c0_i32, %c0_i32_0 : i32, i32
  }
  func.func @transform_2(%arg0: i32, %arg1: i32) -> (i32, i32) {
    %c0_i32 = arith.constant 0 : i32
    %c0_i32_0 = arith.constant 0 : i32
    %c0_i32_1 = arith.constant 0 : i32
    return %c0_i32, %c0_i32_0 : i32, i32
  }
  func.func @transform_3(%arg0: i32, %arg1: i32) -> (i32, i32) {
    %c0_i32 = arith.constant 0 : i32
    %c0_i32_0 = arith.constant 0 : i32
    %c0_i32_1 = arith.constant 0 : i32
    return %c0_i32, %c0_i32_0 : i32, i32
  }
  func.func @transform_4(%arg0: i32, %arg1: i32) -> (i32, i32, i32) {
    %c0_i32 = arith.constant 0 : i32
    %c0_i32_0 = arith.constant 0 : i32
    return %arg0, %arg1, %c0_i32 : i32, i32, i32
  }
}

module attributes {stable_mosaic.version = 11 : i64} {
  func.func @_block_kernel(%arg0: i32, %arg1: memref<1x8x32xf32, #tpu.memory_space<vmem>>, %arg2: memref<3x8x192xf32, #tpu.memory_space<vmem>>, %arg3: memref<3x32x96xbf16, #tpu.memory_space<vmem>>, %arg4: memref<3x1x96xf32, #tpu.memory_space<vmem>>, %arg5: memref<3x32x32xbf16, #tpu.memory_space<vmem>>, %arg6: memref<3x1x32xf32, #tpu.memory_space<vmem>>, %arg7: memref<3x32x128xbf16, #tpu.memory_space<vmem>>, %arg8: memref<3x1x128xf32, #tpu.memory_space<vmem>>, %arg9: memref<3x128x32xbf16, #tpu.memory_space<vmem>>, %arg10: memref<3x1x32xf32, #tpu.memory_space<vmem>>, %arg11: memref<1x8x32xf32, #tpu.memory_space<vmem>>) attributes {dimension_semantics = [#tpu.dimension_semantics<parallel>], iteration_bounds = array<i64: 2>, scalar_prefetch = 0 : i64, scratch_operands = 0 : i64, tpu.core_type = #tpu.core_type<tc>, window_params = [{transform_indices = @transform_0, window_bounds = array<i64: 1, 8, 32>}, {pipeline_mode = #tpu.pipeline_mode<synchronous>, transform_indices = @transform_1, window_bounds = array<i64: 3, 8, 192>}, {pipeline_mode = #tpu.pipeline_mode<synchronous>, transform_indices = @transform_2, window_bounds = array<i64: 3, 32, 96>}, {pipeline_mode = #tpu.pipeline_mode<synchronous>, transform_indices = @transform_3, window_bounds = array<i64: 3, 1, 96>}, {pipeline_mode = #tpu.pipeline_mode<synchronous>, transform_indices = @transform_4, window_bounds = array<i64: 3, 32, 32>}, {pipeline_mode = #tpu.pipeline_mode<synchronous>, transform_indices = @transform_5, window_bounds = array<i64: 3, 1, 32>}, {pipeline_mode = #tpu.pipeline_mode<synchronous>, transform_indices = @transform_6, window_bounds = array<i64: 3, 32, 128>}, {pipeline_mode = #tpu.pipeline_mode<synchronous>, transform_indices = @transform_7, window_bounds = array<i64: 3, 1, 128>}, {pipeline_mode = #tpu.pipeline_mode<synchronous>, transform_indices = @transform_8, window_bounds = array<i64: 3, 128, 32>}, {pipeline_mode = #tpu.pipeline_mode<synchronous>, transform_indices = @transform_9, window_bounds = array<i64: 3, 1, 32>}, {transform_indices = @transform_10, window_bounds = array<i64: 1, 8, 32>}]} {
    %c0 = arith.constant 0 : index
    %c0_0 = arith.constant 0 : index
    %c0_1 = arith.constant 0 : index
    %0 = vector.load %arg1[%c0, %c0_0, %c0_1] : memref<1x8x32xf32, #tpu.memory_space<vmem>>, vector<1x8x32xf32>
    %1 = vector.shape_cast %0 : vector<1x8x32xf32> to vector<8x32xf32>
    %c0_2 = arith.constant 0 : index
    %c0_3 = arith.constant 0 : index
    %c0_4 = arith.constant 0 : index
    %2 = vector.load %arg2[%c0_2, %c0_3, %c0_4] : memref<3x8x192xf32, #tpu.memory_space<vmem>>, vector<1x8x192xf32>
    %3 = vector.shape_cast %2 : vector<1x8x192xf32> to vector<8x192xf32>
    %4 = vector.extract_strided_slice %3 {offsets = [0, 0], sizes = [8, 32], strides = [1, 1]} : vector<8x192xf32> to vector<8x32xf32>
    %5 = vector.extract_strided_slice %3 {offsets = [0, 32], sizes = [8, 32], strides = [1, 1]} : vector<8x192xf32> to vector<8x32xf32>
    %6 = vector.extract_strided_slice %3 {offsets = [0, 64], sizes = [8, 32], strides = [1, 1]} : vector<8x192xf32> to vector<8x32xf32>
    %7 = vector.extract_strided_slice %3 {offsets = [0, 96], sizes = [8, 32], strides = [1, 1]} : vector<8x192xf32> to vector<8x32xf32>
    %8 = vector.extract_strided_slice %3 {offsets = [0, 128], sizes = [8, 32], strides = [1, 1]} : vector<8x192xf32> to vector<8x32xf32>
    %9 = vector.extract_strided_slice %3 {offsets = [0, 160], sizes = [8, 32], strides = [1, 1]} : vector<8x192xf32> to vector<8x32xf32>
    %cst = arith.constant dense<0.000000e+00> : vector<8xf32>
    %10 = vector.multi_reduction <add>, %1, %cst [1] : vector<8x32xf32> to vector<8xf32>
    %11 = vector.shape_cast %10 : vector<8xf32> to vector<8x1xf32>
    %cst_5 = arith.constant 3.200000e+01 : f32
    %12 = vector.broadcast %cst_5 : f32 to vector<8x1xf32>
    %13 = arith.divf %11, %12 : vector<8x1xf32>
    %14 = vector.broadcast %13 : vector<8x1xf32> to vector<8x32xf32>
    %15 = arith.subf %1, %14 : vector<8x32xf32>
    %16 = arith.mulf %15, %15 : vector<8x32xf32>
    %cst_6 = arith.constant dense<0.000000e+00> : vector<8xf32>
    %17 = vector.multi_reduction <add>, %16, %cst_6 [1] : vector<8x32xf32> to vector<8xf32>
    %18 = vector.shape_cast %17 : vector<8xf32> to vector<8x1xf32>
    %cst_7 = arith.constant 3.200000e+01 : f32
    %19 = vector.broadcast %cst_7 : f32 to vector<8x1xf32>
    %20 = arith.divf %18, %19 : vector<8x1xf32>
    %21 = vector.broadcast %13 : vector<8x1xf32> to vector<8x32xf32>
    %22 = arith.subf %1, %21 : vector<8x32xf32>
    %cst_8 = arith.constant 9.99999997E-7 : f32
    %23 = vector.broadcast %cst_8 : f32 to vector<8x1xf32>
    %24 = arith.addf %20, %23 : vector<8x1xf32>
    %25 = math.rsqrt %24 : vector<8x1xf32>
    %26 = vector.broadcast %25 : vector<8x1xf32> to vector<8x32xf32>
    %27 = arith.mulf %22, %26 : vector<8x32xf32>
    %cst_9 = arith.constant 1.000000e+00 : f32
    %28 = vector.broadcast %cst_9 : f32 to vector<8x32xf32>
    %29 = arith.addf %28, %5 : vector<8x32xf32>
    %30 = arith.mulf %27, %29 : vector<8x32xf32>
    %31 = arith.addf %30, %4 : vector<8x32xf32>
    %32 = arith.truncf %31 : vector<8x32xf32> to vector<8x32xbf16>
    %c0_10 = arith.constant 0 : index
    %c0_11 = arith.constant 0 : index
    %c0_12 = arith.constant 0 : index
    %33 = vector.load %arg3[%c0_10, %c0_11, %c0_12] : memref<3x32x96xbf16, #tpu.memory_space<vmem>>, vector<1x32x96xbf16>
    %34 = vector.shape_cast %33 : vector<1x32x96xbf16> to vector<32x96xbf16>
    %cst_13 = arith.constant dense<0.000000e+00> : vector<8x96xf32>
    %35 = tpu.matmul %32, %34, %cst_13 {dimension_numbers = #tpu.dot_dimension_numbers<[1], [0], [0], [1], [0, 0, 1, 1], [], []>} : vector<8x32xbf16>, vector<32x96xbf16>, vector<8x96xf32> -> vector<8x96xf32>
    %c0_14 = arith.constant 0 : index
    %c0_15 = arith.constant 0 : index
    %c0_16 = arith.constant 0 : index
    %36 = vector.load %arg4[%c0_14, %c0_15, %c0_16] : memref<3x1x96xf32, #tpu.memory_space<vmem>>, vector<1x1x96xf32>
    %37 = vector.shape_cast %36 : vector<1x1x96xf32> to vector<1x96xf32>
    %38 = vector.broadcast %37 : vector<1x96xf32> to vector<8x96xf32>
    %39 = arith.addf %35, %38 : vector<8x96xf32>
    %40 = vector.extract_strided_slice %39 {offsets = [0, 0], sizes = [8, 32], strides = [1, 1]} : vector<8x96xf32> to vector<8x32xf32>
    %41 = vector.extract_strided_slice %39 {offsets = [0, 32], sizes = [8, 32], strides = [1, 1]} : vector<8x96xf32> to vector<8x32xf32>
    %42 = vector.extract_strided_slice %39 {offsets = [0, 64], sizes = [8, 32], strides = [1, 1]} : vector<8x96xf32> to vector<8x32xf32>
    %43 = vector.extract_strided_slice %40 {offsets = [0, 0], sizes = [8, 8], strides = [1, 1]} : vector<8x32xf32> to vector<8x8xf32>
    %44 = vector.shape_cast %43 : vector<8x8xf32> to vector<2x4x8xf32>
    %45 = vector.extract_strided_slice %41 {offsets = [0, 0], sizes = [8, 8], strides = [1, 1]} : vector<8x32xf32> to vector<8x8xf32>
    %46 = vector.shape_cast %45 : vector<8x8xf32> to vector<2x4x8xf32>
    %47 = vector.extract_strided_slice %42 {offsets = [0, 0], sizes = [8, 8], strides = [1, 1]} : vector<8x32xf32> to vector<8x8xf32>
    %48 = vector.shape_cast %47 : vector<8x8xf32> to vector<2x4x8xf32>
    "tpu.trace_start"() <{level = 10 : i32, message = "gqd,gkd->gqk"}> : () -> ()
    %cst_17 = arith.constant dense<0.000000e+00> : vector<2x4x4xf32>
    %49 = tpu.matmul %44, %46, %cst_17 {dimension_numbers = #tpu.dot_dimension_numbers<[2], [2], [1], [1], [0, 0, 0, 1, 1, 1], [0], [0]>} : vector<2x4x8xf32>, vector<2x4x8xf32>, vector<2x4x4xf32> -> vector<2x4x4xf32>
    "tpu.trace_stop"() : () -> ()
    %cst_18 = arith.constant 0.353553385 : f32
    %50 = vector.broadcast %cst_18 : f32 to vector<2x4x4xf32>
    %51 = arith.mulf %49, %50 : vector<2x4x4xf32>
    %cst_19 = arith.constant dense<0xFF800000> : vector<2x4xf32>
    %52 = vector.multi_reduction <maximumf>, %51, %cst_19 [2] : vector<2x4x4xf32> to vector<2x4xf32>
    %53 = vector.shape_cast %52 : vector<2x4xf32> to vector<2x4x1xf32>
    %54 = vector.broadcast %53 : vector<2x4x1xf32> to vector<2x4x4xf32>
    %55 = arith.subf %51, %54 : vector<2x4x4xf32>
    %56 = math.exp %55 : vector<2x4x4xf32>
    %cst_20 = arith.constant dense<0.000000e+00> : vector<2x4xf32>
    %57 = vector.multi_reduction <add>, %56, %cst_20 [2] : vector<2x4x4xf32> to vector<2x4xf32>
    %58 = vector.shape_cast %57 : vector<2x4xf32> to vector<2x4x1xf32>
    %59 = tpu.reciprocal %58 {approx = true} : vector<2x4x1xf32> -> vector<2x4x1xf32>
    %60 = vector.broadcast %59 : vector<2x4x1xf32> to vector<2x4x4xf32>
    %61 = arith.mulf %56, %60 : vector<2x4x4xf32>
    "tpu.trace_start"() <{level = 10 : i32, message = "gqk,gkd->gqd"}> : () -> ()
    %cst_21 = arith.constant dense<0.000000e+00> : vector<2x4x8xf32>
    %62 = tpu.matmul %61, %48, %cst_21 {dimension_numbers = #tpu.dot_dimension_numbers<[2], [1], [1], [2], [0, 0, 0, 1, 1, 2], [0], [0]>} : vector<2x4x4xf32>, vector<2x4x8xf32>, vector<2x4x8xf32> -> vector<2x4x8xf32>
    "tpu.trace_stop"() : () -> ()
    %63 = vector.shape_cast %62 : vector<2x4x8xf32> to vector<8x8xf32>
    %64 = vector.extract_strided_slice %40 {offsets = [0, 8], sizes = [8, 8], strides = [1, 1]} : vector<8x32xf32> to vector<8x8xf32>
    %65 = vector.shape_cast %64 : vector<8x8xf32> to vector<2x4x8xf32>
    %66 = vector.extract_strided_slice %41 {offsets = [0, 8], sizes = [8, 8], strides = [1, 1]} : vector<8x32xf32> to vector<8x8xf32>
    %67 = vector.shape_cast %66 : vector<8x8xf32> to vector<2x4x8xf32>
    %68 = vector.extract_strided_slice %42 {offsets = [0, 8], sizes = [8, 8], strides = [1, 1]} : vector<8x32xf32> to vector<8x8xf32>
    %69 = vector.shape_cast %68 : vector<8x8xf32> to vector<2x4x8xf32>
    "tpu.trace_start"() <{level = 10 : i32, message = "gqd,gkd->gqk"}> : () -> ()
    %cst_22 = arith.constant dense<0.000000e+00> : vector<2x4x4xf32>
    %70 = tpu.matmul %65, %67, %cst_22 {dimension_numbers = #tpu.dot_dimension_numbers<[2], [2], [1], [1], [0, 0, 0, 1, 1, 1], [0], [0]>} : vector<2x4x8xf32>, vector<2x4x8xf32>, vector<2x4x4xf32> -> vector<2x4x4xf32>
    "tpu.trace_stop"() : () -> ()
    %cst_23 = arith.constant 0.353553385 : f32
    %71 = vector.broadcast %cst_23 : f32 to vector<2x4x4xf32>
    %72 = arith.mulf %70, %71 : vector<2x4x4xf32>
    %cst_24 = arith.constant dense<0xFF800000> : vector<2x4xf32>
    %73 = vector.multi_reduction <maximumf>, %72, %cst_24 [2] : vector<2x4x4xf32> to vector<2x4xf32>
    %74 = vector.shape_cast %73 : vector<2x4xf32> to vector<2x4x1xf32>
    %75 = vector.broadcast %74 : vector<2x4x1xf32> to vector<2x4x4xf32>
    %76 = arith.subf %72, %75 : vector<2x4x4xf32>
    %77 = math.exp %76 : vector<2x4x4xf32>
    %cst_25 = arith.constant dense<0.000000e+00> : vector<2x4xf32>
    %78 = vector.multi_reduction <add>, %77, %cst_25 [2] : vector<2x4x4xf32> to vector<2x4xf32>
    %79 = vector.shape_cast %78 : vector<2x4xf32> to vector<2x4x1xf32>
    %80 = tpu.reciprocal %79 {approx = true} : vector<2x4x1xf32> -> vector<2x4x1xf32>
    %81 = vector.broadcast %80 : vector<2x4x1xf32> to vector<2x4x4xf32>
    %82 = arith.mulf %77, %81 : vector<2x4x4xf32>
    "tpu.trace_start"() <{level = 10 : i32, message = "gqk,gkd->gqd"}> : () -> ()
    %cst_26 = arith.constant dense<0.000000e+00> : vector<2x4x8xf32>
    %83 = tpu.matmul %82, %69, %cst_26 {dimension_numbers = #tpu.dot_dimension_numbers<[2], [1], [1], [2], [0, 0, 0, 1, 1, 2], [0], [0]>} : vector<2x4x4xf32>, vector<2x4x8xf32>, vector<2x4x8xf32> -> vector<2x4x8xf32>
    "tpu.trace_stop"() : () -> ()
    %84 = vector.shape_cast %83 : vector<2x4x8xf32> to vector<8x8xf32>
    %85 = vector.extract_strided_slice %40 {offsets = [0, 16], sizes = [8, 8], strides = [1, 1]} : vector<8x32xf32> to vector<8x8xf32>
    %86 = vector.shape_cast %85 : vector<8x8xf32> to vector<2x4x8xf32>
    %87 = vector.extract_strided_slice %41 {offsets = [0, 16], sizes = [8, 8], strides = [1, 1]} : vector<8x32xf32> to vector<8x8xf32>
    %88 = vector.shape_cast %87 : vector<8x8xf32> to vector<2x4x8xf32>
    %89 = vector.extract_strided_slice %42 {offsets = [0, 16], sizes = [8, 8], strides = [1, 1]} : vector<8x32xf32> to vector<8x8xf32>
    %90 = vector.shape_cast %89 : vector<8x8xf32> to vector<2x4x8xf32>
    "tpu.trace_start"() <{level = 10 : i32, message = "gqd,gkd->gqk"}> : () -> ()
    %cst_27 = arith.constant dense<0.000000e+00> : vector<2x4x4xf32>
    %91 = tpu.matmul %86, %88, %cst_27 {dimension_numbers = #tpu.dot_dimension_numbers<[2], [2], [1], [1], [0, 0, 0, 1, 1, 1], [0], [0]>} : vector<2x4x8xf32>, vector<2x4x8xf32>, vector<2x4x4xf32> -> vector<2x4x4xf32>
    "tpu.trace_stop"() : () -> ()
    %cst_28 = arith.constant 0.353553385 : f32
    %92 = vector.broadcast %cst_28 : f32 to vector<2x4x4xf32>
    %93 = arith.mulf %91, %92 : vector<2x4x4xf32>
    %cst_29 = arith.constant dense<0xFF800000> : vector<2x4xf32>
    %94 = vector.multi_reduction <maximumf>, %93, %cst_29 [2] : vector<2x4x4xf32> to vector<2x4xf32>
    %95 = vector.shape_cast %94 : vector<2x4xf32> to vector<2x4x1xf32>
    %96 = vector.broadcast %95 : vector<2x4x1xf32> to vector<2x4x4xf32>
    %97 = arith.subf %93, %96 : vector<2x4x4xf32>
    %98 = math.exp %97 : vector<2x4x4xf32>
    %cst_30 = arith.constant dense<0.000000e+00> : vector<2x4xf32>
    %99 = vector.multi_reduction <add>, %98, %cst_30 [2] : vector<2x4x4xf32> to vector<2x4xf32>
    %100 = vector.shape_cast %99 : vector<2x4xf32> to vector<2x4x1xf32>
    %101 = tpu.reciprocal %100 {approx = true} : vector<2x4x1xf32> -> vector<2x4x1xf32>
    %102 = vector.broadcast %101 : vector<2x4x1xf32> to vector<2x4x4xf32>
    %103 = arith.mulf %98, %102 : vector<2x4x4xf32>
    "tpu.trace_start"() <{level = 10 : i32, message = "gqk,gkd->gqd"}> : () -> ()
    %cst_31 = arith.constant dense<0.000000e+00> : vector<2x4x8xf32>
    %104 = tpu.matmul %103, %90, %cst_31 {dimension_numbers = #tpu.dot_dimension_numbers<[2], [1], [1], [2], [0, 0, 0, 1, 1, 2], [0], [0]>} : vector<2x4x4xf32>, vector<2x4x8xf32>, vector<2x4x8xf32> -> vector<2x4x8xf32>
    "tpu.trace_stop"() : () -> ()
    %105 = vector.shape_cast %104 : vector<2x4x8xf32> to vector<8x8xf32>
    %106 = vector.extract_strided_slice %40 {offsets = [0, 24], sizes = [8, 8], strides = [1, 1]} : vector<8x32xf32> to vector<8x8xf32>
    %107 = vector.shape_cast %106 : vector<8x8xf32> to vector<2x4x8xf32>
    %108 = vector.extract_strided_slice %41 {offsets = [0, 24], sizes = [8, 8], strides = [1, 1]} : vector<8x32xf32> to vector<8x8xf32>
    %109 = vector.shape_cast %108 : vector<8x8xf32> to vector<2x4x8xf32>
    %110 = vector.extract_strided_slice %42 {offsets = [0, 24], sizes = [8, 8], strides = [1, 1]} : vector<8x32xf32> to vector<8x8xf32>
    %111 = vector.shape_cast %110 : vector<8x8xf32> to vector<2x4x8xf32>
    "tpu.trace_start"() <{level = 10 : i32, message = "gqd,gkd->gqk"}> : () -> ()
    %cst_32 = arith.constant dense<0.000000e+00> : vector<2x4x4xf32>
    %112 = tpu.matmul %107, %109, %cst_32 {dimension_numbers = #tpu.dot_dimension_numbers<[2], [2], [1], [1], [0, 0, 0, 1, 1, 1], [0], [0]>} : vector<2x4x8xf32>, vector<2x4x8xf32>, vector<2x4x4xf32> -> vector<2x4x4xf32>
    "tpu.trace_stop"() : () -> ()
    %cst_33 = arith.constant 0.353553385 : f32
    %113 = vector.broadcast %cst_33 : f32 to vector<2x4x4xf32>
    %114 = arith.mulf %112, %113 : vector<2x4x4xf32>
    %cst_34 = arith.constant dense<0xFF800000> : vector<2x4xf32>
    %115 = vector.multi_reduction <maximumf>, %114, %cst_34 [2] : vector<2x4x4xf32> to vector<2x4xf32>
    %116 = vector.shape_cast %115 : vector<2x4xf32> to vector<2x4x1xf32>
    %117 = vector.broadcast %116 : vector<2x4x1xf32> to vector<2x4x4xf32>
    %118 = arith.subf %114, %117 : vector<2x4x4xf32>
    %119 = math.exp %118 : vector<2x4x4xf32>
    %cst_35 = arith.constant dense<0.000000e+00> : vector<2x4xf32>
    %120 = vector.multi_reduction <add>, %119, %cst_35 [2] : vector<2x4x4xf32> to vector<2x4xf32>
    %121 = vector.shape_cast %120 : vector<2x4xf32> to vector<2x4x1xf32>
    %122 = tpu.reciprocal %121 {approx = true} : vector<2x4x1xf32> -> vector<2x4x1xf32>
    %123 = vector.broadcast %122 : vector<2x4x1xf32> to vector<2x4x4xf32>
    %124 = arith.mulf %119, %123 : vector<2x4x4xf32>
    "tpu.trace_start"() <{level = 10 : i32, message = "gqk,gkd->gqd"}> : () -> ()
    %cst_36 = arith.constant dense<0.000000e+00> : vector<2x4x8xf32>
    %125 = tpu.matmul %124, %111, %cst_36 {dimension_numbers = #tpu.dot_dimension_numbers<[2], [1], [1], [2], [0, 0, 0, 1, 1, 2], [0], [0]>} : vector<2x4x4xf32>, vector<2x4x8xf32>, vector<2x4x8xf32> -> vector<2x4x8xf32>
    "tpu.trace_stop"() : () -> ()
    %126 = vector.shape_cast %125 : vector<2x4x8xf32> to vector<8x8xf32>
    %127 = tpu.concatenate %63, %84, %105, %126 in 1 : vector<8x8xf32>, vector<8x8xf32>, vector<8x8xf32>, vector<8x8xf32> -> vector<8x32xf32>
    %128 = arith.truncf %127 : vector<8x32xf32> to vector<8x32xbf16>
    %c0_37 = arith.constant 0 : index
    %c0_38 = arith.constant 0 : index
    %c0_39 = arith.constant 0 : index
    %129 = vector.load %arg5[%c0_37, %c0_38, %c0_39] : memref<3x32x32xbf16, #tpu.memory_space<vmem>>, vector<1x32x32xbf16>
    %130 = vector.shape_cast %129 : vector<1x32x32xbf16> to vector<32x32xbf16>
    %cst_40 = arith.constant dense<0.000000e+00> : vector<8x32xf32>
    %131 = tpu.matmul %128, %130, %cst_40 {dimension_numbers = #tpu.dot_dimension_numbers<[1], [0], [0], [1], [0, 0, 1, 1], [], []>} : vector<8x32xbf16>, vector<32x32xbf16>, vector<8x32xf32> -> vector<8x32xf32>
    %c0_41 = arith.constant 0 : index
    %c0_42 = arith.constant 0 : index
    %c0_43 = arith.constant 0 : index
    %132 = vector.load %arg6[%c0_41, %c0_42, %c0_43] : memref<3x1x32xf32, #tpu.memory_space<vmem>>, vector<1x1x32xf32>
    %133 = vector.shape_cast %132 : vector<1x1x32xf32> to vector<1x32xf32>
    %134 = vector.broadcast %133 : vector<1x32xf32> to vector<8x32xf32>
    %135 = arith.addf %131, %134 : vector<8x32xf32>
    %136 = arith.mulf %6, %135 : vector<8x32xf32>
    %137 = arith.addf %1, %136 : vector<8x32xf32>
    %cst_44 = arith.constant dense<0.000000e+00> : vector<8xf32>
    %138 = vector.multi_reduction <add>, %137, %cst_44 [1] : vector<8x32xf32> to vector<8xf32>
    %139 = vector.shape_cast %138 : vector<8xf32> to vector<8x1xf32>
    %cst_45 = arith.constant 3.200000e+01 : f32
    %140 = vector.broadcast %cst_45 : f32 to vector<8x1xf32>
    %141 = arith.divf %139, %140 : vector<8x1xf32>
    %142 = vector.broadcast %141 : vector<8x1xf32> to vector<8x32xf32>
    %143 = arith.subf %137, %142 : vector<8x32xf32>
    %144 = arith.mulf %143, %143 : vector<8x32xf32>
    %cst_46 = arith.constant dense<0.000000e+00> : vector<8xf32>
    %145 = vector.multi_reduction <add>, %144, %cst_46 [1] : vector<8x32xf32> to vector<8xf32>
    %146 = vector.shape_cast %145 : vector<8xf32> to vector<8x1xf32>
    %cst_47 = arith.constant 3.200000e+01 : f32
    %147 = vector.broadcast %cst_47 : f32 to vector<8x1xf32>
    %148 = arith.divf %146, %147 : vector<8x1xf32>
    %149 = vector.broadcast %141 : vector<8x1xf32> to vector<8x32xf32>
    %150 = arith.subf %137, %149 : vector<8x32xf32>
    %cst_48 = arith.constant 9.99999997E-7 : f32
    %151 = vector.broadcast %cst_48 : f32 to vector<8x1xf32>
    %152 = arith.addf %148, %151 : vector<8x1xf32>
    %153 = math.rsqrt %152 : vector<8x1xf32>
    %154 = vector.broadcast %153 : vector<8x1xf32> to vector<8x32xf32>
    %155 = arith.mulf %150, %154 : vector<8x32xf32>
    %cst_49 = arith.constant dense<0.000000e+00> : vector<8xf32>
    %156 = vector.multi_reduction <add>, %155, %cst_49 [1] : vector<8x32xf32> to vector<8xf32>
    %157 = vector.shape_cast %156 : vector<8xf32> to vector<8x1xf32>
    %cst_50 = arith.constant 3.200000e+01 : f32
    %158 = vector.broadcast %cst_50 : f32 to vector<8x1xf32>
    %159 = arith.divf %157, %158 : vector<8x1xf32>
    %160 = vector.broadcast %159 : vector<8x1xf32> to vector<8x32xf32>
    %161 = arith.subf %155, %160 : vector<8x32xf32>
    %162 = arith.mulf %161, %161 : vector<8x32xf32>
    %cst_51 = arith.constant dense<0.000000e+00> : vector<8xf32>
    %163 = vector.multi_reduction <add>, %162, %cst_51 [1] : vector<8x32xf32> to vector<8xf32>
    %164 = vector.shape_cast %163 : vector<8xf32> to vector<8x1xf32>
    %cst_52 = arith.constant 3.200000e+01 : f32
    %165 = vector.broadcast %cst_52 : f32 to vector<8x1xf32>
    %166 = arith.divf %164, %165 : vector<8x1xf32>
    %167 = vector.broadcast %159 : vector<8x1xf32> to vector<8x32xf32>
    %168 = arith.subf %155, %167 : vector<8x32xf32>
    %cst_53 = arith.constant 9.99999997E-7 : f32
    %169 = vector.broadcast %cst_53 : f32 to vector<8x1xf32>
    %170 = arith.addf %166, %169 : vector<8x1xf32>
    %171 = math.rsqrt %170 : vector<8x1xf32>
    %172 = vector.broadcast %171 : vector<8x1xf32> to vector<8x32xf32>
    %173 = arith.mulf %168, %172 : vector<8x32xf32>
    %cst_54 = arith.constant 1.000000e+00 : f32
    %174 = vector.broadcast %cst_54 : f32 to vector<8x32xf32>
    %175 = arith.addf %174, %8 : vector<8x32xf32>
    %176 = arith.mulf %173, %175 : vector<8x32xf32>
    %177 = arith.addf %176, %7 : vector<8x32xf32>
    %178 = arith.truncf %177 : vector<8x32xf32> to vector<8x32xbf16>
    %c0_55 = arith.constant 0 : index
    %c0_56 = arith.constant 0 : index
    %c0_57 = arith.constant 0 : index
    %179 = vector.load %arg7[%c0_55, %c0_56, %c0_57] : memref<3x32x128xbf16, #tpu.memory_space<vmem>>, vector<1x32x128xbf16>
    %180 = vector.shape_cast %179 : vector<1x32x128xbf16> to vector<32x128xbf16>
    %cst_58 = arith.constant dense<0.000000e+00> : vector<8x128xf32>
    %181 = tpu.matmul %178, %180, %cst_58 {dimension_numbers = #tpu.dot_dimension_numbers<[1], [0], [0], [1], [0, 0, 1, 1], [], []>} : vector<8x32xbf16>, vector<32x128xbf16>, vector<8x128xf32> -> vector<8x128xf32>
    %c0_59 = arith.constant 0 : index
    %c0_60 = arith.constant 0 : index
    %c0_61 = arith.constant 0 : index
    %182 = vector.load %arg8[%c0_59, %c0_60, %c0_61] : memref<3x1x128xf32, #tpu.memory_space<vmem>>, vector<1x1x128xf32>
    %183 = vector.shape_cast %182 : vector<1x1x128xf32> to vector<1x128xf32>
    %184 = vector.broadcast %183 : vector<1x128xf32> to vector<8x128xf32>
    %185 = arith.addf %181, %184 : vector<8x128xf32>
    %cst_62 = arith.constant 0.000000e+00 : f32
    %186 = vector.broadcast %cst_62 : f32 to vector<8x128xf32>
    %187 = arith.maximumf %185, %186 : vector<8x128xf32>
    %188 = arith.truncf %187 : vector<8x128xf32> to vector<8x128xbf16>
    %c0_63 = arith.constant 0 : index
    %c0_64 = arith.constant 0 : index
    %c0_65 = arith.constant 0 : index
    %189 = vector.load %arg9[%c0_63, %c0_64, %c0_65] : memref<3x128x32xbf16, #tpu.memory_space<vmem>>, vector<1x128x32xbf16>
    %190 = vector.shape_cast %189 : vector<1x128x32xbf16> to vector<128x32xbf16>
    %cst_66 = arith.constant dense<0.000000e+00> : vector<8x32xf32>
    %191 = tpu.matmul %188, %190, %cst_66 {dimension_numbers = #tpu.dot_dimension_numbers<[1], [0], [0], [1], [0, 0, 1, 1], [], []>} : vector<8x128xbf16>, vector<128x32xbf16>, vector<8x32xf32> -> vector<8x32xf32>
    %c0_67 = arith.constant 0 : index
    %c0_68 = arith.constant 0 : index
    %c0_69 = arith.constant 0 : index
    %192 = vector.load %arg10[%c0_67, %c0_68, %c0_69] : memref<3x1x32xf32, #tpu.memory_space<vmem>>, vector<1x1x32xf32>
    %193 = vector.shape_cast %192 : vector<1x1x32xf32> to vector<1x32xf32>
    %194 = vector.broadcast %193 : vector<1x32xf32> to vector<8x32xf32>
    %195 = arith.addf %191, %194 : vector<8x32xf32>
    %196 = arith.mulf %9, %195 : vector<8x32xf32>
    %197 = arith.addf %155, %196 : vector<8x32xf32>
    %cst_70 = arith.constant dense<0.000000e+00> : vector<8xf32>
    %198 = vector.multi_reduction <add>, %197, %cst_70 [1] : vector<8x32xf32> to vector<8xf32>
    %199 = vector.shape_cast %198 : vector<8xf32> to vector<8x1xf32>
    %cst_71 = arith.constant 3.200000e+01 : f32
    %200 = vector.broadcast %cst_71 : f32 to vector<8x1xf32>
    %201 = arith.divf %199, %200 : vector<8x1xf32>
    %202 = vector.broadcast %201 : vector<8x1xf32> to vector<8x32xf32>
    %203 = arith.subf %197, %202 : vector<8x32xf32>
    %204 = arith.mulf %203, %203 : vector<8x32xf32>
    %cst_72 = arith.constant dense<0.000000e+00> : vector<8xf32>
    %205 = vector.multi_reduction <add>, %204, %cst_72 [1] : vector<8x32xf32> to vector<8xf32>
    %206 = vector.shape_cast %205 : vector<8xf32> to vector<8x1xf32>
    %cst_73 = arith.constant 3.200000e+01 : f32
    %207 = vector.broadcast %cst_73 : f32 to vector<8x1xf32>
    %208 = arith.divf %206, %207 : vector<8x1xf32>
    %209 = vector.broadcast %201 : vector<8x1xf32> to vector<8x32xf32>
    %210 = arith.subf %197, %209 : vector<8x32xf32>
    %cst_74 = arith.constant 9.99999997E-7 : f32
    %211 = vector.broadcast %cst_74 : f32 to vector<8x1xf32>
    %212 = arith.addf %208, %211 : vector<8x1xf32>
    %213 = math.rsqrt %212 : vector<8x1xf32>
    %214 = vector.broadcast %213 : vector<8x1xf32> to vector<8x32xf32>
    %215 = arith.mulf %210, %214 : vector<8x32xf32>
    %c1 = arith.constant 1 : index
    %c0_75 = arith.constant 0 : index
    %c0_76 = arith.constant 0 : index
    %216 = vector.load %arg2[%c1, %c0_75, %c0_76] : memref<3x8x192xf32, #tpu.memory_space<vmem>>, vector<1x8x192xf32>
    %217 = vector.shape_cast %216 : vector<1x8x192xf32> to vector<8x192xf32>
    %218 = vector.extract_strided_slice %217 {offsets = [0, 0], sizes = [8, 32], strides = [1, 1]} : vector<8x192xf32> to vector<8x32xf32>
    %219 = vector.extract_strided_slice %217 {offsets = [0, 32], sizes = [8, 32], strides = [1, 1]} : vector<8x192xf32> to vector<8x32xf32>
    %220 = vector.extract_strided_slice %217 {offsets = [0, 64], sizes = [8, 32], strides = [1, 1]} : vector<8x192xf32> to vector<8x32xf32>
    %221 = vector.extract_strided_slice %217 {offsets = [0, 96], sizes = [8, 32], strides = [1, 1]} : vector<8x192xf32> to vector<8x32xf32>
    %222 = vector.extract_strided_slice %217 {offsets = [0, 128], sizes = [8, 32], strides = [1, 1]} : vector<8x192xf32> to vector<8x32xf32>
    %223 = vector.extract_strided_slice %217 {offsets = [0, 160], sizes = [8, 32], strides = [1, 1]} : vector<8x192xf32> to vector<8x32xf32>
    %cst_77 = arith.constant dense<0.000000e+00> : vector<8xf32>
    %224 = vector.multi_reduction <add>, %215, %cst_77 [1] : vector<8x32xf32> to vector<8xf32>
    %225 = vector.shape_cast %224 : vector<8xf32> to vector<8x1xf32>
    %cst_78 = arith.constant 3.200000e+01 : f32
    %226 = vector.broadcast %cst_78 : f32 to vector<8x1xf32>
    %227 = arith.divf %225, %226 : vector<8x1xf32>
    %228 = vector.broadcast %227 : vector<8x1xf32> to vector<8x32xf32>
    %229 = arith.subf %215, %228 : vector<8x32xf32>
    %230 = arith.mulf %229, %229 : vector<8x32xf32>
    %cst_79 = arith.constant dense<0.000000e+00> : vector<8xf32>
    %231 = vector.multi_reduction <add>, %230, %cst_79 [1] : vector<8x32xf32> to vector<8xf32>
    %232 = vector.shape_cast %231 : vector<8xf32> to vector<8x1xf32>
    %cst_80 = arith.constant 3.200000e+01 : f32
    %233 = vector.broadcast %cst_80 : f32 to vector<8x1xf32>
    %234 = arith.divf %232, %233 : vector<8x1xf32>
    %235 = vector.broadcast %227 : vector<8x1xf32> to vector<8x32xf32>
    %236 = arith.subf %215, %235 : vector<8x32xf32>
    %cst_81 = arith.constant 9.99999997E-7 : f32
    %237 = vector.broadcast %cst_81 : f32 to vector<8x1xf32>
    %238 = arith.addf %234, %237 : vector<8x1xf32>
    %239 = math.rsqrt %238 : vector<8x1xf32>
    %240 = vector.broadcast %239 : vector<8x1xf32> to vector<8x32xf32>
    %241 = arith.mulf %236, %240 : vector<8x32xf32>
    %cst_82 = arith.constant 1.000000e+00 : f32
    %242 = vector.broadcast %cst_82 : f32 to vector<8x32xf32>
    %243 = arith.addf %242, %219 : vector<8x32xf32>
    %244 = arith.mulf %241, %243 : vector<8x32xf32>
    %245 = arith.addf %244, %218 : vector<8x32xf32>
    %246 = arith.truncf %245 : vector<8x32xf32> to vector<8x32xbf16>
    %c1_83 = arith.constant 1 : index
    %c0_84 = arith.constant 0 : index
    %c0_85 = arith.constant 0 : index
    %247 = vector.load %arg3[%c1_83, %c0_84, %c0_85] : memref<3x32x96xbf16, #tpu.memory_space<vmem>>, vector<1x32x96xbf16>
    %248 = vector.shape_cast %247 : vector<1x32x96xbf16> to vector<32x96xbf16>
    %cst_86 = arith.constant dense<0.000000e+00> : vector<8x96xf32>
    %249 = tpu.matmul %246, %248, %cst_86 {dimension_numbers = #tpu.dot_dimension_numbers<[1], [0], [0], [1], [0, 0, 1, 1], [], []>} : vector<8x32xbf16>, vector<32x96xbf16>, vector<8x96xf32> -> vector<8x96xf32>
    %c1_87 = arith.constant 1 : index
    %c0_88 = arith.constant 0 : index
    %c0_89 = arith.constant 0 : index
    %250 = vector.load %arg4[%c1_87, %c0_88, %c0_89] : memref<3x1x96xf32, #tpu.memory_space<vmem>>, vector<1x1x96xf32>
    %251 = vector.shape_cast %250 : vector<1x1x96xf32> to vector<1x96xf32>
    %252 = vector.broadcast %251 : vector<1x96xf32> to vector<8x96xf32>
    %253 = arith.addf %249, %252 : vector<8x96xf32>
    %254 = vector.extract_strided_slice %253 {offsets = [0, 0], sizes = [8, 32], strides = [1, 1]} : vector<8x96xf32> to vector<8x32xf32>
    %255 = vector.extract_strided_slice %253 {offsets = [0, 32], sizes = [8, 32], strides = [1, 1]} : vector<8x96xf32> to vector<8x32xf32>
    %256 = vector.extract_strided_slice %253 {offsets = [0, 64], sizes = [8, 32], strides = [1, 1]} : vector<8x96xf32> to vector<8x32xf32>
    %257 = vector.extract_strided_slice %254 {offsets = [0, 0], sizes = [8, 8], strides = [1, 1]} : vector<8x32xf32> to vector<8x8xf32>
    %258 = vector.shape_cast %257 : vector<8x8xf32> to vector<2x4x8xf32>
    %259 = vector.extract_strided_slice %255 {offsets = [0, 0], sizes = [8, 8], strides = [1, 1]} : vector<8x32xf32> to vector<8x8xf32>
    %260 = vector.shape_cast %259 : vector<8x8xf32> to vector<2x4x8xf32>
    %261 = vector.extract_strided_slice %256 {offsets = [0, 0], sizes = [8, 8], strides = [1, 1]} : vector<8x32xf32> to vector<8x8xf32>
    %262 = vector.shape_cast %261 : vector<8x8xf32> to vector<2x4x8xf32>
    "tpu.trace_start"() <{level = 10 : i32, message = "gqd,gkd->gqk"}> : () -> ()
    %cst_90 = arith.constant dense<0.000000e+00> : vector<2x4x4xf32>
    %263 = tpu.matmul %258, %260, %cst_90 {dimension_numbers = #tpu.dot_dimension_numbers<[2], [2], [1], [1], [0, 0, 0, 1, 1, 1], [0], [0]>} : vector<2x4x8xf32>, vector<2x4x8xf32>, vector<2x4x4xf32> -> vector<2x4x4xf32>
    "tpu.trace_stop"() : () -> ()
    %cst_91 = arith.constant 0.353553385 : f32
    %264 = vector.broadcast %cst_91 : f32 to vector<2x4x4xf32>
    %265 = arith.mulf %263, %264 : vector<2x4x4xf32>
    %cst_92 = arith.constant dense<0xFF800000> : vector<2x4xf32>
    %266 = vector.multi_reduction <maximumf>, %265, %cst_92 [2] : vector<2x4x4xf32> to vector<2x4xf32>
    %267 = vector.shape_cast %266 : vector<2x4xf32> to vector<2x4x1xf32>
    %268 = vector.broadcast %267 : vector<2x4x1xf32> to vector<2x4x4xf32>
    %269 = arith.subf %265, %268 : vector<2x4x4xf32>
    %270 = math.exp %269 : vector<2x4x4xf32>
    %cst_93 = arith.constant dense<0.000000e+00> : vector<2x4xf32>
    %271 = vector.multi_reduction <add>, %270, %cst_93 [2] : vector<2x4x4xf32> to vector<2x4xf32>
    %272 = vector.shape_cast %271 : vector<2x4xf32> to vector<2x4x1xf32>
    %273 = tpu.reciprocal %272 {approx = true} : vector<2x4x1xf32> -> vector<2x4x1xf32>
    %274 = vector.broadcast %273 : vector<2x4x1xf32> to vector<2x4x4xf32>
    %275 = arith.mulf %270, %274 : vector<2x4x4xf32>
    "tpu.trace_start"() <{level = 10 : i32, message = "gqk,gkd->gqd"}> : () -> ()
    %cst_94 = arith.constant dense<0.000000e+00> : vector<2x4x8xf32>
    %276 = tpu.matmul %275, %262, %cst_94 {dimension_numbers = #tpu.dot_dimension_numbers<[2], [1], [1], [2], [0, 0, 0, 1, 1, 2], [0], [0]>} : vector<2x4x4xf32>, vector<2x4x8xf32>, vector<2x4x8xf32> -> vector<2x4x8xf32>
    "tpu.trace_stop"() : () -> ()
    %277 = vector.shape_cast %276 : vector<2x4x8xf32> to vector<8x8xf32>
    %278 = vector.extract_strided_slice %254 {offsets = [0, 8], sizes = [8, 8], strides = [1, 1]} : vector<8x32xf32> to vector<8x8xf32>
    %279 = vector.shape_cast %278 : vector<8x8xf32> to vector<2x4x8xf32>
    %280 = vector.extract_strided_slice %255 {offsets = [0, 8], sizes = [8, 8], strides = [1, 1]} : vector<8x32xf32> to vector<8x8xf32>
    %281 = vector.shape_cast %280 : vector<8x8xf32> to vector<2x4x8xf32>
    %282 = vector.extract_strided_slice %256 {offsets = [0, 8], sizes = [8, 8], strides = [1, 1]} : vector<8x32xf32> to vector<8x8xf32>
    %283 = vector.shape_cast %282 : vector<8x8xf32> to vector<2x4x8xf32>
    "tpu.trace_start"() <{level = 10 : i32, message = "gqd,gkd->gqk"}> : () -> ()
    %cst_95 = arith.constant dense<0.000000e+00> : vector<2x4x4xf32>
    %284 = tpu.matmul %279, %281, %cst_95 {dimension_numbers = #tpu.dot_dimension_numbers<[2], [2], [1], [1], [0, 0, 0, 1, 1, 1], [0], [0]>} : vector<2x4x8xf32>, vector<2x4x8xf32>, vector<2x4x4xf32> -> vector<2x4x4xf32>
    "tpu.trace_stop"() : () -> ()
    %cst_96 = arith.constant 0.353553385 : f32
    %285 = vector.broadcast %cst_96 : f32 to vector<2x4x4xf32>
    %286 = arith.mulf %284, %285 : vector<2x4x4xf32>
    %cst_97 = arith.constant dense<0xFF800000> : vector<2x4xf32>
    %287 = vector.multi_reduction <maximumf>, %286, %cst_97 [2] : vector<2x4x4xf32> to vector<2x4xf32>
    %288 = vector.shape_cast %287 : vector<2x4xf32> to vector<2x4x1xf32>
    %289 = vector.broadcast %288 : vector<2x4x1xf32> to vector<2x4x4xf32>
    %290 = arith.subf %286, %289 : vector<2x4x4xf32>
    %291 = math.exp %290 : vector<2x4x4xf32>
    %cst_98 = arith.constant dense<0.000000e+00> : vector<2x4xf32>
    %292 = vector.multi_reduction <add>, %291, %cst_98 [2] : vector<2x4x4xf32> to vector<2x4xf32>
    %293 = vector.shape_cast %292 : vector<2x4xf32> to vector<2x4x1xf32>
    %294 = tpu.reciprocal %293 {approx = true} : vector<2x4x1xf32> -> vector<2x4x1xf32>
    %295 = vector.broadcast %294 : vector<2x4x1xf32> to vector<2x4x4xf32>
    %296 = arith.mulf %291, %295 : vector<2x4x4xf32>
    "tpu.trace_start"() <{level = 10 : i32, message = "gqk,gkd->gqd"}> : () -> ()
    %cst_99 = arith.constant dense<0.000000e+00> : vector<2x4x8xf32>
    %297 = tpu.matmul %296, %283, %cst_99 {dimension_numbers = #tpu.dot_dimension_numbers<[2], [1], [1], [2], [0, 0, 0, 1, 1, 2], [0], [0]>} : vector<2x4x4xf32>, vector<2x4x8xf32>, vector<2x4x8xf32> -> vector<2x4x8xf32>
    "tpu.trace_stop"() : () -> ()
    %298 = vector.shape_cast %297 : vector<2x4x8xf32> to vector<8x8xf32>
    %299 = vector.extract_strided_slice %254 {offsets = [0, 16], sizes = [8, 8], strides = [1, 1]} : vector<8x32xf32> to vector<8x8xf32>
    %300 = vector.shape_cast %299 : vector<8x8xf32> to vector<2x4x8xf32>
    %301 = vector.extract_strided_slice %255 {offsets = [0, 16], sizes = [8, 8], strides = [1, 1]} : vector<8x32xf32> to vector<8x8xf32>
    %302 = vector.shape_cast %301 : vector<8x8xf32> to vector<2x4x8xf32>
    %303 = vector.extract_strided_slice %256 {offsets = [0, 16], sizes = [8, 8], strides = [1, 1]} : vector<8x32xf32> to vector<8x8xf32>
    %304 = vector.shape_cast %303 : vector<8x8xf32> to vector<2x4x8xf32>
    "tpu.trace_start"() <{level = 10 : i32, message = "gqd,gkd->gqk"}> : () -> ()
    %cst_100 = arith.constant dense<0.000000e+00> : vector<2x4x4xf32>
    %305 = tpu.matmul %300, %302, %cst_100 {dimension_numbers = #tpu.dot_dimension_numbers<[2], [2], [1], [1], [0, 0, 0, 1, 1, 1], [0], [0]>} : vector<2x4x8xf32>, vector<2x4x8xf32>, vector<2x4x4xf32> -> vector<2x4x4xf32>
    "tpu.trace_stop"() : () -> ()
    %cst_101 = arith.constant 0.353553385 : f32
    %306 = vector.broadcast %cst_101 : f32 to vector<2x4x4xf32>
    %307 = arith.mulf %305, %306 : vector<2x4x4xf32>
    %cst_102 = arith.constant dense<0xFF800000> : vector<2x4xf32>
    %308 = vector.multi_reduction <maximumf>, %307, %cst_102 [2] : vector<2x4x4xf32> to vector<2x4xf32>
    %309 = vector.shape_cast %308 : vector<2x4xf32> to vector<2x4x1xf32>
    %310 = vector.broadcast %309 : vector<2x4x1xf32> to vector<2x4x4xf32>
    %311 = arith.subf %307, %310 : vector<2x4x4xf32>
    %312 = math.exp %311 : vector<2x4x4xf32>
    %cst_103 = arith.constant dense<0.000000e+00> : vector<2x4xf32>
    %313 = vector.multi_reduction <add>, %312, %cst_103 [2] : vector<2x4x4xf32> to vector<2x4xf32>
    %314 = vector.shape_cast %313 : vector<2x4xf32> to vector<2x4x1xf32>
    %315 = tpu.reciprocal %314 {approx = true} : vector<2x4x1xf32> -> vector<2x4x1xf32>
    %316 = vector.broadcast %315 : vector<2x4x1xf32> to vector<2x4x4xf32>
    %317 = arith.mulf %312, %316 : vector<2x4x4xf32>
    "tpu.trace_start"() <{level = 10 : i32, message = "gqk,gkd->gqd"}> : () -> ()
    %cst_104 = arith.constant dense<0.000000e+00> : vector<2x4x8xf32>
    %318 = tpu.matmul %317, %304, %cst_104 {dimension_numbers = #tpu.dot_dimension_numbers<[2], [1], [1], [2], [0, 0, 0, 1, 1, 2], [0], [0]>} : vector<2x4x4xf32>, vector<2x4x8xf32>, vector<2x4x8xf32> -> vector<2x4x8xf32>
    "tpu.trace_stop"() : () -> ()
    %319 = vector.shape_cast %318 : vector<2x4x8xf32> to vector<8x8xf32>
    %320 = vector.extract_strided_slice %254 {offsets = [0, 24], sizes = [8, 8], strides = [1, 1]} : vector<8x32xf32> to vector<8x8xf32>
    %321 = vector.shape_cast %320 : vector<8x8xf32> to vector<2x4x8xf32>
    %322 = vector.extract_strided_slice %255 {offsets = [0, 24], sizes = [8, 8], strides = [1, 1]} : vector<8x32xf32> to vector<8x8xf32>
    %323 = vector.shape_cast %322 : vector<8x8xf32> to vector<2x4x8xf32>
    %324 = vector.extract_strided_slice %256 {offsets = [0, 24], sizes = [8, 8], strides = [1, 1]} : vector<8x32xf32> to vector<8x8xf32>
    %325 = vector.shape_cast %324 : vector<8x8xf32> to vector<2x4x8xf32>
    "tpu.trace_start"() <{level = 10 : i32, message = "gqd,gkd->gqk"}> : () -> ()
    %cst_105 = arith.constant dense<0.000000e+00> : vector<2x4x4xf32>
    %326 = tpu.matmul %321, %323, %cst_105 {dimension_numbers = #tpu.dot_dimension_numbers<[2], [2], [1], [1], [0, 0, 0, 1, 1, 1], [0], [0]>} : vector<2x4x8xf32>, vector<2x4x8xf32>, vector<2x4x4xf32> -> vector<2x4x4xf32>
    "tpu.trace_stop"() : () -> ()
    %cst_106 = arith.constant 0.353553385 : f32
    %327 = vector.broadcast %cst_106 : f32 to vector<2x4x4xf32>
    %328 = arith.mulf %326, %327 : vector<2x4x4xf32>
    %cst_107 = arith.constant dense<0xFF800000> : vector<2x4xf32>
    %329 = vector.multi_reduction <maximumf>, %328, %cst_107 [2] : vector<2x4x4xf32> to vector<2x4xf32>
    %330 = vector.shape_cast %329 : vector<2x4xf32> to vector<2x4x1xf32>
    %331 = vector.broadcast %330 : vector<2x4x1xf32> to vector<2x4x4xf32>
    %332 = arith.subf %328, %331 : vector<2x4x4xf32>
    %333 = math.exp %332 : vector<2x4x4xf32>
    %cst_108 = arith.constant dense<0.000000e+00> : vector<2x4xf32>
    %334 = vector.multi_reduction <add>, %333, %cst_108 [2] : vector<2x4x4xf32> to vector<2x4xf32>
    %335 = vector.shape_cast %334 : vector<2x4xf32> to vector<2x4x1xf32>
    %336 = tpu.reciprocal %335 {approx = true} : vector<2x4x1xf32> -> vector<2x4x1xf32>
    %337 = vector.broadcast %336 : vector<2x4x1xf32> to vector<2x4x4xf32>
    %338 = arith.mulf %333, %337 : vector<2x4x4xf32>
    "tpu.trace_start"() <{level = 10 : i32, message = "gqk,gkd->gqd"}> : () -> ()
    %cst_109 = arith.constant dense<0.000000e+00> : vector<2x4x8xf32>
    %339 = tpu.matmul %338, %325, %cst_109 {dimension_numbers = #tpu.dot_dimension_numbers<[2], [1], [1], [2], [0, 0, 0, 1, 1, 2], [0], [0]>} : vector<2x4x4xf32>, vector<2x4x8xf32>, vector<2x4x8xf32> -> vector<2x4x8xf32>
    "tpu.trace_stop"() : () -> ()
    %340 = vector.shape_cast %339 : vector<2x4x8xf32> to vector<8x8xf32>
    %341 = tpu.concatenate %277, %298, %319, %340 in 1 : vector<8x8xf32>, vector<8x8xf32>, vector<8x8xf32>, vector<8x8xf32> -> vector<8x32xf32>
    %342 = arith.truncf %341 : vector<8x32xf32> to vector<8x32xbf16>
    %c1_110 = arith.constant 1 : index
    %c0_111 = arith.constant 0 : index
    %c0_112 = arith.constant 0 : index
    %343 = vector.load %arg5[%c1_110, %c0_111, %c0_112] : memref<3x32x32xbf16, #tpu.memory_space<vmem>>, vector<1x32x32xbf16>
    %344 = vector.shape_cast %343 : vector<1x32x32xbf16> to vector<32x32xbf16>
    %cst_113 = arith.constant dense<0.000000e+00> : vector<8x32xf32>
    %345 = tpu.matmul %342, %344, %cst_113 {dimension_numbers = #tpu.dot_dimension_numbers<[1], [0], [0], [1], [0, 0, 1, 1], [], []>} : vector<8x32xbf16>, vector<32x32xbf16>, vector<8x32xf32> -> vector<8x32xf32>
    %c1_114 = arith.constant 1 : index
    %c0_115 = arith.constant 0 : index
    %c0_116 = arith.constant 0 : index
    %346 = vector.load %arg6[%c1_114, %c0_115, %c0_116] : memref<3x1x32xf32, #tpu.memory_space<vmem>>, vector<1x1x32xf32>
    %347 = vector.shape_cast %346 : vector<1x1x32xf32> to vector<1x32xf32>
    %348 = vector.broadcast %347 : vector<1x32xf32> to vector<8x32xf32>
    %349 = arith.addf %345, %348 : vector<8x32xf32>
    %350 = arith.mulf %220, %349 : vector<8x32xf32>
    %351 = arith.addf %215, %350 : vector<8x32xf32>
    %cst_117 = arith.constant dense<0.000000e+00> : vector<8xf32>
    %352 = vector.multi_reduction <add>, %351, %cst_117 [1] : vector<8x32xf32> to vector<8xf32>
    %353 = vector.shape_cast %352 : vector<8xf32> to vector<8x1xf32>
    %cst_118 = arith.constant 3.200000e+01 : f32
    %354 = vector.broadcast %cst_118 : f32 to vector<8x1xf32>
    %355 = arith.divf %353, %354 : vector<8x1xf32>
    %356 = vector.broadcast %355 : vector<8x1xf32> to vector<8x32xf32>
    %357 = arith.subf %351, %356 : vector<8x32xf32>
    %358 = arith.mulf %357, %357 : vector<8x32xf32>
    %cst_119 = arith.constant dense<0.000000e+00> : vector<8xf32>
    %359 = vector.multi_reduction <add>, %358, %cst_119 [1] : vector<8x32xf32> to vector<8xf32>
    %360 = vector.shape_cast %359 : vector<8xf32> to vector<8x1xf32>
    %cst_120 = arith.constant 3.200000e+01 : f32
    %361 = vector.broadcast %cst_120 : f32 to vector<8x1xf32>
    %362 = arith.divf %360, %361 : vector<8x1xf32>
    %363 = vector.broadcast %355 : vector<8x1xf32> to vector<8x32xf32>
    %364 = arith.subf %351, %363 : vector<8x32xf32>
    %cst_121 = arith.constant 9.99999997E-7 : f32
    %365 = vector.broadcast %cst_121 : f32 to vector<8x1xf32>
    %366 = arith.addf %362, %365 : vector<8x1xf32>
    %367 = math.rsqrt %366 : vector<8x1xf32>
    %368 = vector.broadcast %367 : vector<8x1xf32> to vector<8x32xf32>
    %369 = arith.mulf %364, %368 : vector<8x32xf32>
    %cst_122 = arith.constant dense<0.000000e+00> : vector<8xf32>
    %370 = vector.multi_reduction <add>, %369, %cst_122 [1] : vector<8x32xf32> to vector<8xf32>
    %371 = vector.shape_cast %370 : vector<8xf32> to vector<8x1xf32>
    %cst_123 = arith.constant 3.200000e+01 : f32
    %372 = vector.broadcast %cst_123 : f32 to vector<8x1xf32>
    %373 = arith.divf %371, %372 : vector<8x1xf32>
    %374 = vector.broadcast %373 : vector<8x1xf32> to vector<8x32xf32>
    %375 = arith.subf %369, %374 : vector<8x32xf32>
    %376 = arith.mulf %375, %375 : vector<8x32xf32>
    %cst_124 = arith.constant dense<0.000000e+00> : vector<8xf32>
    %377 = vector.multi_reduction <add>, %376, %cst_124 [1] : vector<8x32xf32> to vector<8xf32>
    %378 = vector.shape_cast %377 : vector<8xf32> to vector<8x1xf32>
    %cst_125 = arith.constant 3.200000e+01 : f32
    %379 = vector.broadcast %cst_125 : f32 to vector<8x1xf32>
    %380 = arith.divf %378, %379 : vector<8x1xf32>
    %381 = vector.broadcast %373 : vector<8x1xf32> to vector<8x32xf32>
    %382 = arith.subf %369, %381 : vector<8x32xf32>
    %cst_126 = arith.constant 9.99999997E-7 : f32
    %383 = vector.broadcast %cst_126 : f32 to vector<8x1xf32>
    %384 = arith.addf %380, %383 : vector<8x1xf32>
    %385 = math.rsqrt %384 : vector<8x1xf32>
    %386 = vector.broadcast %385 : vector<8x1xf32> to vector<8x32xf32>
    %387 = arith.mulf %382, %386 : vector<8x32xf32>
    %cst_127 = arith.constant 1.000000e+00 : f32
    %388 = vector.broadcast %cst_127 : f32 to vector<8x32xf32>
    %389 = arith.addf %388, %222 : vector<8x32xf32>
    %390 = arith.mulf %387, %389 : vector<8x32xf32>
    %391 = arith.addf %390, %221 : vector<8x32xf32>
    %392 = arith.truncf %391 : vector<8x32xf32> to vector<8x32xbf16>
    %c1_128 = arith.constant 1 : index
    %c0_129 = arith.constant 0 : index
    %c0_130 = arith.constant 0 : index
    %393 = vector.load %arg7[%c1_128, %c0_129, %c0_130] : memref<3x32x128xbf16, #tpu.memory_space<vmem>>, vector<1x32x128xbf16>
    %394 = vector.shape_cast %393 : vector<1x32x128xbf16> to vector<32x128xbf16>
    %cst_131 = arith.constant dense<0.000000e+00> : vector<8x128xf32>
    %395 = tpu.matmul %392, %394, %cst_131 {dimension_numbers = #tpu.dot_dimension_numbers<[1], [0], [0], [1], [0, 0, 1, 1], [], []>} : vector<8x32xbf16>, vector<32x128xbf16>, vector<8x128xf32> -> vector<8x128xf32>
    %c1_132 = arith.constant 1 : index
    %c0_133 = arith.constant 0 : index
    %c0_134 = arith.constant 0 : index
    %396 = vector.load %arg8[%c1_132, %c0_133, %c0_134] : memref<3x1x128xf32, #tpu.memory_space<vmem>>, vector<1x1x128xf32>
    %397 = vector.shape_cast %396 : vector<1x1x128xf32> to vector<1x128xf32>
    %398 = vector.broadcast %397 : vector<1x128xf32> to vector<8x128xf32>
    %399 = arith.addf %395, %398 : vector<8x128xf32>
    %cst_135 = arith.constant 0.000000e+00 : f32
    %400 = vector.broadcast %cst_135 : f32 to vector<8x128xf32>
    %401 = arith.maximumf %399, %400 : vector<8x128xf32>
    %402 = arith.truncf %401 : vector<8x128xf32> to vector<8x128xbf16>
    %c1_136 = arith.constant 1 : index
    %c0_137 = arith.constant 0 : index
    %c0_138 = arith.constant 0 : index
    %403 = vector.load %arg9[%c1_136, %c0_137, %c0_138] : memref<3x128x32xbf16, #tpu.memory_space<vmem>>, vector<1x128x32xbf16>
    %404 = vector.shape_cast %403 : vector<1x128x32xbf16> to vector<128x32xbf16>
    %cst_139 = arith.constant dense<0.000000e+00> : vector<8x32xf32>
    %405 = tpu.matmul %402, %404, %cst_139 {dimension_numbers = #tpu.dot_dimension_numbers<[1], [0], [0], [1], [0, 0, 1, 1], [], []>} : vector<8x128xbf16>, vector<128x32xbf16>, vector<8x32xf32> -> vector<8x32xf32>
    %c1_140 = arith.constant 1 : index
    %c0_141 = arith.constant 0 : index
    %c0_142 = arith.constant 0 : index
    %406 = vector.load %arg10[%c1_140, %c0_141, %c0_142] : memref<3x1x32xf32, #tpu.memory_space<vmem>>, vector<1x1x32xf32>
    %407 = vector.shape_cast %406 : vector<1x1x32xf32> to vector<1x32xf32>
    %408 = vector.broadcast %407 : vector<1x32xf32> to vector<8x32xf32>
    %409 = arith.addf %405, %408 : vector<8x32xf32>
    %410 = arith.mulf %223, %409 : vector<8x32xf32>
    %411 = arith.addf %369, %410 : vector<8x32xf32>
    %cst_143 = arith.constant dense<0.000000e+00> : vector<8xf32>
    %412 = vector.multi_reduction <add>, %411, %cst_143 [1] : vector<8x32xf32> to vector<8xf32>
    %413 = vector.shape_cast %412 : vector<8xf32> to vector<8x1xf32>
    %cst_144 = arith.constant 3.200000e+01 : f32
    %414 = vector.broadcast %cst_144 : f32 to vector<8x1xf32>
    %415 = arith.divf %413, %414 : vector<8x1xf32>
    %416 = vector.broadcast %415 : vector<8x1xf32> to vector<8x32xf32>
    %417 = arith.subf %411, %416 : vector<8x32xf32>
    %418 = arith.mulf %417, %417 : vector<8x32xf32>
    %cst_145 = arith.constant dense<0.000000e+00> : vector<8xf32>
    %419 = vector.multi_reduction <add>, %418, %cst_145 [1] : vector<8x32xf32> to vector<8xf32>
    %420 = vector.shape_cast %419 : vector<8xf32> to vector<8x1xf32>
    %cst_146 = arith.constant 3.200000e+01 : f32
    %421 = vector.broadcast %cst_146 : f32 to vector<8x1xf32>
    %422 = arith.divf %420, %421 : vector<8x1xf32>
    %423 = vector.broadcast %415 : vector<8x1xf32> to vector<8x32xf32>
    %424 = arith.subf %411, %423 : vector<8x32xf32>
    %cst_147 = arith.constant 9.99999997E-7 : f32
    %425 = vector.broadcast %cst_147 : f32 to vector<8x1xf32>
    %426 = arith.addf %422, %425 : vector<8x1xf32>
    %427 = math.rsqrt %426 : vector<8x1xf32>
    %428 = vector.broadcast %427 : vector<8x1xf32> to vector<8x32xf32>
    %429 = arith.mulf %424, %428 : vector<8x32xf32>
    %c2 = arith.constant 2 : index
    %c0_148 = arith.constant 0 : index
    %c0_149 = arith.constant 0 : index
    %430 = vector.load %arg2[%c2, %c0_148, %c0_149] : memref<3x8x192xf32, #tpu.memory_space<vmem>>, vector<1x8x192xf32>
    %431 = vector.shape_cast %430 : vector<1x8x192xf32> to vector<8x192xf32>
    %432 = vector.extract_strided_slice %431 {offsets = [0, 0], sizes = [8, 32], strides = [1, 1]} : vector<8x192xf32> to vector<8x32xf32>
    %433 = vector.extract_strided_slice %431 {offsets = [0, 32], sizes = [8, 32], strides = [1, 1]} : vector<8x192xf32> to vector<8x32xf32>
    %434 = vector.extract_strided_slice %431 {offsets = [0, 64], sizes = [8, 32], strides = [1, 1]} : vector<8x192xf32> to vector<8x32xf32>
    %435 = vector.extract_strided_slice %431 {offsets = [0, 96], sizes = [8, 32], strides = [1, 1]} : vector<8x192xf32> to vector<8x32xf32>
    %436 = vector.extract_strided_slice %431 {offsets = [0, 128], sizes = [8, 32], strides = [1, 1]} : vector<8x192xf32> to vector<8x32xf32>
    %437 = vector.extract_strided_slice %431 {offsets = [0, 160], sizes = [8, 32], strides = [1, 1]} : vector<8x192xf32> to vector<8x32xf32>
    %cst_150 = arith.constant dense<0.000000e+00> : vector<8xf32>
    %438 = vector.multi_reduction <add>, %429, %cst_150 [1] : vector<8x32xf32> to vector<8xf32>
    %439 = vector.shape_cast %438 : vector<8xf32> to vector<8x1xf32>
    %cst_151 = arith.constant 3.200000e+01 : f32
    %440 = vector.broadcast %cst_151 : f32 to vector<8x1xf32>
    %441 = arith.divf %439, %440 : vector<8x1xf32>
    %442 = vector.broadcast %441 : vector<8x1xf32> to vector<8x32xf32>
    %443 = arith.subf %429, %442 : vector<8x32xf32>
    %444 = arith.mulf %443, %443 : vector<8x32xf32>
    %cst_152 = arith.constant dense<0.000000e+00> : vector<8xf32>
    %445 = vector.multi_reduction <add>, %444, %cst_152 [1] : vector<8x32xf32> to vector<8xf32>
    %446 = vector.shape_cast %445 : vector<8xf32> to vector<8x1xf32>
    %cst_153 = arith.constant 3.200000e+01 : f32
    %447 = vector.broadcast %cst_153 : f32 to vector<8x1xf32>
    %448 = arith.divf %446, %447 : vector<8x1xf32>
    %449 = vector.broadcast %441 : vector<8x1xf32> to vector<8x32xf32>
    %450 = arith.subf %429, %449 : vector<8x32xf32>
    %cst_154 = arith.constant 9.99999997E-7 : f32
    %451 = vector.broadcast %cst_154 : f32 to vector<8x1xf32>
    %452 = arith.addf %448, %451 : vector<8x1xf32>
    %453 = math.rsqrt %452 : vector<8x1xf32>
    %454 = vector.broadcast %453 : vector<8x1xf32> to vector<8x32xf32>
    %455 = arith.mulf %450, %454 : vector<8x32xf32>
    %cst_155 = arith.constant 1.000000e+00 : f32
    %456 = vector.broadcast %cst_155 : f32 to vector<8x32xf32>
    %457 = arith.addf %456, %433 : vector<8x32xf32>
    %458 = arith.mulf %455, %457 : vector<8x32xf32>
    %459 = arith.addf %458, %432 : vector<8x32xf32>
    %460 = arith.truncf %459 : vector<8x32xf32> to vector<8x32xbf16>
    %c2_156 = arith.constant 2 : index
    %c0_157 = arith.constant 0 : index
    %c0_158 = arith.constant 0 : index
    %461 = vector.load %arg3[%c2_156, %c0_157, %c0_158] : memref<3x32x96xbf16, #tpu.memory_space<vmem>>, vector<1x32x96xbf16>
    %462 = vector.shape_cast %461 : vector<1x32x96xbf16> to vector<32x96xbf16>
    %cst_159 = arith.constant dense<0.000000e+00> : vector<8x96xf32>
    %463 = tpu.matmul %460, %462, %cst_159 {dimension_numbers = #tpu.dot_dimension_numbers<[1], [0], [0], [1], [0, 0, 1, 1], [], []>} : vector<8x32xbf16>, vector<32x96xbf16>, vector<8x96xf32> -> vector<8x96xf32>
    %c2_160 = arith.constant 2 : index
    %c0_161 = arith.constant 0 : index
    %c0_162 = arith.constant 0 : index
    %464 = vector.load %arg4[%c2_160, %c0_161, %c0_162] : memref<3x1x96xf32, #tpu.memory_space<vmem>>, vector<1x1x96xf32>
    %465 = vector.shape_cast %464 : vector<1x1x96xf32> to vector<1x96xf32>
    %466 = vector.broadcast %465 : vector<1x96xf32> to vector<8x96xf32>
    %467 = arith.addf %463, %466 : vector<8x96xf32>
    %468 = vector.extract_strided_slice %467 {offsets = [0, 0], sizes = [8, 32], strides = [1, 1]} : vector<8x96xf32> to vector<8x32xf32>
    %469 = vector.extract_strided_slice %467 {offsets = [0, 32], sizes = [8, 32], strides = [1, 1]} : vector<8x96xf32> to vector<8x32xf32>
    %470 = vector.extract_strided_slice %467 {offsets = [0, 64], sizes = [8, 32], strides = [1, 1]} : vector<8x96xf32> to vector<8x32xf32>
    %471 = vector.extract_strided_slice %468 {offsets = [0, 0], sizes = [8, 8], strides = [1, 1]} : vector<8x32xf32> to vector<8x8xf32>
    %472 = vector.shape_cast %471 : vector<8x8xf32> to vector<2x4x8xf32>
    %473 = vector.extract_strided_slice %469 {offsets = [0, 0], sizes = [8, 8], strides = [1, 1]} : vector<8x32xf32> to vector<8x8xf32>
    %474 = vector.shape_cast %473 : vector<8x8xf32> to vector<2x4x8xf32>
    %475 = vector.extract_strided_slice %470 {offsets = [0, 0], sizes = [8, 8], strides = [1, 1]} : vector<8x32xf32> to vector<8x8xf32>
    %476 = vector.shape_cast %475 : vector<8x8xf32> to vector<2x4x8xf32>
    "tpu.trace_start"() <{level = 10 : i32, message = "gqd,gkd->gqk"}> : () -> ()
    %cst_163 = arith.constant dense<0.000000e+00> : vector<2x4x4xf32>
    %477 = tpu.matmul %472, %474, %cst_163 {dimension_numbers = #tpu.dot_dimension_numbers<[2], [2], [1], [1], [0, 0, 0, 1, 1, 1], [0], [0]>} : vector<2x4x8xf32>, vector<2x4x8xf32>, vector<2x4x4xf32> -> vector<2x4x4xf32>
    "tpu.trace_stop"() : () -> ()
    %cst_164 = arith.constant 0.353553385 : f32
    %478 = vector.broadcast %cst_164 : f32 to vector<2x4x4xf32>
    %479 = arith.mulf %477, %478 : vector<2x4x4xf32>
    %cst_165 = arith.constant dense<0xFF800000> : vector<2x4xf32>
    %480 = vector.multi_reduction <maximumf>, %479, %cst_165 [2] : vector<2x4x4xf32> to vector<2x4xf32>
    %481 = vector.shape_cast %480 : vector<2x4xf32> to vector<2x4x1xf32>
    %482 = vector.broadcast %481 : vector<2x4x1xf32> to vector<2x4x4xf32>
    %483 = arith.subf %479, %482 : vector<2x4x4xf32>
    %484 = math.exp %483 : vector<2x4x4xf32>
    %cst_166 = arith.constant dense<0.000000e+00> : vector<2x4xf32>
    %485 = vector.multi_reduction <add>, %484, %cst_166 [2] : vector<2x4x4xf32> to vector<2x4xf32>
    %486 = vector.shape_cast %485 : vector<2x4xf32> to vector<2x4x1xf32>
    %487 = tpu.reciprocal %486 {approx = true} : vector<2x4x1xf32> -> vector<2x4x1xf32>
    %488 = vector.broadcast %487 : vector<2x4x1xf32> to vector<2x4x4xf32>
    %489 = arith.mulf %484, %488 : vector<2x4x4xf32>
    "tpu.trace_start"() <{level = 10 : i32, message = "gqk,gkd->gqd"}> : () -> ()
    %cst_167 = arith.constant dense<0.000000e+00> : vector<2x4x8xf32>
    %490 = tpu.matmul %489, %476, %cst_167 {dimension_numbers = #tpu.dot_dimension_numbers<[2], [1], [1], [2], [0, 0, 0, 1, 1, 2], [0], [0]>} : vector<2x4x4xf32>, vector<2x4x8xf32>, vector<2x4x8xf32> -> vector<2x4x8xf32>
    "tpu.trace_stop"() : () -> ()
    %491 = vector.shape_cast %490 : vector<2x4x8xf32> to vector<8x8xf32>
    %492 = vector.extract_strided_slice %468 {offsets = [0, 8], sizes = [8, 8], strides = [1, 1]} : vector<8x32xf32> to vector<8x8xf32>
    %493 = vector.shape_cast %492 : vector<8x8xf32> to vector<2x4x8xf32>
    %494 = vector.extract_strided_slice %469 {offsets = [0, 8], sizes = [8, 8], strides = [1, 1]} : vector<8x32xf32> to vector<8x8xf32>
    %495 = vector.shape_cast %494 : vector<8x8xf32> to vector<2x4x8xf32>
    %496 = vector.extract_strided_slice %470 {offsets = [0, 8], sizes = [8, 8], strides = [1, 1]} : vector<8x32xf32> to vector<8x8xf32>
    %497 = vector.shape_cast %496 : vector<8x8xf32> to vector<2x4x8xf32>
    "tpu.trace_start"() <{level = 10 : i32, message = "gqd,gkd->gqk"}> : () -> ()
    %cst_168 = arith.constant dense<0.000000e+00> : vector<2x4x4xf32>
    %498 = tpu.matmul %493, %495, %cst_168 {dimension_numbers = #tpu.dot_dimension_numbers<[2], [2], [1], [1], [0, 0, 0, 1, 1, 1], [0], [0]>} : vector<2x4x8xf32>, vector<2x4x8xf32>, vector<2x4x4xf32> -> vector<2x4x4xf32>
    "tpu.trace_stop"() : () -> ()
    %cst_169 = arith.constant 0.353553385 : f32
    %499 = vector.broadcast %cst_169 : f32 to vector<2x4x4xf32>
    %500 = arith.mulf %498, %499 : vector<2x4x4xf32>
    %cst_170 = arith.constant dense<0xFF800000> : vector<2x4xf32>
    %501 = vector.multi_reduction <maximumf>, %500, %cst_170 [2] : vector<2x4x4xf32> to vector<2x4xf32>
    %502 = vector.shape_cast %501 : vector<2x4xf32> to vector<2x4x1xf32>
    %503 = vector.broadcast %502 : vector<2x4x1xf32> to vector<2x4x4xf32>
    %504 = arith.subf %500, %503 : vector<2x4x4xf32>
    %505 = math.exp %504 : vector<2x4x4xf32>
    %cst_171 = arith.constant dense<0.000000e+00> : vector<2x4xf32>
    %506 = vector.multi_reduction <add>, %505, %cst_171 [2] : vector<2x4x4xf32> to vector<2x4xf32>
    %507 = vector.shape_cast %506 : vector<2x4xf32> to vector<2x4x1xf32>
    %508 = tpu.reciprocal %507 {approx = true} : vector<2x4x1xf32> -> vector<2x4x1xf32>
    %509 = vector.broadcast %508 : vector<2x4x1xf32> to vector<2x4x4xf32>
    %510 = arith.mulf %505, %509 : vector<2x4x4xf32>
    "tpu.trace_start"() <{level = 10 : i32, message = "gqk,gkd->gqd"}> : () -> ()
    %cst_172 = arith.constant dense<0.000000e+00> : vector<2x4x8xf32>
    %511 = tpu.matmul %510, %497, %cst_172 {dimension_numbers = #tpu.dot_dimension_numbers<[2], [1], [1], [2], [0, 0, 0, 1, 1, 2], [0], [0]>} : vector<2x4x4xf32>, vector<2x4x8xf32>, vector<2x4x8xf32> -> vector<2x4x8xf32>
    "tpu.trace_stop"() : () -> ()
    %512 = vector.shape_cast %511 : vector<2x4x8xf32> to vector<8x8xf32>
    %513 = vector.extract_strided_slice %468 {offsets = [0, 16], sizes = [8, 8], strides = [1, 1]} : vector<8x32xf32> to vector<8x8xf32>
    %514 = vector.shape_cast %513 : vector<8x8xf32> to vector<2x4x8xf32>
    %515 = vector.extract_strided_slice %469 {offsets = [0, 16], sizes = [8, 8], strides = [1, 1]} : vector<8x32xf32> to vector<8x8xf32>
    %516 = vector.shape_cast %515 : vector<8x8xf32> to vector<2x4x8xf32>
    %517 = vector.extract_strided_slice %470 {offsets = [0, 16], sizes = [8, 8], strides = [1, 1]} : vector<8x32xf32> to vector<8x8xf32>
    %518 = vector.shape_cast %517 : vector<8x8xf32> to vector<2x4x8xf32>
    "tpu.trace_start"() <{level = 10 : i32, message = "gqd,gkd->gqk"}> : () -> ()
    %cst_173 = arith.constant dense<0.000000e+00> : vector<2x4x4xf32>
    %519 = tpu.matmul %514, %516, %cst_173 {dimension_numbers = #tpu.dot_dimension_numbers<[2], [2], [1], [1], [0, 0, 0, 1, 1, 1], [0], [0]>} : vector<2x4x8xf32>, vector<2x4x8xf32>, vector<2x4x4xf32> -> vector<2x4x4xf32>
    "tpu.trace_stop"() : () -> ()
    %cst_174 = arith.constant 0.353553385 : f32
    %520 = vector.broadcast %cst_174 : f32 to vector<2x4x4xf32>
    %521 = arith.mulf %519, %520 : vector<2x4x4xf32>
    %cst_175 = arith.constant dense<0xFF800000> : vector<2x4xf32>
    %522 = vector.multi_reduction <maximumf>, %521, %cst_175 [2] : vector<2x4x4xf32> to vector<2x4xf32>
    %523 = vector.shape_cast %522 : vector<2x4xf32> to vector<2x4x1xf32>
    %524 = vector.broadcast %523 : vector<2x4x1xf32> to vector<2x4x4xf32>
    %525 = arith.subf %521, %524 : vector<2x4x4xf32>
    %526 = math.exp %525 : vector<2x4x4xf32>
    %cst_176 = arith.constant dense<0.000000e+00> : vector<2x4xf32>
    %527 = vector.multi_reduction <add>, %526, %cst_176 [2] : vector<2x4x4xf32> to vector<2x4xf32>
    %528 = vector.shape_cast %527 : vector<2x4xf32> to vector<2x4x1xf32>
    %529 = tpu.reciprocal %528 {approx = true} : vector<2x4x1xf32> -> vector<2x4x1xf32>
    %530 = vector.broadcast %529 : vector<2x4x1xf32> to vector<2x4x4xf32>
    %531 = arith.mulf %526, %530 : vector<2x4x4xf32>
    "tpu.trace_start"() <{level = 10 : i32, message = "gqk,gkd->gqd"}> : () -> ()
    %cst_177 = arith.constant dense<0.000000e+00> : vector<2x4x8xf32>
    %532 = tpu.matmul %531, %518, %cst_177 {dimension_numbers = #tpu.dot_dimension_numbers<[2], [1], [1], [2], [0, 0, 0, 1, 1, 2], [0], [0]>} : vector<2x4x4xf32>, vector<2x4x8xf32>, vector<2x4x8xf32> -> vector<2x4x8xf32>
    "tpu.trace_stop"() : () -> ()
    %533 = vector.shape_cast %532 : vector<2x4x8xf32> to vector<8x8xf32>
    %534 = vector.extract_strided_slice %468 {offsets = [0, 24], sizes = [8, 8], strides = [1, 1]} : vector<8x32xf32> to vector<8x8xf32>
    %535 = vector.shape_cast %534 : vector<8x8xf32> to vector<2x4x8xf32>
    %536 = vector.extract_strided_slice %469 {offsets = [0, 24], sizes = [8, 8], strides = [1, 1]} : vector<8x32xf32> to vector<8x8xf32>
    %537 = vector.shape_cast %536 : vector<8x8xf32> to vector<2x4x8xf32>
    %538 = vector.extract_strided_slice %470 {offsets = [0, 24], sizes = [8, 8], strides = [1, 1]} : vector<8x32xf32> to vector<8x8xf32>
    %539 = vector.shape_cast %538 : vector<8x8xf32> to vector<2x4x8xf32>
    "tpu.trace_start"() <{level = 10 : i32, message = "gqd,gkd->gqk"}> : () -> ()
    %cst_178 = arith.constant dense<0.000000e+00> : vector<2x4x4xf32>
    %540 = tpu.matmul %535, %537, %cst_178 {dimension_numbers = #tpu.dot_dimension_numbers<[2], [2], [1], [1], [0, 0, 0, 1, 1, 1], [0], [0]>} : vector<2x4x8xf32>, vector<2x4x8xf32>, vector<2x4x4xf32> -> vector<2x4x4xf32>
    "tpu.trace_stop"() : () -> ()
    %cst_179 = arith.constant 0.353553385 : f32
    %541 = vector.broadcast %cst_179 : f32 to vector<2x4x4xf32>
    %542 = arith.mulf %540, %541 : vector<2x4x4xf32>
    %cst_180 = arith.constant dense<0xFF800000> : vector<2x4xf32>
    %543 = vector.multi_reduction <maximumf>, %542, %cst_180 [2] : vector<2x4x4xf32> to vector<2x4xf32>
    %544 = vector.shape_cast %543 : vector<2x4xf32> to vector<2x4x1xf32>
    %545 = vector.broadcast %544 : vector<2x4x1xf32> to vector<2x4x4xf32>
    %546 = arith.subf %542, %545 : vector<2x4x4xf32>
    %547 = math.exp %546 : vector<2x4x4xf32>
    %cst_181 = arith.constant dense<0.000000e+00> : vector<2x4xf32>
    %548 = vector.multi_reduction <add>, %547, %cst_181 [2] : vector<2x4x4xf32> to vector<2x4xf32>
    %549 = vector.shape_cast %548 : vector<2x4xf32> to vector<2x4x1xf32>
    %550 = tpu.reciprocal %549 {approx = true} : vector<2x4x1xf32> -> vector<2x4x1xf32>
    %551 = vector.broadcast %550 : vector<2x4x1xf32> to vector<2x4x4xf32>
    %552 = arith.mulf %547, %551 : vector<2x4x4xf32>
    "tpu.trace_start"() <{level = 10 : i32, message = "gqk,gkd->gqd"}> : () -> ()
    %cst_182 = arith.constant dense<0.000000e+00> : vector<2x4x8xf32>
    %553 = tpu.matmul %552, %539, %cst_182 {dimension_numbers = #tpu.dot_dimension_numbers<[2], [1], [1], [2], [0, 0, 0, 1, 1, 2], [0], [0]>} : vector<2x4x4xf32>, vector<2x4x8xf32>, vector<2x4x8xf32> -> vector<2x4x8xf32>
    "tpu.trace_stop"() : () -> ()
    %554 = vector.shape_cast %553 : vector<2x4x8xf32> to vector<8x8xf32>
    %555 = tpu.concatenate %491, %512, %533, %554 in 1 : vector<8x8xf32>, vector<8x8xf32>, vector<8x8xf32>, vector<8x8xf32> -> vector<8x32xf32>
    %556 = arith.truncf %555 : vector<8x32xf32> to vector<8x32xbf16>
    %c2_183 = arith.constant 2 : index
    %c0_184 = arith.constant 0 : index
    %c0_185 = arith.constant 0 : index
    %557 = vector.load %arg5[%c2_183, %c0_184, %c0_185] : memref<3x32x32xbf16, #tpu.memory_space<vmem>>, vector<1x32x32xbf16>
    %558 = vector.shape_cast %557 : vector<1x32x32xbf16> to vector<32x32xbf16>
    %cst_186 = arith.constant dense<0.000000e+00> : vector<8x32xf32>
    %559 = tpu.matmul %556, %558, %cst_186 {dimension_numbers = #tpu.dot_dimension_numbers<[1], [0], [0], [1], [0, 0, 1, 1], [], []>} : vector<8x32xbf16>, vector<32x32xbf16>, vector<8x32xf32> -> vector<8x32xf32>
    %c2_187 = arith.constant 2 : index
    %c0_188 = arith.constant 0 : index
    %c0_189 = arith.constant 0 : index
    %560 = vector.load %arg6[%c2_187, %c0_188, %c0_189] : memref<3x1x32xf32, #tpu.memory_space<vmem>>, vector<1x1x32xf32>
    %561 = vector.shape_cast %560 : vector<1x1x32xf32> to vector<1x32xf32>
    %562 = vector.broadcast %561 : vector<1x32xf32> to vector<8x32xf32>
    %563 = arith.addf %559, %562 : vector<8x32xf32>
    %564 = arith.mulf %434, %563 : vector<8x32xf32>
    %565 = arith.addf %429, %564 : vector<8x32xf32>
    %cst_190 = arith.constant dense<0.000000e+00> : vector<8xf32>
    %566 = vector.multi_reduction <add>, %565, %cst_190 [1] : vector<8x32xf32> to vector<8xf32>
    %567 = vector.shape_cast %566 : vector<8xf32> to vector<8x1xf32>
    %cst_191 = arith.constant 3.200000e+01 : f32
    %568 = vector.broadcast %cst_191 : f32 to vector<8x1xf32>
    %569 = arith.divf %567, %568 : vector<8x1xf32>
    %570 = vector.broadcast %569 : vector<8x1xf32> to vector<8x32xf32>
    %571 = arith.subf %565, %570 : vector<8x32xf32>
    %572 = arith.mulf %571, %571 : vector<8x32xf32>
    %cst_192 = arith.constant dense<0.000000e+00> : vector<8xf32>
    %573 = vector.multi_reduction <add>, %572, %cst_192 [1] : vector<8x32xf32> to vector<8xf32>
    %574 = vector.shape_cast %573 : vector<8xf32> to vector<8x1xf32>
    %cst_193 = arith.constant 3.200000e+01 : f32
    %575 = vector.broadcast %cst_193 : f32 to vector<8x1xf32>
    %576 = arith.divf %574, %575 : vector<8x1xf32>
    %577 = vector.broadcast %569 : vector<8x1xf32> to vector<8x32xf32>
    %578 = arith.subf %565, %577 : vector<8x32xf32>
    %cst_194 = arith.constant 9.99999997E-7 : f32
    %579 = vector.broadcast %cst_194 : f32 to vector<8x1xf32>
    %580 = arith.addf %576, %579 : vector<8x1xf32>
    %581 = math.rsqrt %580 : vector<8x1xf32>
    %582 = vector.broadcast %581 : vector<8x1xf32> to vector<8x32xf32>
    %583 = arith.mulf %578, %582 : vector<8x32xf32>
    %cst_195 = arith.constant dense<0.000000e+00> : vector<8xf32>
    %584 = vector.multi_reduction <add>, %583, %cst_195 [1] : vector<8x32xf32> to vector<8xf32>
    %585 = vector.shape_cast %584 : vector<8xf32> to vector<8x1xf32>
    %cst_196 = arith.constant 3.200000e+01 : f32
    %586 = vector.broadcast %cst_196 : f32 to vector<8x1xf32>
    %587 = arith.divf %585, %586 : vector<8x1xf32>
    %588 = vector.broadcast %587 : vector<8x1xf32> to vector<8x32xf32>
    %589 = arith.subf %583, %588 : vector<8x32xf32>
    %590 = arith.mulf %589, %589 : vector<8x32xf32>
    %cst_197 = arith.constant dense<0.000000e+00> : vector<8xf32>
    %591 = vector.multi_reduction <add>, %590, %cst_197 [1] : vector<8x32xf32> to vector<8xf32>
    %592 = vector.shape_cast %591 : vector<8xf32> to vector<8x1xf32>
    %cst_198 = arith.constant 3.200000e+01 : f32
    %593 = vector.broadcast %cst_198 : f32 to vector<8x1xf32>
    %594 = arith.divf %592, %593 : vector<8x1xf32>
    %595 = vector.broadcast %587 : vector<8x1xf32> to vector<8x32xf32>
    %596 = arith.subf %583, %595 : vector<8x32xf32>
    %cst_199 = arith.constant 9.99999997E-7 : f32
    %597 = vector.broadcast %cst_199 : f32 to vector<8x1xf32>
    %598 = arith.addf %594, %597 : vector<8x1xf32>
    %599 = math.rsqrt %598 : vector<8x1xf32>
    %600 = vector.broadcast %599 : vector<8x1xf32> to vector<8x32xf32>
    %601 = arith.mulf %596, %600 : vector<8x32xf32>
    %cst_200 = arith.constant 1.000000e+00 : f32
    %602 = vector.broadcast %cst_200 : f32 to vector<8x32xf32>
    %603 = arith.addf %602, %436 : vector<8x32xf32>
    %604 = arith.mulf %601, %603 : vector<8x32xf32>
    %605 = arith.addf %604, %435 : vector<8x32xf32>
    %606 = arith.truncf %605 : vector<8x32xf32> to vector<8x32xbf16>
    %c2_201 = arith.constant 2 : index
    %c0_202 = arith.constant 0 : index
    %c0_203 = arith.constant 0 : index
    %607 = vector.load %arg7[%c2_201, %c0_202, %c0_203] : memref<3x32x128xbf16, #tpu.memory_space<vmem>>, vector<1x32x128xbf16>
    %608 = vector.shape_cast %607 : vector<1x32x128xbf16> to vector<32x128xbf16>
    %cst_204 = arith.constant dense<0.000000e+00> : vector<8x128xf32>
    %609 = tpu.matmul %606, %608, %cst_204 {dimension_numbers = #tpu.dot_dimension_numbers<[1], [0], [0], [1], [0, 0, 1, 1], [], []>} : vector<8x32xbf16>, vector<32x128xbf16>, vector<8x128xf32> -> vector<8x128xf32>
    %c2_205 = arith.constant 2 : index
    %c0_206 = arith.constant 0 : index
    %c0_207 = arith.constant 0 : index
    %610 = vector.load %arg8[%c2_205, %c0_206, %c0_207] : memref<3x1x128xf32, #tpu.memory_space<vmem>>, vector<1x1x128xf32>
    %611 = vector.shape_cast %610 : vector<1x1x128xf32> to vector<1x128xf32>
    %612 = vector.broadcast %611 : vector<1x128xf32> to vector<8x128xf32>
    %613 = arith.addf %609, %612 : vector<8x128xf32>
    %cst_208 = arith.constant 0.000000e+00 : f32
    %614 = vector.broadcast %cst_208 : f32 to vector<8x128xf32>
    %615 = arith.maximumf %613, %614 : vector<8x128xf32>
    %616 = arith.truncf %615 : vector<8x128xf32> to vector<8x128xbf16>
    %c2_209 = arith.constant 2 : index
    %c0_210 = arith.constant 0 : index
    %c0_211 = arith.constant 0 : index
    %617 = vector.load %arg9[%c2_209, %c0_210, %c0_211] : memref<3x128x32xbf16, #tpu.memory_space<vmem>>, vector<1x128x32xbf16>
    %618 = vector.shape_cast %617 : vector<1x128x32xbf16> to vector<128x32xbf16>
    %cst_212 = arith.constant dense<0.000000e+00> : vector<8x32xf32>
    %619 = tpu.matmul %616, %618, %cst_212 {dimension_numbers = #tpu.dot_dimension_numbers<[1], [0], [0], [1], [0, 0, 1, 1], [], []>} : vector<8x128xbf16>, vector<128x32xbf16>, vector<8x32xf32> -> vector<8x32xf32>
    %c2_213 = arith.constant 2 : index
    %c0_214 = arith.constant 0 : index
    %c0_215 = arith.constant 0 : index
    %620 = vector.load %arg10[%c2_213, %c0_214, %c0_215] : memref<3x1x32xf32, #tpu.memory_space<vmem>>, vector<1x1x32xf32>
    %621 = vector.shape_cast %620 : vector<1x1x32xf32> to vector<1x32xf32>
    %622 = vector.broadcast %621 : vector<1x32xf32> to vector<8x32xf32>
    %623 = arith.addf %619, %622 : vector<8x32xf32>
    %624 = arith.mulf %437, %623 : vector<8x32xf32>
    %625 = arith.addf %583, %624 : vector<8x32xf32>
    %cst_216 = arith.constant dense<0.000000e+00> : vector<8xf32>
    %626 = vector.multi_reduction <add>, %625, %cst_216 [1] : vector<8x32xf32> to vector<8xf32>
    %627 = vector.shape_cast %626 : vector<8xf32> to vector<8x1xf32>
    %cst_217 = arith.constant 3.200000e+01 : f32
    %628 = vector.broadcast %cst_217 : f32 to vector<8x1xf32>
    %629 = arith.divf %627, %628 : vector<8x1xf32>
    %630 = vector.broadcast %629 : vector<8x1xf32> to vector<8x32xf32>
    %631 = arith.subf %625, %630 : vector<8x32xf32>
    %632 = arith.mulf %631, %631 : vector<8x32xf32>
    %cst_218 = arith.constant dense<0.000000e+00> : vector<8xf32>
    %633 = vector.multi_reduction <add>, %632, %cst_218 [1] : vector<8x32xf32> to vector<8xf32>
    %634 = vector.shape_cast %633 : vector<8xf32> to vector<8x1xf32>
    %cst_219 = arith.constant 3.200000e+01 : f32
    %635 = vector.broadcast %cst_219 : f32 to vector<8x1xf32>
    %636 = arith.divf %634, %635 : vector<8x1xf32>
    %637 = vector.broadcast %629 : vector<8x1xf32> to vector<8x32xf32>
    %638 = arith.subf %625, %637 : vector<8x32xf32>
    %cst_220 = arith.constant 9.99999997E-7 : f32
    %639 = vector.broadcast %cst_220 : f32 to vector<8x1xf32>
    %640 = arith.addf %636, %639 : vector<8x1xf32>
    %641 = math.rsqrt %640 : vector<8x1xf32>
    %642 = vector.broadcast %641 : vector<8x1xf32> to vector<8x32xf32>
    %643 = arith.mulf %638, %642 : vector<8x32xf32>
    %c0_221 = arith.constant 0 : index
    %c0_222 = arith.constant 0 : index
    %c0_223 = arith.constant 0 : index
    %644 = vector.load %arg11[%c0_221, %c0_222, %c0_223] : memref<1x8x32xf32, #tpu.memory_space<vmem>>, vector<1x8x32xf32>
    %645 = vector.shape_cast %644 : vector<1x8x32xf32> to vector<8x32xf32>
    %646 = vector.shape_cast %643 : vector<8x32xf32> to vector<1x8x32xf32>
    tpu.vector_store %arg11[%c0_221, %c0_222, %c0_223], %646 {strides = array<i32>} : memref<1x8x32xf32, #tpu.memory_space<vmem>>, vector<1x8x32xf32>,
    return
  }
  func.func @transform_0(%arg0: i32) -> (i32, i32, i32) {
    %c0_i32 = arith.constant 0 : i32
    %c0_i32_0 = arith.constant 0 : i32
    %c0_i32_1 = arith.constant 0 : i32
    return %arg0, %c0_i32, %c0_i32_0 : i32, i32, i32
  }
  func.func @transform_1(%arg0: i32) -> (i32, i32, i32) {
    %c0_i32 = arith.constant 0 : i32
    %c0_i32_0 = arith.constant 0 : i32
    %c0_i32_1 = arith.constant 0 : i32
    %c0_i32_2 = arith.constant 0 : i32
    return %c0_i32, %c0_i32_0, %c0_i32_1 : i32, i32, i32
  }
  func.func @transform_2(%arg0: i32) -> (i32, i32, i32) {
    %c0_i32 = arith.constant 0 : i32
    %c0_i32_0 = arith.constant 0 : i32
    %c0_i32_1 = arith.constant 0 : i32
    %c0_i32_2 = arith.constant 0 : i32
    return %c0_i32, %c0_i32_0, %c0_i32_1 : i32, i32, i32
  }
  func.func @transform_3(%arg0: i32) -> (i32, i32, i32) {
    %c0_i32 = arith.constant 0 : i32
    %c0_i32_0 = arith.constant 0 : i32
    %c0_i32_1 = arith.constant 0 : i32
    %c0_i32_2 = arith.constant 0 : i32
    return %c0_i32, %c0_i32_0, %c0_i32_1 : i32, i32, i32
  }
  func.func @transform_4(%arg0: i32) -> (i32, i32, i32) {
    %c0_i32 = arith.constant 0 : i32
    %c0_i32_0 = arith.constant 0 : i32
    %c0_i32_1 = arith.constant 0 : i32
    %c0_i32_2 = arith.constant 0 : i32
    return %c0_i32, %c0_i32_0, %c0_i32_1 : i32, i32, i32
  }
  func.func @transform_5(%arg0: i32) -> (i32, i32, i32) {
    %c0_i32 = arith.constant 0 : i32
    %c0_i32_0 = arith.constant 0 : i32
    %c0_i32_1 = arith.constant 0 : i32
    %c0_i32_2 = arith.constant 0 : i32
    return %c0_i32, %c0_i32_0, %c0_i32_1 : i32, i32, i32
  }
  func.func @transform_6(%arg0: i32) -> (i32, i32, i32) {
    %c0_i32 = arith.constant 0 : i32
    %c0_i32_0 = arith.constant 0 : i32
    %c0_i32_1 = arith.constant 0 : i32
    %c0_i32_2 = arith.constant 0 : i32
    return %c0_i32, %c0_i32_0, %c0_i32_1 : i32, i32, i32
  }
  func.func @transform_7(%arg0: i32) -> (i32, i32, i32) {
    %c0_i32 = arith.constant 0 : i32
    %c0_i32_0 = arith.constant 0 : i32
    %c0_i32_1 = arith.constant 0 : i32
    %c0_i32_2 = arith.constant 0 : i32
    return %c0_i32, %c0_i32_0, %c0_i32_1 : i32, i32, i32
  }
  func.func @transform_8(%arg0: i32) -> (i32, i32, i32) {
    %c0_i32 = arith.constant 0 : i32
    %c0_i32_0 = arith.constant 0 : i32
    %c0_i32_1 = arith.constant 0 : i32
    %c0_i32_2 = arith.constant 0 : i32
    return %c0_i32, %c0_i32_0, %c0_i32_1 : i32, i32, i32
  }
  func.func @transform_9(%arg0: i32) -> (i32, i32, i32) {
    %c0_i32 = arith.constant 0 : i32
    %c0_i32_0 = arith.constant 0 : i32
    %c0_i32_1 = arith.constant 0 : i32
    %c0_i32_2 = arith.constant 0 : i32
    return %c0_i32, %c0_i32_0, %c0_i32_1 : i32, i32, i32
  }
  func.func @transform_10(%arg0: i32) -> (i32, i32, i32) {
    %c0_i32 = arith.constant 0 : i32
    %c0_i32_0 = arith.constant 0 : i32
    %c0_i32_1 = arith.constant 0 : i32
    return %arg0, %c0_i32, %c0_i32_0 : i32, i32, i32
  }
}

module attributes {stable_mosaic.version = 11 : i64} {
  func.func @_block_kernel(%arg0: i32, %arg1: memref<1x8x32xf32, #tpu.memory_space<vmem>>, %arg2: memref<3x8x192xf32, #tpu.memory_space<vmem>>, %arg3: memref<3x32x96xbf16, #tpu.memory_space<vmem>>, %arg4: memref<3x1x96xf32, #tpu.memory_space<vmem>>, %arg5: memref<3x32x32xbf16, #tpu.memory_space<vmem>>, %arg6: memref<3x1x32xf32, #tpu.memory_space<vmem>>, %arg7: memref<3x32x128xbf16, #tpu.memory_space<vmem>>, %arg8: memref<3x1x128xf32, #tpu.memory_space<vmem>>, %arg9: memref<3x128x32xbf16, #tpu.memory_space<vmem>>, %arg10: memref<3x1x32xf32, #tpu.memory_space<vmem>>, %arg11: memref<1x8x32xf32, #tpu.memory_space<vmem>>) attributes {dimension_semantics = [#tpu.dimension_semantics<parallel>], iteration_bounds = array<i64: 2>, scalar_prefetch = 0 : i64, scratch_operands = 0 : i64, tpu.core_type = #tpu.core_type<tc>, window_params = [{transform_indices = @transform_0, window_bounds = array<i64: 1, 8, 32>}, {pipeline_mode = #tpu.pipeline_mode<synchronous>, transform_indices = @transform_1, window_bounds = array<i64: 3, 8, 192>}, {pipeline_mode = #tpu.pipeline_mode<synchronous>, transform_indices = @transform_2, window_bounds = array<i64: 3, 32, 96>}, {pipeline_mode = #tpu.pipeline_mode<synchronous>, transform_indices = @transform_3, window_bounds = array<i64: 3, 1, 96>}, {pipeline_mode = #tpu.pipeline_mode<synchronous>, transform_indices = @transform_4, window_bounds = array<i64: 3, 32, 32>}, {pipeline_mode = #tpu.pipeline_mode<synchronous>, transform_indices = @transform_5, window_bounds = array<i64: 3, 1, 32>}, {pipeline_mode = #tpu.pipeline_mode<synchronous>, transform_indices = @transform_6, window_bounds = array<i64: 3, 32, 128>}, {pipeline_mode = #tpu.pipeline_mode<synchronous>, transform_indices = @transform_7, window_bounds = array<i64: 3, 1, 128>}, {pipeline_mode = #tpu.pipeline_mode<synchronous>, transform_indices = @transform_8, window_bounds = array<i64: 3, 128, 32>}, {pipeline_mode = #tpu.pipeline_mode<synchronous>, transform_indices = @transform_9, window_bounds = array<i64: 3, 1, 32>}, {transform_indices = @transform_10, window_bounds = array<i64: 1, 8, 32>}]} {
    %c0 = arith.constant 0 : index
    %c0_0 = arith.constant 0 : index
    %c0_1 = arith.constant 0 : index
    %0 = vector.load %arg1[%c0, %c0_0, %c0_1] : memref<1x8x32xf32, #tpu.memory_space<vmem>>, vector<1x8x32xf32>
    %1 = vector.shape_cast %0 : vector<1x8x32xf32> to vector<8x32xf32>
    %c0_2 = arith.constant 0 : index
    %c0_3 = arith.constant 0 : index
    %c0_4 = arith.constant 0 : index
    %2 = vector.load %arg2[%c0_2, %c0_3, %c0_4] : memref<3x8x192xf32, #tpu.memory_space<vmem>>, vector<1x8x192xf32>
    %3 = vector.shape_cast %2 : vector<1x8x192xf32> to vector<8x192xf32>
    %4 = vector.extract_strided_slice %3 {offsets = [0, 0], sizes = [8, 32], strides = [1, 1]} : vector<8x192xf32> to vector<8x32xf32>
    %5 = vector.extract_strided_slice %3 {offsets = [0, 32], sizes = [8, 32], strides = [1, 1]} : vector<8x192xf32> to vector<8x32xf32>
    %6 = vector.extract_strided_slice %3 {offsets = [0, 64], sizes = [8, 32], strides = [1, 1]} : vector<8x192xf32> to vector<8x32xf32>
    %7 = vector.extract_strided_slice %3 {offsets = [0, 96], sizes = [8, 32], strides = [1, 1]} : vector<8x192xf32> to vector<8x32xf32>
    %8 = vector.extract_strided_slice %3 {offsets = [0, 128], sizes = [8, 32], strides = [1, 1]} : vector<8x192xf32> to vector<8x32xf32>
    %9 = vector.extract_strided_slice %3 {offsets = [0, 160], sizes = [8, 32], strides = [1, 1]} : vector<8x192xf32> to vector<8x32xf32>
    %cst = arith.constant dense<0.000000e+00> : vector<8xf32>
    %10 = vector.multi_reduction <add>, %1, %cst [1] : vector<8x32xf32> to vector<8xf32>
    %11 = vector.shape_cast %10 : vector<8xf32> to vector<8x1xf32>
    %cst_5 = arith.constant 3.200000e+01 : f32
    %12 = vector.broadcast %cst_5 : f32 to vector<8x1xf32>
    %13 = arith.divf %11, %12 : vector<8x1xf32>
    %14 = vector.broadcast %13 : vector<8x1xf32> to vector<8x32xf32>
    %15 = arith.subf %1, %14 : vector<8x32xf32>
    %16 = arith.mulf %15, %15 : vector<8x32xf32>
    %cst_6 = arith.constant dense<0.000000e+00> : vector<8xf32>
    %17 = vector.multi_reduction <add>, %16, %cst_6 [1] : vector<8x32xf32> to vector<8xf32>
    %18 = vector.shape_cast %17 : vector<8xf32> to vector<8x1xf32>
    %cst_7 = arith.constant 3.200000e+01 : f32
    %19 = vector.broadcast %cst_7 : f32 to vector<8x1xf32>
    %20 = arith.divf %18, %19 : vector<8x1xf32>
    %21 = vector.broadcast %13 : vector<8x1xf32> to vector<8x32xf32>
    %22 = arith.subf %1, %21 : vector<8x32xf32>
    %cst_8 = arith.constant 9.99999997E-7 : f32
    %23 = vector.broadcast %cst_8 : f32 to vector<8x1xf32>
    %24 = arith.addf %20, %23 : vector<8x1xf32>
    %25 = math.rsqrt %24 : vector<8x1xf32>
    %26 = vector.broadcast %25 : vector<8x1xf32> to vector<8x32xf32>
    %27 = arith.mulf %22, %26 : vector<8x32xf32>
    %cst_9 = arith.constant 1.000000e+00 : f32
    %28 = vector.broadcast %cst_9 : f32 to vector<8x32xf32>
    %29 = arith.addf %28, %5 : vector<8x32xf32>
    %30 = arith.mulf %27, %29 : vector<8x32xf32>
    %31 = arith.addf %30, %4 : vector<8x32xf32>
    %32 = arith.truncf %31 : vector<8x32xf32> to vector<8x32xbf16>
    %c0_10 = arith.constant 0 : index
    %c0_11 = arith.constant 0 : index
    %c0_12 = arith.constant 0 : index
    %33 = vector.load %arg3[%c0_10, %c0_11, %c0_12] : memref<3x32x96xbf16, #tpu.memory_space<vmem>>, vector<1x32x96xbf16>
    %34 = vector.shape_cast %33 : vector<1x32x96xbf16> to vector<32x96xbf16>
    %cst_13 = arith.constant dense<0.000000e+00> : vector<8x96xf32>
    %35 = tpu.matmul %32, %34, %cst_13 {dimension_numbers = #tpu.dot_dimension_numbers<[1], [0], [0], [1], [0, 0, 1, 1], [], []>} : vector<8x32xbf16>, vector<32x96xbf16>, vector<8x96xf32> -> vector<8x96xf32>
    %c0_14 = arith.constant 0 : index
    %c0_15 = arith.constant 0 : index
    %c0_16 = arith.constant 0 : index
    %36 = vector.load %arg4[%c0_14, %c0_15, %c0_16] : memref<3x1x96xf32, #tpu.memory_space<vmem>>, vector<1x1x96xf32>
    %37 = vector.shape_cast %36 : vector<1x1x96xf32> to vector<1x96xf32>
    %38 = vector.broadcast %37 : vector<1x96xf32> to vector<8x96xf32>
    %39 = arith.addf %35, %38 : vector<8x96xf32>
    %40 = vector.extract_strided_slice %39 {offsets = [0, 0], sizes = [8, 32], strides = [1, 1]} : vector<8x96xf32> to vector<8x32xf32>
    %41 = vector.extract_strided_slice %39 {offsets = [0, 32], sizes = [8, 32], strides = [1, 1]} : vector<8x96xf32> to vector<8x32xf32>
    %42 = vector.extract_strided_slice %39 {offsets = [0, 64], sizes = [8, 32], strides = [1, 1]} : vector<8x96xf32> to vector<8x32xf32>
    %43 = vector.extract_strided_slice %40 {offsets = [0, 0], sizes = [8, 8], strides = [1, 1]} : vector<8x32xf32> to vector<8x8xf32>
    %44 = vector.shape_cast %43 : vector<8x8xf32> to vector<2x4x8xf32>
    %45 = vector.extract_strided_slice %41 {offsets = [0, 0], sizes = [8, 8], strides = [1, 1]} : vector<8x32xf32> to vector<8x8xf32>
    %46 = vector.shape_cast %45 : vector<8x8xf32> to vector<2x4x8xf32>
    %47 = vector.extract_strided_slice %42 {offsets = [0, 0], sizes = [8, 8], strides = [1, 1]} : vector<8x32xf32> to vector<8x8xf32>
    %48 = vector.shape_cast %47 : vector<8x8xf32> to vector<2x4x8xf32>
    "tpu.trace_start"() <{level = 10 : i32, message = "gqd,gkd->gqk"}> : () -> ()
    %cst_17 = arith.constant dense<0.000000e+00> : vector<2x4x4xf32>
    %49 = tpu.matmul %44, %46, %cst_17 {dimension_numbers = #tpu.dot_dimension_numbers<[2], [2], [1], [1], [0, 0, 0, 1, 1, 1], [0], [0]>} : vector<2x4x8xf32>, vector<2x4x8xf32>, vector<2x4x4xf32> -> vector<2x4x4xf32>
    "tpu.trace_stop"() : () -> ()
    %cst_18 = arith.constant 0.353553385 : f32
    %50 = vector.broadcast %cst_18 : f32 to vector<2x4x4xf32>
    %51 = arith.mulf %49, %50 : vector<2x4x4xf32>
    %cst_19 = arith.constant dense<0xFF800000> : vector<2x4xf32>
    %52 = vector.multi_reduction <maximumf>, %51, %cst_19 [2] : vector<2x4x4xf32> to vector<2x4xf32>
    %53 = vector.shape_cast %52 : vector<2x4xf32> to vector<2x4x1xf32>
    %54 = vector.broadcast %53 : vector<2x4x1xf32> to vector<2x4x4xf32>
    %55 = arith.subf %51, %54 : vector<2x4x4xf32>
    %56 = math.exp %55 : vector<2x4x4xf32>
    %cst_20 = arith.constant dense<0.000000e+00> : vector<2x4xf32>
    %57 = vector.multi_reduction <add>, %56, %cst_20 [2] : vector<2x4x4xf32> to vector<2x4xf32>
    %58 = vector.shape_cast %57 : vector<2x4xf32> to vector<2x4x1xf32>
    %59 = tpu.reciprocal %58 {approx = true} : vector<2x4x1xf32> -> vector<2x4x1xf32>
    %60 = vector.broadcast %59 : vector<2x4x1xf32> to vector<2x4x4xf32>
    %61 = arith.mulf %56, %60 : vector<2x4x4xf32>
    "tpu.trace_start"() <{level = 10 : i32, message = "gqk,gkd->gqd"}> : () -> ()
    %cst_21 = arith.constant dense<0.000000e+00> : vector<2x4x8xf32>
    %62 = tpu.matmul %61, %48, %cst_21 {dimension_numbers = #tpu.dot_dimension_numbers<[2], [1], [1], [2], [0, 0, 0, 1, 1, 2], [0], [0]>} : vector<2x4x4xf32>, vector<2x4x8xf32>, vector<2x4x8xf32> -> vector<2x4x8xf32>
    "tpu.trace_stop"() : () -> ()
    %63 = vector.shape_cast %62 : vector<2x4x8xf32> to vector<8x8xf32>
    %64 = vector.extract_strided_slice %40 {offsets = [0, 8], sizes = [8, 8], strides = [1, 1]} : vector<8x32xf32> to vector<8x8xf32>
    %65 = vector.shape_cast %64 : vector<8x8xf32> to vector<2x4x8xf32>
    %66 = vector.extract_strided_slice %41 {offsets = [0, 8], sizes = [8, 8], strides = [1, 1]} : vector<8x32xf32> to vector<8x8xf32>
    %67 = vector.shape_cast %66 : vector<8x8xf32> to vector<2x4x8xf32>
    %68 = vector.extract_strided_slice %42 {offsets = [0, 8], sizes = [8, 8], strides = [1, 1]} : vector<8x32xf32> to vector<8x8xf32>
    %69 = vector.shape_cast %68 : vector<8x8xf32> to vector<2x4x8xf32>
    "tpu.trace_start"() <{level = 10 : i32, message = "gqd,gkd->gqk"}> : () -> ()
    %cst_22 = arith.constant dense<0.000000e+00> : vector<2x4x4xf32>
    %70 = tpu.matmul %65, %67, %cst_22 {dimension_numbers = #tpu.dot_dimension_numbers<[2], [2], [1], [1], [0, 0, 0, 1, 1, 1], [0], [0]>} : vector<2x4x8xf32>, vector<2x4x8xf32>, vector<2x4x4xf32> -> vector<2x4x4xf32>
    "tpu.trace_stop"() : () -> ()
    %cst_23 = arith.constant 0.353553385 : f32
    %71 = vector.broadcast %cst_23 : f32 to vector<2x4x4xf32>
    %72 = arith.mulf %70, %71 : vector<2x4x4xf32>
    %cst_24 = arith.constant dense<0xFF800000> : vector<2x4xf32>
    %73 = vector.multi_reduction <maximumf>, %72, %cst_24 [2] : vector<2x4x4xf32> to vector<2x4xf32>
    %74 = vector.shape_cast %73 : vector<2x4xf32> to vector<2x4x1xf32>
    %75 = vector.broadcast %74 : vector<2x4x1xf32> to vector<2x4x4xf32>
    %76 = arith.subf %72, %75 : vector<2x4x4xf32>
    %77 = math.exp %76 : vector<2x4x4xf32>
    %cst_25 = arith.constant dense<0.000000e+00> : vector<2x4xf32>
    %78 = vector.multi_reduction <add>, %77, %cst_25 [2] : vector<2x4x4xf32> to vector<2x4xf32>
    %79 = vector.shape_cast %78 : vector<2x4xf32> to vector<2x4x1xf32>
    %80 = tpu.reciprocal %79 {approx = true} : vector<2x4x1xf32> -> vector<2x4x1xf32>
    %81 = vector.broadcast %80 : vector<2x4x1xf32> to vector<2x4x4xf32>
    %82 = arith.mulf %77, %81 : vector<2x4x4xf32>
    "tpu.trace_start"() <{level = 10 : i32, message = "gqk,gkd->gqd"}> : () -> ()
    %cst_26 = arith.constant dense<0.000000e+00> : vector<2x4x8xf32>
    %83 = tpu.matmul %82, %69, %cst_26 {dimension_numbers = #tpu.dot_dimension_numbers<[2], [1], [1], [2], [0, 0, 0, 1, 1, 2], [0], [0]>} : vector<2x4x4xf32>, vector<2x4x8xf32>, vector<2x4x8xf32> -> vector<2x4x8xf32>
    "tpu.trace_stop"() : () -> ()
    %84 = vector.shape_cast %83 : vector<2x4x8xf32> to vector<8x8xf32>
    %85 = vector.extract_strided_slice %40 {offsets = [0, 16], sizes = [8, 8], strides = [1, 1]} : vector<8x32xf32> to vector<8x8xf32>
    %86 = vector.shape_cast %85 : vector<8x8xf32> to vector<2x4x8xf32>
    %87 = vector.extract_strided_slice %41 {offsets = [0, 16], sizes = [8, 8], strides = [1, 1]} : vector<8x32xf32> to vector<8x8xf32>
    %88 = vector.shape_cast %87 : vector<8x8xf32> to vector<2x4x8xf32>
    %89 = vector.extract_strided_slice %42 {offsets = [0, 16], sizes = [8, 8], strides = [1, 1]} : vector<8x32xf32> to vector<8x8xf32>
    %90 = vector.shape_cast %89 : vector<8x8xf32> to vector<2x4x8xf32>
    "tpu.trace_start"() <{level = 10 : i32, message = "gqd,gkd->gqk"}> : () -> ()
    %cst_27 = arith.constant dense<0.000000e+00> : vector<2x4x4xf32>
    %91 = tpu.matmul %86, %88, %cst_27 {dimension_numbers = #tpu.dot_dimension_numbers<[2], [2], [1], [1], [0, 0, 0, 1, 1, 1], [0], [0]>} : vector<2x4x8xf32>, vector<2x4x8xf32>, vector<2x4x4xf32> -> vector<2x4x4xf32>
    "tpu.trace_stop"() : () -> ()
    %cst_28 = arith.constant 0.353553385 : f32
    %92 = vector.broadcast %cst_28 : f32 to vector<2x4x4xf32>
    %93 = arith.mulf %91, %92 : vector<2x4x4xf32>
    %cst_29 = arith.constant dense<0xFF800000> : vector<2x4xf32>
    %94 = vector.multi_reduction <maximumf>, %93, %cst_29 [2] : vector<2x4x4xf32> to vector<2x4xf32>
    %95 = vector.shape_cast %94 : vector<2x4xf32> to vector<2x4x1xf32>
    %96 = vector.broadcast %95 : vector<2x4x1xf32> to vector<2x4x4xf32>
    %97 = arith.subf %93, %96 : vector<2x4x4xf32>
    %98 = math.exp %97 : vector<2x4x4xf32>
    %cst_30 = arith.constant dense<0.000000e+00> : vector<2x4xf32>
    %99 = vector.multi_reduction <add>, %98, %cst_30 [2] : vector<2x4x4xf32> to vector<2x4xf32>
    %100 = vector.shape_cast %99 : vector<2x4xf32> to vector<2x4x1xf32>
    %101 = tpu.reciprocal %100 {approx = true} : vector<2x4x1xf32> -> vector<2x4x1xf32>
    %102 = vector.broadcast %101 : vector<2x4x1xf32> to vector<2x4x4xf32>
    %103 = arith.mulf %98, %102 : vector<2x4x4xf32>
    "tpu.trace_start"() <{level = 10 : i32, message = "gqk,gkd->gqd"}> : () -> ()
    %cst_31 = arith.constant dense<0.000000e+00> : vector<2x4x8xf32>
    %104 = tpu.matmul %103, %90, %cst_31 {dimension_numbers = #tpu.dot_dimension_numbers<[2], [1], [1], [2], [0, 0, 0, 1, 1, 2], [0], [0]>} : vector<2x4x4xf32>, vector<2x4x8xf32>, vector<2x4x8xf32> -> vector<2x4x8xf32>
    "tpu.trace_stop"() : () -> ()
    %105 = vector.shape_cast %104 : vector<2x4x8xf32> to vector<8x8xf32>
    %106 = vector.extract_strided_slice %40 {offsets = [0, 24], sizes = [8, 8], strides = [1, 1]} : vector<8x32xf32> to vector<8x8xf32>
    %107 = vector.shape_cast %106 : vector<8x8xf32> to vector<2x4x8xf32>
    %108 = vector.extract_strided_slice %41 {offsets = [0, 24], sizes = [8, 8], strides = [1, 1]} : vector<8x32xf32> to vector<8x8xf32>
    %109 = vector.shape_cast %108 : vector<8x8xf32> to vector<2x4x8xf32>
    %110 = vector.extract_strided_slice %42 {offsets = [0, 24], sizes = [8, 8], strides = [1, 1]} : vector<8x32xf32> to vector<8x8xf32>
    %111 = vector.shape_cast %110 : vector<8x8xf32> to vector<2x4x8xf32>
    "tpu.trace_start"() <{level = 10 : i32, message = "gqd,gkd->gqk"}> : () -> ()
    %cst_32 = arith.constant dense<0.000000e+00> : vector<2x4x4xf32>
    %112 = tpu.matmul %107, %109, %cst_32 {dimension_numbers = #tpu.dot_dimension_numbers<[2], [2], [1], [1], [0, 0, 0, 1, 1, 1], [0], [0]>} : vector<2x4x8xf32>, vector<2x4x8xf32>, vector<2x4x4xf32> -> vector<2x4x4xf32>
    "tpu.trace_stop"() : () -> ()
    %cst_33 = arith.constant 0.353553385 : f32
    %113 = vector.broadcast %cst_33 : f32 to vector<2x4x4xf32>
    %114 = arith.mulf %112, %113 : vector<2x4x4xf32>
    %cst_34 = arith.constant dense<0xFF800000> : vector<2x4xf32>
    %115 = vector.multi_reduction <maximumf>, %114, %cst_34 [2] : vector<2x4x4xf32> to vector<2x4xf32>
    %116 = vector.shape_cast %115 : vector<2x4xf32> to vector<2x4x1xf32>
    %117 = vector.broadcast %116 : vector<2x4x1xf32> to vector<2x4x4xf32>
    %118 = arith.subf %114, %117 : vector<2x4x4xf32>
    %119 = math.exp %118 : vector<2x4x4xf32>
    %cst_35 = arith.constant dense<0.000000e+00> : vector<2x4xf32>
    %120 = vector.multi_reduction <add>, %119, %cst_35 [2] : vector<2x4x4xf32> to vector<2x4xf32>
    %121 = vector.shape_cast %120 : vector<2x4xf32> to vector<2x4x1xf32>
    %122 = tpu.reciprocal %121 {approx = true} : vector<2x4x1xf32> -> vector<2x4x1xf32>
    %123 = vector.broadcast %122 : vector<2x4x1xf32> to vector<2x4x4xf32>
    %124 = arith.mulf %119, %123 : vector<2x4x4xf32>
    "tpu.trace_start"() <{level = 10 : i32, message = "gqk,gkd->gqd"}> : () -> ()
    %cst_36 = arith.constant dense<0.000000e+00> : vector<2x4x8xf32>
    %125 = tpu.matmul %124, %111, %cst_36 {dimension_numbers = #tpu.dot_dimension_numbers<[2], [1], [1], [2], [0, 0, 0, 1, 1, 2], [0], [0]>} : vector<2x4x4xf32>, vector<2x4x8xf32>, vector<2x4x8xf32> -> vector<2x4x8xf32>
    "tpu.trace_stop"() : () -> ()
    %126 = vector.shape_cast %125 : vector<2x4x8xf32> to vector<8x8xf32>
    %127 = tpu.concatenate %63, %84, %105, %126 in 1 : vector<8x8xf32>, vector<8x8xf32>, vector<8x8xf32>, vector<8x8xf32> -> vector<8x32xf32>
    %128 = arith.truncf %127 : vector<8x32xf32> to vector<8x32xbf16>
    %c0_37 = arith.constant 0 : index
    %c0_38 = arith.constant 0 : index
    %c0_39 = arith.constant 0 : index
    %129 = vector.load %arg5[%c0_37, %c0_38, %c0_39] : memref<3x32x32xbf16, #tpu.memory_space<vmem>>, vector<1x32x32xbf16>
    %130 = vector.shape_cast %129 : vector<1x32x32xbf16> to vector<32x32xbf16>
    %cst_40 = arith.constant dense<0.000000e+00> : vector<8x32xf32>
    %131 = tpu.matmul %128, %130, %cst_40 {dimension_numbers = #tpu.dot_dimension_numbers<[1], [0], [0], [1], [0, 0, 1, 1], [], []>} : vector<8x32xbf16>, vector<32x32xbf16>, vector<8x32xf32> -> vector<8x32xf32>
    %c0_41 = arith.constant 0 : index
    %c0_42 = arith.constant 0 : index
    %c0_43 = arith.constant 0 : index
    %132 = vector.load %arg6[%c0_41, %c0_42, %c0_43] : memref<3x1x32xf32, #tpu.memory_space<vmem>>, vector<1x1x32xf32>
    %133 = vector.shape_cast %132 : vector<1x1x32xf32> to vector<1x32xf32>
    %134 = vector.broadcast %133 : vector<1x32xf32> to vector<8x32xf32>
    %135 = arith.addf %131, %134 : vector<8x32xf32>
    %136 = arith.mulf %6, %135 : vector<8x32xf32>
    %137 = arith.addf %1, %136 : vector<8x32xf32>
    %cst_44 = arith.constant dense<0.000000e+00> : vector<8xf32>
    %138 = vector.multi_reduction <add>, %137, %cst_44 [1] : vector<8x32xf32> to vector<8xf32>
    %139 = vector.shape_cast %138 : vector<8xf32> to vector<8x1xf32>
    %cst_45 = arith.constant 3.200000e+01 : f32
    %140 = vector.broadcast %cst_45 : f32 to vector<8x1xf32>
    %141 = arith.divf %139, %140 : vector<8x1xf32>
    %142 = vector.broadcast %141 : vector<8x1xf32> to vector<8x32xf32>
    %143 = arith.subf %137, %142 : vector<8x32xf32>
    %144 = arith.mulf %143, %143 : vector<8x32xf32>
    %cst_46 = arith.constant dense<0.000000e+00> : vector<8xf32>
    %145 = vector.multi_reduction <add>, %144, %cst_46 [1] : vector<8x32xf32> to vector<8xf32>
    %146 = vector.shape_cast %145 : vector<8xf32> to vector<8x1xf32>
    %cst_47 = arith.constant 3.200000e+01 : f32
    %147 = vector.broadcast %cst_47 : f32 to vector<8x1xf32>
    %148 = arith.divf %146, %147 : vector<8x1xf32>
    %149 = vector.broadcast %141 : vector<8x1xf32> to vector<8x32xf32>
    %150 = arith.subf %137, %149 : vector<8x32xf32>
    %cst_48 = arith.constant 9.99999997E-7 : f32
    %151 = vector.broadcast %cst_48 : f32 to vector<8x1xf32>
    %152 = arith.addf %148, %151 : vector<8x1xf32>
    %153 = math.rsqrt %152 : vector<8x1xf32>
    %154 = vector.broadcast %153 : vector<8x1xf32> to vector<8x32xf32>
    %155 = arith.mulf %150, %154 : vector<8x32xf32>
    %cst_49 = arith.constant dense<0.000000e+00> : vector<8xf32>
    %156 = vector.multi_reduction <add>, %155, %cst_49 [1] : vector<8x32xf32> to vector<8xf32>
    %157 = vector.shape_cast %156 : vector<8xf32> to vector<8x1xf32>
    %cst_50 = arith.constant 3.200000e+01 : f32
    %158 = vector.broadcast %cst_50 : f32 to vector<8x1xf32>
    %159 = arith.divf %157, %158 : vector<8x1xf32>
    %160 = vector.broadcast %159 : vector<8x1xf32> to vector<8x32xf32>
    %161 = arith.subf %155, %160 : vector<8x32xf32>
    %162 = arith.mulf %161, %161 : vector<8x32xf32>
    %cst_51 = arith.constant dense<0.000000e+00> : vector<8xf32>
    %163 = vector.multi_reduction <add>, %162, %cst_51 [1] : vector<8x32xf32> to vector<8xf32>
    %164 = vector.shape_cast %163 : vector<8xf32> to vector<8x1xf32>
    %cst_52 = arith.constant 3.200000e+01 : f32
    %165 = vector.broadcast %cst_52 : f32 to vector<8x1xf32>
    %166 = arith.divf %164, %165 : vector<8x1xf32>
    %167 = vector.broadcast %159 : vector<8x1xf32> to vector<8x32xf32>
    %168 = arith.subf %155, %167 : vector<8x32xf32>
    %cst_53 = arith.constant 9.99999997E-7 : f32
    %169 = vector.broadcast %cst_53 : f32 to vector<8x1xf32>
    %170 = arith.addf %166, %169 : vector<8x1xf32>
    %171 = math.rsqrt %170 : vector<8x1xf32>
    %172 = vector.broadcast %171 : vector<8x1xf32> to vector<8x32xf32>
    %173 = arith.mulf %168, %172 : vector<8x32xf32>
    %cst_54 = arith.constant 1.000000e+00 : f32
    %174 = vector.broadcast %cst_54 : f32 to vector<8x32xf32>
    %175 = arith.addf %174, %8 : vector<8x32xf32>
    %176 = arith.mulf %173, %175 : vector<8x32xf32>
    %177 = arith.addf %176, %7 : vector<8x32xf32>
    %178 = arith.truncf %177 : vector<8x32xf32> to vector<8x32xbf16>
    %c0_55 = arith.constant 0 : index
    %c0_56 = arith.constant 0 : index
    %c0_57 = arith.constant 0 : index
    %179 = vector.load %arg7[%c0_55, %c0_56, %c0_57] : memref<3x32x128xbf16, #tpu.memory_space<vmem>>, vector<1x32x128xbf16>
    %180 = vector.shape_cast %179 : vector<1x32x128xbf16> to vector<32x128xbf16>
    %cst_58 = arith.constant dense<0.000000e+00> : vector<8x128xf32>
    %181 = tpu.matmul %178, %180, %cst_58 {dimension_numbers = #tpu.dot_dimension_numbers<[1], [0], [0], [1], [0, 0, 1, 1], [], []>} : vector<8x32xbf16>, vector<32x128xbf16>, vector<8x128xf32> -> vector<8x128xf32>
    %c0_59 = arith.constant 0 : index
    %c0_60 = arith.constant 0 : index
    %c0_61 = arith.constant 0 : index
    %182 = vector.load %arg8[%c0_59, %c0_60, %c0_61] : memref<3x1x128xf32, #tpu.memory_space<vmem>>, vector<1x1x128xf32>
    %183 = vector.shape_cast %182 : vector<1x1x128xf32> to vector<1x128xf32>
    %184 = vector.broadcast %183 : vector<1x128xf32> to vector<8x128xf32>
    %185 = arith.addf %181, %184 : vector<8x128xf32>
    %cst_62 = arith.constant 0.000000e+00 : f32
    %186 = vector.broadcast %cst_62 : f32 to vector<8x128xf32>
    %187 = arith.maximumf %185, %186 : vector<8x128xf32>
    %188 = arith.truncf %187 : vector<8x128xf32> to vector<8x128xbf16>
    %c0_63 = arith.constant 0 : index
    %c0_64 = arith.constant 0 : index
    %c0_65 = arith.constant 0 : index
    %189 = vector.load %arg9[%c0_63, %c0_64, %c0_65] : memref<3x128x32xbf16, #tpu.memory_space<vmem>>, vector<1x128x32xbf16>
    %190 = vector.shape_cast %189 : vector<1x128x32xbf16> to vector<128x32xbf16>
    %cst_66 = arith.constant dense<0.000000e+00> : vector<8x32xf32>
    %191 = tpu.matmul %188, %190, %cst_66 {dimension_numbers = #tpu.dot_dimension_numbers<[1], [0], [0], [1], [0, 0, 1, 1], [], []>} : vector<8x128xbf16>, vector<128x32xbf16>, vector<8x32xf32> -> vector<8x32xf32>
    %c0_67 = arith.constant 0 : index
    %c0_68 = arith.constant 0 : index
    %c0_69 = arith.constant 0 : index
    %192 = vector.load %arg10[%c0_67, %c0_68, %c0_69] : memref<3x1x32xf32, #tpu.memory_space<vmem>>, vector<1x1x32xf32>
    %193 = vector.shape_cast %192 : vector<1x1x32xf32> to vector<1x32xf32>
    %194 = vector.broadcast %193 : vector<1x32xf32> to vector<8x32xf32>
    %195 = arith.addf %191, %194 : vector<8x32xf32>
    %196 = arith.mulf %9, %195 : vector<8x32xf32>
    %197 = arith.addf %155, %196 : vector<8x32xf32>
    %cst_70 = arith.constant dense<0.000000e+00> : vector<8xf32>
    %198 = vector.multi_reduction <add>, %197, %cst_70 [1] : vector<8x32xf32> to vector<8xf32>
    %199 = vector.shape_cast %198 : vector<8xf32> to vector<8x1xf32>
    %cst_71 = arith.constant 3.200000e+01 : f32
    %200 = vector.broadcast %cst_71 : f32 to vector<8x1xf32>
    %201 = arith.divf %199, %200 : vector<8x1xf32>
    %202 = vector.broadcast %201 : vector<8x1xf32> to vector<8x32xf32>
    %203 = arith.subf %197, %202 : vector<8x32xf32>
    %204 = arith.mulf %203, %203 : vector<8x32xf32>
    %cst_72 = arith.constant dense<0.000000e+00> : vector<8xf32>
    %205 = vector.multi_reduction <add>, %204, %cst_72 [1] : vector<8x32xf32> to vector<8xf32>
    %206 = vector.shape_cast %205 : vector<8xf32> to vector<8x1xf32>
    %cst_73 = arith.constant 3.200000e+01 : f32
    %207 = vector.broadcast %cst_73 : f32 to vector<8x1xf32>
    %208 = arith.divf %206, %207 : vector<8x1xf32>
    %209 = vector.broadcast %201 : vector<8x1xf32> to vector<8x32xf32>
    %210 = arith.subf %197, %209 : vector<8x32xf32>
    %cst_74 = arith.constant 9.99999997E-7 : f32
    %211 = vector.broadcast %cst_74 : f32 to vector<8x1xf32>
    %212 = arith.addf %208, %211 : vector<8x1xf32>
    %213 = math.rsqrt %212 : vector<8x1xf32>
    %214 = vector.broadcast %213 : vector<8x1xf32> to vector<8x32xf32>
    %215 = arith.mulf %210, %214 : vector<8x32xf32>
    %c1 = arith.constant 1 : index
    %c0_75 = arith.constant 0 : index
    %c0_76 = arith.constant 0 : index
    %216 = vector.load %arg2[%c1, %c0_75, %c0_76] : memref<3x8x192xf32, #tpu.memory_space<vmem>>, vector<1x8x192xf32>
    %217 = vector.shape_cast %216 : vector<1x8x192xf32> to vector<8x192xf32>
    %218 = vector.extract_strided_slice %217 {offsets = [0, 0], sizes = [8, 32], strides = [1, 1]} : vector<8x192xf32> to vector<8x32xf32>
    %219 = vector.extract_strided_slice %217 {offsets = [0, 32], sizes = [8, 32], strides = [1, 1]} : vector<8x192xf32> to vector<8x32xf32>
    %220 = vector.extract_strided_slice %217 {offsets = [0, 64], sizes = [8, 32], strides = [1, 1]} : vector<8x192xf32> to vector<8x32xf32>
    %221 = vector.extract_strided_slice %217 {offsets = [0, 96], sizes = [8, 32], strides = [1, 1]} : vector<8x192xf32> to vector<8x32xf32>
    %222 = vector.extract_strided_slice %217 {offsets = [0, 128], sizes = [8, 32], strides = [1, 1]} : vector<8x192xf32> to vector<8x32xf32>
    %223 = vector.extract_strided_slice %217 {offsets = [0, 160], sizes = [8, 32], strides = [1, 1]} : vector<8x192xf32> to vector<8x32xf32>
    %cst_77 = arith.constant dense<0.000000e+00> : vector<8xf32>
    %224 = vector.multi_reduction <add>, %215, %cst_77 [1] : vector<8x32xf32> to vector<8xf32>
    %225 = vector.shape_cast %224 : vector<8xf32> to vector<8x1xf32>
    %cst_78 = arith.constant 3.200000e+01 : f32
    %226 = vector.broadcast %cst_78 : f32 to vector<8x1xf32>
    %227 = arith.divf %225, %226 : vector<8x1xf32>
    %228 = vector.broadcast %227 : vector<8x1xf32> to vector<8x32xf32>
    %229 = arith.subf %215, %228 : vector<8x32xf32>
    %230 = arith.mulf %229, %229 : vector<8x32xf32>
    %cst_79 = arith.constant dense<0.000000e+00> : vector<8xf32>
    %231 = vector.multi_reduction <add>, %230, %cst_79 [1] : vector<8x32xf32> to vector<8xf32>
    %232 = vector.shape_cast %231 : vector<8xf32> to vector<8x1xf32>
    %cst_80 = arith.constant 3.200000e+01 : f32
    %233 = vector.broadcast %cst_80 : f32 to vector<8x1xf32>
    %234 = arith.divf %232, %233 : vector<8x1xf32>
    %235 = vector.broadcast %227 : vector<8x1xf32> to vector<8x32xf32>
    %236 = arith.subf %215, %235 : vector<8x32xf32>
    %cst_81 = arith.constant 9.99999997E-7 : f32
    %237 = vector.broadcast %cst_81 : f32 to vector<8x1xf32>
    %238 = arith.addf %234, %237 : vector<8x1xf32>
    %239 = math.rsqrt %238 : vector<8x1xf32>
    %240 = vector.broadcast %239 : vector<8x1xf32> to vector<8x32xf32>
    %241 = arith.mulf %236, %240 : vector<8x32xf32>
    %cst_82 = arith.constant 1.000000e+00 : f32
    %242 = vector.broadcast %cst_82 : f32 to vector<8x32xf32>
    %243 = arith.addf %242, %219 : vector<8x32xf32>
    %244 = arith.mulf %241, %243 : vector<8x32xf32>
    %245 = arith.addf %244, %218 : vector<8x32xf32>
    %246 = arith.truncf %245 : vector<8x32xf32> to vector<8x32xbf16>
    %c1_83 = arith.constant 1 : index
    %c0_84 = arith.constant 0 : index
    %c0_85 = arith.constant 0 : index
    %247 = vector.load %arg3[%c1_83, %c0_84, %c0_85] : memref<3x32x96xbf16, #tpu.memory_space<vmem>>, vector<1x32x96xbf16>
    %248 = vector.shape_cast %247 : vector<1x32x96xbf16> to vector<32x96xbf16>
    %cst_86 = arith.constant dense<0.000000e+00> : vector<8x96xf32>
    %249 = tpu.matmul %246, %248, %cst_86 {dimension_numbers = #tpu.dot_dimension_numbers<[1], [0], [0], [1], [0, 0, 1, 1], [], []>} : vector<8x32xbf16>, vector<32x96xbf16>, vector<8x96xf32> -> vector<8x96xf32>
    %c1_87 = arith.constant 1 : index
    %c0_88 = arith.constant 0 : index
    %c0_89 = arith.constant 0 : index
    %250 = vector.load %arg4[%c1_87, %c0_88, %c0_89] : memref<3x1x96xf32, #tpu.memory_space<vmem>>, vector<1x1x96xf32>
    %251 = vector.shape_cast %250 : vector<1x1x96xf32> to vector<1x96xf32>
    %252 = vector.broadcast %251 : vector<1x96xf32> to vector<8x96xf32>
    %253 = arith.addf %249, %252 : vector<8x96xf32>
    %254 = vector.extract_strided_slice %253 {offsets = [0, 0], sizes = [8, 32], strides = [1, 1]} : vector<8x96xf32> to vector<8x32xf32>
    %255 = vector.extract_strided_slice %253 {offsets = [0, 32], sizes = [8, 32], strides = [1, 1]} : vector<8x96xf32> to vector<8x32xf32>
    %256 = vector.extract_strided_slice %253 {offsets = [0, 64], sizes = [8, 32], strides = [1, 1]} : vector<8x96xf32> to vector<8x32xf32>
    %257 = vector.extract_strided_slice %254 {offsets = [0, 0], sizes = [8, 8], strides = [1, 1]} : vector<8x32xf32> to vector<8x8xf32>
    %258 = vector.shape_cast %257 : vector<8x8xf32> to vector<2x4x8xf32>
    %259 = vector.extract_strided_slice %255 {offsets = [0, 0], sizes = [8, 8], strides = [1, 1]} : vector<8x32xf32> to vector<8x8xf32>
    %260 = vector.shape_cast %259 : vector<8x8xf32> to vector<2x4x8xf32>
    %261 = vector.extract_strided_slice %256 {offsets = [0, 0], sizes = [8, 8], strides = [1, 1]} : vector<8x32xf32> to vector<8x8xf32>
    %262 = vector.shape_cast %261 : vector<8x8xf32> to vector<2x4x8xf32>
    "tpu.trace_start"() <{level = 10 : i32, message = "gqd,gkd->gqk"}> : () -> ()
    %cst_90 = arith.constant dense<0.000000e+00> : vector<2x4x4xf32>
    %263 = tpu.matmul %258, %260, %cst_90 {dimension_numbers = #tpu.dot_dimension_numbers<[2], [2], [1], [1], [0, 0, 0, 1, 1, 1], [0], [0]>} : vector<2x4x8xf32>, vector<2x4x8xf32>, vector<2x4x4xf32> -> vector<2x4x4xf32>
    "tpu.trace_stop"() : () -> ()
    %cst_91 = arith.constant 0.353553385 : f32
    %264 = vector.broadcast %cst_91 : f32 to vector<2x4x4xf32>
    %265 = arith.mulf %263, %264 : vector<2x4x4xf32>
    %cst_92 = arith.constant dense<0xFF800000> : vector<2x4xf32>
    %266 = vector.multi_reduction <maximumf>, %265, %cst_92 [2] : vector<2x4x4xf32> to vector<2x4xf32>
    %267 = vector.shape_cast %266 : vector<2x4xf32> to vector<2x4x1xf32>
    %268 = vector.broadcast %267 : vector<2x4x1xf32> to vector<2x4x4xf32>
    %269 = arith.subf %265, %268 : vector<2x4x4xf32>
    %270 = math.exp %269 : vector<2x4x4xf32>
    %cst_93 = arith.constant dense<0.000000e+00> : vector<2x4xf32>
    %271 = vector.multi_reduction <add>, %270, %cst_93 [2] : vector<2x4x4xf32> to vector<2x4xf32>
    %272 = vector.shape_cast %271 : vector<2x4xf32> to vector<2x4x1xf32>
    %273 = tpu.reciprocal %272 {approx = true} : vector<2x4x1xf32> -> vector<2x4x1xf32>
    %274 = vector.broadcast %273 : vector<2x4x1xf32> to vector<2x4x4xf32>
    %275 = arith.mulf %270, %274 : vector<2x4x4xf32>
    "tpu.trace_start"() <{level = 10 : i32, message = "gqk,gkd->gqd"}> : () -> ()
    %cst_94 = arith.constant dense<0.000000e+00> : vector<2x4x8xf32>
    %276 = tpu.matmul %275, %262, %cst_94 {dimension_numbers = #tpu.dot_dimension_numbers<[2], [1], [1], [2], [0, 0, 0, 1, 1, 2], [0], [0]>} : vector<2x4x4xf32>, vector<2x4x8xf32>, vector<2x4x8xf32> -> vector<2x4x8xf32>
    "tpu.trace_stop"() : () -> ()
    %277 = vector.shape_cast %276 : vector<2x4x8xf32> to vector<8x8xf32>
    %278 = vector.extract_strided_slice %254 {offsets = [0, 8], sizes = [8, 8], strides = [1, 1]} : vector<8x32xf32> to vector<8x8xf32>
    %279 = vector.shape_cast %278 : vector<8x8xf32> to vector<2x4x8xf32>
    %280 = vector.extract_strided_slice %255 {offsets = [0, 8], sizes = [8, 8], strides = [1, 1]} : vector<8x32xf32> to vector<8x8xf32>
    %281 = vector.shape_cast %280 : vector<8x8xf32> to vector<2x4x8xf32>
    %282 = vector.extract_strided_slice %256 {offsets = [0, 8], sizes = [8, 8], strides = [1, 1]} : vector<8x32xf32> to vector<8x8xf32>
    %283 = vector.shape_cast %282 : vector<8x8xf32> to vector<2x4x8xf32>
    "tpu.trace_start"() <{level = 10 : i32, message = "gqd,gkd->gqk"}> : () -> ()
    %cst_95 = arith.constant dense<0.000000e+00> : vector<2x4x4xf32>
    %284 = tpu.matmul %279, %281, %cst_95 {dimension_numbers = #tpu.dot_dimension_numbers<[2], [2], [1], [1], [0, 0, 0, 1, 1, 1], [0], [0]>} : vector<2x4x8xf32>, vector<2x4x8xf32>, vector<2x4x4xf32> -> vector<2x4x4xf32>
    "tpu.trace_stop"() : () -> ()
    %cst_96 = arith.constant 0.353553385 : f32
    %285 = vector.broadcast %cst_96 : f32 to vector<2x4x4xf32>
    %286 = arith.mulf %284, %285 : vector<2x4x4xf32>
    %cst_97 = arith.constant dense<0xFF800000> : vector<2x4xf32>
    %287 = vector.multi_reduction <maximumf>, %286, %cst_97 [2] : vector<2x4x4xf32> to vector<2x4xf32>
    %288 = vector.shape_cast %287 : vector<2x4xf32> to vector<2x4x1xf32>
    %289 = vector.broadcast %288 : vector<2x4x1xf32> to vector<2x4x4xf32>
    %290 = arith.subf %286, %289 : vector<2x4x4xf32>
    %291 = math.exp %290 : vector<2x4x4xf32>
    %cst_98 = arith.constant dense<0.000000e+00> : vector<2x4xf32>
    %292 = vector.multi_reduction <add>, %291, %cst_98 [2] : vector<2x4x4xf32> to vector<2x4xf32>
    %293 = vector.shape_cast %292 : vector<2x4xf32> to vector<2x4x1xf32>
    %294 = tpu.reciprocal %293 {approx = true} : vector<2x4x1xf32> -> vector<2x4x1xf32>
    %295 = vector.broadcast %294 : vector<2x4x1xf32> to vector<2x4x4xf32>
    %296 = arith.mulf %291, %295 : vector<2x4x4xf32>
    "tpu.trace_start"() <{level = 10 : i32, message = "gqk,gkd->gqd"}> : () -> ()
    %cst_99 = arith.constant dense<0.000000e+00> : vector<2x4x8xf32>
    %297 = tpu.matmul %296, %283, %cst_99 {dimension_numbers = #tpu.dot_dimension_numbers<[2], [1], [1], [2], [0, 0, 0, 1, 1, 2], [0], [0]>} : vector<2x4x4xf32>, vector<2x4x8xf32>, vector<2x4x8xf32> -> vector<2x4x8xf32>
    "tpu.trace_stop"() : () -> ()
    %298 = vector.shape_cast %297 : vector<2x4x8xf32> to vector<8x8xf32>
    %299 = vector.extract_strided_slice %254 {offsets = [0, 16], sizes = [8, 8], strides = [1, 1]} : vector<8x32xf32> to vector<8x8xf32>
    %300 = vector.shape_cast %299 : vector<8x8xf32> to vector<2x4x8xf32>
    %301 = vector.extract_strided_slice %255 {offsets = [0, 16], sizes = [8, 8], strides = [1, 1]} : vector<8x32xf32> to vector<8x8xf32>
    %302 = vector.shape_cast %301 : vector<8x8xf32> to vector<2x4x8xf32>
    %303 = vector.extract_strided_slice %256 {offsets = [0, 16], sizes = [8, 8], strides = [1, 1]} : vector<8x32xf32> to vector<8x8xf32>
    %304 = vector.shape_cast %303 : vector<8x8xf32> to vector<2x4x8xf32>
    "tpu.trace_start"() <{level = 10 : i32, message = "gqd,gkd->gqk"}> : () -> ()
    %cst_100 = arith.constant dense<0.000000e+00> : vector<2x4x4xf32>
    %305 = tpu.matmul %300, %302, %cst_100 {dimension_numbers = #tpu.dot_dimension_numbers<[2], [2], [1], [1], [0, 0, 0, 1, 1, 1], [0], [0]>} : vector<2x4x8xf32>, vector<2x4x8xf32>, vector<2x4x4xf32> -> vector<2x4x4xf32>
    "tpu.trace_stop"() : () -> ()
    %cst_101 = arith.constant 0.353553385 : f32
    %306 = vector.broadcast %cst_101 : f32 to vector<2x4x4xf32>
    %307 = arith.mulf %305, %306 : vector<2x4x4xf32>
    %cst_102 = arith.constant dense<0xFF800000> : vector<2x4xf32>
    %308 = vector.multi_reduction <maximumf>, %307, %cst_102 [2] : vector<2x4x4xf32> to vector<2x4xf32>
    %309 = vector.shape_cast %308 : vector<2x4xf32> to vector<2x4x1xf32>
    %310 = vector.broadcast %309 : vector<2x4x1xf32> to vector<2x4x4xf32>
    %311 = arith.subf %307, %310 : vector<2x4x4xf32>
    %312 = math.exp %311 : vector<2x4x4xf32>
    %cst_103 = arith.constant dense<0.000000e+00> : vector<2x4xf32>
    %313 = vector.multi_reduction <add>, %312, %cst_103 [2] : vector<2x4x4xf32> to vector<2x4xf32>
    %314 = vector.shape_cast %313 : vector<2x4xf32> to vector<2x4x1xf32>
    %315 = tpu.reciprocal %314 {approx = true} : vector<2x4x1xf32> -> vector<2x4x1xf32>
    %316 = vector.broadcast %315 : vector<2x4x1xf32> to vector<2x4x4xf32>
    %317 = arith.mulf %312, %316 : vector<2x4x4xf32>
    "tpu.trace_start"() <{level = 10 : i32, message = "gqk,gkd->gqd"}> : () -> ()
    %cst_104 = arith.constant dense<0.000000e+00> : vector<2x4x8xf32>
    %318 = tpu.matmul %317, %304, %cst_104 {dimension_numbers = #tpu.dot_dimension_numbers<[2], [1], [1], [2], [0, 0, 0, 1, 1, 2], [0], [0]>} : vector<2x4x4xf32>, vector<2x4x8xf32>, vector<2x4x8xf32> -> vector<2x4x8xf32>
    "tpu.trace_stop"() : () -> ()
    %319 = vector.shape_cast %318 : vector<2x4x8xf32> to vector<8x8xf32>
    %320 = vector.extract_strided_slice %254 {offsets = [0, 24], sizes = [8, 8], strides = [1, 1]} : vector<8x32xf32> to vector<8x8xf32>
    %321 = vector.shape_cast %320 : vector<8x8xf32> to vector<2x4x8xf32>
    %322 = vector.extract_strided_slice %255 {offsets = [0, 24], sizes = [8, 8], strides = [1, 1]} : vector<8x32xf32> to vector<8x8xf32>
    %323 = vector.shape_cast %322 : vector<8x8xf32> to vector<2x4x8xf32>
    %324 = vector.extract_strided_slice %256 {offsets = [0, 24], sizes = [8, 8], strides = [1, 1]} : vector<8x32xf32> to vector<8x8xf32>
    %325 = vector.shape_cast %324 : vector<8x8xf32> to vector<2x4x8xf32>
    "tpu.trace_start"() <{level = 10 : i32, message = "gqd,gkd->gqk"}> : () -> ()
    %cst_105 = arith.constant dense<0.000000e+00> : vector<2x4x4xf32>
    %326 = tpu.matmul %321, %323, %cst_105 {dimension_numbers = #tpu.dot_dimension_numbers<[2], [2], [1], [1], [0, 0, 0, 1, 1, 1], [0], [0]>} : vector<2x4x8xf32>, vector<2x4x8xf32>, vector<2x4x4xf32> -> vector<2x4x4xf32>
    "tpu.trace_stop"() : () -> ()
    %cst_106 = arith.constant 0.353553385 : f32
    %327 = vector.broadcast %cst_106 : f32 to vector<2x4x4xf32>
    %328 = arith.mulf %326, %327 : vector<2x4x4xf32>
    %cst_107 = arith.constant dense<0xFF800000> : vector<2x4xf32>
    %329 = vector.multi_reduction <maximumf>, %328, %cst_107 [2] : vector<2x4x4xf32> to vector<2x4xf32>
    %330 = vector.shape_cast %329 : vector<2x4xf32> to vector<2x4x1xf32>
    %331 = vector.broadcast %330 : vector<2x4x1xf32> to vector<2x4x4xf32>
    %332 = arith.subf %328, %331 : vector<2x4x4xf32>
    %333 = math.exp %332 : vector<2x4x4xf32>
    %cst_108 = arith.constant dense<0.000000e+00> : vector<2x4xf32>
    %334 = vector.multi_reduction <add>, %333, %cst_108 [2] : vector<2x4x4xf32> to vector<2x4xf32>
    %335 = vector.shape_cast %334 : vector<2x4xf32> to vector<2x4x1xf32>
    %336 = tpu.reciprocal %335 {approx = true} : vector<2x4x1xf32> -> vector<2x4x1xf32>
    %337 = vector.broadcast %336 : vector<2x4x1xf32> to vector<2x4x4xf32>
    %338 = arith.mulf %333, %337 : vector<2x4x4xf32>
    "tpu.trace_start"() <{level = 10 : i32, message = "gqk,gkd->gqd"}> : () -> ()
    %cst_109 = arith.constant dense<0.000000e+00> : vector<2x4x8xf32>
    %339 = tpu.matmul %338, %325, %cst_109 {dimension_numbers = #tpu.dot_dimension_numbers<[2], [1], [1], [2], [0, 0, 0, 1, 1, 2], [0], [0]>} : vector<2x4x4xf32>, vector<2x4x8xf32>, vector<2x4x8xf32> -> vector<2x4x8xf32>
    "tpu.trace_stop"() : () -> ()
    %340 = vector.shape_cast %339 : vector<2x4x8xf32> to vector<8x8xf32>
    %341 = tpu.concatenate %277, %298, %319, %340 in 1 : vector<8x8xf32>, vector<8x8xf32>, vector<8x8xf32>, vector<8x8xf32> -> vector<8x32xf32>
    %342 = arith.truncf %341 : vector<8x32xf32> to vector<8x32xbf16>
    %c1_110 = arith.constant 1 : index
    %c0_111 = arith.constant 0 : index
    %c0_112 = arith.constant 0 : index
    %343 = vector.load %arg5[%c1_110, %c0_111, %c0_112] : memref<3x32x32xbf16, #tpu.memory_space<vmem>>, vector<1x32x32xbf16>
    %344 = vector.shape_cast %343 : vector<1x32x32xbf16> to vector<32x32xbf16>
    %cst_113 = arith.constant dense<0.000000e+00> : vector<8x32xf32>
    %345 = tpu.matmul %342, %344, %cst_113 {dimension_numbers = #tpu.dot_dimension_numbers<[1], [0], [0], [1], [0, 0, 1, 1], [], []>} : vector<8x32xbf16>, vector<32x32xbf16>, vector<8x32xf32> -> vector<8x32xf32>
    %c1_114 = arith.constant 1 : index
    %c0_115 = arith.constant 0 : index
    %c0_116 = arith.constant 0 : index
    %346 = vector.load %arg6[%c1_114, %c0_115, %c0_116] : memref<3x1x32xf32, #tpu.memory_space<vmem>>, vector<1x1x32xf32>
    %347 = vector.shape_cast %346 : vector<1x1x32xf32> to vector<1x32xf32>
    %348 = vector.broadcast %347 : vector<1x32xf32> to vector<8x32xf32>
    %349 = arith.addf %345, %348 : vector<8x32xf32>
    %350 = arith.mulf %220, %349 : vector<8x32xf32>
    %351 = arith.addf %215, %350 : vector<8x32xf32>
    %cst_117 = arith.constant dense<0.000000e+00> : vector<8xf32>
    %352 = vector.multi_reduction <add>, %351, %cst_117 [1] : vector<8x32xf32> to vector<8xf32>
    %353 = vector.shape_cast %352 : vector<8xf32> to vector<8x1xf32>
    %cst_118 = arith.constant 3.200000e+01 : f32
    %354 = vector.broadcast %cst_118 : f32 to vector<8x1xf32>
    %355 = arith.divf %353, %354 : vector<8x1xf32>
    %356 = vector.broadcast %355 : vector<8x1xf32> to vector<8x32xf32>
    %357 = arith.subf %351, %356 : vector<8x32xf32>
    %358 = arith.mulf %357, %357 : vector<8x32xf32>
    %cst_119 = arith.constant dense<0.000000e+00> : vector<8xf32>
    %359 = vector.multi_reduction <add>, %358, %cst_119 [1] : vector<8x32xf32> to vector<8xf32>
    %360 = vector.shape_cast %359 : vector<8xf32> to vector<8x1xf32>
    %cst_120 = arith.constant 3.200000e+01 : f32
    %361 = vector.broadcast %cst_120 : f32 to vector<8x1xf32>
    %362 = arith.divf %360, %361 : vector<8x1xf32>
    %363 = vector.broadcast %355 : vector<8x1xf32> to vector<8x32xf32>
    %364 = arith.subf %351, %363 : vector<8x32xf32>
    %cst_121 = arith.constant 9.99999997E-7 : f32
    %365 = vector.broadcast %cst_121 : f32 to vector<8x1xf32>
    %366 = arith.addf %362, %365 : vector<8x1xf32>
    %367 = math.rsqrt %366 : vector<8x1xf32>
    %368 = vector.broadcast %367 : vector<8x1xf32> to vector<8x32xf32>
    %369 = arith.mulf %364, %368 : vector<8x32xf32>
    %cst_122 = arith.constant dense<0.000000e+00> : vector<8xf32>
    %370 = vector.multi_reduction <add>, %369, %cst_122 [1] : vector<8x32xf32> to vector<8xf32>
    %371 = vector.shape_cast %370 : vector<8xf32> to vector<8x1xf32>
    %cst_123 = arith.constant 3.200000e+01 : f32
    %372 = vector.broadcast %cst_123 : f32 to vector<8x1xf32>
    %373 = arith.divf %371, %372 : vector<8x1xf32>
    %374 = vector.broadcast %373 : vector<8x1xf32> to vector<8x32xf32>
    %375 = arith.subf %369, %374 : vector<8x32xf32>
    %376 = arith.mulf %375, %375 : vector<8x32xf32>
    %cst_124 = arith.constant dense<0.000000e+00> : vector<8xf32>
    %377 = vector.multi_reduction <add>, %376, %cst_124 [1] : vector<8x32xf32> to vector<8xf32>
    %378 = vector.shape_cast %377 : vector<8xf32> to vector<8x1xf32>
    %cst_125 = arith.constant 3.200000e+01 : f32
    %379 = vector.broadcast %cst_125 : f32 to vector<8x1xf32>
    %380 = arith.divf %378, %379 : vector<8x1xf32>
    %381 = vector.broadcast %373 : vector<8x1xf32> to vector<8x32xf32>
    %382 = arith.subf %369, %381 : vector<8x32xf32>
    %cst_126 = arith.constant 9.99999997E-7 : f32
    %383 = vector.broadcast %cst_126 : f32 to vector<8x1xf32>
    %384 = arith.addf %380, %383 : vector<8x1xf32>
    %385 = math.rsqrt %384 : vector<8x1xf32>
    %386 = vector.broadcast %385 : vector<8x1xf32> to vector<8x32xf32>
    %387 = arith.mulf %382, %386 : vector<8x32xf32>
    %cst_127 = arith.constant 1.000000e+00 : f32
    %388 = vector.broadcast %cst_127 : f32 to vector<8x32xf32>
    %389 = arith.addf %388, %222 : vector<8x32xf32>
    %390 = arith.mulf %387, %389 : vector<8x32xf32>
    %391 = arith.addf %390, %221 : vector<8x32xf32>
    %392 = arith.truncf %391 : vector<8x32xf32> to vector<8x32xbf16>
    %c1_128 = arith.constant 1 : index
    %c0_129 = arith.constant 0 : index
    %c0_130 = arith.constant 0 : index
    %393 = vector.load %arg7[%c1_128, %c0_129, %c0_130] : memref<3x32x128xbf16, #tpu.memory_space<vmem>>, vector<1x32x128xbf16>
    %394 = vector.shape_cast %393 : vector<1x32x128xbf16> to vector<32x128xbf16>
    %cst_131 = arith.constant dense<0.000000e+00> : vector<8x128xf32>
    %395 = tpu.matmul %392, %394, %cst_131 {dimension_numbers = #tpu.dot_dimension_numbers<[1], [0], [0], [1], [0, 0, 1, 1], [], []>} : vector<8x32xbf16>, vector<32x128xbf16>, vector<8x128xf32> -> vector<8x128xf32>
    %c1_132 = arith.constant 1 : index
    %c0_133 = arith.constant 0 : index
    %c0_134 = arith.constant 0 : index
    %396 = vector.load %arg8[%c1_132, %c0_133, %c0_134] : memref<3x1x128xf32, #tpu.memory_space<vmem>>, vector<1x1x128xf32>
    %397 = vector.shape_cast %396 : vector<1x1x128xf32> to vector<1x128xf32>
    %398 = vector.broadcast %397 : vector<1x128xf32> to vector<8x128xf32>
    %399 = arith.addf %395, %398 : vector<8x128xf32>
    %cst_135 = arith.constant 0.000000e+00 : f32
    %400 = vector.broadcast %cst_135 : f32 to vector<8x128xf32>
    %401 = arith.maximumf %399, %400 : vector<8x128xf32>
    %402 = arith.truncf %401 : vector<8x128xf32> to vector<8x128xbf16>
    %c1_136 = arith.constant 1 : index
    %c0_137 = arith.constant 0 : index
    %c0_138 = arith.constant 0 : index
    %403 = vector.load %arg9[%c1_136, %c0_137, %c0_138] : memref<3x128x32xbf16, #tpu.memory_space<vmem>>, vector<1x128x32xbf16>
    %404 = vector.shape_cast %403 : vector<1x128x32xbf16> to vector<128x32xbf16>
    %cst_139 = arith.constant dense<0.000000e+00> : vector<8x32xf32>
    %405 = tpu.matmul %402, %404, %cst_139 {dimension_numbers = #tpu.dot_dimension_numbers<[1], [0], [0], [1], [0, 0, 1, 1], [], []>} : vector<8x128xbf16>, vector<128x32xbf16>, vector<8x32xf32> -> vector<8x32xf32>
    %c1_140 = arith.constant 1 : index
    %c0_141 = arith.constant 0 : index
    %c0_142 = arith.constant 0 : index
    %406 = vector.load %arg10[%c1_140, %c0_141, %c0_142] : memref<3x1x32xf32, #tpu.memory_space<vmem>>, vector<1x1x32xf32>
    %407 = vector.shape_cast %406 : vector<1x1x32xf32> to vector<1x32xf32>
    %408 = vector.broadcast %407 : vector<1x32xf32> to vector<8x32xf32>
    %409 = arith.addf %405, %408 : vector<8x32xf32>
    %410 = arith.mulf %223, %409 : vector<8x32xf32>
    %411 = arith.addf %369, %410 : vector<8x32xf32>
    %cst_143 = arith.constant dense<0.000000e+00> : vector<8xf32>
    %412 = vector.multi_reduction <add>, %411, %cst_143 [1] : vector<8x32xf32> to vector<8xf32>
    %413 = vector.shape_cast %412 : vector<8xf32> to vector<8x1xf32>
    %cst_144 = arith.constant 3.200000e+01 : f32
    %414 = vector.broadcast %cst_144 : f32 to vector<8x1xf32>
    %415 = arith.divf %413, %414 : vector<8x1xf32>
    %416 = vector.broadcast %415 : vector<8x1xf32> to vector<8x32xf32>
    %417 = arith.subf %411, %416 : vector<8x32xf32>
    %418 = arith.mulf %417, %417 : vector<8x32xf32>
    %cst_145 = arith.constant dense<0.000000e+00> : vector<8xf32>
    %419 = vector.multi_reduction <add>, %418, %cst_145 [1] : vector<8x32xf32> to vector<8xf32>
    %420 = vector.shape_cast %419 : vector<8xf32> to vector<8x1xf32>
    %cst_146 = arith.constant 3.200000e+01 : f32
    %421 = vector.broadcast %cst_146 : f32 to vector<8x1xf32>
    %422 = arith.divf %420, %421 : vector<8x1xf32>
    %423 = vector.broadcast %415 : vector<8x1xf32> to vector<8x32xf32>
    %424 = arith.subf %411, %423 : vector<8x32xf32>
    %cst_147 = arith.constant 9.99999997E-7 : f32
    %425 = vector.broadcast %cst_147 : f32 to vector<8x1xf32>
    %426 = arith.addf %422, %425 : vector<8x1xf32>
    %427 = math.rsqrt %426 : vector<8x1xf32>
    %428 = vector.broadcast %427 : vector<8x1xf32> to vector<8x32xf32>
    %429 = arith.mulf %424, %428 : vector<8x32xf32>
    %c2 = arith.constant 2 : index
    %c0_148 = arith.constant 0 : index
    %c0_149 = arith.constant 0 : index
    %430 = vector.load %arg2[%c2, %c0_148, %c0_149] : memref<3x8x192xf32, #tpu.memory_space<vmem>>, vector<1x8x192xf32>
    %431 = vector.shape_cast %430 : vector<1x8x192xf32> to vector<8x192xf32>
    %432 = vector.extract_strided_slice %431 {offsets = [0, 0], sizes = [8, 32], strides = [1, 1]} : vector<8x192xf32> to vector<8x32xf32>
    %433 = vector.extract_strided_slice %431 {offsets = [0, 32], sizes = [8, 32], strides = [1, 1]} : vector<8x192xf32> to vector<8x32xf32>
    %434 = vector.extract_strided_slice %431 {offsets = [0, 64], sizes = [8, 32], strides = [1, 1]} : vector<8x192xf32> to vector<8x32xf32>
    %435 = vector.extract_strided_slice %431 {offsets = [0, 96], sizes = [8, 32], strides = [1, 1]} : vector<8x192xf32> to vector<8x32xf32>
    %436 = vector.extract_strided_slice %431 {offsets = [0, 128], sizes = [8, 32], strides = [1, 1]} : vector<8x192xf32> to vector<8x32xf32>
    %437 = vector.extract_strided_slice %431 {offsets = [0, 160], sizes = [8, 32], strides = [1, 1]} : vector<8x192xf32> to vector<8x32xf32>
    %cst_150 = arith.constant dense<0.000000e+00> : vector<8xf32>
    %438 = vector.multi_reduction <add>, %429, %cst_150 [1] : vector<8x32xf32> to vector<8xf32>
    %439 = vector.shape_cast %438 : vector<8xf32> to vector<8x1xf32>
    %cst_151 = arith.constant 3.200000e+01 : f32
    %440 = vector.broadcast %cst_151 : f32 to vector<8x1xf32>
    %441 = arith.divf %439, %440 : vector<8x1xf32>
    %442 = vector.broadcast %441 : vector<8x1xf32> to vector<8x32xf32>
    %443 = arith.subf %429, %442 : vector<8x32xf32>
    %444 = arith.mulf %443, %443 : vector<8x32xf32>
    %cst_152 = arith.constant dense<0.000000e+00> : vector<8xf32>
    %445 = vector.multi_reduction <add>, %444, %cst_152 [1] : vector<8x32xf32> to vector<8xf32>
    %446 = vector.shape_cast %445 : vector<8xf32> to vector<8x1xf32>
    %cst_153 = arith.constant 3.200000e+01 : f32
    %447 = vector.broadcast %cst_153 : f32 to vector<8x1xf32>
    %448 = arith.divf %446, %447 : vector<8x1xf32>
    %449 = vector.broadcast %441 : vector<8x1xf32> to vector<8x32xf32>
    %450 = arith.subf %429, %449 : vector<8x32xf32>
    %cst_154 = arith.constant 9.99999997E-7 : f32
    %451 = vector.broadcast %cst_154 : f32 to vector<8x1xf32>
    %452 = arith.addf %448, %451 : vector<8x1xf32>
    %453 = math.rsqrt %452 : vector<8x1xf32>
    %454 = vector.broadcast %453 : vector<8x1xf32> to vector<8x32xf32>
    %455 = arith.mulf %450, %454 : vector<8x32xf32>
    %cst_155 = arith.constant 1.000000e+00 : f32
    %456 = vector.broadcast %cst_155 : f32 to vector<8x32xf32>
    %457 = arith.addf %456, %433 : vector<8x32xf32>
    %458 = arith.mulf %455, %457 : vector<8x32xf32>
    %459 = arith.addf %458, %432 : vector<8x32xf32>
    %460 = arith.truncf %459 : vector<8x32xf32> to vector<8x32xbf16>
    %c2_156 = arith.constant 2 : index
    %c0_157 = arith.constant 0 : index
    %c0_158 = arith.constant 0 : index
    %461 = vector.load %arg3[%c2_156, %c0_157, %c0_158] : memref<3x32x96xbf16, #tpu.memory_space<vmem>>, vector<1x32x96xbf16>
    %462 = vector.shape_cast %461 : vector<1x32x96xbf16> to vector<32x96xbf16>
    %cst_159 = arith.constant dense<0.000000e+00> : vector<8x96xf32>
    %463 = tpu.matmul %460, %462, %cst_159 {dimension_numbers = #tpu.dot_dimension_numbers<[1], [0], [0], [1], [0, 0, 1, 1], [], []>} : vector<8x32xbf16>, vector<32x96xbf16>, vector<8x96xf32> -> vector<8x96xf32>
    %c2_160 = arith.constant 2 : index
    %c0_161 = arith.constant 0 : index
    %c0_162 = arith.constant 0 : index
    %464 = vector.load %arg4[%c2_160, %c0_161, %c0_162] : memref<3x1x96xf32, #tpu.memory_space<vmem>>, vector<1x1x96xf32>
    %465 = vector.shape_cast %464 : vector<1x1x96xf32> to vector<1x96xf32>
    %466 = vector.broadcast %465 : vector<1x96xf32> to vector<8x96xf32>
    %467 = arith.addf %463, %466 : vector<8x96xf32>
    %468 = vector.extract_strided_slice %467 {offsets = [0, 0], sizes = [8, 32], strides = [1, 1]} : vector<8x96xf32> to vector<8x32xf32>
    %469 = vector.extract_strided_slice %467 {offsets = [0, 32], sizes = [8, 32], strides = [1, 1]} : vector<8x96xf32> to vector<8x32xf32>
    %470 = vector.extract_strided_slice %467 {offsets = [0, 64], sizes = [8, 32], strides = [1, 1]} : vector<8x96xf32> to vector<8x32xf32>
    %471 = vector.extract_strided_slice %468 {offsets = [0, 0], sizes = [8, 8], strides = [1, 1]} : vector<8x32xf32> to vector<8x8xf32>
    %472 = vector.shape_cast %471 : vector<8x8xf32> to vector<2x4x8xf32>
    %473 = vector.extract_strided_slice %469 {offsets = [0, 0], sizes = [8, 8], strides = [1, 1]} : vector<8x32xf32> to vector<8x8xf32>
    %474 = vector.shape_cast %473 : vector<8x8xf32> to vector<2x4x8xf32>
    %475 = vector.extract_strided_slice %470 {offsets = [0, 0], sizes = [8, 8], strides = [1, 1]} : vector<8x32xf32> to vector<8x8xf32>
    %476 = vector.shape_cast %475 : vector<8x8xf32> to vector<2x4x8xf32>
    "tpu.trace_start"() <{level = 10 : i32, message = "gqd,gkd->gqk"}> : () -> ()
    %cst_163 = arith.constant dense<0.000000e+00> : vector<2x4x4xf32>
    %477 = tpu.matmul %472, %474, %cst_163 {dimension_numbers = #tpu.dot_dimension_numbers<[2], [2], [1], [1], [0, 0, 0, 1, 1, 1], [0], [0]>} : vector<2x4x8xf32>, vector<2x4x8xf32>, vector<2x4x4xf32> -> vector<2x4x4xf32>
    "tpu.trace_stop"() : () -> ()
    %cst_164 = arith.constant 0.353553385 : f32
    %478 = vector.broadcast %cst_164 : f32 to vector<2x4x4xf32>
    %479 = arith.mulf %477, %478 : vector<2x4x4xf32>
    %cst_165 = arith.constant dense<0xFF800000> : vector<2x4xf32>
    %480 = vector.multi_reduction <maximumf>, %479, %cst_165 [2] : vector<2x4x4xf32> to vector<2x4xf32>
    %481 = vector.shape_cast %480 : vector<2x4xf32> to vector<2x4x1xf32>
    %482 = vector.broadcast %481 : vector<2x4x1xf32> to vector<2x4x4xf32>
    %483 = arith.subf %479, %482 : vector<2x4x4xf32>
    %484 = math.exp %483 : vector<2x4x4xf32>
    %cst_166 = arith.constant dense<0.000000e+00> : vector<2x4xf32>
    %485 = vector.multi_reduction <add>, %484, %cst_166 [2] : vector<2x4x4xf32> to vector<2x4xf32>
    %486 = vector.shape_cast %485 : vector<2x4xf32> to vector<2x4x1xf32>
    %487 = tpu.reciprocal %486 {approx = true} : vector<2x4x1xf32> -> vector<2x4x1xf32>
    %488 = vector.broadcast %487 : vector<2x4x1xf32> to vector<2x4x4xf32>
    %489 = arith.mulf %484, %488 : vector<2x4x4xf32>
    "tpu.trace_start"() <{level = 10 : i32, message = "gqk,gkd->gqd"}> : () -> ()
    %cst_167 = arith.constant dense<0.000000e+00> : vector<2x4x8xf32>
    %490 = tpu.matmul %489, %476, %cst_167 {dimension_numbers = #tpu.dot_dimension_numbers<[2], [1], [1], [2], [0, 0, 0, 1, 1, 2], [0], [0]>} : vector<2x4x4xf32>, vector<2x4x8xf32>, vector<2x4x8xf32> -> vector<2x4x8xf32>
    "tpu.trace_stop"() : () -> ()
    %491 = vector.shape_cast %490 : vector<2x4x8xf32> to vector<8x8xf32>
    %492 = vector.extract_strided_slice %468 {offsets = [0, 8], sizes = [8, 8], strides = [1, 1]} : vector<8x32xf32> to vector<8x8xf32>
    %493 = vector.shape_cast %492 : vector<8x8xf32> to vector<2x4x8xf32>
    %494 = vector.extract_strided_slice %469 {offsets = [0, 8], sizes = [8, 8], strides = [1, 1]} : vector<8x32xf32> to vector<8x8xf32>
    %495 = vector.shape_cast %494 : vector<8x8xf32> to vector<2x4x8xf32>
    %496 = vector.extract_strided_slice %470 {offsets = [0, 8], sizes = [8, 8], strides = [1, 1]} : vector<8x32xf32> to vector<8x8xf32>
    %497 = vector.shape_cast %496 : vector<8x8xf32> to vector<2x4x8xf32>
    "tpu.trace_start"() <{level = 10 : i32, message = "gqd,gkd->gqk"}> : () -> ()
    %cst_168 = arith.constant dense<0.000000e+00> : vector<2x4x4xf32>
    %498 = tpu.matmul %493, %495, %cst_168 {dimension_numbers = #tpu.dot_dimension_numbers<[2], [2], [1], [1], [0, 0, 0, 1, 1, 1], [0], [0]>} : vector<2x4x8xf32>, vector<2x4x8xf32>, vector<2x4x4xf32> -> vector<2x4x4xf32>
    "tpu.trace_stop"() : () -> ()
    %cst_169 = arith.constant 0.353553385 : f32
    %499 = vector.broadcast %cst_169 : f32 to vector<2x4x4xf32>
    %500 = arith.mulf %498, %499 : vector<2x4x4xf32>
    %cst_170 = arith.constant dense<0xFF800000> : vector<2x4xf32>
    %501 = vector.multi_reduction <maximumf>, %500, %cst_170 [2] : vector<2x4x4xf32> to vector<2x4xf32>
    %502 = vector.shape_cast %501 : vector<2x4xf32> to vector<2x4x1xf32>
    %503 = vector.broadcast %502 : vector<2x4x1xf32> to vector<2x4x4xf32>
    %504 = arith.subf %500, %503 : vector<2x4x4xf32>
    %505 = math.exp %504 : vector<2x4x4xf32>
    %cst_171 = arith.constant dense<0.000000e+00> : vector<2x4xf32>
    %506 = vector.multi_reduction <add>, %505, %cst_171 [2] : vector<2x4x4xf32> to vector<2x4xf32>
    %507 = vector.shape_cast %506 : vector<2x4xf32> to vector<2x4x1xf32>
    %508 = tpu.reciprocal %507 {approx = true} : vector<2x4x1xf32> -> vector<2x4x1xf32>
    %509 = vector.broadcast %508 : vector<2x4x1xf32> to vector<2x4x4xf32>
    %510 = arith.mulf %505, %509 : vector<2x4x4xf32>
    "tpu.trace_start"() <{level = 10 : i32, message = "gqk,gkd->gqd"}> : () -> ()
    %cst_172 = arith.constant dense<0.000000e+00> : vector<2x4x8xf32>
    %511 = tpu.matmul %510, %497, %cst_172 {dimension_numbers = #tpu.dot_dimension_numbers<[2], [1], [1], [2], [0, 0, 0, 1, 1, 2], [0], [0]>} : vector<2x4x4xf32>, vector<2x4x8xf32>, vector<2x4x8xf32> -> vector<2x4x8xf32>
    "tpu.trace_stop"() : () -> ()
    %512 = vector.shape_cast %511 : vector<2x4x8xf32> to vector<8x8xf32>
    %513 = vector.extract_strided_slice %468 {offsets = [0, 16], sizes = [8, 8], strides = [1, 1]} : vector<8x32xf32> to vector<8x8xf32>
    %514 = vector.shape_cast %513 : vector<8x8xf32> to vector<2x4x8xf32>
    %515 = vector.extract_strided_slice %469 {offsets = [0, 16], sizes = [8, 8], strides = [1, 1]} : vector<8x32xf32> to vector<8x8xf32>
    %516 = vector.shape_cast %515 : vector<8x8xf32> to vector<2x4x8xf32>
    %517 = vector.extract_strided_slice %470 {offsets = [0, 16], sizes = [8, 8], strides = [1, 1]} : vector<8x32xf32> to vector<8x8xf32>
    %518 = vector.shape_cast %517 : vector<8x8xf32> to vector<2x4x8xf32>
    "tpu.trace_start"() <{level = 10 : i32, message = "gqd,gkd->gqk"}> : () -> ()
    %cst_173 = arith.constant dense<0.000000e+00> : vector<2x4x4xf32>
    %519 = tpu.matmul %514, %516, %cst_173 {dimension_numbers = #tpu.dot_dimension_numbers<[2], [2], [1], [1], [0, 0, 0, 1, 1, 1], [0], [0]>} : vector<2x4x8xf32>, vector<2x4x8xf32>, vector<2x4x4xf32> -> vector<2x4x4xf32>
    "tpu.trace_stop"() : () -> ()
    %cst_174 = arith.constant 0.353553385 : f32
    %520 = vector.broadcast %cst_174 : f32 to vector<2x4x4xf32>
    %521 = arith.mulf %519, %520 : vector<2x4x4xf32>
    %cst_175 = arith.constant dense<0xFF800000> : vector<2x4xf32>
    %522 = vector.multi_reduction <maximumf>, %521, %cst_175 [2] : vector<2x4x4xf32> to vector<2x4xf32>
    %523 = vector.shape_cast %522 : vector<2x4xf32> to vector<2x4x1xf32>
    %524 = vector.broadcast %523 : vector<2x4x1xf32> to vector<2x4x4xf32>
    %525 = arith.subf %521, %524 : vector<2x4x4xf32>
    %526 = math.exp %525 : vector<2x4x4xf32>
    %cst_176 = arith.constant dense<0.000000e+00> : vector<2x4xf32>
    %527 = vector.multi_reduction <add>, %526, %cst_176 [2] : vector<2x4x4xf32> to vector<2x4xf32>
    %528 = vector.shape_cast %527 : vector<2x4xf32> to vector<2x4x1xf32>
    %529 = tpu.reciprocal %528 {approx = true} : vector<2x4x1xf32> -> vector<2x4x1xf32>
    %530 = vector.broadcast %529 : vector<2x4x1xf32> to vector<2x4x4xf32>
    %531 = arith.mulf %526, %530 : vector<2x4x4xf32>
    "tpu.trace_start"() <{level = 10 : i32, message = "gqk,gkd->gqd"}> : () -> ()
    %cst_177 = arith.constant dense<0.000000e+00> : vector<2x4x8xf32>
    %532 = tpu.matmul %531, %518, %cst_177 {dimension_numbers = #tpu.dot_dimension_numbers<[2], [1], [1], [2], [0, 0, 0, 1, 1, 2], [0], [0]>} : vector<2x4x4xf32>, vector<2x4x8xf32>, vector<2x4x8xf32> -> vector<2x4x8xf32>
    "tpu.trace_stop"() : () -> ()
    %533 = vector.shape_cast %532 : vector<2x4x8xf32> to vector<8x8xf32>
    %534 = vector.extract_strided_slice %468 {offsets = [0, 24], sizes = [8, 8], strides = [1, 1]} : vector<8x32xf32> to vector<8x8xf32>
    %535 = vector.shape_cast %534 : vector<8x8xf32> to vector<2x4x8xf32>
    %536 = vector.extract_strided_slice %469 {offsets = [0, 24], sizes = [8, 8], strides = [1, 1]} : vector<8x32xf32> to vector<8x8xf32>
    %537 = vector.shape_cast %536 : vector<8x8xf32> to vector<2x4x8xf32>
    %538 = vector.extract_strided_slice %470 {offsets = [0, 24], sizes = [8, 8], strides = [1, 1]} : vector<8x32xf32> to vector<8x8xf32>
    %539 = vector.shape_cast %538 : vector<8x8xf32> to vector<2x4x8xf32>
    "tpu.trace_start"() <{level = 10 : i32, message = "gqd,gkd->gqk"}> : () -> ()
    %cst_178 = arith.constant dense<0.000000e+00> : vector<2x4x4xf32>
    %540 = tpu.matmul %535, %537, %cst_178 {dimension_numbers = #tpu.dot_dimension_numbers<[2], [2], [1], [1], [0, 0, 0, 1, 1, 1], [0], [0]>} : vector<2x4x8xf32>, vector<2x4x8xf32>, vector<2x4x4xf32> -> vector<2x4x4xf32>
    "tpu.trace_stop"() : () -> ()
    %cst_179 = arith.constant 0.353553385 : f32
    %541 = vector.broadcast %cst_179 : f32 to vector<2x4x4xf32>
    %542 = arith.mulf %540, %541 : vector<2x4x4xf32>
    %cst_180 = arith.constant dense<0xFF800000> : vector<2x4xf32>
    %543 = vector.multi_reduction <maximumf>, %542, %cst_180 [2] : vector<2x4x4xf32> to vector<2x4xf32>
    %544 = vector.shape_cast %543 : vector<2x4xf32> to vector<2x4x1xf32>
    %545 = vector.broadcast %544 : vector<2x4x1xf32> to vector<2x4x4xf32>
    %546 = arith.subf %542, %545 : vector<2x4x4xf32>
    %547 = math.exp %546 : vector<2x4x4xf32>
    %cst_181 = arith.constant dense<0.000000e+00> : vector<2x4xf32>
    %548 = vector.multi_reduction <add>, %547, %cst_181 [2] : vector<2x4x4xf32> to vector<2x4xf32>
    %549 = vector.shape_cast %548 : vector<2x4xf32> to vector<2x4x1xf32>
    %550 = tpu.reciprocal %549 {approx = true} : vector<2x4x1xf32> -> vector<2x4x1xf32>
    %551 = vector.broadcast %550 : vector<2x4x1xf32> to vector<2x4x4xf32>
    %552 = arith.mulf %547, %551 : vector<2x4x4xf32>
    "tpu.trace_start"() <{level = 10 : i32, message = "gqk,gkd->gqd"}> : () -> ()
    %cst_182 = arith.constant dense<0.000000e+00> : vector<2x4x8xf32>
    %553 = tpu.matmul %552, %539, %cst_182 {dimension_numbers = #tpu.dot_dimension_numbers<[2], [1], [1], [2], [0, 0, 0, 1, 1, 2], [0], [0]>} : vector<2x4x4xf32>, vector<2x4x8xf32>, vector<2x4x8xf32> -> vector<2x4x8xf32>
    "tpu.trace_stop"() : () -> ()
    %554 = vector.shape_cast %553 : vector<2x4x8xf32> to vector<8x8xf32>
    %555 = tpu.concatenate %491, %512, %533, %554 in 1 : vector<8x8xf32>, vector<8x8xf32>, vector<8x8xf32>, vector<8x8xf32> -> vector<8x32xf32>
    %556 = arith.truncf %555 : vector<8x32xf32> to vector<8x32xbf16>
    %c2_183 = arith.constant 2 : index
    %c0_184 = arith.constant 0 : index
    %c0_185 = arith.constant 0 : index
    %557 = vector.load %arg5[%c2_183, %c0_184, %c0_185] : memref<3x32x32xbf16, #tpu.memory_space<vmem>>, vector<1x32x32xbf16>
    %558 = vector.shape_cast %557 : vector<1x32x32xbf16> to vector<32x32xbf16>
    %cst_186 = arith.constant dense<0.000000e+00> : vector<8x32xf32>
    %559 = tpu.matmul %556, %558, %cst_186 {dimension_numbers = #tpu.dot_dimension_numbers<[1], [0], [0], [1], [0, 0, 1, 1], [], []>} : vector<8x32xbf16>, vector<32x32xbf16>, vector<8x32xf32> -> vector<8x32xf32>
    %c2_187 = arith.constant 2 : index
    %c0_188 = arith.constant 0 : index
    %c0_189 = arith.constant 0 : index
    %560 = vector.load %arg6[%c2_187, %c0_188, %c0_189] : memref<3x1x32xf32, #tpu.memory_space<vmem>>, vector<1x1x32xf32>
    %561 = vector.shape_cast %560 : vector<1x1x32xf32> to vector<1x32xf32>
    %562 = vector.broadcast %561 : vector<1x32xf32> to vector<8x32xf32>
    %563 = arith.addf %559, %562 : vector<8x32xf32>
    %564 = arith.mulf %434, %563 : vector<8x32xf32>
    %565 = arith.addf %429, %564 : vector<8x32xf32>
    %cst_190 = arith.constant dense<0.000000e+00> : vector<8xf32>
    %566 = vector.multi_reduction <add>, %565, %cst_190 [1] : vector<8x32xf32> to vector<8xf32>
    %567 = vector.shape_cast %566 : vector<8xf32> to vector<8x1xf32>
    %cst_191 = arith.constant 3.200000e+01 : f32
    %568 = vector.broadcast %cst_191 : f32 to vector<8x1xf32>
    %569 = arith.divf %567, %568 : vector<8x1xf32>
    %570 = vector.broadcast %569 : vector<8x1xf32> to vector<8x32xf32>
    %571 = arith.subf %565, %570 : vector<8x32xf32>
    %572 = arith.mulf %571, %571 : vector<8x32xf32>
    %cst_192 = arith.constant dense<0.000000e+00> : vector<8xf32>
    %573 = vector.multi_reduction <add>, %572, %cst_192 [1] : vector<8x32xf32> to vector<8xf32>
    %574 = vector.shape_cast %573 : vector<8xf32> to vector<8x1xf32>
    %cst_193 = arith.constant 3.200000e+01 : f32
    %575 = vector.broadcast %cst_193 : f32 to vector<8x1xf32>
    %576 = arith.divf %574, %575 : vector<8x1xf32>
    %577 = vector.broadcast %569 : vector<8x1xf32> to vector<8x32xf32>
    %578 = arith.subf %565, %577 : vector<8x32xf32>
    %cst_194 = arith.constant 9.99999997E-7 : f32
    %579 = vector.broadcast %cst_194 : f32 to vector<8x1xf32>
    %580 = arith.addf %576, %579 : vector<8x1xf32>
    %581 = math.rsqrt %580 : vector<8x1xf32>
    %582 = vector.broadcast %581 : vector<8x1xf32> to vector<8x32xf32>
    %583 = arith.mulf %578, %582 : vector<8x32xf32>
    %cst_195 = arith.constant dense<0.000000e+00> : vector<8xf32>
    %584 = vector.multi_reduction <add>, %583, %cst_195 [1] : vector<8x32xf32> to vector<8xf32>
    %585 = vector.shape_cast %584 : vector<8xf32> to vector<8x1xf32>
    %cst_196 = arith.constant 3.200000e+01 : f32
    %586 = vector.broadcast %cst_196 : f32 to vector<8x1xf32>
    %587 = arith.divf %585, %586 : vector<8x1xf32>
    %588 = vector.broadcast %587 : vector<8x1xf32> to vector<8x32xf32>
    %589 = arith.subf %583, %588 : vector<8x32xf32>
    %590 = arith.mulf %589, %589 : vector<8x32xf32>
    %cst_197 = arith.constant dense<0.000000e+00> : vector<8xf32>
    %591 = vector.multi_reduction <add>, %590, %cst_197 [1] : vector<8x32xf32> to vector<8xf32>
    %592 = vector.shape_cast %591 : vector<8xf32> to vector<8x1xf32>
    %cst_198 = arith.constant 3.200000e+01 : f32
    %593 = vector.broadcast %cst_198 : f32 to vector<8x1xf32>
    %594 = arith.divf %592, %593 : vector<8x1xf32>
    %595 = vector.broadcast %587 : vector<8x1xf32> to vector<8x32xf32>
    %596 = arith.subf %583, %595 : vector<8x32xf32>
    %cst_199 = arith.constant 9.99999997E-7 : f32
    %597 = vector.broadcast %cst_199 : f32 to vector<8x1xf32>
    %598 = arith.addf %594, %597 : vector<8x1xf32>
    %599 = math.rsqrt %598 : vector<8x1xf32>
    %600 = vector.broadcast %599 : vector<8x1xf32> to vector<8x32xf32>
    %601 = arith.mulf %596, %600 : vector<8x32xf32>
    %cst_200 = arith.constant 1.000000e+00 : f32
    %602 = vector.broadcast %cst_200 : f32 to vector<8x32xf32>
    %603 = arith.addf %602, %436 : vector<8x32xf32>
    %604 = arith.mulf %601, %603 : vector<8x32xf32>
    %605 = arith.addf %604, %435 : vector<8x32xf32>
    %606 = arith.truncf %605 : vector<8x32xf32> to vector<8x32xbf16>
    %c2_201 = arith.constant 2 : index
    %c0_202 = arith.constant 0 : index
    %c0_203 = arith.constant 0 : index
    %607 = vector.load %arg7[%c2_201, %c0_202, %c0_203] : memref<3x32x128xbf16, #tpu.memory_space<vmem>>, vector<1x32x128xbf16>
    %608 = vector.shape_cast %607 : vector<1x32x128xbf16> to vector<32x128xbf16>
    %cst_204 = arith.constant dense<0.000000e+00> : vector<8x128xf32>
    %609 = tpu.matmul %606, %608, %cst_204 {dimension_numbers = #tpu.dot_dimension_numbers<[1], [0], [0], [1], [0, 0, 1, 1], [], []>} : vector<8x32xbf16>, vector<32x128xbf16>, vector<8x128xf32> -> vector<8x128xf32>
    %c2_205 = arith.constant 2 : index
    %c0_206 = arith.constant 0 : index
    %c0_207 = arith.constant 0 : index
    %610 = vector.load %arg8[%c2_205, %c0_206, %c0_207] : memref<3x1x128xf32, #tpu.memory_space<vmem>>, vector<1x1x128xf32>
    %611 = vector.shape_cast %610 : vector<1x1x128xf32> to vector<1x128xf32>
    %612 = vector.broadcast %611 : vector<1x128xf32> to vector<8x128xf32>
    %613 = arith.addf %609, %612 : vector<8x128xf32>
    %cst_208 = arith.constant 0.000000e+00 : f32
    %614 = vector.broadcast %cst_208 : f32 to vector<8x128xf32>
    %615 = arith.maximumf %613, %614 : vector<8x128xf32>
    %616 = arith.truncf %615 : vector<8x128xf32> to vector<8x128xbf16>
    %c2_209 = arith.constant 2 : index
    %c0_210 = arith.constant 0 : index
    %c0_211 = arith.constant 0 : index
    %617 = vector.load %arg9[%c2_209, %c0_210, %c0_211] : memref<3x128x32xbf16, #tpu.memory_space<vmem>>, vector<1x128x32xbf16>
    %618 = vector.shape_cast %617 : vector<1x128x32xbf16> to vector<128x32xbf16>
    %cst_212 = arith.constant dense<0.000000e+00> : vector<8x32xf32>
    %619 = tpu.matmul %616, %618, %cst_212 {dimension_numbers = #tpu.dot_dimension_numbers<[1], [0], [0], [1], [0, 0, 1, 1], [], []>} : vector<8x128xbf16>, vector<128x32xbf16>, vector<8x32xf32> -> vector<8x32xf32>
    %c2_213 = arith.constant 2 : index
    %c0_214 = arith.constant 0 : index
    %c0_215 = arith.constant 0 : index
    %620 = vector.load %arg10[%c2_213, %c0_214, %c0_215] : memref<3x1x32xf32, #tpu.memory_space<vmem>>, vector<1x1x32xf32>
    %621 = vector.shape_cast %620 : vector<1x1x32xf32> to vector<1x32xf32>
    %622 = vector.broadcast %621 : vector<1x32xf32> to vector<8x32xf32>
    %623 = arith.addf %619, %622 : vector<8x32xf32>
    %624 = arith.mulf %437, %623 : vector<8x32xf32>
    %625 = arith.addf %583, %624 : vector<8x32xf32>
    %cst_216 = arith.constant dense<0.000000e+00> : vector<8xf32>
    %626 = vector.multi_reduction <add>, %625, %cst_216 [1] : vector<8x32xf32> to vector<8xf32>
    %627 = vector.shape_cast %626 : vector<8xf32> to vector<8x1xf32>
    %cst_217 = arith.constant 3.200000e+01 : f32
    %628 = vector.broadcast %cst_217 : f32 to vector<8x1xf32>
    %629 = arith.divf %627, %628 : vector<8x1xf32>
    %630 = vector.broadcast %629 : vector<8x1xf32> to vector<8x32xf32>
    %631 = arith.subf %625, %630 : vector<8x32xf32>
    %632 = arith.mulf %631, %631 : vector<8x32xf32>
    %cst_218 = arith.constant dense<0.000000e+00> : vector<8xf32>
    %633 = vector.multi_reduction <add>, %632, %cst_218 [1] : vector<8x32xf32> to vector<8xf32>
    %634 = vector.shape_cast %633 : vector<8xf32> to vector<8x1xf32>
    %cst_219 = arith.constant 3.200000e+01 : f32
    %635 = vector.broadcast %cst_219 : f32 to vector<8x1xf32>
    %636 = arith.divf %634, %635 : vector<8x1xf32>
    %637 = vector.broadcast %629 : vector<8x1xf32> to vector<8x32xf32>
    %638 = arith.subf %625, %637 : vector<8x32xf32>
    %cst_220 = arith.constant 9.99999997E-7 : f32
    %639 = vector.broadcast %cst_220 : f32 to vector<8x1xf32>
    %640 = arith.addf %636, %639 : vector<8x1xf32>
    %641 = math.rsqrt %640 : vector<8x1xf32>
    %642 = vector.broadcast %641 : vector<8x1xf32> to vector<8x32xf32>
    %643 = arith.mulf %638, %642 : vector<8x32xf32>
    %c0_221 = arith.constant 0 : index
    %c0_222 = arith.constant 0 : index
    %c0_223 = arith.constant 0 : index
    %644 = vector.load %arg11[%c0_221, %c0_222, %c0_223] : memref<1x8x32xf32, #tpu.memory_space<vmem>>, vector<1x8x32xf32>
    %645 = vector.shape_cast %644 : vector<1x8x32xf32> to vector<8x32xf32>
    %646 = vector.shape_cast %643 : vector<8x32xf32> to vector<1x8x32xf32>
    tpu.vector_store %arg11[%c0_221, %c0_222, %c0_223], %646 {strides = array<i32>} : memref<1x8x32xf32, #tpu.memory_space<vmem>>, vector<1x8x32xf32>,
    return
  }
  func.func @transform_0(%arg0: i32) -> (i32, i32, i32) {
    %c0_i32 = arith.constant 0 : i32
    %c0_i32_0 = arith.constant 0 : i32
    %c0_i32_1 = arith.constant 0 : i32
    return %arg0, %c0_i32, %c0_i32_0 : i32, i32, i32
  }
  func.func @transform_1(%arg0: i32) -> (i32, i32, i32) {
    %c0_i32 = arith.constant 0 : i32
    %c0_i32_0 = arith.constant 0 : i32
    %c0_i32_1 = arith.constant 0 : i32
    %c0_i32_2 = arith.constant 0 : i32
    return %c0_i32, %c0_i32_0, %c0_i32_1 : i32, i32, i32
  }
  func.func @transform_2(%arg0: i32) -> (i32, i32, i32) {
    %c0_i32 = arith.constant 0 : i32
    %c0_i32_0 = arith.constant 0 : i32
    %c0_i32_1 = arith.constant 0 : i32
    %c0_i32_2 = arith.constant 0 : i32
    return %c0_i32, %c0_i32_0, %c0_i32_1 : i32, i32, i32
  }
  func.func @transform_3(%arg0: i32) -> (i32, i32, i32) {
    %c0_i32 = arith.constant 0 : i32
    %c0_i32_0 = arith.constant 0 : i32
    %c0_i32_1 = arith.constant 0 : i32
    %c0_i32_2 = arith.constant 0 : i32
    return %c0_i32, %c0_i32_0, %c0_i32_1 : i32, i32, i32
  }
  func.func @transform_4(%arg0: i32) -> (i32, i32, i32) {
    %c0_i32 = arith.constant 0 : i32
    %c0_i32_0 = arith.constant 0 : i32
    %c0_i32_1 = arith.constant 0 : i32
    %c0_i32_2 = arith.constant 0 : i32
    return %c0_i32, %c0_i32_0, %c0_i32_1 : i32, i32, i32
  }
  func.func @transform_5(%arg0: i32) -> (i32, i32, i32) {
    %c0_i32 = arith.constant 0 : i32
    %c0_i32_0 = arith.constant 0 : i32
    %c0_i32_1 = arith.constant 0 : i32
    %c0_i32_2 = arith.constant 0 : i32
    return %c0_i32, %c0_i32_0, %c0_i32_1 : i32, i32, i32
  }
  func.func @transform_6(%arg0: i32) -> (i32, i32, i32) {
    %c0_i32 = arith.constant 0 : i32
    %c0_i32_0 = arith.constant 0 : i32
    %c0_i32_1 = arith.constant 0 : i32
    %c0_i32_2 = arith.constant 0 : i32
    return %c0_i32, %c0_i32_0, %c0_i32_1 : i32, i32, i32
  }
  func.func @transform_7(%arg0: i32) -> (i32, i32, i32) {
    %c0_i32 = arith.constant 0 : i32
    %c0_i32_0 = arith.constant 0 : i32
    %c0_i32_1 = arith.constant 0 : i32
    %c0_i32_2 = arith.constant 0 : i32
    return %c0_i32, %c0_i32_0, %c0_i32_1 : i32, i32, i32
  }
  func.func @transform_8(%arg0: i32) -> (i32, i32, i32) {
    %c0_i32 = arith.constant 0 : i32
    %c0_i32_0 = arith.constant 0 : i32
    %c0_i32_1 = arith.constant 0 : i32
    %c0_i32_2 = arith.constant 0 : i32
    return %c0_i32, %c0_i32_0, %c0_i32_1 : i32, i32, i32
  }
  func.func @transform_9(%arg0: i32) -> (i32, i32, i32) {
    %c0_i32 = arith.constant 0 : i32
    %c0_i32_0 = arith.constant 0 : i32
    %c0_i32_1 = arith.constant 0 : i32
    %c0_i32_2 = arith.constant 0 : i32
    return %c0_i32, %c0_i32_0, %c0_i32_1 : i32, i32, i32
  }
  func.func @transform_10(%arg0: i32) -> (i32, i32, i32) {
    %c0_i32 = arith.constant 0 : i32
    %c0_i32_0 = arith.constant 0 : i32
    %c0_i32_1 = arith.constant 0 : i32
    return %arg0, %c0_i32, %c0_i32_0 : i32, i32, i32
  }
}

</mosaic_0001>

<bundles_post_ra>
// kernel: genetic_diffusion_forward.5
= control target key start
LH: loop header
LB: loop body
LE: loop exit
PB: predicated region body
PF: predicated region fallthrough
CT: control target
= control target key end

     0   :  { %s542_s17 = smov 0   ;;  %s544_s18 = smov 0   ;;  %s611_s0 = inlined_call_operand.vmem [shape: f32[2,1,10,64], index: 0, kind: input, shape index: {}]   ;;  %s612_s1 = inlined_call_operand.vmem [shape: f32[10,64], index: 1, kind: input, shape index: {}]   ;;  %s613_s2 = inlined_call_operand.vmem [shape: f32[64,32], index: 2, kind: input, shape index: {}]   ;;  %s614_s3 = inlined_call_operand.<no memory space> [shape: f32[1,1], index: 3, kind: input, shape index: {}]   ;;  %s615_s4 = inlined_call_operand.vmem [shape: f32[2,1,32], index: 4, kind: output, shape index: {}]  }
   0x1   :  { %v9_v0 = vstv %s614_s3  ;;  %s546_s19 = smov 0  }
   0x2   :  { %10 = vst [vmem:[#allocation2] sm:$0x1] %v9_v0 }
   0x3 LB: > { %s28_s3 = sadd.s32 1, %s505_s18  ;;  %p411_p0 = scmp.ge.s32.totalorder %s509_s19, 1  ;;  %s509_s19 = sphi %s546_s19, %s16_s19   ;;  %s505_s18 = sphi %s544_s18, %s617_s18   ;;  %s501_s17 = sphi %s542_s17, %s616_s17  }
   0x4   : > { %p30_p1 = scmp.ge.s32.totalorder %s28_s3, 2  ;;  %p184_p2 = scmp.lt.s32.totalorder %s509_s19, 3 }
   0x6   : > { %s619_s3 = smov (%p30_p1, %s28_s3), 0  ;;  %p185_p3 = pnand %p411_p0, %p184_p2 }
   0x7   : > { %v247_v1 = vld [vmem:[%s613_s2] sm:$0xff] (!%p185_p3)  ;;  %v248_v2 = vld [vmem:[%s613_s2 + $0x8] sm:$0xff] (!%p185_p3)  ;;  %v249_v3 = vld [vmem:[%s613_s2 + $0x10] sm:$0xff] (!%p185_p3)  ;;  %v511_v4 = vmov (!%p185_p3), 0.0|0.0   ;;  %vm512_vm0 = vmmov (!%p185_p3), 0   ;;  %v513_v7 = vmov (!%p185_p3), 0.0  }
   0x8   : > { %188 = sbr.rel (%p185_p3) target bundleno = 251 (0xfb), region = 36  ;;  %446 = vmatprep.subr.bf16.mxu0 (!%p185_p3), %v511_v4  ;;  %v447_v5 = vpack.c.bf16 (!%p185_p3), %v248_v2, %v247_v1  ;;  %v250_v6 = vld [vmem:[%s613_s2 + $0x18] sm:$0xff] (!%p185_p3)  ;;  %443 = vmatprep.mubr.msk.f32.mxu0 (!%p185_p3), %vm512_vm0, %v513_v7  ;;  %p215_p4 = scmp.lt.s32.totalorder (!%p185_p3), %s501_s17, 1  ;;  %v251_v10 = vld [vmem:[%s613_s2 + $0x20] sm:$0xff] (!%p185_p3)  ;;  %v252_v11 = vld [vmem:[%s613_s2 + $0x28] sm:$0xff] (!%p185_p3)  ;;  %vm236_vm1 = vcmask (!%p185_p3), 523264  }
   0x9   : > { %v450_v8 = vpack.c.bf16 (!%p185_p3), %v250_v6, %v249_v3  ;;  %v255_v9 = vld [vmem:[#allocation2] sm:$0x1] (!%p185_p3)  ;;  %v233_v13 = vld [vmem:[%s612_s1 + $0x8] sm:$0x3] (!%p185_p3)  ;;  %v453_v14 = vpack.c.bf16 (!%p185_p3), %v252_v11, %v251_v10  ;;  %vm238_vm2 = vcmask (!%p185_p3), 517120   ;;  %v253_v17 = vld [vmem:[%s613_s2 + $0x30] sm:$0xff] (!%p185_p3) }
   0xa   : > { %448 = vmatpush3.bf16.msra.mxu0 (!%p185_p3), %v447_v5  ;;  %458 = vpush (!%p185_p3), %v255_v9  ;;  %v232_v12 = vld [vmem:[%s612_s1] sm:$0xff] (!%p185_p3)  ;;  %v254_v18 = vld [vmem:[%s613_s2 + $0x38] sm:$0xff] (!%p185_p3)  ;;  %vm331_vm3 = vcmask (!%p185_p3), 253952  }
   0xb   : > { %449 = vmatprep.subr.bf16.mxu0 (!%p185_p3), %v511_v4  ;;  %v456_v23 = vpack.c.bf16 (!%p185_p3), %v254_v18, %v253_v17 }
   0xe   : > { %451 = vmatpush3.bf16.msra.mxu0 (!%p185_p3), %v450_v8 }
   0xf   : > { %s621_s17 = smov (!%p215_p4, %s501_s17), 1  ;;  %452 = vmatprep.subr.bf16.mxu0 %v511_v4 }
  0x10   : > { %s417_s6 = sshll.u32 %s621_s17, 4  ;;  %s229_s24 = scalar_lea.vmem %s615_s4, %s621_s17 }
  0x11   : > { %s223_s13 = scalar_lea.vmem %s611_s0, %s417_s6 }
  0x12   : > { %v230_v15 = vld [vmem:[%s223_s13] sm:$0xff]  ;;  %v231_v16 = vld [vmem:[%s223_s13 + $0x8] sm:$0x3]  ;;  %454 = vmatpush3.bf16.msra.mxu0 %v453_v14 }
  0x13   : > { %v234_v19 = vmul.f32 %v232_v12, %v230_v15  ;;  %v235_v20 = vmul.f32 %v233_v13, %v231_v16  ;;  %455 = vmatprep.subr.bf16.mxu0 %v511_v4 }
  0x15   : > { %v237_v21 = vsel %vm236_vm1, %v234_v19, 0.0  ;;  %v239_v22 = vsel %vm238_vm2, %v235_v20, 0.0 }
  0x16   : > { %v240_v24 = vadd.f32 %v239_v22, %v237_v21  ;;  %457 = vmatpush3.bf16.msra.mxu0 %v456_v23 }
  0x18   : > { %v241_v25 = vrot.slane %v240_v24, 4 }
  0x1a   : > { %v242_v26 = vadd.f32 %v241_v25, %v240_v24 }
  0x1c   : > { %v243_v27 = vrot.slane %v242_v26, 2 }
  0x1e   : > { %v244_v28 = vadd.f32 %v243_v27, %v242_v26 }
  0x20   : > { %v245_v29 = vrot.slane %v244_v28, 1 }
  0x22   : > { %v246_v30 = vadd.f32 %v245_v29, %v244_v28 }
  0x24   : > { %444 = vmatmul.mubr.msk.f32.vlgmr.msra.gmra.mrb[0].mxu0 %vm236_vm1, %v246_v30 }
  0x3b   : > { %s459_s21 = spop %458 }
  0x3c   : > { %v257_v31 = vstv %s459_s21 }
  0xf7   : > { %v327_v32 = vpop.f32.mrb[0].mxu0 }
  0xf8   : > { %v328_v33 = vadd.f32 %v327_v32, %v257_v31  ;;  %v445_v34 = vpop.f32.mrb[1].mxu0 }
  0xfa   : > { %332 = vst.msk [vmem:[%s229_s24] sm:$0x1] %vm331_vm3, %v328_v33 }
  0xfb PF: > { %s16_s19 = sadd.s32 1, %s509_s19   ;;  %s616_s17 = smov %s505_s18 }
  0xfc   : > { %p13_p5 = scmp.ge.s32.totalorder %s16_s19, 4   ;;  %s617_s18 = smov %s619_s3 }
  0xfe   :  { %15 = sbr.rel (!%p13_p5) target bundleno = 3 (0x3), region = 66 }

// kernel: genetic_diffusion_forward.6
= control target key start
LH: loop header
LB: loop body
LE: loop exit
PB: predicated region body
PF: predicated region fallthrough
CT: control target
= control target key end

     0   :  { %s6745_s13 = smov 0   ;;  %s7631_s0 = inlined_call_operand.vmem [shape: f32[2,8,32], index: 0, kind: input, shape index: {}]   ;;  %s7632_s1 = inlined_call_operand.vmem [shape: f32[3,8,192], index: 1, kind: input, shape index: {}]   ;;  %s7633_s2 = inlined_call_operand.vmem [shape: bf16[3,32,96], index: 2, kind: input, shape index: {}]   ;;  %s7634_s3 = inlined_call_operand.vmem [shape: f32[3,1,96], index: 3, kind: input, shape index: {}]   ;;  %s7635_s4 = inlined_call_operand.vmem [shape: bf16[3,32,32], index: 4, kind: input, shape index: {}]   ;;  %s7636_s5 = inlined_call_operand.vmem [shape: f32[3,1,32], index: 5, kind: input, shape index: {}]   ;;  %s7637_s6 = inlined_call_operand.vmem [shape: bf16[3,32,128], index: 6, kind: input, shape index: {}]   ;;  %s7638_s7 = inlined_call_operand.vmem [shape: f32[3,1,128], index: 7, kind: input, shape index: {}]   ;;  %s7639_s8 = inlined_call_operand.vmem [shape: bf16[3,128,32], index: 8, kind: input, shape index: {}]   ;;  %s7640_s9 = inlined_call_operand.vmem [shape: f32[3,1,32], index: 9, kind: input, shape index: {}]   ;;  %s7641_s10 = inlined_call_operand.vmem [shape: f32[2,8,32], index: 10, kind: output, shape index: {}]  }
   0x1 LB: > { %s5720_s14 = sadd.s32 4294967295, %s6671_s13   ;;  %p5724_p0 = scmp.ge.s32.totalorder %s6671_s13, 1  ;;  %s6671_s13 = sphi %s6745_s13, %s20_s13  }
   0x2   : > { %p311_p1 = scmp.lt.s32.totalorder %s6671_s13, 3 }
   0x4   : > { %p312_p2 = pnand %p5724_p0, %p311_p1 }
   0x5   : > { %p347_p3 = scmp.lt.s32.totalorder (!%p312_p2), %s5720_s14, 1  ;;  %vm359_vm0 = vcmask (!%p312_p2), 261120   ;;  %v6768_v2 = vld [vmem:[%s7632_s1] sm:$0xff] (!%p312_p2)  ;;  %s6673_s21 = smov (!%p312_p2), 96   ;;  %v6674_v10 = vmov (!%p312_p2), 0.0   ;;  %v6504_v11 = vld [vmem:[%s7633_s2 + $0x8] sm:$0xff] (!%p312_p2)  }
   0x6   : > { %315 = sbr.rel (%p312_p2) target bundleno = 15494 (0x3c86), region = 60  ;;  %v374_v3 = vadd.f32 (!%p312_p2), 1.0, %v6768_v2  ;;  %v6503_v9 = vld [vmem:[%s7633_s2] sm:$0xff] (!%p312_p2)   ;;  %6106 = vmatprep.subr.bf16.mxu0 (!%p312_p2), %v6674_v10  ;;  %6119 = vmatprep.subr.mxu1 (!%p312_p2), %v6674_v10  ;;  %vm6675_vm1 = vmmov (!%p312_p2), 0   ;;  %vm452_vm2 = vcmask (!%p312_p2), 64512   ;;  %vm605_vm3 = vcmask (!%p312_p2), 27648  }
   0x7   : > { %6107 = vmatpush3.bf16.msra.mxu0 (!%p312_p2), %v6503_v9  ;;  %6110 = vmatprep.mubr.msk.bf16.mxu0 (!%p312_p2), %vm6675_vm1, %v6674_v10  ;;  %v5727_v21 = vld [vmem:[%s7634_s3] ss:$0 sm:$0xff] (!%p312_p2)  ;;  %s6676_s28 = smov (!%p312_p2), 64   ;;  %s6677_s29 = smov (!%p312_p2), 88   ;;  %vm634_vm4 = vcmask (!%p312_p2), 1043456   ;;  %vm630_vm5 = vcmask (!%p312_p2), 31744  }
   0x8   : > { %376 = vrot.lane.b32.xlu1 (!%p312_p2), %v374_v3, %s6673_s21  ;;  %6108 = vmatprep.subr.bf16.mxu0 (!%p312_p2), %v6674_v10  ;;  %s6678_s30 = smov (!%p312_p2), 120   ;;  %s7661_s11 = smov (!%p312_p2), 56   ;;  %vm1809_vm6 = vcmask (!%p312_p2), 130048   ;;  %vm1811_vm7 = vcmask (!%p312_p2), 195584  }
   0x9   : > { %6121 = vmatprep.mubr.msk.f32.mxu1 (!%p312_p2), %vm6675_vm1, %v6674_v10  ;;  %s7659_s12 = smov (!%p312_p2), 80   ;;  %s7657_s16 = smov (!%p312_p2), 112  }
   0xa   : > { %s7655_s17 = smov (!%p312_p2), 48   ;;  %s7651_s19 = smov (!%p312_p2), 104  }
   0xb   : > { %6109 = vmatpush3.bf16.msra.mxu0 (!%p312_p2), %v6504_v11  ;;  %s7649_s20 = smov (!%p312_p2), 40   ;;  %s7647_s22 = smov (!%p312_p2), 8  }
   0xc   : > { %6114 = vmatprep.subr.mxu0 (!%p312_p2), %v6674_v10  ;;  %s7645_s23 = smov (!%p312_p2), 16   ;;  %s6689_s26 = smov (!%p312_p2), 32  }
   0xd   : > { %s7675_s14 = smov (!%p347_p3, %s5720_s14), 1  ;;  %s7664_s25 = smov 40  }
   0xe   : > { %s7642_s15 = sshll.u32 %s7675_s14, 3 }
   0xf   : > { %s350_s18 = scalar_lea.vmem %s7631_s0, %s7642_s15  ;;  %s7643_s15 = smov 24  }
  0x10   : > { %v6761_v0 = vld [vmem:[%s350_s18] sm:$0xff]  ;;  %s7653_s18 = smov 72  }
  0x11   : > { %v360_v1 = vsel %vm359_vm0, %v6761_v0, 0.0 }
  0x12   : > { %361 = vadd.xlane.f32.xlu0 %v360_v1 }
  0x7a   : > { %v377_v16 = vpop.permute.xlu1 %376 }
  0x9f   : > { %v362_v4 = vpop.xlane.xlu0 %361 }
  0xa0   : > { %v364_v5 = vmul.f32 0.03125, %v362_v4 }
  0xa2   : > { %v365_v6 = vsub.f32 %v6761_v0, %v364_v5 }
  0xa4   : > { %v366_v7 = vmul.f32 %v365_v6, %v365_v6 }
  0xa6   : > { %v367_v8 = vsel %vm359_vm0, %v366_v7, 0.0 }
  0xa7   : > { %368 = vadd.xlane.f32.xlu0 %v367_v8 }
 0x134   : > { %v369_v12 = vpop.xlane.xlu0 %368 }
 0x135   : > { %v370_v13 = vmul.f32 0.03125, %v369_v12 }
 0x137   : > { %v371_v14 = vadd.f32 1e-06, %v370_v13 }
 0x139   : > { %6545 = vrsqrt.f32 %v371_v14 }
 0x143   : > { %v6546_v15 = vpop.eup %6545 }
 0x144   : > { %v373_v17 = vmul.f32 %v6546_v15, %v365_v6 }
 0x146   : > { %v379_v18 = vmul.f32 %v377_v16, %v373_v17 }
 0x148   : > { %v380_v19 = vadd.f32 %v379_v18, %v6768_v2 }
 0x14a   : > { %v381_v20 = vpack.c.bf16 %v380_v19, %v380_v19 }
 0x14c   : > { %6111 = vmatmul.mubr.msk.bf16.vlgmr.msra.gmra.mrb[0].mxu0 %vm359_vm0, %v381_v20 }
 0x14d   : > { %6116 = vmatprep.mubr.msk.f32.mxu0 %vm6675_vm1, %v6674_v10 }
 0x21f   : > { %v442_v22 = vpop.f32.mrb[0].mxu0 }
 0x220   : > { %v6795_v23 = vadd.f32 %v5727_v21, %v442_v22  ;;  %v6112_v24 = vpop.f32.mrb[1].mxu0 }
 0x221   : > { %v445_v25 = vpop.f32.mrb[2].mxu0 }
 0x222   : > { %450 = vrot.lane.b32.xlu1 %v6795_v23, %s6673_s21  ;;  %v6113_v26 = vpop.f32.mrb[3].mxu0  ;;  %v6801_v27 = vcombine.high %v6795_v23, %v6795_v23 }
 0x224   : > { %527 = vrot.lane.b32.xlu0 %v6801_v27, %s6673_s21 }
 0x294   : > { %v451_v28 = vpop.permute.xlu1 %450 }
 0x295   : > { %6115 = vmatpush3.xpose.msk.msra.mxu0 %vm452_vm2, %v451_v28 }
 0x296   : > { %v528_v29 = vpop.permute.xlu0 %527  ;;  %6129 = vmatprep.subr.mxu0 %v6674_v10 }
 0x297   : > { %6120 = vmatpush3.xpose.msk.msra.mxu1 %vm452_vm2, %v528_v29 }
 0x298   : > { %6117 = vmatmul.mubr.msk.f32.vlgmr.msra.gmra.mrb[4].mxu0 %vm452_vm2, %v6795_v23  ;;  %6124 = vmatprep.subr.mxu1 %v6674_v10 }
 0x299   : > { %6131 = vmatprep.mubr.msk.f32.mxu0 %vm6675_vm1, %v6674_v10 }
 0x29a   : > { %6122 = vmatmul.mubr.msk.f32.vlgmr.msra.gmra.mrb[0].mxu1 %vm452_vm2, %v6801_v27 }
 0x29b   : > { %6126 = vmatprep.mubr.msk.f32.mxu1 %vm6675_vm1, %v6674_v10 }
 0x36b   : > { %v523_v30 = vpop.f32.mrb[4].mxu0 }
 0x36c   : > { %v603_v31 = vmul.f32 0.35355338, %v523_v30  ;;  %v6118_v32 = vpop.f32.mrb[5].mxu0 }
 0x36d   : > { %v599_v33 = vpop.f32.mrb[0].mxu1 }
 0x36e   : > { %v604_v34 = vmul.f32 0.35355338, %v599_v33  ;;  %v6123_v35 = vpop.f32.mrb[1].mxu1  ;;  %v606_v36 = vsel %vm605_vm3, %v603_v31, -inf }
 0x36f   : > { %607 = vmax.xlane.f32.xlu1 %v606_v36 }
 0x370   : > { %v609_v37 = vsel %vm605_vm3, %v604_v34, -inf }
 0x371   : > { %610 = vmax.xlane.f32.xlu0 %v609_v37 }
 0x380   : > { %628 = vrot.lane.b32.xlu1 %v6795_v23, %s6676_s28 }
 0x384   : > { %786 = vrot.lane.b32.xlu1 %v6795_v23, %s6677_s29 }
 0x387   : > { %707 = vrot.lane.b32.xlu0 %v6801_v27, %s6676_s28 }
 0x388   : > { %864 = vrot.lane.b32.xlu1 %v6801_v27, %s6677_s29 }
 0x38c   : > { %784 = vrot.lane.b32.xlu1 %v6795_v23, %s6678_s30 }
 0x3fc   : > { %v608_v38 = vpop.xlane.xlu1 %607 }
 0x3fd   : > { %v612_v39 = vsub.f32 %v603_v31, %v608_v38 }
 0x3fe   : > { %v611_v40 = vpop.xlane.xlu0 %610 }
 0x3ff   : > { %v614_v41 = vmul.f32 1.442695, %v612_v39  ;;  %v613_v42 = vsub.f32 %v604_v34, %v611_v40 }
 0x400   : > { %v629_v43 = vpop.permute.xlu1 %628 }
 0x401   : > { %6547 = vpow2.f32 %v614_v41  ;;  %v616_v44 = vmul.f32 1.442695, %v613_v42  ;;  %6125 = vmatpush3.msk.msra.mxu1 %vm634_vm4, %v629_v43 }
 0x402   : > { %v708_v45 = vpop.permute.xlu0 %707  ;;  %6134 = vmatprep.subr.mxu1 %v6674_v10 }
 0x403   : > { %6549 = vpow2.f32 %v616_v44  ;;  %6130 = vmatpush3.msk.msra.mxu0 %vm634_vm4, %v708_v45 }
 0x404   : > { %6139 = vmatprep.subr.mxu0 %v6674_v10  ;;  %v787_v50 = vpop.permute.xlu1 %786 }
 0x408   : > { %v865_v51 = vpop.permute.xlu1 %864 }
 0x40b   : > { %v6548_v46 = vpop.eup %6547 }
 0x40c   : > { %v618_v47 = vsel %vm605_vm3, %v6548_v46, 0.0  ;;  %v785_v52 = vpop.permute.xlu1 %784 }
 0x40d   : > { %v6550_v48 = vpop.eup %6549  ;;  %619 = vadd.xlane.f32.xlu1 %v618_v47 }
 0x40e   : > { %v621_v49 = vsel %vm605_vm3, %v6550_v48, 0.0 }
 0x411   : > { %622 = vadd.xlane.f32.xlu1 %v621_v49 }
 0x422   : > { %862 = vrot.lane.b32.xlu1 %v6801_v27, %s6678_s30 }
 0x49a   : > { %v620_v53 = vpop.xlane.xlu1 %619 }
 0x49b   : > { %6551 = vrcp.f32 %v620_v53 }
 0x49e   : > { %v623_v54 = vpop.xlane.xlu1 %622 }
 0x49f   : > { %6553 = vrcp.f32 %v623_v54 }
 0x4a2   : > { %v863_v59 = vpop.permute.xlu1 %862 }
 0x4a5   : > { %v6552_v55 = vpop.eup %6551 }
 0x4a6   : > { %v626_v56 = vmul.f32 %v6552_v55, %v6548_v46 }
 0x4a8   : > { %6127 = vmatmul.mubr.msk.f32.vlgmr.msra.gmra.mrb[2].mxu1 %vm630_vm5, %v626_v56 }
 0x4a9   : > { %v6554_v57 = vpop.eup %6553  ;;  %6135 = vmatpush3.xpose.msk.msra.mxu1 %vm452_vm2, %v787_v50  ;;  %6136 = vmatprep.mubr.msk.f32.mxu1 %vm6675_vm1, %v6674_v10 }
 0x4aa   : > { %v627_v58 = vmul.f32 %v6554_v57, %v6550_v48  ;;  %6144 = vmatprep.subr.mxu1 %v6674_v10 }
 0x4ac   : > { %6132 = vmatmul.mubr.msk.f32.vlgmr.msra.gmra.mrb[6].mxu0 %vm630_vm5, %v627_v58  ;;  %6137 = vmatmul.mubr.msk.f32.vlgmr.msra.gmra.mrb[4].mxu1 %vm452_vm2, %v785_v52 }
 0x4ad   : > { %6140 = vmatpush3.xpose.msk.msra.mxu0 %vm452_vm2, %v865_v51  ;;  %6141 = vmatprep.mubr.msk.f32.mxu0 %vm6675_vm1, %v6674_v10 }
 0x4ae   : > { %6149 = vmatprep.subr.mxu0 %v6674_v10  ;;  %6146 = vmatprep.mubr.msk.f32.mxu1 %vm6675_vm1, %v6674_v10 }
 0x4b0   : > { %6142 = vmatmul.mubr.msk.f32.vlgmr.msra.gmra.mrb[8].mxu0 %vm452_vm2, %v863_v59 }
 0x4b1   : > { %6151 = vmatprep.mubr.msk.f32.mxu0 %vm6675_vm1, %v6674_v10 }
 0x57b   : > { %v6853_v60 = vpop.f32.mrb[2].mxu1 }
 0x57c   : > { %v6128_v61 = vpop.f32.mrb[3].mxu1 }
 0x57f   : > { %v6855_v62 = vpop.f32.mrb[6].mxu0  ;;  %v858_v63 = vpop.f32.mrb[4].mxu1 }
 0x580   : > { %v1788_v1 = vcombine.low %v6853_v60, %v6855_v62  ;;  %v940_v3 = vmul.f32 0.35355338, %v858_v63  ;;  %v6133_v4 = vpop.f32.mrb[7].mxu0  ;;  %v6138_v5 = vpop.f32.mrb[5].mxu1 }
 0x582   : > { %v942_v6 = vsel %vm605_vm3, %v940_v3, -inf }
 0x583   : > { %943 = vmax.xlane.f32.xlu0 %v942_v6  ;;  %v936_v7 = vpop.f32.mrb[8].mxu0 }
 0x584   : > { %v941_v8 = vmul.f32 0.35355338, %v936_v7  ;;  %v6143_v9 = vpop.f32.mrb[9].mxu0 }
 0x586   : > { %v945_v11 = vsel %vm605_vm3, %v941_v8, -inf }
 0x587   : > { %946 = vmax.xlane.f32.xlu1 %v945_v11 }
 0x598   : > { %964 = vrot.lane.b32.xlu1 %v6795_v23, %s7661_s11 }
 0x599   : > { %1041 = vrot.lane.b32.xlu0 %v6801_v27, %s7661_s11 }
 0x59c   : > { %1120 = vrot.lane.b32.xlu1 %v6795_v23, %s7659_s12 }
 0x5a0   : > { %1198 = vrot.lane.b32.xlu1 %v6801_v27, %s7659_s12 }
 0x5a4   : > { %1196 = vrot.lane.b32.xlu1 %v6801_v27, %s7657_s16 }
 0x610   : > { %v944_v12 = vpop.xlane.xlu0 %943 }
 0x611   : > { %v948_v13 = vsub.f32 %v940_v3, %v944_v12 }
 0x613   : > { %v950_v14 = vmul.f32 1.442695, %v948_v13 }
 0x614   : > { %v1042_v15 = vpop.permute.xlu0 %1041  ;;  %v947_v16 = vpop.xlane.xlu1 %946 }
 0x615   : > { %6555 = vpow2.f32 %v950_v14  ;;  %v949_v17 = vsub.f32 %v941_v8, %v947_v16  ;;  %6150 = vmatpush3.msk.msra.mxu0 %vm634_vm4, %v1042_v15 }
 0x616   : > { %6159 = vmatprep.subr.mxu0 %v6674_v10 }
 0x617   : > { %v952_v18 = vmul.f32 1.442695, %v949_v17 }
 0x618   : > { %v965_v19 = vpop.permute.xlu1 %964 }
 0x619   : > { %6557 = vpow2.f32 %v952_v18  ;;  %6145 = vmatpush3.msk.msra.mxu1 %vm634_vm4, %v965_v19 }
 0x61a   : > { %6154 = vmatprep.subr.mxu1 %v6674_v10 }
 0x61c   : > { %v1121_v28 = vpop.permute.xlu1 %1120 }
 0x61f   : > { %v6556_v20 = vpop.eup %6555 }
 0x620   : > { %v954_v21 = vsel %vm605_vm3, %v6556_v20, 0.0  ;;  %v1199_v32 = vpop.permute.xlu1 %1198 }
 0x621   : > { %955 = vadd.xlane.f32.xlu0 %v954_v21 }
 0x623   : > { %v6558_v22 = vpop.eup %6557 }
 0x624   : > { %v957_v24 = vsel %vm605_vm3, %v6558_v22, 0.0  ;;  %v1197_v35 = vpop.permute.xlu1 %1196 }
 0x625   : > { %958 = vadd.xlane.f32.xlu0 %v957_v24 }
 0x63b   : > { %1118 = vrot.lane.b32.xlu0 %v6795_v23, %s7657_s16 }
 0x6ae   : > { %v956_v25 = vpop.xlane.xlu0 %955 }
 0x6af   : > { %6559 = vrcp.f32 %v956_v25 }
 0x6b2   : > { %v959_v26 = vpop.xlane.xlu0 %958 }
 0x6b3   : > { %6561 = vrcp.f32 %v959_v26 }
 0x6b6   : > { %v1119_v34 = vpop.permute.xlu0 %1118 }
 0x6b9   : > { %v6560_v29 = vpop.eup %6559 }
 0x6ba   : > { %v962_v30 = vmul.f32 %v6560_v29, %v6556_v20 }
 0x6bc   : > { %6147 = vmatmul.mubr.msk.f32.vlgmr.msra.gmra.mrb[6].mxu1 %vm630_vm5, %v962_v30 }
 0x6bd   : > { %v6562_v31 = vpop.eup %6561  ;;  %6155 = vmatpush3.xpose.msk.msra.mxu1 %vm452_vm2, %v1121_v28  ;;  %6156 = vmatprep.mubr.msk.f32.mxu1 %vm6675_vm1, %v6674_v10 }
 0x6be   : > { %v963_v33 = vmul.f32 %v6562_v31, %v6558_v22  ;;  %6164 = vmatprep.subr.mxu1 %v6674_v10 }
 0x6c0   : > { %6152 = vmatmul.mubr.msk.f32.vlgmr.msra.gmra.mrb[10].mxu0 %vm630_vm5, %v963_v33  ;;  %6157 = vmatmul.mubr.msk.f32.vlgmr.msra.gmra.mrb[8].mxu1 %vm452_vm2, %v1119_v34 }
 0x6c1   : > { %6160 = vmatpush3.xpose.msk.msra.mxu0 %vm452_vm2, %v1199_v32  ;;  %6161 = vmatprep.mubr.msk.f32.mxu0 %vm6675_vm1, %v6674_v10 }
 0x6c2   : > { %6169 = vmatprep.subr.mxu0 %v6674_v10  ;;  %6166 = vmatprep.mubr.msk.f32.mxu1 %vm6675_vm1, %v6674_v10 }
 0x6c4   : > { %6162 = vmatmul.mubr.msk.f32.vlgmr.msra.gmra.mrb[12].mxu0 %vm452_vm2, %v1197_v35 }
 0x6c5   : > { %6171 = vmatprep.mubr.msk.f32.mxu0 %vm6675_vm1, %v6674_v10 }
 0x78f   : > { %v6895_v36 = vpop.f32.mrb[6].mxu1 }
 0x790   : > { %v6148_v37 = vpop.f32.mrb[7].mxu1 }
 0x793   : > { %v6897_v38 = vpop.f32.mrb[10].mxu0  ;;  %v1192_v39 = vpop.f32.mrb[8].mxu1 }
 0x794   : > { %v1792_v40 = vcombine.low %v6895_v36, %v6897_v38  ;;  %v1274_v41 = vmul.f32 0.35355338, %v1192_v39  ;;  %v6153_v42 = vpop.f32.mrb[11].mxu0  ;;  %v6158_v43 = vpop.f32.mrb[9].mxu1 }
 0x796   : > { %v1276_v44 = vsel %vm605_vm3, %v1274_v41, -inf }
 0x797   : > { %1277 = vmax.xlane.f32.xlu0 %v1276_v44  ;;  %v1270_v45 = vpop.f32.mrb[12].mxu0 }
 0x798   : > { %v1275_v46 = vmul.f32 0.35355338, %v1270_v45  ;;  %v6163_v47 = vpop.f32.mrb[13].mxu0  ;;  %v6506_v45 = vld [vmem:[%s7635_s4 + $0x8] sm:$0xff]  }
 0x79a   : > { %v1279_v48 = vsel %vm605_vm3, %v1275_v46, -inf }
 0x79b   : > { %1280 = vmax.xlane.f32.xlu1 %v1279_v48 }
 0x7ac   : > { %1298 = vrot.lane.b32.xlu1 %v6795_v23, %s7655_s17 }
 0x7ad   : > { %1375 = vrot.lane.b32.xlu0 %v6801_v27, %s7655_s17 }
 0x7b0   : > { %1454 = vrot.lane.b32.xlu1 %v6795_v23, %s7653_s18 }
 0x7b4   : > { %1532 = vrot.lane.b32.xlu1 %v6801_v27, %s7653_s18 }
 0x7b8   : > { %1530 = vrot.lane.b32.xlu1 %v6801_v27, %s7651_s19 }
 0x824   : > { %v1278_v49 = vpop.xlane.xlu0 %1277 }
 0x825   : > { %v1282_v50 = vsub.f32 %v1274_v41, %v1278_v49 }
 0x827   : > { %v1284_v51 = vmul.f32 1.442695, %v1282_v50 }
 0x828   : > { %v1376_v52 = vpop.permute.xlu0 %1375  ;;  %v1281_v53 = vpop.xlane.xlu1 %1280 }
 0x829   : > { %6563 = vpow2.f32 %v1284_v51  ;;  %v1283_v54 = vsub.f32 %v1275_v46, %v1281_v53  ;;  %6170 = vmatpush3.msk.msra.mxu0 %vm634_vm4, %v1376_v52 }
 0x82a   : > { %6179 = vmatprep.subr.mxu0 %v6674_v10 }
 0x82b   : > { %v1286_v55 = vmul.f32 1.442695, %v1283_v54 }
 0x82c   : > { %v1299_v56 = vpop.permute.xlu1 %1298 }
 0x82d   : > { %6565 = vpow2.f32 %v1286_v55  ;;  %6165 = vmatpush3.msk.msra.mxu1 %vm634_vm4, %v1299_v56 }
 0x82e   : > { %6174 = vmatprep.subr.mxu1 %v6674_v10 }
 0x830   : > { %v1455_v4 = vpop.permute.xlu1 %1454 }
 0x833   : > { %v6564_v57 = vpop.eup %6563 }
 0x834   : > { %v1288_v58 = vsel %vm605_vm3, %v6564_v57, 0.0  ;;  %v1533_v8 = vpop.permute.xlu1 %1532 }
 0x835   : > { %1289 = vadd.xlane.f32.xlu0 %v1288_v58  ;;  %v5763_v58 = vld [vmem:[%s7636_s5] ss:$0 sm:$0xff] }
 0x837   : > { %v6566_v59 = vpop.eup %6565 }
 0x838   : > { %v1291_v61 = vsel %vm605_vm3, %v6566_v59, 0.0  ;;  %v1531_v12 = vpop.permute.xlu1 %1530 }
 0x839   : > { %1292 = vadd.xlane.f32.xlu0 %v1291_v61 }
 0x84f   : > { %1452 = vrot.lane.b32.xlu0 %v6795_v23, %s7651_s19  ;;  %s7666_s19 = smov 16  }
 0x8c2   : > { %v1290_v63 = vpop.xlane.xlu0 %1289 }
 0x8c3   : > { %6567 = vrcp.f32 %v1290_v63 }
 0x8c6   : > { %v1293_v3 = vpop.xlane.xlu0 %1292 }
 0x8c7   : > { %6569 = vrcp.f32 %v1293_v3 }
 0x8ca   : > { %v1453_v11 = vpop.permute.xlu0 %1452 }
 0x8cd   : > { %v6568_v5 = vpop.eup %6567 }
 0x8ce   : > { %v1296_v6 = vmul.f32 %v6568_v5, %v6564_v57 }
 0x8d0   : > { %6167 = vmatmul.mubr.msk.f32.vlgmr.msra.gmra.mrb[10].mxu1 %vm630_vm5, %v1296_v6 }
 0x8d1   : > { %v6570_v7 = vpop.eup %6569  ;;  %6175 = vmatpush3.xpose.msk.msra.mxu1 %vm452_vm2, %v1455_v4  ;;  %6176 = vmatprep.mubr.msk.f32.mxu1 %vm6675_vm1, %v6674_v10 }
 0x8d2   : > { %v1297_v9 = vmul.f32 %v6570_v7, %v6566_v59  ;;  %6184 = vmatprep.subr.mxu1 %v6674_v10 }
 0x8d4   : > { %6172 = vmatmul.mubr.msk.f32.vlgmr.msra.gmra.mrb[14].mxu0 %vm630_vm5, %v1297_v9  ;;  %6177 = vmatmul.mubr.msk.f32.vlgmr.msra.gmra.mrb[12].mxu1 %vm452_vm2, %v1453_v11 }
 0x8d5   : > { %6180 = vmatpush3.xpose.msk.msra.mxu0 %vm452_vm2, %v1533_v8  ;;  %6181 = vmatprep.mubr.msk.f32.mxu0 %vm6675_vm1, %v6674_v10 }
 0x8d6   : > { %6189 = vmatprep.subr.mxu0 %v6674_v10  ;;  %6186 = vmatprep.mubr.msk.f32.mxu1 %vm6675_vm1, %v6674_v10 }
 0x8d8   : > { %6182 = vmatmul.mubr.msk.f32.vlgmr.msra.gmra.mrb[16].mxu0 %vm452_vm2, %v1531_v12 }
 0x8d9   : > { %6191 = vmatprep.mubr.msk.f32.mxu0 %vm6675_vm1, %v6674_v10 }
 0x9a3   : > { %v1371_v13 = vpop.f32.mrb[10].mxu1 }
 0x9a4   : > { %v6168_v14 = vpop.f32.mrb[11].mxu1 }
 0x9a7   : > { %v1448_v15 = vpop.f32.mrb[14].mxu0  ;;  %v1526_v16 = vpop.f32.mrb[12].mxu1 }
 0x9a8   : > { %v1798_v17 = vcombine.low %v1371_v13, %v1448_v15  ;;  %v1608_v18 = vmul.f32 0.35355338, %v1526_v16  ;;  %v6173_v19 = vpop.f32.mrb[15].mxu0  ;;  %v6178_v20 = vpop.f32.mrb[13].mxu1 }
 0x9aa   : > { %v1610_v21 = vsel %vm605_vm3, %v1608_v18, -inf }
 0x9ab   : > { %1611 = vmax.xlane.f32.xlu0 %v1610_v21  ;;  %v1604_v22 = vpop.f32.mrb[16].mxu0 }
 0x9ac   : > { %v1609_v24 = vmul.f32 0.35355338, %v1604_v22  ;;  %v6183_v25 = vpop.f32.mrb[17].mxu0 }
 0x9ad   : > { %v6508_v25 = vld [vmem:[%s7637_s6 + $0x8] sm:$0xff]  }
 0x9ae   : > { %v1613_v26 = vsel %vm605_vm3, %v1609_v24, -inf }
 0x9af   : > { %1614 = vmax.xlane.f32.xlu1 %v1613_v26  ;;  %v6510_v26 = vld [vmem:[%s7639_s8 + $0x8] sm:$0xff]  }
 0x9c0   : > { %1632 = vrot.lane.b32.xlu1 %v6795_v23, %s7649_s20 }
 0x9c4   : > { %1793 = vrot.lane.b32.xlu1 %v1792_v40, %s7647_s22  ;;  %s7665_s22 = smov 8  }
 0x9c8   : > { %1799 = vrot.lane.b32.xlu1 %v1798_v17, %s7645_s23  ;;  %s7671_s23 = smov 48  }
 0xa38   : > { %v1612_v28 = vpop.xlane.xlu0 %1611 }
 0xa39   : > { %v1616_v29 = vsub.f32 %v1608_v18, %v1612_v28  ;;  %v6511_v28 = vld [vmem:[%s7639_s8 + $0x10] sm:$0xff]  }
 0xa3b   : > { %v1618_v30 = vmul.f32 1.442695, %v1616_v29  ;;  %v6512_v29 = vld [vmem:[%s7639_s8 + $0x18] sm:$0xff]  }
 0xa3c   : > { %v1615_v31 = vpop.xlane.xlu1 %1614 }
 0xa3d   : > { %6571 = vpow2.f32 %v1618_v30  ;;  %v1617_v32 = vsub.f32 %v1609_v24, %v1615_v31  ;;  %v6507_v24 = vld [vmem:[%s7637_s6] sm:$0xff]   ;;  %v6514_v31 = vld [vmem:[%s7639_s8 + $0x28] sm:$0xff]  }
 0xa3e   : > { %v6513_v30 = vld [vmem:[%s7639_s8 + $0x20] sm:$0xff]  }
 0xa3f   : > { %v1620_v33 = vmul.f32 1.442695, %v1617_v32 }
 0xa40   : > { %v1633_v34 = vpop.permute.xlu1 %1632 }
 0xa41   : > { %6573 = vpow2.f32 %v1620_v33  ;;  %6185 = vmatpush3.msk.msra.mxu1 %vm634_vm4, %v1633_v34 }
 0xa42   : > { %6210 = vmatprep.subr.bf16.mxu1 %v6674_v10 }
 0xa44   : > { %v1794_v51 = vpop.permute.xlu1 %1793 }
 0xa45   : > { %v1808_v53 = vsel %vm452_vm2, %v1788_v1, %v1794_v51  ;;  %v5771_v51 = vld [vmem:[%s7640_s9] ss:$0 sm:$0xff] }
 0xa47   : > { %v6572_v23 = vpop.eup %6571 }
 0xa48   : > { %v1622_v35 = vsel %vm605_vm3, %v6572_v23, 0.0  ;;  %v1800_v52 = vpop.permute.xlu1 %1799 }
 0xa49   : > { %1623 = vadd.xlane.f32.xlu0 %v1622_v35  ;;  %v1810_v54 = vsel %vm1809_vm6, %v1808_v53, %v1800_v52 }
 0xa4b   : > { %v6574_v36 = vpop.eup %6573 }
 0xa4c   : > { %v1625_v37 = vsel %vm605_vm3, %v6574_v36, 0.0 }
 0xa4d   : > { %1626 = vadd.xlane.f32.xlu0 %v1625_v37 }
 0xa63   : > { %1709 = vrot.lane.b32.xlu0 %v6801_v27, %s7649_s20  ;;  %v6505_v27 = vld [vmem:[%s7635_s4] sm:$0xff]   ;;  %s7670_s20 = smov 112  }
 0xad6   : > { %v1624_v38 = vpop.xlane.xlu0 %1623 }
 0xad7   : > { %6575 = vrcp.f32 %v1624_v38 }
 0xada   : > { %v1627_v39 = vpop.xlane.xlu0 %1626 }
 0xadb   : > { %6577 = vrcp.f32 %v1627_v39 }
 0xade   : > { %v1710_v40 = vpop.permute.xlu0 %1709 }
 0xadf   : > { %6190 = vmatpush3.msk.msra.mxu0 %vm634_vm4, %v1710_v40 }
 0xae0   : > { %6194 = vmatprep.subr.bf16.mxu0 %v6674_v10 }
 0xae1   : > { %v6576_v41 = vpop.eup %6575 }
 0xae2   : > { %v1630_v42 = vmul.f32 %v6576_v41, %v6572_v23  ;;  %v358_v23 = vld [vmem:[%s7632_s1 + $0x8] sm:$0xff] }
 0xae3   : > { %v1916_v35 = vadd.f32 1.0, %v358_v23 }
 0xae4   : > { %6187 = vmatmul.mubr.msk.f32.vlgmr.msra.gmra.mrb[14].mxu1 %vm630_vm5, %v1630_v42  ;;  %v6515_v42 = vld [vmem:[%s7639_s8 + $0x30] sm:$0xff]  }
 0xae5   : > { %v6578_v43 = vpop.eup %6577  ;;  %6226 = vmatprep.mubr.msk.bf16.mxu1 %vm6675_vm1, %v6674_v10 }
 0xae6   : > { %v1631_v44 = vmul.f32 %v6578_v43, %v6574_v36  ;;  %v6516_v43 = vld [vmem:[%s7639_s8 + $0x38] sm:$0xff]  }
 0xae8   : > { %6192 = vmatmul.mubr.msk.f32.vlgmr.msra.gmra.mrb[18].mxu0 %vm630_vm5, %v1631_v44  ;;  %v5767_v44 = vld [vmem:[%s7638_s7] ss:$0 sm:$0xff] }
 0xae9   : > { %6198 = vmatprep.mubr.msk.bf16.mxu0 %vm6675_vm1, %v6674_v10  ;;  %6195 = vmatpush3.bf16.msra.mxu0 %v6505_v27 }
 0xaea   : > { %6196 = vmatprep.subr.bf16.mxu0 %v6674_v10 }
 0xaed   : > { %6197 = vmatpush3.bf16.msra.mxu0 %v6506_v45 }
 0xaee   : > { %6202 = vmatprep.subr.bf16.mxu0 %v6674_v10 }
 0xbb7   : > { %v1705_v46 = vpop.f32.mrb[14].mxu1 }
 0xbb8   : > { %v6188_v47 = vpop.f32.mrb[15].mxu1 }
 0xbbb   : > { %v1782_v48 = vpop.f32.mrb[18].mxu0 }
 0xbbc   : > { %v1804_v49 = vcombine.low %v1705_v46, %v1782_v48  ;;  %v6193_v50 = vpop.f32.mrb[19].mxu0 }
 0xbbe   : > { %1805 = vrot.lane.b32.xlu0 %v1804_v49, %s7643_s15  ;;  %s7663_s15 = smov 104  }
 0xc30   : > { %v1806_v55 = vpop.permute.xlu0 %1805 }
 0xc31   : > { %v1812_v56 = vsel %vm1811_vm7, %v1810_v54, %v1806_v55 }
 0xc32   : > { %v1813_v57 = vpack.c.bf16 %v1812_v56, %v1812_v56 }
 0xc34   : > { %6199 = vmatmul.mubr.msk.bf16.vlgmr.msra.gmra.mrb[20].mxu0 %vm359_vm0, %v1813_v57 }
 0xc35   : > { %6206 = vmatprep.mubr.msk.bf16.mxu0 %vm6675_vm1, %v6674_v10  ;;  %6203 = vmatpush3.bf16.msra.mxu0 %v6507_v24 }
 0xc36   : > { %6204 = vmatprep.subr.bf16.mxu0 %v6674_v10 }
 0xc39   : > { %6205 = vmatpush3.bf16.msra.mxu0 %v6508_v25 }
 0xc3a   : > { %6230 = vmatprep.subr.bf16.mxu0 %v6674_v10 }
 0xd07   : > { %v1874_v59 = vpop.f32.mrb[20].mxu0 }
 0xd08   : > { %v1875_v61 = vadd.f32 %v5763_v58, %v1874_v59  ;;  %v6200_v60 = vpop.f32.mrb[21].mxu0 }
 0xd09   : > { %v1877_v62 = vpop.f32.mrb[22].mxu0 }
 0xd0a   : > { %1881 = vrot.lane.b32.xlu1 %v1875_v61, %s6676_s28  ;;  %v6201_v1 = vpop.f32.mrb[23].mxu0 }
 0xd7c   : > { %v1882_v63 = vpop.permute.xlu1 %1881 }
 0xd7d   : > { %v1884_v3 = vmul.f32 %v1882_v63, %v6768_v2 }
 0xd7f   : > { %1886 = vrot.lane.b32.xlu0 %v1884_v3, %s6676_s28 }
 0xdf1   : > { %v1887_v4 = vpop.permute.xlu0 %1886 }
 0xdf2   : > { %v1889_v5 = vadd.f32 %v1887_v4, %v6761_v0 }
 0xdf4   : > { %v1890_v6 = vsel %vm359_vm0, %v1889_v5, 0.0 }
 0xdf5   : > { %1891 = vadd.xlane.f32.xlu1 %v1890_v6 }
 0xe82   : > { %v1892_v7 = vpop.xlane.xlu1 %1891 }
 0xe83   : > { %v1893_v8 = vmul.f32 0.03125, %v1892_v7 }
 0xe85   : > { %v1894_v9 = vsub.f32 %v1889_v5, %v1893_v8 }
 0xe87   : > { %v1895_v11 = vmul.f32 %v1894_v9, %v1894_v9 }
 0xe89   : > { %v1896_v12 = vsel %vm359_vm0, %v1895_v11, 0.0 }
 0xe8a   : > { %1897 = vadd.xlane.f32.xlu0 %v1896_v12  ;;  %v7061_v12 = vld [vmem:[%s7632_s1 + $0x10] sm:$0xff] }
 0xf17   : > { %v1898_v13 = vpop.xlane.xlu0 %1897 }
 0xf18   : > { %v1899_v14 = vmul.f32 0.03125, %v1898_v13  ;;  %v2142_v13 = vadd.f32 1.0, %v7061_v12 }
 0xf1a   : > { %v1900_v15 = vadd.f32 1e-06, %v1899_v14 }
 0xf1c   : > { %6579 = vrsqrt.f32 %v1900_v15 }
 0xf26   : > { %v6580_v16 = vpop.eup %6579 }
 0xf27   : > { %v6987_v17 = vmul.f32 %v6580_v16, %v1894_v9 }
 0xf29   : > { %v1903_v0 = vsel %vm359_vm0, %v6987_v17, 0.0 }
 0xf2a   : > { %1904 = vadd.xlane.f32.xlu0 %v1903_v0 }
 0xf40   : > { %1919 = vrot.lane.b32.xlu0 %v6768_v2, %s6689_s26  ;;  %v6509_v2 = vld [vmem:[%s7639_s8] sm:$0xff]  }
 0xf41   : > { %6211 = vmatpush3.bf16.msra.mxu1 %v6509_v2 }
 0xf42   : > { %6212 = vmatprep.subr.bf16.mxu1 %v6674_v10 }
 0xf45   : > { %6213 = vmatpush3.bf16.msra.mxu1 %v6510_v26 }
 0xf46   : > { %6214 = vmatprep.subr.bf16.mxu1 %v6674_v10 }
 0xf49   : > { %6215 = vmatpush3.bf16.msra.mxu1 %v6511_v28 }
 0xf4a   : > { %6216 = vmatprep.subr.bf16.mxu1 %v6674_v10 }
 0xf4d   : > { %6217 = vmatpush3.bf16.msra.mxu1 %v6512_v29 }
 0xf4e   : > { %6218 = vmatprep.subr.bf16.mxu1 %v6674_v10 }
 0xf51   : > { %6219 = vmatpush3.bf16.msra.mxu1 %v6513_v30  ;;  %v5787_v30 = vld [vmem:[%s7634_s3 + $0x1] ss:$0 sm:$0xff] }
 0xf52   : > { %6220 = vmatprep.subr.bf16.mxu1 %v6674_v10 }
 0xf55   : > { %6221 = vmatpush3.bf16.msra.mxu1 %v6514_v31 }
 0xf56   : > { %6222 = vmatprep.subr.bf16.mxu1 %v6674_v10 }
 0xf59   : > { %6223 = vmatpush3.bf16.msra.mxu1 %v6515_v42 }
 0xf5a   : > { %6224 = vmatprep.subr.bf16.mxu1 %v6674_v10 }
 0xf5d   : > { %6225 = vmatpush3.bf16.msra.mxu1 %v6516_v43 }
 0xf5e   : > { %6268 = vmatprep.subr.mxu1 %v6674_v10 }
 0xfb7   : > { %v1905_v18 = vpop.xlane.xlu0 %1904 }
 0xfb8   : > { %v1906_v19 = vmul.f32 0.03125, %v1905_v18  ;;  %v6517_v18 = vld [vmem:[%s7633_s2 + $0x10] sm:$0xff]  }
 0xfba   : > { %v1907_v20 = vsub.f32 %v6987_v17, %v1906_v19  ;;  %v6518_v19 = vld [vmem:[%s7633_s2 + $0x18] sm:$0xff]  }
 0xfbb   : > { %v1920_v38 = vpop.permute.xlu0 %1919 }
 0xfbc   : > { %v1908_v21 = vmul.f32 %v1907_v20, %v1907_v20 }
 0xfbe   : > { %v1909_v22 = vsel %vm359_vm0, %v1908_v21, 0.0 }
 0xfbf   : > { %1910 = vadd.xlane.f32.xlu1 %v1909_v22 }
0x104c   : > { %v1911_v32 = vpop.xlane.xlu1 %1910 }
0x104d   : > { %v1912_v33 = vmul.f32 0.03125, %v1911_v32 }
0x104f   : > { %v1913_v34 = vadd.f32 1e-06, %v1912_v33 }
0x1051   : > { %6581 = vrsqrt.f32 %v1913_v34 }
0x105b   : > { %v6582_v36 = vpop.eup %6581 }
0x105c   : > { %v1915_v37 = vmul.f32 %v6582_v36, %v1907_v20 }
0x105e   : > { %v1917_v39 = vmul.f32 %v1916_v35, %v1915_v37 }
0x1060   : > { %v1922_v40 = vadd.f32 %v1920_v38, %v1917_v39 }
0x1062   : > { %v1923_v41 = vpack.c.bf16 %v1922_v40, %v1922_v40 }
0x1064   : > { %6207 = vmatmul.mubr.msk.bf16.vlgmr.msra.gmra.mrb[24].mxu0 %vm359_vm0, %v1923_v41 }
0x1065   : > { %6234 = vmatprep.mubr.msk.bf16.mxu0 %vm6675_vm1, %v6674_v10  ;;  %6231 = vmatpush3.bf16.msra.mxu0 %v6517_v18 }
0x1066   : > { %6232 = vmatprep.subr.bf16.mxu0 %v6674_v10 }
0x1069   : > { %6233 = vmatpush3.bf16.msra.mxu0 %v6518_v19 }
0x106a   : > { %6238 = vmatprep.subr.mxu0 %v6674_v10 }
0x1137   : > { %v1984_v27 = vpop.f32.mrb[24].mxu0 }
0x1138   : > { %v1985_v45 = vadd.f32 %v5767_v44, %v1984_v27  ;;  %v6208_v46 = vpop.f32.mrb[25].mxu0 }
0x1139   : > { %v1987_v47 = vpop.f32.mrb[26].mxu0 }
0x113a   : > { %v1990_v48 = vmax.f32 %v1985_v45, 0.0  ;;  %v6209_v49 = vpop.f32.mrb[27].mxu0 }
0x113c   : > { %v1991_v50 = vpack.c.bf16 %v1990_v48, %v1990_v48 }
0x113e   : > { %6227 = vmatmul.mubr.bf16.vlgmr.msra.gmra.mrb[16].mxu1 %v1991_v50 }
0x113f   : > { %6270 = vmatprep.mubr.msk.f32.mxu1 %vm6675_vm1, %v6674_v10 }
0x1211   : > { %v2097_v52 = vpop.f32.mrb[16].mxu1 }
0x1212   : > { %v2098_v53 = vadd.f32 %v5771_v51, %v2097_v52  ;;  %v6228_v54 = vpop.f32.mrb[17].mxu1 }
0x1213   : > { %v2100_v55 = vpop.f32.mrb[18].mxu1 }
0x1214   : > { %2104 = vrot.lane.b32.xlu1 %v2098_v53, %s6689_s26  ;;  %v6229_v56 = vpop.f32.mrb[19].mxu1 }
0x1286   : > { %v2105_v57 = vpop.permute.xlu1 %2104 }
0x1287   : > { %v2107_v58 = vmul.f32 %v2105_v57, %v358_v23 }
0x1289   : > { %2109 = vrot.lane.b32.xlu1 %v2107_v58, %s6673_s21 }
0x12fb   : > { %v2110_v59 = vpop.permute.xlu1 %2109 }
0x12fc   : > { %v2112_v61 = vadd.f32 %v2110_v59, %v6987_v17 }
0x12fe   : > { %v2113_v60 = vsel %vm359_vm0, %v2112_v61, 0.0 }
0x12ff   : > { %2114 = vadd.xlane.f32.xlu0 %v2113_v60 }
0x138c   : > { %v2115_v62 = vpop.xlane.xlu0 %2114 }
0x138d   : > { %v2116_v1 = vmul.f32 0.03125, %v2115_v62 }
0x138f   : > { %v2117_v63 = vsub.f32 %v2112_v61, %v2116_v1 }
0x1391   : > { %v2118_v3 = vmul.f32 %v2117_v63, %v2117_v63 }
0x1393   : > { %v2119_v4 = vsel %vm359_vm0, %v2118_v3, 0.0 }
0x1394   : > { %2120 = vadd.xlane.f32.xlu1 %v2119_v4 }
0x13a5   : > { %2144 = vrot.lane.b32.xlu1 %v2142_v13, %s6673_s21 }
0x1421   : > { %v2121_v5 = vpop.xlane.xlu1 %2120 }
0x1422   : > { %v2122_v6 = vmul.f32 0.03125, %v2121_v5 }
0x1424   : > { %v2123_v7 = vadd.f32 1e-06, %v2122_v6 }
0x1425   : > { %v2145_v25 = vpop.permute.xlu1 %2144 }
0x1426   : > { %6583 = vrsqrt.f32 %v2123_v7 }
0x1430   : > { %v6584_v8 = vpop.eup %6583 }
0x1431   : > { %v7054_v9 = vmul.f32 %v6584_v8, %v2117_v63 }
0x1433   : > { %v2129_v11 = vsel %vm359_vm0, %v7054_v9, 0.0 }
0x1434   : > { %2130 = vadd.xlane.f32.xlu0 %v2129_v11 }
0x14c1   : > { %v2131_v14 = vpop.xlane.xlu0 %2130 }
0x14c2   : > { %v2132_v15 = vmul.f32 0.03125, %v2131_v14 }
0x14c4   : > { %v2133_v16 = vsub.f32 %v7054_v9, %v2132_v15 }
0x14c6   : > { %v2134_v17 = vmul.f32 %v2133_v16, %v2133_v16 }
0x14c8   : > { %v2135_v0 = vsel %vm359_vm0, %v2134_v17, 0.0 }
0x14c9   : > { %2136 = vadd.xlane.f32.xlu0 %v2135_v0 }
0x1556   : > { %v2137_v20 = vpop.xlane.xlu0 %2136 }
0x1557   : > { %v2138_v21 = vmul.f32 0.03125, %v2137_v20 }
0x1559   : > { %v2139_v22 = vadd.f32 1e-06, %v2138_v21 }
0x155b   : > { %6585 = vrsqrt.f32 %v2139_v22 }
0x1565   : > { %v6586_v24 = vpop.eup %6585 }
0x1566   : > { %v2141_v2 = vmul.f32 %v6586_v24, %v2133_v16 }
0x1568   : > { %v2147_v26 = vmul.f32 %v2145_v25, %v2141_v2 }
0x156a   : > { %v2148_v28 = vadd.f32 %v7061_v12, %v2147_v26 }
0x156c   : > { %v2149_v29 = vpack.c.bf16 %v2148_v28, %v2148_v28 }
0x156e   : > { %6235 = vmatmul.mubr.msk.bf16.vlgmr.msra.gmra.mrb[28].mxu0 %vm359_vm0, %v2149_v29 }
0x156f   : > { %6240 = vmatprep.mubr.msk.f32.mxu0 %vm6675_vm1, %v6674_v10 }
0x1641   : > { %v2212_v31 = vpop.f32.mrb[28].mxu0 }
0x1642   : > { %v7082_v32 = vadd.f32 %v5787_v30, %v2212_v31  ;;  %v6236_v33 = vpop.f32.mrb[29].mxu0 }
0x1643   : > { %v2215_v34 = vpop.f32.mrb[30].mxu0 }
0x1644   : > { %2220 = vrot.lane.b32.xlu0 %v7082_v32, %s6673_s21  ;;  %v6237_v23 = vpop.f32.mrb[31].mxu0  ;;  %v7088_v35 = vcombine.high %v7082_v32, %v7082_v32 }
0x1646   : > { %2296 = vrot.lane.b32.xlu1 %v7088_v35, %s6673_s21 }
0x16b6   : > { %v2221_v36 = vpop.permute.xlu0 %2220 }
0x16b7   : > { %6239 = vmatpush3.xpose.msk.msra.mxu0 %vm452_vm2, %v2221_v36 }
0x16b8   : > { %6243 = vmatprep.subr.mxu0 %v6674_v10  ;;  %v2297_v37 = vpop.permute.xlu1 %2296 }
0x16ba   : > { %6241 = vmatmul.mubr.msk.f32.vlgmr.msra.gmra.mrb[32].mxu0 %vm452_vm2, %v7082_v32 }
0x16bb   : > { %6244 = vmatpush3.xpose.msk.msra.mxu0 %vm452_vm2, %v2297_v37  ;;  %6245 = vmatprep.mubr.msk.f32.mxu0 %vm6675_vm1, %v6674_v10 }
0x16bc   : > { %6248 = vmatprep.subr.mxu0 %v6674_v10 }
0x16be   : > { %6246 = vmatmul.mubr.msk.f32.vlgmr.msra.gmra.mrb[34].mxu0 %vm452_vm2, %v7088_v35 }
0x16bf   : > { %6250 = vmatprep.mubr.msk.f32.mxu0 %vm6675_vm1, %v6674_v10 }
0x178d   : > { %v2292_v38 = vpop.f32.mrb[32].mxu0 }
0x178e   : > { %v2372_v39 = vmul.f32 0.35355338, %v2292_v38  ;;  %v6242_v40 = vpop.f32.mrb[33].mxu0 }
0x1790   : > { %v2374_v41 = vsel %vm605_vm3, %v2372_v39, -inf }
0x1791   : > { %2375 = vmax.xlane.f32.xlu1 %v2374_v41  ;;  %v2368_v42 = vpop.f32.mrb[34].mxu0 }
0x1792   : > { %v2373_v43 = vmul.f32 0.35355338, %v2368_v42  ;;  %v6247_v44 = vpop.f32.mrb[35].mxu0 }
0x1794   : > { %v2377_v27 = vsel %vm605_vm3, %v2373_v43, -inf }
0x1795   : > { %2378 = vmax.xlane.f32.xlu0 %v2377_v27 }
0x17a2   : > { %2473 = vrot.lane.b32.xlu1 %v7088_v35, %s6676_s28 }
0x17a6   : > { %2552 = vrot.lane.b32.xlu1 %v7082_v32, %s6677_s29 }
0x181e   : > { %v2376_v45 = vpop.xlane.xlu1 %2375 }
0x181f   : > { %v2380_v46 = vsub.f32 %v2372_v39, %v2376_v45 }
0x1821   : > { %v2382_v47 = vmul.f32 1.442695, %v2380_v46 }
0x1822   : > { %v2379_v48 = vpop.xlane.xlu0 %2378  ;;  %v2474_v55 = vpop.permute.xlu1 %2473 }
0x1823   : > { %6587 = vpow2.f32 %v2382_v47  ;;  %v2381_v49 = vsub.f32 %v2373_v43, %v2379_v48 }
0x1825   : > { %v2384_v50 = vmul.f32 1.442695, %v2381_v49 }
0x1826   : > { %v2553_v56 = vpop.permute.xlu1 %2552 }
0x1827   : > { %6589 = vpow2.f32 %v2384_v50 }
0x182d   : > { %v6588_v51 = vpop.eup %6587 }
0x182e   : > { %v2386_v52 = vsel %vm605_vm3, %v6588_v51, 0.0 }
0x182f   : > { %2387 = vadd.xlane.f32.xlu0 %v2386_v52 }
0x1831   : > { %v6590_v53 = vpop.eup %6589 }
0x1832   : > { %v2389_v54 = vsel %vm605_vm3, %v6590_v53, 0.0 }
0x1833   : > { %2390 = vadd.xlane.f32.xlu1 %v2389_v54 }
0x1844   : > { %2630 = vrot.lane.b32.xlu1 %v7088_v35, %s6677_s29 }
0x1845   : > { %2396 = vrot.lane.b32.xlu0 %v7082_v32, %s6676_s28 }
0x1849   : > { %2550 = vrot.lane.b32.xlu0 %v7082_v32, %s6678_s30 }
0x184d   : > { %2628 = vrot.lane.b32.xlu0 %v7088_v35, %s6678_s30 }
0x18bc   : > { %v2388_v57 = vpop.xlane.xlu0 %2387 }
0x18bd   : > { %6591 = vrcp.f32 %v2388_v57 }
0x18c0   : > { %v2391_v58 = vpop.xlane.xlu1 %2390  ;;  %v2397_v59 = vpop.permute.xlu0 %2396 }
0x18c1   : > { %6593 = vrcp.f32 %v2391_v58  ;;  %6249 = vmatpush3.msk.msra.mxu0 %vm634_vm4, %v2397_v59 }
0x18c2   : > { %6253 = vmatprep.subr.mxu0 %v6674_v10 }
0x18c4   : > { %v2551_v63 = vpop.permute.xlu0 %2550  ;;  %v2631_v3 = vpop.permute.xlu1 %2630 }
0x18c7   : > { %v6592_v61 = vpop.eup %6591 }
0x18c8   : > { %v2394_v60 = vmul.f32 %v6592_v61, %v6588_v51  ;;  %v2629_v4 = vpop.permute.xlu0 %2628 }
0x18ca   : > { %6251 = vmatmul.mubr.msk.f32.vlgmr.msra.gmra.mrb[36].mxu0 %vm630_vm5, %v2394_v60 }
0x18cb   : > { %v6594_v62 = vpop.eup %6593  ;;  %6254 = vmatpush3.msk.msra.mxu0 %vm634_vm4, %v2474_v55  ;;  %6255 = vmatprep.mubr.msk.f32.mxu0 %vm6675_vm1, %v6674_v10 }
0x18cc   : > { %v2395_v1 = vmul.f32 %v6594_v62, %v6590_v53  ;;  %6258 = vmatprep.subr.mxu0 %v6674_v10 }
0x18ce   : > { %6256 = vmatmul.mubr.msk.f32.vlgmr.msra.gmra.mrb[38].mxu0 %vm630_vm5, %v2395_v1 }
0x18cf   : > { %6260 = vmatprep.mubr.msk.f32.mxu0 %vm6675_vm1, %v6674_v10 }
0x18d2   : > { %6259 = vmatpush3.xpose.msk.msra.mxu0 %vm452_vm2, %v2553_v56 }
0x18d3   : > { %6263 = vmatprep.subr.mxu0 %v6674_v10 }
0x18d5   : > { %6261 = vmatmul.mubr.msk.f32.vlgmr.msra.gmra.mrb[40].mxu0 %vm452_vm2, %v2551_v63 }
0x18d6   : > { %6264 = vmatpush3.xpose.msk.msra.mxu0 %vm452_vm2, %v2631_v3  ;;  %6265 = vmatprep.mubr.msk.f32.mxu0 %vm6675_vm1, %v6674_v10 }
0x18d7   : > { %6273 = vmatprep.subr.mxu0 %v6674_v10 }
0x18d9   : > { %6266 = vmatmul.mubr.msk.f32.vlgmr.msra.gmra.mrb[42].mxu0 %vm452_vm2, %v2629_v4 }
0x18da   : > { %6275 = vmatprep.mubr.msk.f32.mxu0 %vm6675_vm1, %v6674_v10 }
0x199d   : > { %v7140_v5 = vpop.f32.mrb[36].mxu0 }
0x199e   : > { %v6252_v6 = vpop.f32.mrb[37].mxu0 }
0x19a1   : > { %v7142_v7 = vpop.f32.mrb[38].mxu0 }
0x19a2   : > { %v3554_v8 = vcombine.low %v7140_v5, %v7142_v7  ;;  %v6257_v11 = vpop.f32.mrb[39].mxu0 }
0x19a8   : > { %v2624_v13 = vpop.f32.mrb[40].mxu0 }
0x19a9   : > { %v2706_v14 = vmul.f32 0.35355338, %v2624_v13  ;;  %v6262_v15 = vpop.f32.mrb[41].mxu0 }
0x19ab   : > { %v2708_v16 = vsel %vm605_vm3, %v2706_v14, -inf }
0x19ac   : > { %2709 = vmax.xlane.f32.xlu1 %v2708_v16  ;;  %v2702_v17 = vpop.f32.mrb[42].mxu0 }
0x19ad   : > { %v2707_v0 = vmul.f32 0.35355338, %v2702_v17  ;;  %v6267_v18 = vpop.f32.mrb[43].mxu0 }
0x19af   : > { %v2711_v19 = vsel %vm605_vm3, %v2707_v0, -inf }
0x19b0   : > { %2712 = vmax.xlane.f32.xlu0 %v2711_v19 }
0x19bd   : > { %2807 = vrot.lane.b32.xlu1 %v7088_v35, %s7661_s11 }
0x19c1   : > { %2886 = vrot.lane.b32.xlu1 %v7082_v32, %s7659_s12 }
0x19c6   : > { %2730 = vrot.lane.b32.xlu0 %v7082_v32, %s7661_s11 }
0x19ca   : > { %2964 = vrot.lane.b32.xlu0 %v7088_v35, %s7659_s12 }
0x1a39   : > { %v2710_v20 = vpop.xlane.xlu1 %2709 }
0x1a3a   : > { %v2714_v21 = vsub.f32 %v2706_v14, %v2710_v20 }
0x1a3c   : > { %v2716_v22 = vmul.f32 1.442695, %v2714_v21 }
0x1a3d   : > { %v2808_v24 = vpop.permute.xlu1 %2807  ;;  %v2713_v25 = vpop.xlane.xlu0 %2712 }
0x1a3e   : > { %6595 = vpow2.f32 %v2716_v22  ;;  %v2715_v2 = vsub.f32 %v2707_v0, %v2713_v25  ;;  %6274 = vmatpush3.msk.msra.mxu0 %vm634_vm4, %v2808_v24 }
0x1a3f   : > { %6283 = vmatprep.subr.mxu0 %v6674_v10 }
0x1a40   : > { %v2718_v26 = vmul.f32 1.442695, %v2715_v2 }
0x1a41   : > { %v2731_v28 = vpop.permute.xlu0 %2730  ;;  %v2887_v23 = vpop.permute.xlu1 %2886 }
0x1a42   : > { %6597 = vpow2.f32 %v2718_v26  ;;  %6269 = vmatpush3.msk.msra.mxu1 %vm634_vm4, %v2731_v28 }
0x1a43   : > { %6278 = vmatprep.subr.mxu1 %v6674_v10 }
0x1a45   : > { %v2965_v34 = vpop.permute.xlu0 %2964 }
0x1a48   : > { %v6596_v29 = vpop.eup %6595 }
0x1a49   : > { %v2720_v30 = vsel %vm605_vm3, %v6596_v29, 0.0 }
0x1a4a   : > { %2721 = vadd.xlane.f32.xlu0 %v2720_v30 }
0x1a4c   : > { %v6598_v31 = vpop.eup %6597 }
0x1a4d   : > { %v2723_v33 = vsel %vm605_vm3, %v6598_v31, 0.0 }
0x1a4e   : > { %2724 = vadd.xlane.f32.xlu1 %v2723_v33 }
0x1a5f   : > { %2884 = vrot.lane.b32.xlu1 %v7082_v32, %s7657_s16 }
0x1a60   : > { %2962 = vrot.lane.b32.xlu0 %v7088_v35, %s7657_s16  ;;  %s7672_s16 = smov 72  }
0x1ad7   : > { %v2722_v36 = vpop.xlane.xlu0 %2721 }
0x1ad8   : > { %6599 = vrcp.f32 %v2722_v36 }
0x1adb   : > { %v2725_v37 = vpop.xlane.xlu1 %2724  ;;  %v2963_v43 = vpop.permute.xlu0 %2962 }
0x1adc   : > { %6601 = vrcp.f32 %v2725_v37 }
0x1adf   : > { %v2885_v42 = vpop.permute.xlu1 %2884 }
0x1ae2   : > { %v6600_v38 = vpop.eup %6599 }
0x1ae3   : > { %v2728_v39 = vmul.f32 %v6600_v38, %v6596_v29 }
0x1ae5   : > { %6271 = vmatmul.mubr.msk.f32.vlgmr.msra.gmra.mrb[20].mxu1 %vm630_vm5, %v2728_v39 }
0x1ae6   : > { %v6602_v40 = vpop.eup %6601  ;;  %6279 = vmatpush3.xpose.msk.msra.mxu1 %vm452_vm2, %v2887_v23  ;;  %6280 = vmatprep.mubr.msk.f32.mxu1 %vm6675_vm1, %v6674_v10 }
0x1ae7   : > { %v2729_v41 = vmul.f32 %v6602_v40, %v6598_v31  ;;  %6288 = vmatprep.subr.mxu1 %v6674_v10 }
0x1ae9   : > { %6276 = vmatmul.mubr.msk.f32.vlgmr.msra.gmra.mrb[44].mxu0 %vm630_vm5, %v2729_v41  ;;  %6281 = vmatmul.mubr.msk.f32.vlgmr.msra.gmra.mrb[22].mxu1 %vm452_vm2, %v2885_v42 }
0x1aea   : > { %6284 = vmatpush3.xpose.msk.msra.mxu0 %vm452_vm2, %v2965_v34  ;;  %6285 = vmatprep.mubr.msk.f32.mxu0 %vm6675_vm1, %v6674_v10 }
0x1aeb   : > { %6293 = vmatprep.subr.mxu0 %v6674_v10  ;;  %6290 = vmatprep.mubr.msk.f32.mxu1 %vm6675_vm1, %v6674_v10 }
0x1aed   : > { %6286 = vmatmul.mubr.msk.f32.vlgmr.msra.gmra.mrb[46].mxu0 %vm452_vm2, %v2963_v43 }
0x1aee   : > { %6295 = vmatprep.mubr.msk.f32.mxu0 %vm6675_vm1, %v6674_v10 }
0x1bb8   : > { %v7182_v44 = vpop.f32.mrb[20].mxu1 }
0x1bb9   : > { %v6272_v27 = vpop.f32.mrb[21].mxu1 }
0x1bbc   : > { %v7184_v45 = vpop.f32.mrb[44].mxu0  ;;  %v2958_v46 = vpop.f32.mrb[22].mxu1 }
0x1bbd   : > { %v3558_v47 = vcombine.low %v7182_v44, %v7184_v45  ;;  %v3040_v48 = vmul.f32 0.35355338, %v2958_v46  ;;  %v6277_v49 = vpop.f32.mrb[45].mxu0  ;;  %v6282_v50 = vpop.f32.mrb[23].mxu1 }
0x1bbf   : > { %v3042_v51 = vsel %vm605_vm3, %v3040_v48, -inf }
0x1bc0   : > { %3043 = vmax.xlane.f32.xlu1 %v3042_v51  ;;  %v3036_v52 = vpop.f32.mrb[46].mxu0 }
0x1bc1   : > { %v3041_v53 = vmul.f32 0.35355338, %v3036_v52  ;;  %v6287_v54 = vpop.f32.mrb[47].mxu0  ;;  %v6520_v52 = vld [vmem:[%s7635_s4 + $0x18] sm:$0xff]  }
0x1bc3   : > { %v3045_v55 = vsel %vm605_vm3, %v3041_v53, -inf }
0x1bc4   : > { %3046 = vmax.xlane.f32.xlu0 %v3045_v55 }
0x1bd1   : > { %3141 = vrot.lane.b32.xlu1 %v7088_v35, %s7655_s17 }
0x1bd5   : > { %3220 = vrot.lane.b32.xlu1 %v7082_v32, %s7653_s18 }
0x1bda   : > { %3064 = vrot.lane.b32.xlu0 %v7082_v32, %s7655_s17 }
0x1bde   : > { %3298 = vrot.lane.b32.xlu0 %v7088_v35, %s7653_s18  ;;  %s7667_s18 = smov 24  }
0x1c4d   : > { %v3044_v56 = vpop.xlane.xlu1 %3043 }
0x1c4e   : > { %v3048_v57 = vsub.f32 %v3040_v48, %v3044_v56 }
0x1c50   : > { %v3050_v58 = vmul.f32 1.442695, %v3048_v57 }
0x1c51   : > { %v3142_v59 = vpop.permute.xlu1 %3141  ;;  %v3047_v61 = vpop.xlane.xlu0 %3046 }
0x1c52   : > { %6603 = vpow2.f32 %v3050_v58  ;;  %v3049_v60 = vsub.f32 %v3041_v53, %v3047_v61  ;;  %6294 = vmatpush3.msk.msra.mxu0 %vm634_vm4, %v3142_v59 }
0x1c53   : > { %6303 = vmatprep.subr.mxu0 %v6674_v10 }
0x1c54   : > { %v3052_v62 = vmul.f32 1.442695, %v3049_v60 }
0x1c55   : > { %v3065_v1 = vpop.permute.xlu0 %3064  ;;  %v3221_v13 = vpop.permute.xlu1 %3220 }
0x1c56   : > { %6605 = vpow2.f32 %v3052_v62  ;;  %6289 = vmatpush3.msk.msra.mxu1 %vm634_vm4, %v3065_v1 }
0x1c57   : > { %6298 = vmatprep.subr.mxu1 %v6674_v10 }
0x1c59   : > { %v3299_v11 = vpop.permute.xlu0 %3298 }
0x1c5c   : > { %v6604_v63 = vpop.eup %6603 }
0x1c5d   : > { %v3054_v3 = vsel %vm605_vm3, %v6604_v63, 0.0 }
0x1c5e   : > { %3055 = vadd.xlane.f32.xlu0 %v3054_v3  ;;  %v5828_v3 = vld [vmem:[%s7636_s5 + $0x1] ss:$0 sm:$0xff] }
0x1c60   : > { %v6606_v4 = vpop.eup %6605 }
0x1c61   : > { %v3057_v6 = vsel %vm605_vm3, %v6606_v4, 0.0 }
0x1c62   : > { %3058 = vadd.xlane.f32.xlu1 %v3057_v6 }
0x1c73   : > { %3218 = vrot.lane.b32.xlu1 %v7082_v32, %s7663_s15 }
0x1c74   : > { %3296 = vrot.lane.b32.xlu0 %v7088_v35, %s7663_s15 }
0x1ceb   : > { %v3056_v14 = vpop.xlane.xlu0 %3055 }
0x1cec   : > { %6607 = vrcp.f32 %v3056_v14 }
0x1cef   : > { %v3059_v15 = vpop.xlane.xlu1 %3058  ;;  %v3297_v20 = vpop.permute.xlu0 %3296 }
0x1cf0   : > { %6609 = vrcp.f32 %v3059_v15 }
0x1cf3   : > { %v3219_v19 = vpop.permute.xlu1 %3218 }
0x1cf6   : > { %v6608_v16 = vpop.eup %6607 }
0x1cf7   : > { %v3062_v17 = vmul.f32 %v6608_v16, %v6604_v63 }
0x1cf9   : > { %6291 = vmatmul.mubr.msk.f32.vlgmr.msra.gmra.mrb[24].mxu1 %vm630_vm5, %v3062_v17 }
0x1cfa   : > { %v6610_v0 = vpop.eup %6609  ;;  %6299 = vmatpush3.xpose.msk.msra.mxu1 %vm452_vm2, %v3221_v13  ;;  %6300 = vmatprep.mubr.msk.f32.mxu1 %vm6675_vm1, %v6674_v10 }
0x1cfb   : > { %v3063_v18 = vmul.f32 %v6610_v0, %v6606_v4  ;;  %6308 = vmatprep.subr.mxu1 %v6674_v10 }
0x1cfd   : > { %6296 = vmatmul.mubr.msk.f32.vlgmr.msra.gmra.mrb[48].mxu0 %vm630_vm5, %v3063_v18  ;;  %6301 = vmatmul.mubr.msk.f32.vlgmr.msra.gmra.mrb[26].mxu1 %vm452_vm2, %v3219_v19 }
0x1cfe   : > { %6304 = vmatpush3.xpose.msk.msra.mxu0 %vm452_vm2, %v3299_v11  ;;  %6305 = vmatprep.mubr.msk.f32.mxu0 %vm6675_vm1, %v6674_v10 }
0x1cff   : > { %6313 = vmatprep.subr.mxu0 %v6674_v10  ;;  %6310 = vmatprep.mubr.msk.f32.mxu1 %vm6675_vm1, %v6674_v10 }
0x1d01   : > { %6306 = vmatmul.mubr.msk.f32.vlgmr.msra.gmra.mrb[50].mxu0 %vm452_vm2, %v3297_v20 }
0x1d02   : > { %6315 = vmatprep.mubr.msk.f32.mxu0 %vm6675_vm1, %v6674_v10 }
0x1dcc   : > { %v3137_v21 = vpop.f32.mrb[24].mxu1 }
0x1dcd   : > { %v6292_v22 = vpop.f32.mrb[25].mxu1 }
0x1dd0   : > { %v3214_v24 = vpop.f32.mrb[48].mxu0  ;;  %v3292_v25 = vpop.f32.mrb[26].mxu1 }
0x1dd1   : > { %v3564_v2 = vcombine.low %v3137_v21, %v3214_v24  ;;  %v3374_v26 = vmul.f32 0.35355338, %v3292_v25  ;;  %v6297_v28 = vpop.f32.mrb[49].mxu0  ;;  %v6302_v29 = vpop.f32.mrb[27].mxu1 }
0x1dd3   : > { %v3376_v30 = vsel %vm605_vm3, %v3374_v26, -inf }
0x1dd4   : > { %3377 = vmax.xlane.f32.xlu1 %v3376_v30  ;;  %v3370_v31 = vpop.f32.mrb[50].mxu0 }
0x1dd5   : > { %v3375_v33 = vmul.f32 0.35355338, %v3370_v31  ;;  %v6307_v34 = vpop.f32.mrb[51].mxu0 }
0x1dd6   : > { %v6523_v34 = vld [vmem:[%s7639_s8 + $0x40] sm:$0xff]  }
0x1dd7   : > { %v3379_v23 = vsel %vm605_vm3, %v3375_v33, -inf }
0x1dd8   : > { %3380 = vmax.xlane.f32.xlu0 %v3379_v23  ;;  %v6524_v23 = vld [vmem:[%s7639_s8 + $0x48] sm:$0xff]  }
0x1e61   : > { %v3378_v36 = vpop.xlane.xlu1 %3377 }
0x1e62   : > { %v3382_v37 = vsub.f32 %v3374_v26, %v3378_v36  ;;  %v6525_v36 = vld [vmem:[%s7639_s8 + $0x50] sm:$0xff]  }
0x1e64   : > { %v3384_v38 = vmul.f32 1.442695, %v3382_v37  ;;  %v6526_v37 = vld [vmem:[%s7639_s8 + $0x58] sm:$0xff]  }
0x1e65   : > { %v3381_v39 = vpop.xlane.xlu0 %3380 }
0x1e66   : > { %6611 = vpow2.f32 %v3384_v38  ;;  %v3383_v40 = vsub.f32 %v3375_v33, %v3381_v39  ;;  %v6522_v33 = vld [vmem:[%s7637_s6 + $0x18] sm:$0xff]   ;;  %v6527_v38 = vld [vmem:[%s7639_s8 + $0x60] sm:$0xff]   ;;  %v6528_v39 = vld [vmem:[%s7639_s8 + $0x68] sm:$0xff]  }
0x1e68   : > { %v3386_v41 = vmul.f32 1.442695, %v3383_v40 }
0x1e6a   : > { %6613 = vpow2.f32 %v3386_v41 }
0x1e70   : > { %v6612_v42 = vpop.eup %6611 }
0x1e71   : > { %v3388_v43 = vsel %vm605_vm3, %v6612_v42, 0.0 }
0x1e72   : > { %3389 = vadd.xlane.f32.xlu0 %v3388_v43  ;;  %v5781_v43 = vld [vmem:[%s7632_s1 + $0x18] sm:$0xff] }
0x1e74   : > { %v6614_v27 = vpop.eup %6613 }
0x1e75   : > { %v3391_v46 = vsel %vm605_vm3, %v6614_v27, 0.0 }
0x1e76   : > { %3392 = vadd.xlane.f32.xlu1 %v3391_v46 }
0x1e87   : > { %3475 = vrot.lane.b32.xlu1 %v7088_v35, %s7664_s25 }
0x1e88   : > { %3398 = vrot.lane.b32.xlu0 %v7082_v32, %s7664_s25 }
0x1e8b   : > { %3559 = vrot.lane.b32.xlu1 %v3558_v47, %s7665_s22  ;;  %v6519_v47 = vld [vmem:[%s7635_s4 + $0x10] sm:$0xff]  }
0x1e8c   : > { %3565 = vrot.lane.b32.xlu0 %v3564_v2, %s7666_s19 }
0x1eff   : > { %v3390_v48 = vpop.xlane.xlu0 %3389 }
0x1f00   : > { %6615 = vrcp.f32 %v3390_v48 }
0x1f03   : > { %v3393_v49 = vpop.xlane.xlu1 %3392  ;;  %v3399_v50 = vpop.permute.xlu0 %3398 }
0x1f04   : > { %6617 = vrcp.f32 %v3393_v49  ;;  %6309 = vmatpush3.msk.msra.mxu1 %vm634_vm4, %v3399_v50 }
0x1f05   : > { %6318 = vmatprep.subr.bf16.mxu1 %v6674_v10 }
0x1f07   : > { %v3476_v35 = vpop.permute.xlu1 %3475  ;;  %v3566_v61 = vpop.permute.xlu0 %3565 }
0x1f08   : > { %6314 = vmatpush3.msk.msra.mxu0 %vm634_vm4, %v3476_v35 }
0x1f09   : > { %6326 = vmatprep.subr.bf16.mxu0 %v6674_v10 }
0x1f0a   : > { %v6616_v32 = vpop.eup %6615 }
0x1f0b   : > { %v3396_v51 = vmul.f32 %v6616_v32, %v6612_v42  ;;  %v3560_v58 = vpop.permute.xlu1 %3559 }
0x1f0c   : > { %v3574_v59 = vsel %vm452_vm2, %v3554_v8, %v3560_v58  ;;  %v5858_v58 = vld [vmem:[%s7640_s9 + $0x1] ss:$0 sm:$0xff] }
0x1f0d   : > { %6311 = vmatmul.mubr.msk.f32.vlgmr.msra.gmra.mrb[28].mxu1 %vm630_vm5, %v3396_v51  ;;  %v3575_v60 = vsel %vm1809_vm6, %v3574_v59, %v3566_v61  ;;  %v6529_v51 = vld [vmem:[%s7639_s8 + $0x70] sm:$0xff]  }
0x1f0e   : > { %v6618_v44 = vpop.eup %6617  ;;  %6322 = vmatprep.mubr.msk.bf16.mxu1 %vm6675_vm1, %v6674_v10  ;;  %6319 = vmatpush3.bf16.msra.mxu1 %v6519_v47 }
0x1f0f   : > { %v3397_v45 = vmul.f32 %v6618_v44, %v6614_v27  ;;  %6320 = vmatprep.subr.bf16.mxu1 %v6674_v10  ;;  %v3682_v27 = vadd.f32 1.0, %v5781_v43  ;;  %v6530_v44 = vld [vmem:[%s7639_s8 + $0x78] sm:$0xff]  }
0x1f11   : > { %6316 = vmatmul.mubr.msk.f32.vlgmr.msra.gmra.mrb[52].mxu0 %vm630_vm5, %v3397_v45  ;;  %v5837_v45 = vld [vmem:[%s7638_s7 + $0x1] ss:$0 sm:$0xff] }
0x1f12   : > { %6330 = vmatprep.mubr.msk.bf16.mxu0 %vm6675_vm1, %v6674_v10  ;;  %6321 = vmatpush3.bf16.msra.mxu1 %v6520_v52 }
0x1f13   : > { %6334 = vmatprep.subr.bf16.mxu1 %v6674_v10 }
0x1fe0   : > { %v3471_v53 = vpop.f32.mrb[28].mxu1 }
0x1fe1   : > { %v6312_v54 = vpop.f32.mrb[29].mxu1 }
0x1fe4   : > { %v3548_v55 = vpop.f32.mrb[52].mxu0 }
0x1fe5   : > { %v3570_v56 = vcombine.low %v3471_v53, %v3548_v55  ;;  %v6317_v57 = vpop.f32.mrb[53].mxu0 }
0x1fe7   : > { %3571 = vrot.lane.b32.xlu1 %v3570_v56, %s7667_s18 }
0x2059   : > { %v3572_v62 = vpop.permute.xlu1 %3571 }
0x205a   : > { %v3576_v1 = vsel %vm1811_vm7, %v3575_v60, %v3572_v62 }
0x205b   : > { %v3577_v63 = vpack.c.bf16 %v3576_v1, %v3576_v1 }
0x205d   : > { %6323 = vmatmul.mubr.msk.bf16.vlgmr.msra.gmra.mrb[32].mxu1 %vm359_vm0, %v3577_v63 }
0x205e   : > { %6350 = vmatprep.mubr.msk.bf16.mxu1 %vm6675_vm1, %v6674_v10  ;;  %6335 = vmatpush3.bf16.msra.mxu1 %v6523_v34 }
0x205f   : > { %6336 = vmatprep.subr.bf16.mxu1 %v6674_v10 }
0x2062   : > { %6337 = vmatpush3.bf16.msra.mxu1 %v6524_v23 }
0x2063   : > { %6338 = vmatprep.subr.bf16.mxu1 %v6674_v10 }
0x2066   : > { %6339 = vmatpush3.bf16.msra.mxu1 %v6525_v36 }
0x2067   : > { %6340 = vmatprep.subr.bf16.mxu1 %v6674_v10 }
0x206a   : > { %6341 = vmatpush3.bf16.msra.mxu1 %v6526_v37 }
0x206b   : > { %6342 = vmatprep.subr.bf16.mxu1 %v6674_v10 }
0x206e   : > { %6343 = vmatpush3.bf16.msra.mxu1 %v6527_v38  ;;  %v5874_v38 = vld [vmem:[%s7634_s3 + $0x2] ss:$0 sm:$0xff] }
0x206f   : > { %6344 = vmatprep.subr.bf16.mxu1 %v6674_v10 }
0x2072   : > { %6345 = vmatpush3.bf16.msra.mxu1 %v6528_v39 }
0x2073   : > { %6346 = vmatprep.subr.bf16.mxu1 %v6674_v10 }
0x2076   : > { %6347 = vmatpush3.bf16.msra.mxu1 %v6529_v51 }
0x2077   : > { %6348 = vmatprep.subr.bf16.mxu1 %v6674_v10 }
0x207a   : > { %6349 = vmatpush3.bf16.msra.mxu1 %v6530_v44 }
0x207b   : > { %6392 = vmatprep.subr.mxu1 %v6674_v10 }
0x2130   : > { %v3640_v4 = vpop.f32.mrb[32].mxu1 }
0x2131   : > { %v3641_v5 = vadd.f32 %v5828_v3, %v3640_v4  ;;  %v6324_v7 = vpop.f32.mrb[33].mxu1 }
0x2132   : > { %v3643_v8 = vpop.f32.mrb[34].mxu1 }
0x2133   : > { %3647 = vrot.lane.b32.xlu0 %v3641_v5, %s6676_s28  ;;  %v6325_v6 = vpop.f32.mrb[35].mxu1 }
0x21a5   : > { %v3648_v11 = vpop.permute.xlu0 %3647 }
0x21a6   : > { %v3650_v13 = vmul.f32 %v7061_v12, %v3648_v11 }
0x21a8   : > { %3652 = vrot.lane.b32.xlu1 %v3650_v13, %s6676_s28 }
0x221a   : > { %v3653_v14 = vpop.permute.xlu1 %3652 }
0x221b   : > { %v3655_v15 = vadd.f32 %v3653_v14, %v7054_v9 }
0x221d   : > { %v3656_v16 = vsel %vm359_vm0, %v3655_v15, 0.0 }
0x221e   : > { %3657 = vadd.xlane.f32.xlu0 %v3656_v16 }
0x22ab   : > { %v3658_v17 = vpop.xlane.xlu0 %3657 }
0x22ac   : > { %v3659_v0 = vmul.f32 0.03125, %v3658_v17 }
0x22ae   : > { %v3660_v18 = vsub.f32 %v3655_v15, %v3659_v0 }
0x22b0   : > { %v3661_v19 = vmul.f32 %v3660_v18, %v3660_v18 }
0x22b2   : > { %v3662_v20 = vsel %vm359_vm0, %v3661_v19, 0.0 }
0x22b3   : > { %3663 = vadd.xlane.f32.xlu1 %v3662_v20  ;;  %v7348_v20 = vld [vmem:[%s7632_s1 + $0x20] sm:$0xff] }
0x22c4   : > { %3685 = vrot.lane.b32.xlu1 %v7061_v12, %s6689_s26  ;;  %v6521_v12 = vld [vmem:[%s7637_s6 + $0x10] sm:$0xff]  }
0x22c5   : > { %6327 = vmatpush3.bf16.msra.mxu0 %v6521_v12 }
0x22c6   : > { %6328 = vmatprep.subr.bf16.mxu0 %v6674_v10 }
0x22c9   : > { %6329 = vmatpush3.bf16.msra.mxu0 %v6522_v33 }
0x22ca   : > { %6354 = vmatprep.subr.bf16.mxu0 %v6674_v10 }
0x2340   : > { %v3664_v21 = vpop.xlane.xlu1 %3663 }
0x2341   : > { %v3665_v22 = vmul.f32 0.03125, %v3664_v21  ;;  %v3912_v21 = vadd.f32 1.0, %v7348_v20 }
0x2343   : > { %v3666_v24 = vadd.f32 1e-06, %v3665_v22 }
0x2344   : > { %v3686_v49 = vpop.permute.xlu1 %3685 }
0x2345   : > { %6619 = vrsqrt.f32 %v3666_v24 }
0x234f   : > { %v6620_v25 = vpop.eup %6619 }
0x2350   : > { %v7276_v2 = vmul.f32 %v6620_v25, %v3660_v18 }
0x2352   : > { %v3669_v9 = vsel %vm359_vm0, %v7276_v2, 0.0 }
0x2353   : > { %3670 = vadd.xlane.f32.xlu0 %v3669_v9 }
0x23e0   : > { %v3671_v26 = vpop.xlane.xlu0 %3670 }
0x23e1   : > { %v3672_v28 = vmul.f32 0.03125, %v3671_v26  ;;  %v6531_v26 = vld [vmem:[%s7633_s2 + $0x20] sm:$0xff]  }
0x23e3   : > { %v3673_v29 = vsub.f32 %v7276_v2, %v3672_v28  ;;  %v6532_v28 = vld [vmem:[%s7633_s2 + $0x28] sm:$0xff]  }
0x23e5   : > { %v3674_v30 = vmul.f32 %v3673_v29, %v3673_v29 }
0x23e7   : > { %v3675_v31 = vsel %vm359_vm0, %v3674_v30, 0.0 }
0x23e8   : > { %3676 = vadd.xlane.f32.xlu0 %v3675_v31 }
0x2475   : > { %v3677_v40 = vpop.xlane.xlu0 %3676 }
0x2476   : > { %v3678_v41 = vmul.f32 0.03125, %v3677_v40 }
0x2478   : > { %v3679_v42 = vadd.f32 1e-06, %v3678_v41 }
0x247a   : > { %6621 = vrsqrt.f32 %v3679_v42 }
0x2484   : > { %v6622_v46 = vpop.eup %6621 }
0x2485   : > { %v3681_v48 = vmul.f32 %v6622_v46, %v3673_v29 }
0x2487   : > { %v3683_v50 = vmul.f32 %v3682_v27, %v3681_v48 }
0x2489   : > { %v3688_v35 = vadd.f32 %v3686_v49, %v3683_v50 }
0x248b   : > { %v3689_v32 = vpack.c.bf16 %v3688_v35, %v3688_v35 }
0x248d   : > { %6331 = vmatmul.mubr.msk.bf16.vlgmr.msra.gmra.mrb[56].mxu0 %vm359_vm0, %v3689_v32 }
0x248e   : > { %6358 = vmatprep.mubr.msk.bf16.mxu0 %vm6675_vm1, %v6674_v10  ;;  %6355 = vmatpush3.bf16.msra.mxu0 %v6531_v26 }
0x248f   : > { %6356 = vmatprep.subr.bf16.mxu0 %v6674_v10 }
0x2492   : > { %6357 = vmatpush3.bf16.msra.mxu0 %v6532_v28 }
0x2493   : > { %6362 = vmatprep.subr.mxu0 %v6674_v10 }
0x2560   : > { %v3752_v47 = vpop.f32.mrb[56].mxu0 }
0x2561   : > { %v3753_v52 = vadd.f32 %v5837_v45, %v3752_v47  ;;  %v6332_v53 = vpop.f32.mrb[57].mxu0 }
0x2562   : > { %v3755_v54 = vpop.f32.mrb[58].mxu0 }
0x2563   : > { %v3758_v55 = vmax.f32 %v3753_v52, 0.0  ;;  %v6333_v56 = vpop.f32.mrb[59].mxu0 }
0x2565   : > { %v3759_v57 = vpack.c.bf16 %v3758_v55, %v3758_v55 }
0x2567   : > { %6351 = vmatmul.mubr.bf16.vlgmr.msra.gmra.mrb[36].mxu1 %v3759_v57 }
0x2568   : > { %6394 = vmatprep.mubr.msk.f32.mxu1 %vm6675_vm1, %v6674_v10 }
0x263a   : > { %v3867_v59 = vpop.f32.mrb[36].mxu1 }
0x263b   : > { %v3868_v61 = vadd.f32 %v5858_v58, %v3867_v59  ;;  %v6352_v60 = vpop.f32.mrb[37].mxu1 }
0x263c   : > { %v3870_v62 = vpop.f32.mrb[38].mxu1 }
0x263d   : > { %3874 = vrot.lane.b32.xlu0 %v3868_v61, %s6689_s26  ;;  %v6353_v1 = vpop.f32.mrb[39].mxu1 }
0x26af   : > { %v3875_v63 = vpop.permute.xlu0 %3874 }
0x26b0   : > { %v3877_v3 = vmul.f32 %v5781_v43, %v3875_v63 }
0x26b2   : > { %3879 = vrot.lane.b32.xlu1 %v3877_v3, %s6673_s21 }
0x2724   : > { %v3880_v4 = vpop.permute.xlu1 %3879 }
0x2725   : > { %v3882_v5 = vadd.f32 %v3880_v4, %v7276_v2 }
0x2727   : > { %v3883_v7 = vsel %vm359_vm0, %v3882_v5, 0.0 }
0x2728   : > { %3884 = vadd.xlane.f32.xlu1 %v3883_v7 }
0x27b5   : > { %v3885_v8 = vpop.xlane.xlu1 %3884 }
0x27b6   : > { %v3886_v6 = vmul.f32 0.03125, %v3885_v8 }
0x27b8   : > { %v3887_v11 = vsub.f32 %v3882_v5, %v3886_v6 }
0x27ba   : > { %v3888_v13 = vmul.f32 %v3887_v11, %v3887_v11 }
0x27bc   : > { %v3889_v14 = vsel %vm359_vm0, %v3888_v13, 0.0 }
0x27bd   : > { %3890 = vadd.xlane.f32.xlu0 %v3889_v14 }
0x284a   : > { %v3891_v15 = vpop.xlane.xlu0 %3890 }
0x284b   : > { %v3892_v16 = vmul.f32 0.03125, %v3891_v15 }
0x284d   : > { %v3893_v17 = vadd.f32 1e-06, %v3892_v16 }
0x284f   : > { %6623 = vrsqrt.f32 %v3893_v17 }
0x2859   : > { %v6624_v0 = vpop.eup %6623 }
0x285a   : > { %v7341_v18 = vmul.f32 %v6624_v0, %v3887_v11 }
0x285c   : > { %v3899_v19 = vsel %vm359_vm0, %v7341_v18, 0.0 }
0x285d   : > { %3900 = vadd.xlane.f32.xlu0 %v3899_v19 }
0x2873   : > { %3914 = vrot.lane.b32.xlu0 %v3912_v21, %s6673_s21 }
0x28ea   : > { %v3901_v22 = vpop.xlane.xlu0 %3900 }
0x28eb   : > { %v3902_v24 = vmul.f32 0.03125, %v3901_v22 }
0x28ed   : > { %v3903_v25 = vsub.f32 %v7341_v18, %v3902_v24 }
0x28ee   : > { %v3915_v33 = vpop.permute.xlu0 %3914 }
0x28ef   : > { %v3904_v2 = vmul.f32 %v3903_v25, %v3903_v25 }
0x28f1   : > { %v3905_v9 = vsel %vm359_vm0, %v3904_v2, 0.0 }
0x28f2   : > { %3906 = vadd.xlane.f32.xlu1 %v3905_v9 }
0x297f   : > { %v3907_v29 = vpop.xlane.xlu1 %3906 }
0x2980   : > { %v3908_v30 = vmul.f32 0.03125, %v3907_v29 }
0x2982   : > { %v3909_v31 = vadd.f32 1e-06, %v3908_v30 }
0x2984   : > { %6625 = vrsqrt.f32 %v3909_v31 }
0x298e   : > { %v6626_v12 = vpop.eup %6625 }
0x298f   : > { %v3911_v34 = vmul.f32 %v6626_v12, %v3903_v25 }
0x2991   : > { %v3917_v23 = vmul.f32 %v3915_v33, %v3911_v34 }
0x2993   : > { %v3918_v36 = vadd.f32 %v7348_v20, %v3917_v23 }
0x2995   : > { %v3919_v37 = vpack.c.bf16 %v3918_v36, %v3918_v36 }
0x2997   : > { %6359 = vmatmul.mubr.msk.bf16.vlgmr.msra.gmra.mrb[60].mxu0 %vm359_vm0, %v3919_v37 }
0x2998   : > { %6364 = vmatprep.mubr.msk.f32.mxu0 %vm6675_vm1, %v6674_v10 }
0x2a6a   : > { %v3982_v39 = vpop.f32.mrb[60].mxu0 }
0x2a6b   : > { %v7369_v40 = vadd.f32 %v5874_v38, %v3982_v39  ;;  %v6360_v41 = vpop.f32.mrb[61].mxu0 }
0x2a6c   : > { %v3985_v42 = vpop.f32.mrb[62].mxu0 }
0x2a6d   : > { %3990 = vrot.lane.b32.xlu1 %v7369_v40, %s6673_s21  ;;  %v6361_v43 = vpop.f32.mrb[63].mxu0  ;;  %v7375_v27 = vcombine.high %v7369_v40, %v7369_v40 }
0x2a71   : > { %4066 = vrot.lane.b32.xlu1 %v7375_v27, %s6673_s21 }
0x2adf   : > { %v3991_v46 = vpop.permute.xlu1 %3990 }
0x2ae0   : > { %6363 = vmatpush3.xpose.msk.msra.mxu0 %vm452_vm2, %v3991_v46 }
0x2ae1   : > { %6367 = vmatprep.subr.mxu0 %v6674_v10 }
0x2ae3   : > { %6365 = vmatmul.mubr.msk.f32.vlgmr.msra.gmra.mrb[54].mxu0 %vm452_vm2, %v7369_v40  ;;  %v4067_v48 = vpop.permute.xlu1 %4066 }
0x2ae4   : > { %6368 = vmatpush3.xpose.msk.msra.mxu0 %vm452_vm2, %v4067_v48  ;;  %6369 = vmatprep.mubr.msk.f32.mxu0 %vm6675_vm1, %v6674_v10 }
0x2ae5   : > { %6372 = vmatprep.subr.mxu0 %v6674_v10 }
0x2ae7   : > { %6370 = vmatmul.mubr.msk.f32.vlgmr.msra.gmra.mrb[64].mxu0 %vm452_vm2, %v7375_v27 }
0x2ae8   : > { %6374 = vmatprep.mubr.msk.f32.mxu0 %vm6675_vm1, %v6674_v10 }
0x2bb6   : > { %v4062_v49 = vpop.f32.mrb[54].mxu0 }
0x2bb7   : > { %v4142_v50 = vmul.f32 0.35355338, %v4062_v49  ;;  %v6366_v35 = vpop.f32.mrb[55].mxu0 }
0x2bb9   : > { %v4144_v32 = vsel %vm605_vm3, %v4142_v50, -inf }
0x2bba   : > { %4145 = vmax.xlane.f32.xlu0 %v4144_v32  ;;  %v4138_v51 = vpop.f32.mrb[64].mxu0 }
0x2bbb   : > { %v4143_v44 = vmul.f32 0.35355338, %v4138_v51  ;;  %v6371_v45 = vpop.f32.mrb[65].mxu0 }
0x2bbd   : > { %v4147_v47 = vsel %vm605_vm3, %v4143_v44, -inf }
0x2bbe   : > { %4148 = vmax.xlane.f32.xlu1 %v4147_v47 }
0x2bcf   : > { %4166 = vrot.lane.b32.xlu1 %v7369_v40, %s6676_s28 }
0x2bd3   : > { %4322 = vrot.lane.b32.xlu1 %v7369_v40, %s6677_s29 }
0x2bd7   : > { %4320 = vrot.lane.b32.xlu1 %v7369_v40, %s6678_s30 }
0x2bdb   : > { %4398 = vrot.lane.b32.xlu1 %v7375_v27, %s6678_s30  ;;  %s7669_s30 = smov 80  }
0x2c47   : > { %v4146_v52 = vpop.xlane.xlu0 %4145 }
0x2c48   : > { %v4150_v53 = vsub.f32 %v4142_v50, %v4146_v52 }
0x2c4a   : > { %v4152_v54 = vmul.f32 1.442695, %v4150_v53 }
0x2c4b   : > { %v4149_v55 = vpop.xlane.xlu1 %4148 }
0x2c4c   : > { %6627 = vpow2.f32 %v4152_v54  ;;  %v4151_v56 = vsub.f32 %v4143_v44, %v4149_v55 }
0x2c4e   : > { %v4154_v57 = vmul.f32 1.442695, %v4151_v56 }
0x2c4f   : > { %v4167_v58 = vpop.permute.xlu1 %4166 }
0x2c50   : > { %6629 = vpow2.f32 %v4154_v57  ;;  %6373 = vmatpush3.msk.msra.mxu0 %vm634_vm4, %v4167_v58 }
0x2c51   : > { %6377 = vmatprep.subr.mxu0 %v6674_v10 }
0x2c53   : > { %v4323_v8 = vpop.permute.xlu1 %4322 }
0x2c56   : > { %v6628_v59 = vpop.eup %6627 }
0x2c57   : > { %v4156_v61 = vsel %vm605_vm3, %v6628_v59, 0.0  ;;  %v4321_v11 = vpop.permute.xlu1 %4320 }
0x2c58   : > { %4157 = vadd.xlane.f32.xlu0 %v4156_v61 }
0x2c5a   : > { %v6630_v60 = vpop.eup %6629 }
0x2c5b   : > { %v4159_v62 = vsel %vm605_vm3, %v6630_v60, 0.0  ;;  %v4399_v14 = vpop.permute.xlu1 %4398 }
0x2c5c   : > { %4160 = vadd.xlane.f32.xlu0 %v4159_v62 }
0x2c72   : > { %4243 = vrot.lane.b32.xlu0 %v7375_v27, %s6676_s28 }
0x2c76   : > { %4400 = vrot.lane.b32.xlu0 %v7375_v27, %s6677_s29  ;;  %s7668_s29 = smov 56  }
0x2ce5   : > { %v4158_v1 = vpop.xlane.xlu0 %4157 }
0x2ce6   : > { %6631 = vrcp.f32 %v4158_v1 }
0x2ce9   : > { %v4161_v63 = vpop.xlane.xlu0 %4160 }
0x2cea   : > { %6633 = vrcp.f32 %v4161_v63 }
0x2ced   : > { %v4244_v5 = vpop.permute.xlu0 %4243 }
0x2cf0   : > { %v6632_v3 = vpop.eup %6631 }
0x2cf1   : > { %v4164_v4 = vmul.f32 %v6632_v3, %v6628_v59  ;;  %v4401_v13 = vpop.permute.xlu0 %4400 }
0x2cf3   : > { %6375 = vmatmul.mubr.msk.f32.vlgmr.msra.gmra.mrb[66].mxu0 %vm630_vm5, %v4164_v4 }
0x2cf4   : > { %v6634_v7 = vpop.eup %6633  ;;  %6378 = vmatpush3.msk.msra.mxu0 %vm634_vm4, %v4244_v5  ;;  %6379 = vmatprep.mubr.msk.f32.mxu0 %vm6675_vm1, %v6674_v10 }
0x2cf5   : > { %v4165_v6 = vmul.f32 %v6634_v7, %v6630_v60  ;;  %6382 = vmatprep.subr.mxu0 %v6674_v10 }
0x2cf7   : > { %6380 = vmatmul.mubr.msk.f32.vlgmr.msra.gmra.mrb[68].mxu0 %vm630_vm5, %v4165_v6 }
0x2cf8   : > { %6384 = vmatprep.mubr.msk.f32.mxu0 %vm6675_vm1, %v6674_v10 }
0x2cfb   : > { %6383 = vmatpush3.xpose.msk.msra.mxu0 %vm452_vm2, %v4323_v8 }
0x2cfc   : > { %6387 = vmatprep.subr.mxu0 %v6674_v10 }
0x2cfe   : > { %6385 = vmatmul.mubr.msk.f32.vlgmr.msra.gmra.mrb[70].mxu0 %vm452_vm2, %v4321_v11 }
0x2cff   : > { %6388 = vmatpush3.xpose.msk.msra.mxu0 %vm452_vm2, %v4401_v13  ;;  %6389 = vmatprep.mubr.msk.f32.mxu0 %vm6675_vm1, %v6674_v10 }
0x2d00   : > { %6397 = vmatprep.subr.mxu0 %v6674_v10 }
0x2d02   : > { %6390 = vmatmul.mubr.msk.f32.vlgmr.msra.gmra.mrb[72].mxu0 %vm452_vm2, %v4399_v14 }
0x2d03   : > { %6399 = vmatprep.mubr.msk.f32.mxu0 %vm6675_vm1, %v6674_v10 }
0x2dc6   : > { %v7427_v15 = vpop.f32.mrb[66].mxu0 }
0x2dc7   : > { %v6376_v16 = vpop.f32.mrb[67].mxu0 }
0x2dca   : > { %v7429_v17 = vpop.f32.mrb[68].mxu0 }
0x2dcb   : > { %v5324_v0 = vcombine.low %v7427_v15, %v7429_v17  ;;  %v6381_v19 = vpop.f32.mrb[69].mxu0 }
0x2dd1   : > { %v4394_v21 = vpop.f32.mrb[70].mxu0 }
0x2dd2   : > { %v4476_v22 = vmul.f32 0.35355338, %v4394_v21  ;;  %v6386_v24 = vpop.f32.mrb[71].mxu0 }
0x2dd4   : > { %v4478_v25 = vsel %vm605_vm3, %v4476_v22, -inf }
0x2dd5   : > { %4479 = vmax.xlane.f32.xlu0 %v4478_v25  ;;  %v4472_v2 = vpop.f32.mrb[72].mxu0 }
0x2dd6   : > { %v4477_v9 = vmul.f32 0.35355338, %v4472_v2  ;;  %v6391_v26 = vpop.f32.mrb[73].mxu0 }
0x2dd8   : > { %v4481_v28 = vsel %vm605_vm3, %v4477_v9, -inf }
0x2dd9   : > { %4482 = vmax.xlane.f32.xlu1 %v4481_v28 }
0x2dea   : > { %4500 = vrot.lane.b32.xlu1 %v7369_v40, %s7668_s29 }
0x2deb   : > { %4577 = vrot.lane.b32.xlu0 %v7375_v27, %s7668_s29 }
0x2dee   : > { %4656 = vrot.lane.b32.xlu1 %v7369_v40, %s7669_s30 }
0x2df2   : > { %4734 = vrot.lane.b32.xlu1 %v7375_v27, %s7669_s30 }
0x2df6   : > { %4732 = vrot.lane.b32.xlu1 %v7375_v27, %s7670_s20 }
0x2e62   : > { %v4480_v29 = vpop.xlane.xlu0 %4479 }
0x2e63   : > { %v4484_v30 = vsub.f32 %v4476_v22, %v4480_v29 }
0x2e65   : > { %v4486_v31 = vmul.f32 1.442695, %v4484_v30 }
0x2e66   : > { %v4578_v12 = vpop.permute.xlu0 %4577  ;;  %v4483_v33 = vpop.xlane.xlu1 %4482 }
0x2e67   : > { %6635 = vpow2.f32 %v4486_v31  ;;  %v4485_v34 = vsub.f32 %v4477_v9, %v4483_v33  ;;  %6398 = vmatpush3.msk.msra.mxu0 %vm634_vm4, %v4578_v12 }
0x2e68   : > { %6407 = vmatprep.subr.mxu0 %v6674_v10 }
0x2e69   : > { %v4488_v23 = vmul.f32 1.442695, %v4485_v34 }
0x2e6a   : > { %v4501_v36 = vpop.permute.xlu1 %4500 }
0x2e6b   : > { %6637 = vpow2.f32 %v4488_v23  ;;  %6393 = vmatpush3.msk.msra.mxu1 %vm634_vm4, %v4501_v36 }
0x2e6c   : > { %6402 = vmatprep.subr.mxu1 %v6674_v10 }
0x2e6e   : > { %v4657_v46 = vpop.permute.xlu1 %4656 }
0x2e71   : > { %v6636_v37 = vpop.eup %6635 }
0x2e72   : > { %v4490_v38 = vsel %vm605_vm3, %v6636_v37, 0.0  ;;  %v4735_v35 = vpop.permute.xlu1 %4734 }
0x2e73   : > { %4491 = vadd.xlane.f32.xlu0 %v4490_v38 }
0x2e75   : > { %v6638_v39 = vpop.eup %6637 }
0x2e76   : > { %v4493_v41 = vsel %vm605_vm3, %v6638_v39, 0.0  ;;  %v4733_v44 = vpop.permute.xlu1 %4732 }
0x2e77   : > { %4494 = vadd.xlane.f32.xlu0 %v4493_v41 }
0x2e8d   : > { %4654 = vrot.lane.b32.xlu0 %v7369_v40, %s7670_s20 }
0x2f00   : > { %v4492_v42 = vpop.xlane.xlu0 %4491 }
0x2f01   : > { %6639 = vrcp.f32 %v4492_v42 }
0x2f04   : > { %v4495_v43 = vpop.xlane.xlu0 %4494 }
0x2f05   : > { %6641 = vrcp.f32 %v4495_v43 }
0x2f08   : > { %v4655_v51 = vpop.permute.xlu0 %4654 }
0x2f0b   : > { %v6640_v48 = vpop.eup %6639 }
0x2f0c   : > { %v4498_v49 = vmul.f32 %v6640_v48, %v6636_v37 }
0x2f0e   : > { %6395 = vmatmul.mubr.msk.f32.vlgmr.msra.gmra.mrb[30].mxu1 %vm630_vm5, %v4498_v49 }
0x2f0f   : > { %v6642_v50 = vpop.eup %6641  ;;  %6403 = vmatpush3.xpose.msk.msra.mxu1 %vm452_vm2, %v4657_v46  ;;  %6404 = vmatprep.mubr.msk.f32.mxu1 %vm6675_vm1, %v6674_v10 }
0x2f10   : > { %v4499_v32 = vmul.f32 %v6642_v50, %v6638_v39  ;;  %6412 = vmatprep.subr.mxu1 %v6674_v10 }
0x2f12   : > { %6400 = vmatmul.mubr.msk.f32.vlgmr.msra.gmra.mrb[74].mxu0 %vm630_vm5, %v4499_v32  ;;  %6405 = vmatmul.mubr.msk.f32.vlgmr.msra.gmra.mrb[40].mxu1 %vm452_vm2, %v4655_v51 }
0x2f13   : > { %6408 = vmatpush3.xpose.msk.msra.mxu0 %vm452_vm2, %v4735_v35  ;;  %6409 = vmatprep.mubr.msk.f32.mxu0 %vm6675_vm1, %v6674_v10 }
0x2f14   : > { %6417 = vmatprep.subr.mxu0 %v6674_v10  ;;  %6414 = vmatprep.mubr.msk.f32.mxu1 %vm6675_vm1, %v6674_v10 }
0x2f16   : > { %6410 = vmatmul.mubr.msk.f32.vlgmr.msra.gmra.mrb[76].mxu0 %vm452_vm2, %v4733_v44 }
0x2f17   : > { %6419 = vmatprep.mubr.msk.f32.mxu0 %vm6675_vm1, %v6674_v10 }
0x2fe1   : > { %v7469_v45 = vpop.f32.mrb[30].mxu1 }
0x2fe2   : > { %v6396_v47 = vpop.f32.mrb[31].mxu1 }
0x2fe5   : > { %v7471_v52 = vpop.f32.mrb[74].mxu0  ;;  %v4728_v53 = vpop.f32.mrb[40].mxu1 }
0x2fe6   : > { %v5328_v54 = vcombine.low %v7469_v45, %v7471_v52  ;;  %v4810_v55 = vmul.f32 0.35355338, %v4728_v53  ;;  %v6401_v56 = vpop.f32.mrb[75].mxu0  ;;  %v6406_v57 = vpop.f32.mrb[41].mxu1 }
0x2fe8   : > { %v4812_v58 = vsel %vm605_vm3, %v4810_v55, -inf }
0x2fe9   : > { %4813 = vmax.xlane.f32.xlu0 %v4812_v58  ;;  %v4806_v59 = vpop.f32.mrb[76].mxu0 }
0x2fea   : > { %v4811_v61 = vmul.f32 0.35355338, %v4806_v59  ;;  %v6411_v60 = vpop.f32.mrb[77].mxu0  ;;  %v6534_v59 = vld [vmem:[%s7635_s4 + $0x28] sm:$0xff]  }
0x2fec   : > { %v4815_v62 = vsel %vm605_vm3, %v4811_v61, -inf }
0x2fed   : > { %4816 = vmax.xlane.f32.xlu1 %v4815_v62 }
0x2ffe   : > { %4834 = vrot.lane.b32.xlu1 %v7369_v40, %s7671_s23 }
0x2fff   : > { %4911 = vrot.lane.b32.xlu0 %v7375_v27, %s7671_s23 }
0x3002   : > { %4990 = vrot.lane.b32.xlu1 %v7369_v40, %s7672_s16 }
0x3006   : > { %5068 = vrot.lane.b32.xlu1 %v7375_v27, %s7672_s16 }
0x300a   : > { %5066 = vrot.lane.b32.xlu1 %v7375_v27, %s7663_s15 }
0x3076   : > { %v4814_v1 = vpop.xlane.xlu0 %4813 }
0x3077   : > { %v4818_v63 = vsub.f32 %v4810_v55, %v4814_v1 }
0x3079   : > { %v4820_v3 = vmul.f32 1.442695, %v4818_v63 }
0x307a   : > { %v4912_v4 = vpop.permute.xlu0 %4911  ;;  %v4817_v5 = vpop.xlane.xlu1 %4816 }
0x307b   : > { %6643 = vpow2.f32 %v4820_v3  ;;  %v4819_v7 = vsub.f32 %v4811_v61, %v4817_v5  ;;  %6418 = vmatpush3.msk.msra.mxu0 %vm634_vm4, %v4912_v4 }
0x307c   : > { %6427 = vmatprep.subr.mxu0 %v6674_v10 }
0x307d   : > { %v4822_v8 = vmul.f32 1.442695, %v4819_v7 }
0x307e   : > { %v4835_v6 = vpop.permute.xlu1 %4834 }
0x307f   : > { %6645 = vpow2.f32 %v4822_v8  ;;  %6413 = vmatpush3.msk.msra.mxu1 %vm634_vm4, %v4835_v6 }
0x3080   : > { %6422 = vmatprep.subr.mxu1 %v6674_v10 }
0x3082   : > { %v4991_v22 = vpop.permute.xlu1 %4990 }
0x3085   : > { %v6644_v11 = vpop.eup %6643 }
0x3086   : > { %v4824_v13 = vsel %vm605_vm3, %v6644_v11, 0.0  ;;  %v5069_v9 = vpop.permute.xlu1 %5068 }
0x3087   : > { %4825 = vadd.xlane.f32.xlu0 %v4824_v13  ;;  %v5915_v13 = vld [vmem:[%s7636_s5 + $0x2] ss:$0 sm:$0xff] }
0x3089   : > { %v6646_v14 = vpop.eup %6645 }
0x308a   : > { %v4827_v16 = vsel %vm605_vm3, %v6646_v14, 0.0  ;;  %v5067_v29 = vpop.permute.xlu1 %5066 }
0x308b   : > { %4828 = vadd.xlane.f32.xlu0 %v4827_v16 }
0x30a1   : > { %4988 = vrot.lane.b32.xlu0 %v7369_v40, %s7663_s15 }
0x3114   : > { %v4826_v19 = vpop.xlane.xlu0 %4825 }
0x3115   : > { %6647 = vrcp.f32 %v4826_v19 }
0x3118   : > { %v4829_v21 = vpop.xlane.xlu0 %4828 }
0x3119   : > { %6649 = vrcp.f32 %v4829_v21 }
0x311c   : > { %v4989_v28 = vpop.permute.xlu0 %4988 }
0x311f   : > { %v6648_v24 = vpop.eup %6647 }
0x3120   : > { %v4832_v25 = vmul.f32 %v6648_v24, %v6644_v11 }
0x3122   : > { %6415 = vmatmul.mubr.msk.f32.vlgmr.msra.gmra.mrb[42].mxu1 %vm630_vm5, %v4832_v25 }
0x3123   : > { %v6650_v2 = vpop.eup %6649  ;;  %6423 = vmatpush3.xpose.msk.msra.mxu1 %vm452_vm2, %v4991_v22  ;;  %6424 = vmatprep.mubr.msk.f32.mxu1 %vm6675_vm1, %v6674_v10 }
0x3124   : > { %v4833_v26 = vmul.f32 %v6650_v2, %v6646_v14  ;;  %6432 = vmatprep.subr.mxu1 %v6674_v10 }
0x3126   : > { %6420 = vmatmul.mubr.msk.f32.vlgmr.msra.gmra.mrb[78].mxu0 %vm630_vm5, %v4833_v26  ;;  %6425 = vmatmul.mubr.msk.f32.vlgmr.msra.gmra.mrb[44].mxu1 %vm452_vm2, %v4989_v28 }
0x3127   : > { %6428 = vmatpush3.xpose.msk.msra.mxu0 %vm452_vm2, %v5069_v9  ;;  %6429 = vmatprep.mubr.msk.f32.mxu0 %vm6675_vm1, %v6674_v10 }
0x3128   : > { %6437 = vmatprep.subr.mxu0 %v6674_v10  ;;  %6434 = vmatprep.mubr.msk.f32.mxu1 %vm6675_vm1, %v6674_v10 }
0x312a   : > { %6430 = vmatmul.mubr.msk.f32.vlgmr.msra.gmra.mrb[80].mxu0 %vm452_vm2, %v5067_v29 }
0x312b   : > { %6439 = vmatprep.mubr.msk.f32.mxu0 %vm6675_vm1, %v6674_v10 }
0x31f5   : > { %v4907_v30 = vpop.f32.mrb[42].mxu1 }
0x31f6   : > { %v6416_v31 = vpop.f32.mrb[43].mxu1 }
0x31f9   : > { %v4984_v12 = vpop.f32.mrb[78].mxu0  ;;  %v5062_v33 = vpop.f32.mrb[44].mxu1 }
0x31fa   : > { %v5334_v34 = vcombine.low %v4907_v30, %v4984_v12  ;;  %v5144_v23 = vmul.f32 0.35355338, %v5062_v33  ;;  %v6421_v36 = vpop.f32.mrb[79].mxu0  ;;  %v6426_v37 = vpop.f32.mrb[45].mxu1 }
0x31fc   : > { %v5146_v38 = vsel %vm605_vm3, %v5144_v23, -inf }
0x31fd   : > { %5147 = vmax.xlane.f32.xlu0 %v5146_v38  ;;  %v5140_v39 = vpop.f32.mrb[80].mxu0 }
0x31fe   : > { %v5145_v41 = vmul.f32 0.35355338, %v5140_v39  ;;  %v6431_v42 = vpop.f32.mrb[81].mxu0 }
0x31ff   : > { %v6536_v42 = vld [vmem:[%s7637_s6 + $0x28] sm:$0xff]  }
0x3200   : > { %v5149_v43 = vsel %vm605_vm3, %v5145_v41, -inf }
0x3201   : > { %5150 = vmax.xlane.f32.xlu1 %v5149_v43  ;;  %v6538_v43 = vld [vmem:[%s7639_s8 + $0x88] sm:$0xff]  }
0x3212   : > { %5168 = vrot.lane.b32.xlu1 %v7369_v40, %s7664_s25 }
0x3216   : > { %5329 = vrot.lane.b32.xlu1 %v5328_v54, %s7665_s22 }
0x321a   : > { %5335 = vrot.lane.b32.xlu1 %v5334_v34, %s7666_s19 }
0x328a   : > { %v5148_v46 = vpop.xlane.xlu0 %5147 }
0x328b   : > { %v5152_v48 = vsub.f32 %v5144_v23, %v5148_v46  ;;  %v6539_v46 = vld [vmem:[%s7639_s8 + $0x90] sm:$0xff]  }
0x328d   : > { %v5154_v49 = vmul.f32 1.442695, %v5152_v48  ;;  %v6540_v48 = vld [vmem:[%s7639_s8 + $0x98] sm:$0xff]  }
0x328e   : > { %v5151_v50 = vpop.xlane.xlu1 %5150 }
0x328f   : > { %6651 = vpow2.f32 %v5154_v49  ;;  %v5153_v35 = vsub.f32 %v5145_v41, %v5151_v50  ;;  %v6535_v41 = vld [vmem:[%s7637_s6 + $0x20] sm:$0xff]   ;;  %v6542_v50 = vld [vmem:[%s7639_s8 + $0xa8] sm:$0xff]  }
0x3290   : > { %v6541_v49 = vld [vmem:[%s7639_s8 + $0xa0] sm:$0xff]  }
0x3291   : > { %v5156_v32 = vmul.f32 1.442695, %v5153_v35 }
0x3292   : > { %v5169_v51 = vpop.permute.xlu1 %5168 }
0x3293   : > { %6653 = vpow2.f32 %v5156_v32  ;;  %6433 = vmatpush3.msk.msra.mxu1 %vm634_vm4, %v5169_v51 }
0x3294   : > { %6442 = vmatprep.subr.bf16.mxu1 %v6674_v10 }
0x3296   : > { %v5330_v3 = vpop.permute.xlu1 %5329 }
0x3297   : > { %v5344_v5 = vsel %vm452_vm2, %v5324_v0, %v5330_v3 }
0x3299   : > { %v6652_v40 = vpop.eup %6651 }
0x329a   : > { %v5158_v44 = vsel %vm605_vm3, %v6652_v40, 0.0  ;;  %v5336_v4 = vpop.permute.xlu1 %5335 }
0x329b   : > { %5159 = vadd.xlane.f32.xlu0 %v5158_v44  ;;  %v5345_v7 = vsel %vm1809_vm6, %v5344_v5, %v5336_v4 }
0x329d   : > { %v6654_v45 = vpop.eup %6653 }
0x329e   : > { %v5161_v47 = vsel %vm605_vm3, %v6654_v45, 0.0 }
0x329f   : > { %5162 = vadd.xlane.f32.xlu0 %v5161_v47 }
0x32b5   : > { %5245 = vrot.lane.b32.xlu0 %v7375_v27, %s7664_s25  ;;  %v6533_v27 = vld [vmem:[%s7635_s4 + $0x20] sm:$0xff]  }
0x3328   : > { %v5160_v52 = vpop.xlane.xlu0 %5159 }
0x3329   : > { %6655 = vrcp.f32 %v5160_v52 }
0x332c   : > { %v5163_v53 = vpop.xlane.xlu0 %5162 }
0x332d   : > { %6657 = vrcp.f32 %v5163_v53 }
0x3330   : > { %v5246_v54 = vpop.permute.xlu0 %5245 }
0x3331   : > { %6438 = vmatpush3.msk.msra.mxu0 %vm634_vm4, %v5246_v54 }
0x3332   : > { %6450 = vmatprep.subr.bf16.mxu0 %v6674_v10 }
0x3333   : > { %v6656_v55 = vpop.eup %6655 }
0x3334   : > { %v5166_v56 = vmul.f32 %v6656_v55, %v6652_v40  ;;  %v5868_v40 = vld [vmem:[%s7632_s1 + $0x28] sm:$0xff] }
0x3335   : > { %v5452_v44 = vadd.f32 1.0, %v5868_v40 }
0x3336   : > { %6435 = vmatmul.mubr.msk.f32.vlgmr.msra.gmra.mrb[46].mxu1 %vm630_vm5, %v5166_v56  ;;  %v6543_v56 = vld [vmem:[%s7639_s8 + $0xb0] sm:$0xff]  }
0x3337   : > { %v6658_v57 = vpop.eup %6657  ;;  %6446 = vmatprep.mubr.msk.bf16.mxu1 %vm6675_vm1, %v6674_v10  ;;  %6443 = vmatpush3.bf16.msra.mxu1 %v6533_v27 }
0x3338   : > { %v5167_v58 = vmul.f32 %v6658_v57, %v6654_v45  ;;  %6444 = vmatprep.subr.bf16.mxu1 %v6674_v10  ;;  %v6544_v57 = vld [vmem:[%s7639_s8 + $0xb8] sm:$0xff]  }
0x333a   : > { %6440 = vmatmul.mubr.msk.f32.vlgmr.msra.gmra.mrb[82].mxu0 %vm630_vm5, %v5167_v58  ;;  %v5924_v58 = vld [vmem:[%s7638_s7 + $0x2] ss:$0 sm:$0xff] }
0x333b   : > { %6454 = vmatprep.mubr.msk.bf16.mxu0 %vm6675_vm1, %v6674_v10  ;;  %6445 = vmatpush3.bf16.msra.mxu1 %v6534_v59 }
0x333c   : > { %6458 = vmatprep.subr.bf16.mxu1 %v6674_v10  ;;  %6451 = vmatpush3.bf16.msra.mxu0 %v6535_v41 }
0x333d   : > { %6452 = vmatprep.subr.bf16.mxu0 %v6674_v10 }
0x3340   : > { %6453 = vmatpush3.bf16.msra.mxu0 %v6536_v42 }
0x3409   : > { %v5241_v61 = vpop.f32.mrb[46].mxu1 }
0x340a   : > { %v6436_v60 = vpop.f32.mrb[47].mxu1 }
0x340d   : > { %v5318_v62 = vpop.f32.mrb[82].mxu0 }
0x340e   : > { %v5340_v1 = vcombine.low %v5241_v61, %v5318_v62  ;;  %v6441_v63 = vpop.f32.mrb[83].mxu0 }
0x3410   : > { %5341 = vrot.lane.b32.xlu0 %v5340_v1, %s7667_s18 }
0x3482   : > { %v5342_v8 = vpop.permute.xlu0 %5341 }
0x3483   : > { %v5346_v6 = vsel %vm1811_vm7, %v5345_v7, %v5342_v8 }
0x3484   : > { %v5347_v11 = vpack.c.bf16 %v5346_v6, %v5346_v6 }
0x3486   : > { %6447 = vmatmul.mubr.msk.bf16.vlgmr.msra.gmra.mrb[48].mxu1 %vm359_vm0, %v5347_v11 }
0x3487   : > { %6474 = vmatprep.mubr.msk.bf16.mxu1 %vm6675_vm1, %v6674_v10 }
0x3559   : > { %v5410_v14 = vpop.f32.mrb[48].mxu1 }
0x355a   : > { %v5411_v16 = vadd.f32 %v5915_v13, %v5410_v14  ;;  %v6448_v15 = vpop.f32.mrb[49].mxu1 }
0x355b   : > { %v5413_v17 = vpop.f32.mrb[50].mxu1 }
0x355c   : > { %5417 = vrot.lane.b32.xlu1 %v5411_v16, %s6676_s28  ;;  %v6449_v0 = vpop.f32.mrb[51].mxu1 }
0x35ce   : > { %v5418_v19 = vpop.permute.xlu1 %5417 }
0x35cf   : > { %v5420_v21 = vmul.f32 %v7348_v20, %v5418_v19 }
0x35d1   : > { %5422 = vrot.lane.b32.xlu0 %v5420_v21, %s6676_s28 }
0x3643   : > { %v5423_v22 = vpop.permute.xlu0 %5422 }
0x3644   : > { %v5425_v24 = vadd.f32 %v5423_v22, %v7341_v18 }
0x3646   : > { %v5426_v25 = vsel %vm359_vm0, %v5425_v24, 0.0 }
0x3647   : > { %5427 = vadd.xlane.f32.xlu1 %v5426_v25 }
0x36d4   : > { %v5428_v2 = vpop.xlane.xlu1 %5427 }
0x36d5   : > { %v5429_v9 = vmul.f32 0.03125, %v5428_v2 }
0x36d7   : > { %v5430_v26 = vsub.f32 %v5425_v24, %v5429_v9 }
0x36d9   : > { %v5431_v28 = vmul.f32 %v5430_v26, %v5430_v26 }
0x36db   : > { %v5432_v29 = vsel %vm359_vm0, %v5431_v28, 0.0 }
0x36dc   : > { %5433 = vadd.xlane.f32.xlu0 %v5432_v29 }
0x3769   : > { %v5434_v30 = vpop.xlane.xlu0 %5433 }
0x376a   : > { %v5435_v31 = vmul.f32 0.03125, %v5434_v30 }
0x376c   : > { %v5436_v12 = vadd.f32 1e-06, %v5435_v31 }
0x376e   : > { %6659 = vrsqrt.f32 %v5436_v12 }
0x3778   : > { %v6660_v33 = vpop.eup %6659 }
0x3779   : > { %v7561_v34 = vmul.f32 %v6660_v33, %v5430_v26 }
0x377b   : > { %v5439_v18 = vsel %vm359_vm0, %v7561_v34, 0.0 }
0x377c   : > { %5440 = vadd.xlane.f32.xlu0 %v5439_v18 }
0x3792   : > { %5455 = vrot.lane.b32.xlu0 %v7348_v20, %s6689_s26  ;;  %v6537_v20 = vld [vmem:[%s7639_s8 + $0x80] sm:$0xff]  }
0x3793   : > { %6459 = vmatpush3.bf16.msra.mxu1 %v6537_v20 }
0x3794   : > { %6460 = vmatprep.subr.bf16.mxu1 %v6674_v10 }
0x3797   : > { %6461 = vmatpush3.bf16.msra.mxu1 %v6538_v43 }
0x3798   : > { %6462 = vmatprep.subr.bf16.mxu1 %v6674_v10 }
0x379b   : > { %6463 = vmatpush3.bf16.msra.mxu1 %v6539_v46 }
0x379c   : > { %6464 = vmatprep.subr.bf16.mxu1 %v6674_v10 }
0x379f   : > { %6465 = vmatpush3.bf16.msra.mxu1 %v6540_v48 }
0x37a0   : > { %6466 = vmatprep.subr.bf16.mxu1 %v6674_v10 }
0x37a3   : > { %6467 = vmatpush3.bf16.msra.mxu1 %v6541_v49 }
0x37a4   : > { %6468 = vmatprep.subr.bf16.mxu1 %v6674_v10 }
0x37a7   : > { %6469 = vmatpush3.bf16.msra.mxu1 %v6542_v50 }
0x37a8   : > { %6470 = vmatprep.subr.bf16.mxu1 %v6674_v10 }
0x37ab   : > { %6471 = vmatpush3.bf16.msra.mxu1 %v6543_v56 }
0x37ac   : > { %6472 = vmatprep.subr.bf16.mxu1 %v6674_v10  ;;  %v5945_v10 = vld [vmem:[%s7640_s9 + $0x2] ss:$0 sm:$0xff] }
0x37af   : > { %6473 = vmatpush3.bf16.msra.mxu1 %v6544_v57 }
0x3809   : > { %v5441_v23 = vpop.xlane.xlu0 %5440 }
0x380a   : > { %v5442_v36 = vmul.f32 0.03125, %v5441_v23 }
0x380c   : > { %v5443_v37 = vsub.f32 %v7561_v34, %v5442_v36 }
0x380d   : > { %v5456_v52 = vpop.permute.xlu0 %5455 }
0x380e   : > { %v5444_v38 = vmul.f32 %v5443_v37, %v5443_v37 }
0x3810   : > { %v5445_v39 = vsel %vm359_vm0, %v5444_v38, 0.0 }
0x3811   : > { %5446 = vadd.xlane.f32.xlu1 %v5445_v39 }
0x389e   : > { %v5447_v35 = vpop.xlane.xlu1 %5446 }
0x389f   : > { %v5448_v32 = vmul.f32 0.03125, %v5447_v35 }
0x38a1   : > { %v5449_v51 = vadd.f32 1e-06, %v5448_v32 }
0x38a3   : > { %6661 = vrsqrt.f32 %v5449_v51 }
0x38ad   : > { %v6662_v45 = vpop.eup %6661 }
0x38ae   : > { %v5451_v47 = vmul.f32 %v6662_v45, %v5443_v37 }
0x38b0   : > { %v5453_v53 = vmul.f32 %v5452_v44, %v5451_v47 }
0x38b2   : > { %v5458_v54 = vadd.f32 %v5456_v52, %v5453_v53 }
0x38b4   : > { %v5459_v55 = vpack.c.bf16 %v5458_v54, %v5458_v54 }
0x38b6   : > { %6455 = vmatmul.mubr.msk.bf16.vlgmr.msra.gmra.mrb[84].mxu0 %vm359_vm0, %v5459_v55 }
0x3989   : > { %v5522_v27 = vpop.f32.mrb[84].mxu0 }
0x398a   : > { %v5523_v59 = vadd.f32 %v5924_v58, %v5522_v27  ;;  %v6456_v61 = vpop.f32.mrb[85].mxu0 }
0x398b   : > { %v5525_v60 = vpop.f32.mrb[86].mxu0 }
0x398c   : > { %v5528_v62 = vmax.f32 %v5523_v59, 0.0  ;;  %v6457_v1 = vpop.f32.mrb[87].mxu0 }
0x398e   : > { %v5529_v63 = vpack.c.bf16 %v5528_v62, %v5528_v62 }
0x3990   : > { %6475 = vmatmul.mubr.bf16.vlgmr.msra.gmra.mrb[52].mxu1 %v5529_v63 }
0x3a63   : > { %v5637_v3 = vpop.f32.mrb[52].mxu1 }
0x3a64   : > { %v5638_v4 = vadd.f32 %v5945_v10, %v5637_v3  ;;  %v6476_v5 = vpop.f32.mrb[53].mxu1 }
0x3a65   : > { %v5640_v7 = vpop.f32.mrb[54].mxu1 }
0x3a66   : > { %5644 = vrot.lane.b32.xlu1 %v5638_v4, %s6689_s26  ;;  %v6477_v8 = vpop.f32.mrb[55].mxu1 }
0x3ad8   : > { %v5645_v6 = vpop.permute.xlu1 %5644 }
0x3ad9   : > { %v5647_v11 = vmul.f32 %v5868_v40, %v5645_v6 }
0x3adb   : > { %5649 = vrot.lane.b32.xlu1 %v5647_v11, %s6673_s21  ;;  %s7673_s21 = sshll.u32 %s7675_s14, 3 }
0x3adc   : > { %s354_s25 = scalar_lea.vmem %s7641_s10, %s7673_s21 }
0x3b4d   : > { %v5650_v13 = vpop.permute.xlu1 %5649 }
0x3b4e   : > { %v5652_v14 = vadd.f32 %v5650_v13, %v7561_v34 }
0x3b50   : > { %v5653_v16 = vsel %vm359_vm0, %v5652_v14, 0.0 }
0x3b51   : > { %5654 = vadd.xlane.f32.xlu0 %v5653_v16 }
0x3bde   : > { %v5655_v15 = vpop.xlane.xlu0 %5654 }
0x3bdf   : > { %v5656_v17 = vmul.f32 0.03125, %v5655_v15 }
0x3be1   : > { %v5657_v0 = vsub.f32 %v5652_v14, %v5656_v17 }
0x3be3   : > { %v5658_v19 = vmul.f32 %v5657_v0, %v5657_v0 }
0x3be5   : > { %v5659_v21 = vsel %vm359_vm0, %v5658_v19, 0.0 }
0x3be6   : > { %5660 = vadd.xlane.f32.xlu1 %v5659_v21 }
0x3c73   : > { %v5661_v22 = vpop.xlane.xlu1 %5660 }
0x3c74   : > { %v5662_v24 = vmul.f32 0.03125, %v5661_v22 }
0x3c76   : > { %v5663_v25 = vadd.f32 1e-06, %v5662_v24 }
0x3c78   : > { %6663 = vrsqrt.f32 %v5663_v25 }
0x3c82   : > { %v6664_v2 = vpop.eup %6663 }
0x3c83   : > { %v5665_v9 = vmul.f32 %v6664_v2, %v5657_v0 }
0x3c85   : > { %5666 = vst.msk [vmem:[%s354_s25] sm:$0xff] %vm359_vm0, %v5665_v9 }
0x3c86 PF: > { %s20_s13 = sadd.s32 1, %s6671_s13  }
0x3c87   : > { %p17_p4 = scmp.ge.s32.totalorder %s20_s13, 4  }
0x3c89   :  { %19 = sbr.rel (!%p17_p4) target bundleno = 1 (0x1), region = 108 }

// kernel: genetic_diffusion_forward.9
= control target key start
LH: loop header
LB: loop body
LE: loop exit
PB: predicated region body
PF: predicated region fallthrough
CT: control target
= control target key end

     0   :  { %s7816_s0 = inlined_call_operand.vmem [shape: f32[2,8,32], index: 0, kind: input, shape index: {}]   ;;  %s7817_s1 = inlined_call_operand.vmem [shape: f32[3,8,192], index: 1, kind: input, shape index: {}]   ;;  %s7818_s2 = inlined_call_operand.vmem [shape: bf16[3,32,96], index: 2, kind: input, shape index: {}]   ;;  %s7819_s3 = inlined_call_operand.vmem [shape: f32[3,1,96], index: 3, kind: input, shape index: {}]   ;;  %s7820_s4 = inlined_call_operand.vmem [shape: bf16[3,32,32], index: 4, kind: input, shape index: {}]   ;;  %s7821_s5 = inlined_call_operand.vmem [shape: f32[3,1,32], index: 5, kind: input, shape index: {}]   ;;  %s7822_s6 = inlined_call_operand.vmem [shape: bf16[3,32,128], index: 6, kind: input, shape index: {}]   ;;  %s7823_s7 = inlined_call_operand.vmem [shape: f32[3,1,128], index: 7, kind: input, shape index: {}]   ;;  %s7824_s8 = inlined_call_operand.vmem [shape: bf16[3,128,32], index: 8, kind: input, shape index: {}]   ;;  %s7825_s9 = inlined_call_operand.vmem [shape: f32[3,1,32], index: 9, kind: input, shape index: {}]   ;;  %s7826_s10 = inlined_call_operand.hbm [shape: f32[2,8,32], index: 10, kind: output, shape index: {}]  }
   0x1   :  { %7868 = sst [smem:[#allocation14_spill]] %s7816_s0 }
   0x2   :  { %7869 = sst [smem:[#allocation15_spill]] %s7826_s10 }
   0x3   :  { %15 = vsyncpa [#allocation3], 0 }
   0x4   :  { %17 = vsyncpa [#allocation3 + $0x1], 0  ;;  %s6854_s13 = smov 0   ;;  %s6856_s14 = smov 0  }
   0x5   :  { %s6858_s15 = smov 0   ;;  %s6860_s16 = smov 0  }
   0x6 LB: > { %7870 = sst [smem:[#allocation5_spill]] %s6767_s13  ;;  %s6875_s17 = sadd.s32 4294967295, %s6779_s16   ;;  %s6779_s16 = sphi %s6860_s16, %s7904_s16   ;;  %s6775_s15 = sphi %s6858_s15, %s7907_s15   ;;  %s6771_s14 = sphi %s6856_s14, %s7906_s14   ;;  %s6767_s13 = sphi %s6854_s13, %s7905_s13  }
   0x7   : > { %7871 = sst [smem:[#allocation6_spill]] %s6771_s14  ;;  %s5740_s18 = sadd.s32 4294967294, %s6779_s16  }
   0x8   : > { %7872 = sst [smem:[#allocation7_spill]] %s6775_s15  ;;  %s6879_s19 = sadd.s32 1, %s6779_s16  }
   0x9   : > { %7873 = sst [smem:[#allocation8_spill]] %s6779_s16  ;;  %s245_s20 = sadd.s32 1, %s6775_s15 }
   0xa   : > { %7874 = sst [smem:[#allocation9_spill]] %s6875_s17  ;;  %s242_s21 = ssub.s32 %s6779_s16, %s6879_s19 }
   0xb   : > { %7875 = sst [smem:[#allocation10_spill]] %s6879_s19  ;;  %p255_p0 = scmp.ne.s32.totalorder %s6775_s15, %s6771_s14 }
   0xc   : > { %p243_p1 = scmp.eq.s32.totalorder %s242_s21, 0  ;;  %p256_p2 = scmp.eq.s32.totalorder %s6875_s17, 1 }
   0xd   : > { %p261_p3 = scmp.ne.s32.totalorder %s6771_s14, %s6767_s13  ;;  %p262_p4 = scmp.eq.s32.totalorder %s5740_s18, 1 }
   0xe   : > { %s6890_s22 = scalar_select %p243_p1, %s6775_s15, %s245_s20  }
   0xf   : > { %p6892_p5 = por %p256_p2, %p255_p0  ;;  %p6896_p6 = por %p262_p4, %p261_p3 }
  0x10   : > { %7876 = sst [smem:[#allocation11_spill]] %s6890_s22  ;;  %p5743_p7 = scmp.ge.s32.totalorder %s6779_s16, 1 }
  0x11   : > { %s7877_s23 = scalar_select %p6892_p5, 1, 0 }
  0x12   : > { %s7879_s24 = scalar_select %p6896_p6, 1, 0 }
  0x13   : > { %7878 = sst [smem:[#allocation12_spill]] %s7877_s23  ;;  %p314_p8 = scmp.lt.s32.totalorder %s6779_s16, 3 }
  0x14   : > { %7880 = sst [smem:[#allocation13_spill]] %s7879_s24 }
  0x15   : > { %p315_p9 = pnand %p5743_p7, %p314_p8 }
  0x16   : > { %p351_p10 = scmp.lt.s32.totalorder (!%p315_p9), %s6875_s17, 1  ;;  %vm359_vm0 = vcmask (!%p315_p9), 261120   ;;  %s7881_s0 = sld [smem:[#allocation14_spill]] (!%p315_p9)  ;;  %v6914_v2 = vld [vmem:[%s7817_s1] sm:$0xff] (!%p315_p9)  ;;  %v6782_v10 = vmov (!%p315_p9), 0.0   ;;  %v6556_v11 = vld [vmem:[%s7818_s2 + $0x8] sm:$0xff] (!%p315_p9)  }
  0x17   : > { %318 = sbr.rel (%p315_p9) target bundleno = 15525 (0x3ca5), region = 60  ;;  %v374_v3 = vadd.f32 (!%p315_p9), 1.0, %v6914_v2  ;;  %s7851_s12 = smov (!%p315_p9), 96   ;;  %v6555_v9 = vld [vmem:[%s7818_s2] sm:$0xff] (!%p315_p9)   ;;  %6127 = vmatprep.subr.bf16.mxu0 (!%p315_p9), %v6782_v10  ;;  %6140 = vmatprep.subr.mxu1 (!%p315_p9), %v6782_v10  ;;  %vm6783_vm1 = vmmov (!%p315_p9), 0   ;;  %vm452_vm2 = vcmask (!%p315_p9), 64512  }
  0x18   : > { %6128 = vmatpush3.bf16.msra.mxu0 (!%p315_p9), %v6555_v9  ;;  %6131 = vmatprep.mubr.msk.bf16.mxu0 (!%p315_p9), %vm6783_vm1, %v6782_v10  ;;  %v5746_v21 = vld [vmem:[%s7819_s3] ss:$0 sm:$0xff] (!%p315_p9)  ;;  %vm605_vm3 = vcmask (!%p315_p9), 27648   ;;  %s7855_s28 = smov (!%p315_p9), 64   ;;  %s7847_s30 = smov (!%p315_p9), 120   ;;  %vm634_vm4 = vcmask (!%p315_p9), 1043456  }
  0x19   : > { %376 = vrot.lane.b32.xlu1 (!%p315_p9), %v374_v3, %s7851_s12  ;;  %6129 = vmatprep.subr.bf16.mxu0 (!%p315_p9), %v6782_v10  ;;  %vm630_vm5 = vcmask (!%p315_p9), 31744   ;;  %s7845_s11 = smov (!%p315_p9), 56   ;;  %s7843_s18 = smov (!%p315_p9), 80   ;;  %vm1809_vm6 = vcmask (!%p315_p9), 130048   ;;  %vm1811_vm7 = vcmask (!%p315_p9), 195584  }
  0x1a   : > { %6142 = vmatprep.mubr.msk.f32.mxu1 (!%p315_p9), %vm6783_vm1, %v6782_v10  ;;  %s7839_s20 = smov (!%p315_p9), 112   ;;  %s7837_s21 = smov (!%p315_p9), 48  }
  0x1b   : > { %s7835_s27 = smov (!%p315_p9), 40   ;;  %s7893_s24 = smov (!%p315_p9), 24  }
  0x1c   : > { %6130 = vmatpush3.bf16.msra.mxu0 (!%p315_p9), %v6556_v11  ;;  %s7894_s19 = smov (!%p315_p9), 64   ;;  %s7895_s22 = smov (!%p315_p9), 32  }
  0x1d   : > { %6135 = vmatprep.subr.mxu0 (!%p315_p9), %v6782_v10  ;;  %s7896_s13 = smov (!%p315_p9), 96   ;;  %s7898_s10 = sld [smem:[#allocation9_spill]] (!%p315_p9) }
  0x1e   : > { %s352_s25 = scalar_select %p351_p10, %s6875_s17, 1 }
  0x20   : > { %s5745_s26 = sshll.u32 %s352_s25, 3  ;;  %s7829_s25 = smov 72  }
  0x21   : > { %s354_s29 = scalar_lea.vmem %s7881_s0, %s5745_s26  ;;  %s7827_s26 = smov 104  }
  0x22   : > { %v6907_v0 = vld [vmem:[%s354_s29] sm:$0xff]  ;;  %s7849_s29 = smov 88  }
  0x23   : > { %v360_v1 = vsel %vm359_vm0, %v6907_v0, 0.0  ;;  %s5974_s17 = sshll.u32 %s7898_s10, 7 }
  0x24   : > { %361 = vadd.xlane.f32.xlu0 %v360_v1 }
  0x8b   : > { %v377_v16 = vpop.permute.xlu1 %376 }
  0xb1   : > { %v362_v4 = vpop.xlane.xlu0 %361 }
  0xb2   : > { %v364_v5 = vmul.f32 0.03125, %v362_v4 }
  0xb4   : > { %v365_v6 = vsub.f32 %v6907_v0, %v364_v5 }
  0xb6   : > { %v366_v7 = vmul.f32 %v365_v6, %v365_v6 }
  0xb8   : > { %v367_v8 = vsel %vm359_vm0, %v366_v7, 0.0 }
  0xb9   : > { %368 = vadd.xlane.f32.xlu0 %v367_v8 }
 0x146   : > { %v369_v12 = vpop.xlane.xlu0 %368 }
 0x147   : > { %v370_v13 = vmul.f32 0.03125, %v369_v12 }
 0x149   : > { %v371_v14 = vadd.f32 1e-06, %v370_v13 }
 0x14b   : > { %6597 = vrsqrt.f32 %v371_v14 }
 0x155   : > { %v6598_v15 = vpop.eup %6597 }
 0x156   : > { %v373_v17 = vmul.f32 %v6598_v15, %v365_v6 }
 0x158   : > { %v379_v18 = vmul.f32 %v377_v16, %v373_v17 }
 0x15a   : > { %v380_v19 = vadd.f32 %v379_v18, %v6914_v2 }
 0x15c   : > { %v381_v20 = vpack.c.bf16 %v380_v19, %v380_v19 }
 0x15e   : > { %6132 = vmatmul.mubr.msk.bf16.vlgmr.msra.gmra.mrb[0].mxu0 %vm359_vm0, %v381_v20 }
 0x15f   : > { %6137 = vmatprep.mubr.msk.f32.mxu0 %vm6783_vm1, %v6782_v10 }
 0x231   : > { %v442_v22 = vpop.f32.mrb[0].mxu0 }
 0x232   : > { %v6941_v23 = vadd.f32 %v5746_v21, %v442_v22  ;;  %v6133_v24 = vpop.f32.mrb[1].mxu0 }
 0x233   : > { %v445_v25 = vpop.f32.mrb[2].mxu0 }
 0x234   : > { %450 = vrot.lane.b32.xlu1 %v6941_v23, %s7851_s12  ;;  %v6134_v26 = vpop.f32.mrb[3].mxu0  ;;  %v6947_v27 = vcombine.high %v6941_v23, %v6941_v23 }
 0x236   : > { %527 = vrot.lane.b32.xlu0 %v6947_v27, %s7851_s12 }
 0x2a6   : > { %v451_v28 = vpop.permute.xlu1 %450 }
 0x2a7   : > { %6136 = vmatpush3.xpose.msk.msra.mxu0 %vm452_vm2, %v451_v28 }
 0x2a8   : > { %v528_v29 = vpop.permute.xlu0 %527  ;;  %6150 = vmatprep.subr.mxu0 %v6782_v10 }
 0x2a9   : > { %6141 = vmatpush3.xpose.msk.msra.mxu1 %vm452_vm2, %v528_v29 }
 0x2aa   : > { %6138 = vmatmul.mubr.msk.f32.vlgmr.msra.gmra.mrb[4].mxu0 %vm452_vm2, %v6941_v23  ;;  %6145 = vmatprep.subr.mxu1 %v6782_v10 }
 0x2ab   : > { %6152 = vmatprep.mubr.msk.f32.mxu0 %vm6783_vm1, %v6782_v10 }
 0x2ac   : > { %6143 = vmatmul.mubr.msk.f32.vlgmr.msra.gmra.mrb[0].mxu1 %vm452_vm2, %v6947_v27 }
 0x2ad   : > { %6147 = vmatprep.mubr.msk.f32.mxu1 %vm6783_vm1, %v6782_v10 }
 0x37d   : > { %v523_v30 = vpop.f32.mrb[4].mxu0 }
 0x37e   : > { %v603_v31 = vmul.f32 0.35355338, %v523_v30  ;;  %v6139_v32 = vpop.f32.mrb[5].mxu0 }
 0x37f   : > { %v599_v33 = vpop.f32.mrb[0].mxu1 }
 0x380   : > { %v604_v34 = vmul.f32 0.35355338, %v599_v33  ;;  %v6144_v35 = vpop.f32.mrb[1].mxu1  ;;  %v606_v36 = vsel %vm605_vm3, %v603_v31, -inf }
 0x381   : > { %607 = vmax.xlane.f32.xlu1 %v606_v36 }
 0x382   : > { %v609_v37 = vsel %vm605_vm3, %v604_v34, -inf }
 0x383   : > { %610 = vmax.xlane.f32.xlu0 %v609_v37 }
 0x392   : > { %628 = vrot.lane.b32.xlu1 %v6941_v23, %s7855_s28 }
 0x396   : > { %786 = vrot.lane.b32.xlu1 %v6941_v23, %s7849_s29 }
 0x399   : > { %707 = vrot.lane.b32.xlu0 %v6947_v27, %s7855_s28 }
 0x39a   : > { %864 = vrot.lane.b32.xlu1 %v6947_v27, %s7849_s29  ;;  %s7885_s29 = smov 80  }
 0x39e   : > { %784 = vrot.lane.b32.xlu1 %v6941_v23, %s7847_s30 }
 0x40e   : > { %v608_v38 = vpop.xlane.xlu1 %607 }
 0x40f   : > { %v612_v39 = vsub.f32 %v603_v31, %v608_v38 }
 0x410   : > { %v611_v40 = vpop.xlane.xlu0 %610 }
 0x411   : > { %v614_v41 = vmul.f32 1.442695, %v612_v39  ;;  %v613_v42 = vsub.f32 %v604_v34, %v611_v40 }
 0x412   : > { %v629_v43 = vpop.permute.xlu1 %628 }
 0x413   : > { %6599 = vpow2.f32 %v614_v41  ;;  %v616_v44 = vmul.f32 1.442695, %v613_v42  ;;  %6146 = vmatpush3.msk.msra.mxu1 %vm634_vm4, %v629_v43 }
 0x414   : > { %v708_v45 = vpop.permute.xlu0 %707  ;;  %6155 = vmatprep.subr.mxu1 %v6782_v10 }
 0x415   : > { %6601 = vpow2.f32 %v616_v44  ;;  %6151 = vmatpush3.msk.msra.mxu0 %vm634_vm4, %v708_v45 }
 0x416   : > { %6160 = vmatprep.subr.mxu0 %v6782_v10  ;;  %v787_v50 = vpop.permute.xlu1 %786 }
 0x41a   : > { %v865_v51 = vpop.permute.xlu1 %864 }
 0x41d   : > { %v6600_v46 = vpop.eup %6599 }
 0x41e   : > { %v618_v47 = vsel %vm605_vm3, %v6600_v46, 0.0  ;;  %v785_v52 = vpop.permute.xlu1 %784 }
 0x41f   : > { %v6602_v48 = vpop.eup %6601  ;;  %619 = vadd.xlane.f32.xlu1 %v618_v47 }
 0x420   : > { %v621_v49 = vsel %vm605_vm3, %v6602_v48, 0.0 }
 0x423   : > { %622 = vadd.xlane.f32.xlu1 %v621_v49 }
 0x434   : > { %862 = vrot.lane.b32.xlu1 %v6947_v27, %s7847_s30  ;;  %s7886_s30 = smov 112  }
 0x4ac   : > { %v620_v53 = vpop.xlane.xlu1 %619 }
 0x4ad   : > { %6603 = vrcp.f32 %v620_v53 }
 0x4b0   : > { %v623_v54 = vpop.xlane.xlu1 %622 }
 0x4b1   : > { %6605 = vrcp.f32 %v623_v54 }
 0x4b4   : > { %v863_v59 = vpop.permute.xlu1 %862 }
 0x4b7   : > { %v6604_v55 = vpop.eup %6603 }
 0x4b8   : > { %v626_v56 = vmul.f32 %v6604_v55, %v6600_v46 }
 0x4ba   : > { %6148 = vmatmul.mubr.msk.f32.vlgmr.msra.gmra.mrb[2].mxu1 %vm630_vm5, %v626_v56 }
 0x4bb   : > { %v6606_v57 = vpop.eup %6605  ;;  %6156 = vmatpush3.xpose.msk.msra.mxu1 %vm452_vm2, %v787_v50  ;;  %6157 = vmatprep.mubr.msk.f32.mxu1 %vm6783_vm1, %v6782_v10 }
 0x4bc   : > { %v627_v58 = vmul.f32 %v6606_v57, %v6602_v48  ;;  %6165 = vmatprep.subr.mxu1 %v6782_v10 }
 0x4be   : > { %6153 = vmatmul.mubr.msk.f32.vlgmr.msra.gmra.mrb[6].mxu0 %vm630_vm5, %v627_v58  ;;  %6158 = vmatmul.mubr.msk.f32.vlgmr.msra.gmra.mrb[4].mxu1 %vm452_vm2, %v785_v52 }
 0x4bf   : > { %6161 = vmatpush3.xpose.msk.msra.mxu0 %vm452_vm2, %v865_v51  ;;  %6162 = vmatprep.mubr.msk.f32.mxu0 %vm6783_vm1, %v6782_v10 }
 0x4c0   : > { %6170 = vmatprep.subr.mxu0 %v6782_v10  ;;  %6167 = vmatprep.mubr.msk.f32.mxu1 %vm6783_vm1, %v6782_v10 }
 0x4c2   : > { %6163 = vmatmul.mubr.msk.f32.vlgmr.msra.gmra.mrb[8].mxu0 %vm452_vm2, %v863_v59 }
 0x4c3   : > { %6172 = vmatprep.mubr.msk.f32.mxu0 %vm6783_vm1, %v6782_v10 }
 0x58d   : > { %v6999_v60 = vpop.f32.mrb[2].mxu1 }
 0x58e   : > { %v6149_v61 = vpop.f32.mrb[3].mxu1 }
 0x591   : > { %v7001_v62 = vpop.f32.mrb[6].mxu0  ;;  %v858_v63 = vpop.f32.mrb[4].mxu1 }
 0x592   : > { %v1788_v1 = vcombine.low %v6999_v60, %v7001_v62  ;;  %v940_v3 = vmul.f32 0.35355338, %v858_v63  ;;  %v6154_v4 = vpop.f32.mrb[7].mxu0  ;;  %v6159_v5 = vpop.f32.mrb[5].mxu1 }
 0x594   : > { %v942_v6 = vsel %vm605_vm3, %v940_v3, -inf }
 0x595   : > { %943 = vmax.xlane.f32.xlu0 %v942_v6  ;;  %v936_v7 = vpop.f32.mrb[8].mxu0 }
 0x596   : > { %v941_v8 = vmul.f32 0.35355338, %v936_v7  ;;  %v6164_v9 = vpop.f32.mrb[9].mxu0 }
 0x598   : > { %v945_v11 = vsel %vm605_vm3, %v941_v8, -inf }
 0x599   : > { %946 = vmax.xlane.f32.xlu1 %v945_v11 }
 0x5aa   : > { %964 = vrot.lane.b32.xlu1 %v6941_v23, %s7845_s11 }
 0x5ab   : > { %1041 = vrot.lane.b32.xlu0 %v6947_v27, %s7845_s11  ;;  %s7884_s11 = smov 56  }
 0x5ae   : > { %1120 = vrot.lane.b32.xlu1 %v6941_v23, %s7843_s18 }
 0x5b2   : > { %1198 = vrot.lane.b32.xlu1 %v6947_v27, %s7843_s18  ;;  %s7887_s18 = smov 48  }
 0x5b6   : > { %1196 = vrot.lane.b32.xlu1 %v6947_v27, %s7839_s20 }
 0x622   : > { %v944_v12 = vpop.xlane.xlu0 %943 }
 0x623   : > { %v948_v13 = vsub.f32 %v940_v3, %v944_v12 }
 0x625   : > { %v950_v14 = vmul.f32 1.442695, %v948_v13 }
 0x626   : > { %v1042_v15 = vpop.permute.xlu0 %1041  ;;  %v947_v16 = vpop.xlane.xlu1 %946 }
 0x627   : > { %6607 = vpow2.f32 %v950_v14  ;;  %v949_v17 = vsub.f32 %v941_v8, %v947_v16  ;;  %6171 = vmatpush3.msk.msra.mxu0 %vm634_vm4, %v1042_v15 }
 0x628   : > { %6180 = vmatprep.subr.mxu0 %v6782_v10 }
 0x629   : > { %v952_v18 = vmul.f32 1.442695, %v949_v17 }
 0x62a   : > { %v965_v19 = vpop.permute.xlu1 %964 }
 0x62b   : > { %6609 = vpow2.f32 %v952_v18  ;;  %6166 = vmatpush3.msk.msra.mxu1 %vm634_vm4, %v965_v19 }
 0x62c   : > { %6175 = vmatprep.subr.mxu1 %v6782_v10 }
 0x62e   : > { %v1121_v28 = vpop.permute.xlu1 %1120 }
 0x631   : > { %v6608_v20 = vpop.eup %6607 }
 0x632   : > { %v954_v21 = vsel %vm605_vm3, %v6608_v20, 0.0  ;;  %v1199_v32 = vpop.permute.xlu1 %1198 }
 0x633   : > { %955 = vadd.xlane.f32.xlu0 %v954_v21 }
 0x635   : > { %v6610_v22 = vpop.eup %6609 }
 0x636   : > { %v957_v24 = vsel %vm605_vm3, %v6610_v22, 0.0  ;;  %v1197_v35 = vpop.permute.xlu1 %1196 }
 0x637   : > { %958 = vadd.xlane.f32.xlu0 %v957_v24 }
 0x64d   : > { %1118 = vrot.lane.b32.xlu0 %v6941_v23, %s7839_s20  ;;  %s7841_s20 = smov 24  }
 0x6c0   : > { %v956_v25 = vpop.xlane.xlu0 %955 }
 0x6c1   : > { %6611 = vrcp.f32 %v956_v25 }
 0x6c4   : > { %v959_v26 = vpop.xlane.xlu0 %958 }
 0x6c5   : > { %6613 = vrcp.f32 %v959_v26 }
 0x6c8   : > { %v1119_v34 = vpop.permute.xlu0 %1118 }
 0x6cb   : > { %v6612_v29 = vpop.eup %6611 }
 0x6cc   : > { %v962_v30 = vmul.f32 %v6612_v29, %v6608_v20 }
 0x6ce   : > { %6168 = vmatmul.mubr.msk.f32.vlgmr.msra.gmra.mrb[6].mxu1 %vm630_vm5, %v962_v30 }
 0x6cf   : > { %v6614_v31 = vpop.eup %6613  ;;  %6176 = vmatpush3.xpose.msk.msra.mxu1 %vm452_vm2, %v1121_v28  ;;  %6177 = vmatprep.mubr.msk.f32.mxu1 %vm6783_vm1, %v6782_v10 }
 0x6d0   : > { %v963_v33 = vmul.f32 %v6614_v31, %v6610_v22  ;;  %6185 = vmatprep.subr.mxu1 %v6782_v10 }
 0x6d2   : > { %6173 = vmatmul.mubr.msk.f32.vlgmr.msra.gmra.mrb[10].mxu0 %vm630_vm5, %v963_v33  ;;  %6178 = vmatmul.mubr.msk.f32.vlgmr.msra.gmra.mrb[8].mxu1 %vm452_vm2, %v1119_v34 }
 0x6d3   : > { %6181 = vmatpush3.xpose.msk.msra.mxu0 %vm452_vm2, %v1199_v32  ;;  %6182 = vmatprep.mubr.msk.f32.mxu0 %vm6783_vm1, %v6782_v10 }
 0x6d4   : > { %6190 = vmatprep.subr.mxu0 %v6782_v10  ;;  %6187 = vmatprep.mubr.msk.f32.mxu1 %vm6783_vm1, %v6782_v10 }
 0x6d6   : > { %6183 = vmatmul.mubr.msk.f32.vlgmr.msra.gmra.mrb[12].mxu0 %vm452_vm2, %v1197_v35 }
 0x6d7   : > { %6192 = vmatprep.mubr.msk.f32.mxu0 %vm6783_vm1, %v6782_v10 }
 0x7a1   : > { %v7041_v36 = vpop.f32.mrb[6].mxu1 }
 0x7a2   : > { %v6169_v37 = vpop.f32.mrb[7].mxu1 }
 0x7a5   : > { %v7043_v38 = vpop.f32.mrb[10].mxu0  ;;  %v1192_v39 = vpop.f32.mrb[8].mxu1 }
 0x7a6   : > { %v1792_v40 = vcombine.low %v7041_v36, %v7043_v38  ;;  %v1274_v41 = vmul.f32 0.35355338, %v1192_v39  ;;  %v6174_v42 = vpop.f32.mrb[11].mxu0  ;;  %v6179_v43 = vpop.f32.mrb[9].mxu1 }
 0x7a8   : > { %v1276_v44 = vsel %vm605_vm3, %v1274_v41, -inf }
 0x7a9   : > { %1277 = vmax.xlane.f32.xlu0 %v1276_v44  ;;  %v1270_v45 = vpop.f32.mrb[12].mxu0 }
 0x7aa   : > { %v1275_v46 = vmul.f32 0.35355338, %v1270_v45  ;;  %v6184_v47 = vpop.f32.mrb[13].mxu0  ;;  %v6558_v45 = vld [vmem:[%s7820_s4 + $0x8] sm:$0xff]  }
 0x7ac   : > { %v1279_v48 = vsel %vm605_vm3, %v1275_v46, -inf }
 0x7ad   : > { %1280 = vmax.xlane.f32.xlu1 %v1279_v48 }
 0x7be   : > { %1298 = vrot.lane.b32.xlu1 %v6941_v23, %s7837_s21 }
 0x7bf   : > { %1375 = vrot.lane.b32.xlu0 %v6947_v27, %s7837_s21  ;;  %s7889_s21 = smov 104  }
 0x7c2   : > { %1454 = vrot.lane.b32.xlu1 %v6941_v23, %s7829_s25 }
 0x7c6   : > { %1532 = vrot.lane.b32.xlu1 %v6947_v27, %s7829_s25  ;;  %s7831_s25 = smov 16  }
 0x7ca   : > { %1530 = vrot.lane.b32.xlu1 %v6947_v27, %s7827_s26 }
 0x836   : > { %v1278_v49 = vpop.xlane.xlu0 %1277 }
 0x837   : > { %v1282_v50 = vsub.f32 %v1274_v41, %v1278_v49 }
 0x839   : > { %v1284_v51 = vmul.f32 1.442695, %v1282_v50 }
 0x83a   : > { %v1376_v52 = vpop.permute.xlu0 %1375  ;;  %v1281_v53 = vpop.xlane.xlu1 %1280 }
 0x83b   : > { %6615 = vpow2.f32 %v1284_v51  ;;  %v1283_v54 = vsub.f32 %v1275_v46, %v1281_v53  ;;  %6191 = vmatpush3.msk.msra.mxu0 %vm634_vm4, %v1376_v52 }
 0x83c   : > { %6200 = vmatprep.subr.mxu0 %v6782_v10 }
 0x83d   : > { %v1286_v55 = vmul.f32 1.442695, %v1283_v54 }
 0x83e   : > { %v1299_v56 = vpop.permute.xlu1 %1298 }
 0x83f   : > { %6617 = vpow2.f32 %v1286_v55  ;;  %6186 = vmatpush3.msk.msra.mxu1 %vm634_vm4, %v1299_v56 }
 0x840   : > { %6195 = vmatprep.subr.mxu1 %v6782_v10 }
 0x842   : > { %v1455_v4 = vpop.permute.xlu1 %1454 }
 0x845   : > { %v6616_v57 = vpop.eup %6615 }
 0x846   : > { %v1288_v58 = vsel %vm605_vm3, %v6616_v57, 0.0  ;;  %v1533_v8 = vpop.permute.xlu1 %1532 }
 0x847   : > { %1289 = vadd.xlane.f32.xlu0 %v1288_v58  ;;  %v5782_v58 = vld [vmem:[%s7821_s5] ss:$0 sm:$0xff] }
 0x849   : > { %v6618_v59 = vpop.eup %6617 }
 0x84a   : > { %v1291_v61 = vsel %vm605_vm3, %v6618_v59, 0.0  ;;  %v1531_v12 = vpop.permute.xlu1 %1530 }
 0x84b   : > { %1292 = vadd.xlane.f32.xlu0 %v1291_v61 }
 0x861   : > { %1452 = vrot.lane.b32.xlu0 %v6941_v23, %s7827_s26  ;;  %s7833_s26 = smov 8  }
 0x8d4   : > { %v1290_v63 = vpop.xlane.xlu0 %1289 }
 0x8d5   : > { %6619 = vrcp.f32 %v1290_v63 }
 0x8d8   : > { %v1293_v3 = vpop.xlane.xlu0 %1292 }
 0x8d9   : > { %6621 = vrcp.f32 %v1293_v3 }
 0x8dc   : > { %v1453_v11 = vpop.permute.xlu0 %1452 }
 0x8df   : > { %v6620_v5 = vpop.eup %6619 }
 0x8e0   : > { %v1296_v6 = vmul.f32 %v6620_v5, %v6616_v57 }
 0x8e2   : > { %6188 = vmatmul.mubr.msk.f32.vlgmr.msra.gmra.mrb[10].mxu1 %vm630_vm5, %v1296_v6 }
 0x8e3   : > { %v6622_v7 = vpop.eup %6621  ;;  %6196 = vmatpush3.xpose.msk.msra.mxu1 %vm452_vm2, %v1455_v4  ;;  %6197 = vmatprep.mubr.msk.f32.mxu1 %vm6783_vm1, %v6782_v10 }
 0x8e4   : > { %v1297_v9 = vmul.f32 %v6622_v7, %v6618_v59  ;;  %6205 = vmatprep.subr.mxu1 %v6782_v10 }
 0x8e6   : > { %6193 = vmatmul.mubr.msk.f32.vlgmr.msra.gmra.mrb[14].mxu0 %vm630_vm5, %v1297_v9  ;;  %6198 = vmatmul.mubr.msk.f32.vlgmr.msra.gmra.mrb[12].mxu1 %vm452_vm2, %v1453_v11 }
 0x8e7   : > { %6201 = vmatpush3.xpose.msk.msra.mxu0 %vm452_vm2, %v1533_v8  ;;  %6202 = vmatprep.mubr.msk.f32.mxu0 %vm6783_vm1, %v6782_v10 }
 0x8e8   : > { %6210 = vmatprep.subr.mxu0 %v6782_v10  ;;  %6207 = vmatprep.mubr.msk.f32.mxu1 %vm6783_vm1, %v6782_v10 }
 0x8ea   : > { %6203 = vmatmul.mubr.msk.f32.vlgmr.msra.gmra.mrb[16].mxu0 %vm452_vm2, %v1531_v12 }
 0x8eb   : > { %6212 = vmatprep.mubr.msk.f32.mxu0 %vm6783_vm1, %v6782_v10 }
 0x9b5   : > { %v1371_v13 = vpop.f32.mrb[10].mxu1 }
 0x9b6   : > { %v6189_v14 = vpop.f32.mrb[11].mxu1 }
 0x9b9   : > { %v1448_v15 = vpop.f32.mrb[14].mxu0  ;;  %v1526_v16 = vpop.f32.mrb[12].mxu1 }
 0x9ba   : > { %v1798_v17 = vcombine.low %v1371_v13, %v1448_v15  ;;  %v1608_v18 = vmul.f32 0.35355338, %v1526_v16  ;;  %v6194_v19 = vpop.f32.mrb[15].mxu0  ;;  %v6199_v20 = vpop.f32.mrb[13].mxu1 }
 0x9bc   : > { %v1610_v21 = vsel %vm605_vm3, %v1608_v18, -inf }
 0x9bd   : > { %1611 = vmax.xlane.f32.xlu0 %v1610_v21  ;;  %v1604_v22 = vpop.f32.mrb[16].mxu0 }
 0x9be   : > { %v1609_v24 = vmul.f32 0.35355338, %v1604_v22  ;;  %v6204_v25 = vpop.f32.mrb[17].mxu0 }
 0x9bf   : > { %v6560_v25 = vld [vmem:[%s7822_s6 + $0x8] sm:$0xff]  }
 0x9c0   : > { %v1613_v26 = vsel %vm605_vm3, %v1609_v24, -inf }
 0x9c1   : > { %1614 = vmax.xlane.f32.xlu1 %v1613_v26  ;;  %v6562_v26 = vld [vmem:[%s7824_s8 + $0x8] sm:$0xff]  }
 0x9d2   : > { %1632 = vrot.lane.b32.xlu1 %v6941_v23, %s7835_s27 }
 0x9d6   : > { %1793 = vrot.lane.b32.xlu1 %v1792_v40, %s7833_s26  ;;  %s7853_s26 = smov 32  }
 0x9da   : > { %1799 = vrot.lane.b32.xlu1 %v1798_v17, %s7831_s25  ;;  %s7883_s25 = smov 120  }
 0xa4a   : > { %v1612_v28 = vpop.xlane.xlu0 %1611 }
 0xa4b   : > { %v1616_v29 = vsub.f32 %v1608_v18, %v1612_v28  ;;  %v6563_v28 = vld [vmem:[%s7824_s8 + $0x10] sm:$0xff]  }
 0xa4d   : > { %v1618_v30 = vmul.f32 1.442695, %v1616_v29  ;;  %v6564_v29 = vld [vmem:[%s7824_s8 + $0x18] sm:$0xff]  }
 0xa4e   : > { %v1615_v31 = vpop.xlane.xlu1 %1614 }
 0xa4f   : > { %6623 = vpow2.f32 %v1618_v30  ;;  %v1617_v32 = vsub.f32 %v1609_v24, %v1615_v31  ;;  %v6559_v24 = vld [vmem:[%s7822_s6] sm:$0xff]   ;;  %v6566_v31 = vld [vmem:[%s7824_s8 + $0x28] sm:$0xff]  }
 0xa50   : > { %v6565_v30 = vld [vmem:[%s7824_s8 + $0x20] sm:$0xff]  }
 0xa51   : > { %v1620_v33 = vmul.f32 1.442695, %v1617_v32 }
 0xa52   : > { %v1633_v34 = vpop.permute.xlu1 %1632 }
 0xa53   : > { %6625 = vpow2.f32 %v1620_v33  ;;  %6206 = vmatpush3.msk.msra.mxu1 %vm634_vm4, %v1633_v34 }
 0xa54   : > { %6231 = vmatprep.subr.bf16.mxu1 %v6782_v10 }
 0xa56   : > { %v1794_v51 = vpop.permute.xlu1 %1793 }
 0xa57   : > { %v1808_v53 = vsel %vm452_vm2, %v1788_v1, %v1794_v51  ;;  %v5790_v51 = vld [vmem:[%s7825_s9] ss:$0 sm:$0xff] }
 0xa59   : > { %v6624_v23 = vpop.eup %6623 }
 0xa5a   : > { %v1622_v35 = vsel %vm605_vm3, %v6624_v23, 0.0  ;;  %v1800_v52 = vpop.permute.xlu1 %1799 }
 0xa5b   : > { %1623 = vadd.xlane.f32.xlu0 %v1622_v35  ;;  %v1810_v54 = vsel %vm1809_vm6, %v1808_v53, %v1800_v52 }
 0xa5d   : > { %v6626_v36 = vpop.eup %6625 }
 0xa5e   : > { %v1625_v37 = vsel %vm605_vm3, %v6626_v36, 0.0 }
 0xa5f   : > { %1626 = vadd.xlane.f32.xlu0 %v1625_v37 }
 0xa75   : > { %1709 = vrot.lane.b32.xlu0 %v6947_v27, %s7835_s27  ;;  %v6557_v27 = vld [vmem:[%s7820_s4] sm:$0xff]   ;;  %s7888_s27 = smov 72  }
 0xae8   : > { %v1624_v38 = vpop.xlane.xlu0 %1623 }
 0xae9   : > { %6627 = vrcp.f32 %v1624_v38 }
 0xaec   : > { %v1627_v39 = vpop.xlane.xlu0 %1626 }
 0xaed   : > { %6629 = vrcp.f32 %v1627_v39 }
 0xaf0   : > { %v1710_v40 = vpop.permute.xlu0 %1709 }
 0xaf1   : > { %6211 = vmatpush3.msk.msra.mxu0 %vm634_vm4, %v1710_v40 }
 0xaf2   : > { %6215 = vmatprep.subr.bf16.mxu0 %v6782_v10 }
 0xaf3   : > { %v6628_v41 = vpop.eup %6627 }
 0xaf4   : > { %v1630_v42 = vmul.f32 %v6628_v41, %v6624_v23  ;;  %v358_v23 = vld [vmem:[%s7817_s1 + $0x8] sm:$0xff] }
 0xaf5   : > { %v1916_v35 = vadd.f32 1.0, %v358_v23 }
 0xaf6   : > { %6208 = vmatmul.mubr.msk.f32.vlgmr.msra.gmra.mrb[14].mxu1 %vm630_vm5, %v1630_v42  ;;  %v6567_v42 = vld [vmem:[%s7824_s8 + $0x30] sm:$0xff]  }
 0xaf7   : > { %v6630_v43 = vpop.eup %6629  ;;  %6247 = vmatprep.mubr.msk.bf16.mxu1 %vm6783_vm1, %v6782_v10 }
 0xaf8   : > { %v1631_v44 = vmul.f32 %v6630_v43, %v6626_v36  ;;  %v6568_v43 = vld [vmem:[%s7824_s8 + $0x38] sm:$0xff]  }
 0xafa   : > { %6213 = vmatmul.mubr.msk.f32.vlgmr.msra.gmra.mrb[18].mxu0 %vm630_vm5, %v1631_v44  ;;  %v5786_v44 = vld [vmem:[%s7823_s7] ss:$0 sm:$0xff] }
 0xafb   : > { %6219 = vmatprep.mubr.msk.bf16.mxu0 %vm6783_vm1, %v6782_v10  ;;  %6216 = vmatpush3.bf16.msra.mxu0 %v6557_v27 }
 0xafc   : > { %6217 = vmatprep.subr.bf16.mxu0 %v6782_v10 }
 0xaff   : > { %6218 = vmatpush3.bf16.msra.mxu0 %v6558_v45 }
 0xb00   : > { %6223 = vmatprep.subr.bf16.mxu0 %v6782_v10 }
 0xbc9   : > { %v1705_v46 = vpop.f32.mrb[14].mxu1 }
 0xbca   : > { %v6209_v47 = vpop.f32.mrb[15].mxu1 }
 0xbcd   : > { %v1782_v48 = vpop.f32.mrb[18].mxu0 }
 0xbce   : > { %v1804_v49 = vcombine.low %v1705_v46, %v1782_v48  ;;  %v6214_v50 = vpop.f32.mrb[19].mxu0 }
 0xbd0   : > { %1805 = vrot.lane.b32.xlu0 %v1804_v49, %s7841_s20  ;;  %s7882_s20 = smov 88  }
 0xc42   : > { %v1806_v55 = vpop.permute.xlu0 %1805 }
 0xc43   : > { %v1812_v56 = vsel %vm1811_vm7, %v1810_v54, %v1806_v55 }
 0xc44   : > { %v1813_v57 = vpack.c.bf16 %v1812_v56, %v1812_v56 }
 0xc46   : > { %6220 = vmatmul.mubr.msk.bf16.vlgmr.msra.gmra.mrb[20].mxu0 %vm359_vm0, %v1813_v57 }
 0xc47   : > { %6227 = vmatprep.mubr.msk.bf16.mxu0 %vm6783_vm1, %v6782_v10  ;;  %6224 = vmatpush3.bf16.msra.mxu0 %v6559_v24 }
 0xc48   : > { %6225 = vmatprep.subr.bf16.mxu0 %v6782_v10 }
 0xc4b   : > { %6226 = vmatpush3.bf16.msra.mxu0 %v6560_v25 }
 0xc4c   : > { %6251 = vmatprep.subr.bf16.mxu0 %v6782_v10 }
 0xd19   : > { %v1874_v59 = vpop.f32.mrb[20].mxu0 }
 0xd1a   : > { %v1875_v61 = vadd.f32 %v5782_v58, %v1874_v59  ;;  %v6221_v60 = vpop.f32.mrb[21].mxu0 }
 0xd1b   : > { %v1877_v62 = vpop.f32.mrb[22].mxu0 }
 0xd1c   : > { %1881 = vrot.lane.b32.xlu1 %v1875_v61, %s7855_s28  ;;  %v6222_v1 = vpop.f32.mrb[23].mxu0 }
 0xd8e   : > { %v1882_v63 = vpop.permute.xlu1 %1881 }
 0xd8f   : > { %v1884_v3 = vmul.f32 %v1882_v63, %v6914_v2 }
 0xd91   : > { %1886 = vrot.lane.b32.xlu0 %v1884_v3, %s7855_s28 }
 0xe03   : > { %v1887_v4 = vpop.permute.xlu0 %1886 }
 0xe04   : > { %v1889_v5 = vadd.f32 %v1887_v4, %v6907_v0 }
 0xe06   : > { %v1890_v6 = vsel %vm359_vm0, %v1889_v5, 0.0 }
 0xe07   : > { %1891 = vadd.xlane.f32.xlu1 %v1890_v6 }
 0xe94   : > { %v1892_v7 = vpop.xlane.xlu1 %1891 }
 0xe95   : > { %v1893_v8 = vmul.f32 0.03125, %v1892_v7 }
 0xe97   : > { %v1894_v9 = vsub.f32 %v1889_v5, %v1893_v8 }
 0xe99   : > { %v1895_v11 = vmul.f32 %v1894_v9, %v1894_v9 }
 0xe9b   : > { %v1896_v12 = vsel %vm359_vm0, %v1895_v11, 0.0 }
 0xe9c   : > { %1897 = vadd.xlane.f32.xlu0 %v1896_v12  ;;  %v7207_v12 = vld [vmem:[%s7817_s1 + $0x10] sm:$0xff] }
 0xf29   : > { %v1898_v13 = vpop.xlane.xlu0 %1897 }
 0xf2a   : > { %v1899_v14 = vmul.f32 0.03125, %v1898_v13  ;;  %v2142_v13 = vadd.f32 1.0, %v7207_v12 }
 0xf2c   : > { %v1900_v15 = vadd.f32 1e-06, %v1899_v14 }
 0xf2e   : > { %6631 = vrsqrt.f32 %v1900_v15 }
 0xf38   : > { %v6632_v16 = vpop.eup %6631 }
 0xf39   : > { %v7133_v17 = vmul.f32 %v6632_v16, %v1894_v9 }
 0xf3b   : > { %v1903_v0 = vsel %vm359_vm0, %v7133_v17, 0.0 }
 0xf3c   : > { %1904 = vadd.xlane.f32.xlu0 %v1903_v0 }
 0xf52   : > { %1919 = vrot.lane.b32.xlu0 %v6914_v2, %s7853_s26  ;;  %v6561_v2 = vld [vmem:[%s7824_s8] sm:$0xff]  }
 0xf53   : > { %6232 = vmatpush3.bf16.msra.mxu1 %v6561_v2 }
 0xf54   : > { %6233 = vmatprep.subr.bf16.mxu1 %v6782_v10 }
 0xf57   : > { %6234 = vmatpush3.bf16.msra.mxu1 %v6562_v26 }
 0xf58   : > { %6235 = vmatprep.subr.bf16.mxu1 %v6782_v10 }
 0xf5b   : > { %6236 = vmatpush3.bf16.msra.mxu1 %v6563_v28 }
 0xf5c   : > { %6237 = vmatprep.subr.bf16.mxu1 %v6782_v10 }
 0xf5f   : > { %6238 = vmatpush3.bf16.msra.mxu1 %v6564_v29 }
 0xf60   : > { %6239 = vmatprep.subr.bf16.mxu1 %v6782_v10 }
 0xf63   : > { %6240 = vmatpush3.bf16.msra.mxu1 %v6565_v30  ;;  %v5806_v30 = vld [vmem:[%s7819_s3 + $0x1] ss:$0 sm:$0xff] }
 0xf64   : > { %6241 = vmatprep.subr.bf16.mxu1 %v6782_v10 }
 0xf67   : > { %6242 = vmatpush3.bf16.msra.mxu1 %v6566_v31 }
 0xf68   : > { %6243 = vmatprep.subr.bf16.mxu1 %v6782_v10 }
 0xf6b   : > { %6244 = vmatpush3.bf16.msra.mxu1 %v6567_v42 }
 0xf6c   : > { %6245 = vmatprep.subr.bf16.mxu1 %v6782_v10 }
 0xf6f   : > { %6246 = vmatpush3.bf16.msra.mxu1 %v6568_v43 }
 0xf70   : > { %6289 = vmatprep.subr.mxu1 %v6782_v10 }
 0xfc9   : > { %v1905_v18 = vpop.xlane.xlu0 %1904 }
 0xfca   : > { %v1906_v19 = vmul.f32 0.03125, %v1905_v18  ;;  %v6569_v18 = vld [vmem:[%s7818_s2 + $0x10] sm:$0xff]  }
 0xfcc   : > { %v1907_v20 = vsub.f32 %v7133_v17, %v1906_v19  ;;  %v6570_v19 = vld [vmem:[%s7818_s2 + $0x18] sm:$0xff]  }
 0xfcd   : > { %v1920_v38 = vpop.permute.xlu0 %1919 }
 0xfce   : > { %v1908_v21 = vmul.f32 %v1907_v20, %v1907_v20 }
 0xfd0   : > { %v1909_v22 = vsel %vm359_vm0, %v1908_v21, 0.0 }
 0xfd1   : > { %1910 = vadd.xlane.f32.xlu1 %v1909_v22 }
0x105e   : > { %v1911_v32 = vpop.xlane.xlu1 %1910 }
0x105f   : > { %v1912_v33 = vmul.f32 0.03125, %v1911_v32 }
0x1061   : > { %v1913_v34 = vadd.f32 1e-06, %v1912_v33 }
0x1063   : > { %6633 = vrsqrt.f32 %v1913_v34 }
0x106d   : > { %v6634_v36 = vpop.eup %6633 }
0x106e   : > { %v1915_v37 = vmul.f32 %v6634_v36, %v1907_v20 }
0x1070   : > { %v1917_v39 = vmul.f32 %v1916_v35, %v1915_v37 }
0x1072   : > { %v1922_v40 = vadd.f32 %v1920_v38, %v1917_v39 }
0x1074   : > { %v1923_v41 = vpack.c.bf16 %v1922_v40, %v1922_v40 }
0x1076   : > { %6228 = vmatmul.mubr.msk.bf16.vlgmr.msra.gmra.mrb[24].mxu0 %vm359_vm0, %v1923_v41 }
0x1077   : > { %6255 = vmatprep.mubr.msk.bf16.mxu0 %vm6783_vm1, %v6782_v10  ;;  %6252 = vmatpush3.bf16.msra.mxu0 %v6569_v18 }
0x1078   : > { %6253 = vmatprep.subr.bf16.mxu0 %v6782_v10 }
0x107b   : > { %6254 = vmatpush3.bf16.msra.mxu0 %v6570_v19 }
0x107c   : > { %6259 = vmatprep.subr.mxu0 %v6782_v10 }
0x1149   : > { %v1984_v27 = vpop.f32.mrb[24].mxu0 }
0x114a   : > { %v1985_v45 = vadd.f32 %v5786_v44, %v1984_v27  ;;  %v6229_v46 = vpop.f32.mrb[25].mxu0 }
0x114b   : > { %v1987_v47 = vpop.f32.mrb[26].mxu0 }
0x114c   : > { %v1990_v48 = vmax.f32 %v1985_v45, 0.0  ;;  %v6230_v49 = vpop.f32.mrb[27].mxu0 }
0x114e   : > { %v1991_v50 = vpack.c.bf16 %v1990_v48, %v1990_v48 }
0x1150   : > { %6248 = vmatmul.mubr.bf16.vlgmr.msra.gmra.mrb[16].mxu1 %v1991_v50 }
0x1151   : > { %6291 = vmatprep.mubr.msk.f32.mxu1 %vm6783_vm1, %v6782_v10 }
0x1223   : > { %v2097_v52 = vpop.f32.mrb[16].mxu1 }
0x1224   : > { %v2098_v53 = vadd.f32 %v5790_v51, %v2097_v52  ;;  %v6249_v54 = vpop.f32.mrb[17].mxu1 }
0x1225   : > { %v2100_v55 = vpop.f32.mrb[18].mxu1 }
0x1226   : > { %2104 = vrot.lane.b32.xlu1 %v2098_v53, %s7853_s26  ;;  %v6250_v56 = vpop.f32.mrb[19].mxu1  ;;  %s7891_s26 = smov 8  }
0x1298   : > { %v2105_v57 = vpop.permute.xlu1 %2104 }
0x1299   : > { %v2107_v58 = vmul.f32 %v2105_v57, %v358_v23 }
0x129b   : > { %2109 = vrot.lane.b32.xlu1 %v2107_v58, %s7851_s12 }
0x130d   : > { %v2110_v59 = vpop.permute.xlu1 %2109 }
0x130e   : > { %v2112_v61 = vadd.f32 %v2110_v59, %v7133_v17 }
0x1310   : > { %v2113_v60 = vsel %vm359_vm0, %v2112_v61, 0.0 }
0x1311   : > { %2114 = vadd.xlane.f32.xlu0 %v2113_v60 }
0x139e   : > { %v2115_v62 = vpop.xlane.xlu0 %2114 }
0x139f   : > { %v2116_v1 = vmul.f32 0.03125, %v2115_v62 }
0x13a1   : > { %v2117_v63 = vsub.f32 %v2112_v61, %v2116_v1 }
0x13a3   : > { %v2118_v3 = vmul.f32 %v2117_v63, %v2117_v63 }
0x13a5   : > { %v2119_v4 = vsel %vm359_vm0, %v2118_v3, 0.0 }
0x13a6   : > { %2120 = vadd.xlane.f32.xlu1 %v2119_v4 }
0x13b7   : > { %2144 = vrot.lane.b32.xlu1 %v2142_v13, %s7851_s12 }
0x1433   : > { %v2121_v5 = vpop.xlane.xlu1 %2120 }
0x1434   : > { %v2122_v6 = vmul.f32 0.03125, %v2121_v5 }
0x1436   : > { %v2123_v7 = vadd.f32 1e-06, %v2122_v6 }
0x1437   : > { %v2145_v25 = vpop.permute.xlu1 %2144 }
0x1438   : > { %6635 = vrsqrt.f32 %v2123_v7 }
0x1442   : > { %v6636_v8 = vpop.eup %6635 }
0x1443   : > { %v7200_v9 = vmul.f32 %v6636_v8, %v2117_v63 }
0x1445   : > { %v2129_v11 = vsel %vm359_vm0, %v7200_v9, 0.0 }
0x1446   : > { %2130 = vadd.xlane.f32.xlu0 %v2129_v11 }
0x14d3   : > { %v2131_v14 = vpop.xlane.xlu0 %2130 }
0x14d4   : > { %v2132_v15 = vmul.f32 0.03125, %v2131_v14 }
0x14d6   : > { %v2133_v16 = vsub.f32 %v7200_v9, %v2132_v15 }
0x14d8   : > { %v2134_v17 = vmul.f32 %v2133_v16, %v2133_v16 }
0x14da   : > { %v2135_v0 = vsel %vm359_vm0, %v2134_v17, 0.0 }
0x14db   : > { %2136 = vadd.xlane.f32.xlu0 %v2135_v0 }
0x1568   : > { %v2137_v20 = vpop.xlane.xlu0 %2136 }
0x1569   : > { %v2138_v21 = vmul.f32 0.03125, %v2137_v20 }
0x156b   : > { %v2139_v22 = vadd.f32 1e-06, %v2138_v21 }
0x156d   : > { %6637 = vrsqrt.f32 %v2139_v22 }
0x1577   : > { %v6638_v24 = vpop.eup %6637 }
0x1578   : > { %v2141_v2 = vmul.f32 %v6638_v24, %v2133_v16 }
0x157a   : > { %v2147_v26 = vmul.f32 %v2145_v25, %v2141_v2 }
0x157c   : > { %v2148_v28 = vadd.f32 %v7207_v12, %v2147_v26 }
0x157e   : > { %v2149_v29 = vpack.c.bf16 %v2148_v28, %v2148_v28 }
0x1580   : > { %6256 = vmatmul.mubr.msk.bf16.vlgmr.msra.gmra.mrb[28].mxu0 %vm359_vm0, %v2149_v29 }
0x1581   : > { %6261 = vmatprep.mubr.msk.f32.mxu0 %vm6783_vm1, %v6782_v10 }
0x1653   : > { %v2212_v31 = vpop.f32.mrb[28].mxu0 }
0x1654   : > { %v7228_v32 = vadd.f32 %v5806_v30, %v2212_v31  ;;  %v6257_v33 = vpop.f32.mrb[29].mxu0 }
0x1655   : > { %v2215_v34 = vpop.f32.mrb[30].mxu0 }
0x1656   : > { %2220 = vrot.lane.b32.xlu0 %v7228_v32, %s7851_s12  ;;  %v6258_v23 = vpop.f32.mrb[31].mxu0  ;;  %v7234_v35 = vcombine.high %v7228_v32, %v7228_v32 }
0x1658   : > { %2296 = vrot.lane.b32.xlu1 %v7234_v35, %s7851_s12  ;;  %s7890_s12 = smov 40  }
0x16c8   : > { %v2221_v36 = vpop.permute.xlu0 %2220 }
0x16c9   : > { %6260 = vmatpush3.xpose.msk.msra.mxu0 %vm452_vm2, %v2221_v36 }
0x16ca   : > { %6264 = vmatprep.subr.mxu0 %v6782_v10  ;;  %v2297_v37 = vpop.permute.xlu1 %2296 }
0x16cc   : > { %6262 = vmatmul.mubr.msk.f32.vlgmr.msra.gmra.mrb[32].mxu0 %vm452_vm2, %v7228_v32 }
0x16cd   : > { %6265 = vmatpush3.xpose.msk.msra.mxu0 %vm452_vm2, %v2297_v37  ;;  %6266 = vmatprep.mubr.msk.f32.mxu0 %vm6783_vm1, %v6782_v10 }
0x16ce   : > { %6269 = vmatprep.subr.mxu0 %v6782_v10 }
0x16d0   : > { %6267 = vmatmul.mubr.msk.f32.vlgmr.msra.gmra.mrb[34].mxu0 %vm452_vm2, %v7234_v35 }
0x16d1   : > { %6271 = vmatprep.mubr.msk.f32.mxu0 %vm6783_vm1, %v6782_v10 }
0x179f   : > { %v2292_v38 = vpop.f32.mrb[32].mxu0 }
0x17a0   : > { %v2372_v39 = vmul.f32 0.35355338, %v2292_v38  ;;  %v6263_v40 = vpop.f32.mrb[33].mxu0 }
0x17a2   : > { %v2374_v41 = vsel %vm605_vm3, %v2372_v39, -inf }
0x17a3   : > { %2375 = vmax.xlane.f32.xlu1 %v2374_v41  ;;  %v2368_v42 = vpop.f32.mrb[34].mxu0 }
0x17a4   : > { %v2373_v43 = vmul.f32 0.35355338, %v2368_v42  ;;  %v6268_v44 = vpop.f32.mrb[35].mxu0 }
0x17a6   : > { %v2377_v27 = vsel %vm605_vm3, %v2373_v43, -inf }
0x17a7   : > { %2378 = vmax.xlane.f32.xlu0 %v2377_v27 }
0x17b4   : > { %2473 = vrot.lane.b32.xlu1 %v7234_v35, %s7855_s28 }
0x17b8   : > { %2552 = vrot.lane.b32.xlu1 %v7228_v32, %s7882_s20 }
0x1830   : > { %v2376_v45 = vpop.xlane.xlu1 %2375 }
0x1831   : > { %v2380_v46 = vsub.f32 %v2372_v39, %v2376_v45 }
0x1833   : > { %v2382_v47 = vmul.f32 1.442695, %v2380_v46 }
0x1834   : > { %v2379_v48 = vpop.xlane.xlu0 %2378  ;;  %v2474_v55 = vpop.permute.xlu1 %2473 }
0x1835   : > { %6639 = vpow2.f32 %v2382_v47  ;;  %v2381_v49 = vsub.f32 %v2373_v43, %v2379_v48 }
0x1837   : > { %v2384_v50 = vmul.f32 1.442695, %v2381_v49 }
0x1838   : > { %v2553_v56 = vpop.permute.xlu1 %2552 }
0x1839   : > { %6641 = vpow2.f32 %v2384_v50 }
0x183f   : > { %v6640_v51 = vpop.eup %6639 }
0x1840   : > { %v2386_v52 = vsel %vm605_vm3, %v6640_v51, 0.0 }
0x1841   : > { %2387 = vadd.xlane.f32.xlu0 %v2386_v52 }
0x1843   : > { %v6642_v53 = vpop.eup %6641 }
0x1844   : > { %v2389_v54 = vsel %vm605_vm3, %v6642_v53, 0.0 }
0x1845   : > { %2390 = vadd.xlane.f32.xlu1 %v2389_v54 }
0x1856   : > { %2630 = vrot.lane.b32.xlu1 %v7234_v35, %s7882_s20 }
0x1857   : > { %2396 = vrot.lane.b32.xlu0 %v7228_v32, %s7855_s28  ;;  %s7892_s28 = smov 16  }
0x185b   : > { %2550 = vrot.lane.b32.xlu0 %v7228_v32, %s7883_s25 }
0x185f   : > { %2628 = vrot.lane.b32.xlu0 %v7234_v35, %s7883_s25 }
0x18ce   : > { %v2388_v57 = vpop.xlane.xlu0 %2387 }
0x18cf   : > { %6643 = vrcp.f32 %v2388_v57 }
0x18d2   : > { %v2391_v58 = vpop.xlane.xlu1 %2390  ;;  %v2397_v59 = vpop.permute.xlu0 %2396 }
0x18d3   : > { %6645 = vrcp.f32 %v2391_v58  ;;  %6270 = vmatpush3.msk.msra.mxu0 %vm634_vm4, %v2397_v59 }
0x18d4   : > { %6274 = vmatprep.subr.mxu0 %v6782_v10 }
0x18d6   : > { %v2551_v63 = vpop.permute.xlu0 %2550  ;;  %v2631_v3 = vpop.permute.xlu1 %2630 }
0x18d9   : > { %v6644_v61 = vpop.eup %6643 }
0x18da   : > { %v2394_v60 = vmul.f32 %v6644_v61, %v6640_v51  ;;  %v2629_v4 = vpop.permute.xlu0 %2628 }
0x18dc   : > { %6272 = vmatmul.mubr.msk.f32.vlgmr.msra.gmra.mrb[36].mxu0 %vm630_vm5, %v2394_v60 }
0x18dd   : > { %v6646_v62 = vpop.eup %6645  ;;  %6275 = vmatpush3.msk.msra.mxu0 %vm634_vm4, %v2474_v55  ;;  %6276 = vmatprep.mubr.msk.f32.mxu0 %vm6783_vm1, %v6782_v10 }
0x18de   : > { %v2395_v1 = vmul.f32 %v6646_v62, %v6642_v53  ;;  %6279 = vmatprep.subr.mxu0 %v6782_v10 }
0x18e0   : > { %6277 = vmatmul.mubr.msk.f32.vlgmr.msra.gmra.mrb[38].mxu0 %vm630_vm5, %v2395_v1 }
0x18e1   : > { %6281 = vmatprep.mubr.msk.f32.mxu0 %vm6783_vm1, %v6782_v10 }
0x18e4   : > { %6280 = vmatpush3.xpose.msk.msra.mxu0 %vm452_vm2, %v2553_v56 }
0x18e5   : > { %6284 = vmatprep.subr.mxu0 %v6782_v10 }
0x18e7   : > { %6282 = vmatmul.mubr.msk.f32.vlgmr.msra.gmra.mrb[40].mxu0 %vm452_vm2, %v2551_v63 }
0x18e8   : > { %6285 = vmatpush3.xpose.msk.msra.mxu0 %vm452_vm2, %v2631_v3  ;;  %6286 = vmatprep.mubr.msk.f32.mxu0 %vm6783_vm1, %v6782_v10 }
0x18e9   : > { %6294 = vmatprep.subr.mxu0 %v6782_v10 }
0x18eb   : > { %6287 = vmatmul.mubr.msk.f32.vlgmr.msra.gmra.mrb[42].mxu0 %vm452_vm2, %v2629_v4 }
0x18ec   : > { %6296 = vmatprep.mubr.msk.f32.mxu0 %vm6783_vm1, %v6782_v10 }
0x19af   : > { %v7286_v5 = vpop.f32.mrb[36].mxu0 }
0x19b0   : > { %v6273_v6 = vpop.f32.mrb[37].mxu0 }
0x19b3   : > { %v7288_v7 = vpop.f32.mrb[38].mxu0 }
0x19b4   : > { %v3554_v8 = vcombine.low %v7286_v5, %v7288_v7  ;;  %v6278_v11 = vpop.f32.mrb[39].mxu0 }
0x19ba   : > { %v2624_v13 = vpop.f32.mrb[40].mxu0 }
0x19bb   : > { %v2706_v14 = vmul.f32 0.35355338, %v2624_v13  ;;  %v6283_v15 = vpop.f32.mrb[41].mxu0 }
0x19bd   : > { %v2708_v16 = vsel %vm605_vm3, %v2706_v14, -inf }
0x19be   : > { %2709 = vmax.xlane.f32.xlu1 %v2708_v16  ;;  %v2702_v17 = vpop.f32.mrb[42].mxu0 }
0x19bf   : > { %v2707_v0 = vmul.f32 0.35355338, %v2702_v17  ;;  %v6288_v18 = vpop.f32.mrb[43].mxu0 }
0x19c1   : > { %v2711_v19 = vsel %vm605_vm3, %v2707_v0, -inf }
0x19c2   : > { %2712 = vmax.xlane.f32.xlu0 %v2711_v19 }
0x19cf   : > { %2807 = vrot.lane.b32.xlu1 %v7234_v35, %s7884_s11 }
0x19d3   : > { %2886 = vrot.lane.b32.xlu1 %v7228_v32, %s7885_s29 }
0x19d8   : > { %2730 = vrot.lane.b32.xlu0 %v7228_v32, %s7884_s11 }
0x19dc   : > { %2964 = vrot.lane.b32.xlu0 %v7234_v35, %s7885_s29 }
0x1a4b   : > { %v2710_v20 = vpop.xlane.xlu1 %2709 }
0x1a4c   : > { %v2714_v21 = vsub.f32 %v2706_v14, %v2710_v20 }
0x1a4e   : > { %v2716_v22 = vmul.f32 1.442695, %v2714_v21 }
0x1a4f   : > { %v2808_v24 = vpop.permute.xlu1 %2807  ;;  %v2713_v25 = vpop.xlane.xlu0 %2712 }
0x1a50   : > { %6647 = vpow2.f32 %v2716_v22  ;;  %v2715_v2 = vsub.f32 %v2707_v0, %v2713_v25  ;;  %6295 = vmatpush3.msk.msra.mxu0 %vm634_vm4, %v2808_v24 }
0x1a51   : > { %6304 = vmatprep.subr.mxu0 %v6782_v10 }
0x1a52   : > { %v2718_v26 = vmul.f32 1.442695, %v2715_v2 }
0x1a53   : > { %v2731_v28 = vpop.permute.xlu0 %2730  ;;  %v2887_v23 = vpop.permute.xlu1 %2886 }
0x1a54   : > { %6649 = vpow2.f32 %v2718_v26  ;;  %6290 = vmatpush3.msk.msra.mxu1 %vm634_vm4, %v2731_v28 }
0x1a55   : > { %6299 = vmatprep.subr.mxu1 %v6782_v10 }
0x1a57   : > { %v2965_v34 = vpop.permute.xlu0 %2964 }
0x1a5a   : > { %v6648_v29 = vpop.eup %6647 }
0x1a5b   : > { %v2720_v30 = vsel %vm605_vm3, %v6648_v29, 0.0 }
0x1a5c   : > { %2721 = vadd.xlane.f32.xlu0 %v2720_v30 }
0x1a5e   : > { %v6650_v31 = vpop.eup %6649 }
0x1a5f   : > { %v2723_v33 = vsel %vm605_vm3, %v6650_v31, 0.0 }
0x1a60   : > { %2724 = vadd.xlane.f32.xlu1 %v2723_v33 }
0x1a71   : > { %2884 = vrot.lane.b32.xlu1 %v7228_v32, %s7886_s30 }
0x1a72   : > { %2962 = vrot.lane.b32.xlu0 %v7234_v35, %s7886_s30 }
0x1ae9   : > { %v2722_v36 = vpop.xlane.xlu0 %2721 }
0x1aea   : > { %6651 = vrcp.f32 %v2722_v36 }
0x1aed   : > { %v2725_v37 = vpop.xlane.xlu1 %2724  ;;  %v2963_v43 = vpop.permute.xlu0 %2962 }
0x1aee   : > { %6653 = vrcp.f32 %v2725_v37 }
0x1af1   : > { %v2885_v42 = vpop.permute.xlu1 %2884 }
0x1af4   : > { %v6652_v38 = vpop.eup %6651 }
0x1af5   : > { %v2728_v39 = vmul.f32 %v6652_v38, %v6648_v29 }
0x1af7   : > { %6292 = vmatmul.mubr.msk.f32.vlgmr.msra.gmra.mrb[20].mxu1 %vm630_vm5, %v2728_v39 }
0x1af8   : > { %v6654_v40 = vpop.eup %6653  ;;  %6300 = vmatpush3.xpose.msk.msra.mxu1 %vm452_vm2, %v2887_v23  ;;  %6301 = vmatprep.mubr.msk.f32.mxu1 %vm6783_vm1, %v6782_v10 }
0x1af9   : > { %v2729_v41 = vmul.f32 %v6654_v40, %v6650_v31  ;;  %6309 = vmatprep.subr.mxu1 %v6782_v10 }
0x1afb   : > { %6297 = vmatmul.mubr.msk.f32.vlgmr.msra.gmra.mrb[44].mxu0 %vm630_vm5, %v2729_v41  ;;  %6302 = vmatmul.mubr.msk.f32.vlgmr.msra.gmra.mrb[22].mxu1 %vm452_vm2, %v2885_v42 }
0x1afc   : > { %6305 = vmatpush3.xpose.msk.msra.mxu0 %vm452_vm2, %v2965_v34  ;;  %6306 = vmatprep.mubr.msk.f32.mxu0 %vm6783_vm1, %v6782_v10 }
0x1afd   : > { %6314 = vmatprep.subr.mxu0 %v6782_v10  ;;  %6311 = vmatprep.mubr.msk.f32.mxu1 %vm6783_vm1, %v6782_v10 }
0x1aff   : > { %6307 = vmatmul.mubr.msk.f32.vlgmr.msra.gmra.mrb[46].mxu0 %vm452_vm2, %v2963_v43 }
0x1b00   : > { %6316 = vmatprep.mubr.msk.f32.mxu0 %vm6783_vm1, %v6782_v10 }
0x1bca   : > { %v7328_v44 = vpop.f32.mrb[20].mxu1 }
0x1bcb   : > { %v6293_v27 = vpop.f32.mrb[21].mxu1 }
0x1bce   : > { %v7330_v45 = vpop.f32.mrb[44].mxu0  ;;  %v2958_v46 = vpop.f32.mrb[22].mxu1 }
0x1bcf   : > { %v3558_v47 = vcombine.low %v7328_v44, %v7330_v45  ;;  %v3040_v48 = vmul.f32 0.35355338, %v2958_v46  ;;  %v6298_v49 = vpop.f32.mrb[45].mxu0  ;;  %v6303_v50 = vpop.f32.mrb[23].mxu1 }
0x1bd1   : > { %v3042_v51 = vsel %vm605_vm3, %v3040_v48, -inf }
0x1bd2   : > { %3043 = vmax.xlane.f32.xlu1 %v3042_v51  ;;  %v3036_v52 = vpop.f32.mrb[46].mxu0 }
0x1bd3   : > { %v3041_v53 = vmul.f32 0.35355338, %v3036_v52  ;;  %v6308_v54 = vpop.f32.mrb[47].mxu0  ;;  %v6572_v52 = vld [vmem:[%s7820_s4 + $0x18] sm:$0xff]  }
0x1bd5   : > { %v3045_v55 = vsel %vm605_vm3, %v3041_v53, -inf }
0x1bd6   : > { %3046 = vmax.xlane.f32.xlu0 %v3045_v55 }
0x1be3   : > { %3141 = vrot.lane.b32.xlu1 %v7234_v35, %s7887_s18 }
0x1be7   : > { %3220 = vrot.lane.b32.xlu1 %v7228_v32, %s7888_s27 }
0x1bec   : > { %3064 = vrot.lane.b32.xlu0 %v7228_v32, %s7887_s18 }
0x1bf0   : > { %3298 = vrot.lane.b32.xlu0 %v7234_v35, %s7888_s27 }
0x1c5f   : > { %v3044_v56 = vpop.xlane.xlu1 %3043 }
0x1c60   : > { %v3048_v57 = vsub.f32 %v3040_v48, %v3044_v56 }
0x1c62   : > { %v3050_v58 = vmul.f32 1.442695, %v3048_v57 }
0x1c63   : > { %v3142_v59 = vpop.permute.xlu1 %3141  ;;  %v3047_v61 = vpop.xlane.xlu0 %3046 }
0x1c64   : > { %6655 = vpow2.f32 %v3050_v58  ;;  %v3049_v60 = vsub.f32 %v3041_v53, %v3047_v61  ;;  %6315 = vmatpush3.msk.msra.mxu0 %vm634_vm4, %v3142_v59 }
0x1c65   : > { %6324 = vmatprep.subr.mxu0 %v6782_v10 }
0x1c66   : > { %v3052_v62 = vmul.f32 1.442695, %v3049_v60 }
0x1c67   : > { %v3065_v1 = vpop.permute.xlu0 %3064  ;;  %v3221_v13 = vpop.permute.xlu1 %3220 }
0x1c68   : > { %6657 = vpow2.f32 %v3052_v62  ;;  %6310 = vmatpush3.msk.msra.mxu1 %vm634_vm4, %v3065_v1 }
0x1c69   : > { %6319 = vmatprep.subr.mxu1 %v6782_v10 }
0x1c6b   : > { %v3299_v11 = vpop.permute.xlu0 %3298 }
0x1c6e   : > { %v6656_v63 = vpop.eup %6655 }
0x1c6f   : > { %v3054_v3 = vsel %vm605_vm3, %v6656_v63, 0.0 }
0x1c70   : > { %3055 = vadd.xlane.f32.xlu0 %v3054_v3  ;;  %v5847_v3 = vld [vmem:[%s7821_s5 + $0x1] ss:$0 sm:$0xff] }
0x1c72   : > { %v6658_v4 = vpop.eup %6657 }
0x1c73   : > { %v3057_v6 = vsel %vm605_vm3, %v6658_v4, 0.0 }
0x1c74   : > { %3058 = vadd.xlane.f32.xlu1 %v3057_v6 }
0x1c85   : > { %3218 = vrot.lane.b32.xlu1 %v7228_v32, %s7889_s21 }
0x1c86   : > { %3296 = vrot.lane.b32.xlu0 %v7234_v35, %s7889_s21 }
0x1cfd   : > { %v3056_v14 = vpop.xlane.xlu0 %3055 }
0x1cfe   : > { %6659 = vrcp.f32 %v3056_v14 }
0x1d01   : > { %v3059_v15 = vpop.xlane.xlu1 %3058  ;;  %v3297_v20 = vpop.permute.xlu0 %3296 }
0x1d02   : > { %6661 = vrcp.f32 %v3059_v15 }
0x1d05   : > { %v3219_v19 = vpop.permute.xlu1 %3218 }
0x1d08   : > { %v6660_v16 = vpop.eup %6659 }
0x1d09   : > { %v3062_v17 = vmul.f32 %v6660_v16, %v6656_v63 }
0x1d0b   : > { %6312 = vmatmul.mubr.msk.f32.vlgmr.msra.gmra.mrb[24].mxu1 %vm630_vm5, %v3062_v17 }
0x1d0c   : > { %v6662_v0 = vpop.eup %6661  ;;  %6320 = vmatpush3.xpose.msk.msra.mxu1 %vm452_vm2, %v3221_v13  ;;  %6321 = vmatprep.mubr.msk.f32.mxu1 %vm6783_vm1, %v6782_v10 }
0x1d0d   : > { %v3063_v18 = vmul.f32 %v6662_v0, %v6658_v4  ;;  %6329 = vmatprep.subr.mxu1 %v6782_v10 }
0x1d0f   : > { %6317 = vmatmul.mubr.msk.f32.vlgmr.msra.gmra.mrb[48].mxu0 %vm630_vm5, %v3063_v18  ;;  %6322 = vmatmul.mubr.msk.f32.vlgmr.msra.gmra.mrb[26].mxu1 %vm452_vm2, %v3219_v19 }
0x1d10   : > { %6325 = vmatpush3.xpose.msk.msra.mxu0 %vm452_vm2, %v3299_v11  ;;  %6326 = vmatprep.mubr.msk.f32.mxu0 %vm6783_vm1, %v6782_v10 }
0x1d11   : > { %6334 = vmatprep.subr.mxu0 %v6782_v10  ;;  %6331 = vmatprep.mubr.msk.f32.mxu1 %vm6783_vm1, %v6782_v10 }
0x1d13   : > { %6327 = vmatmul.mubr.msk.f32.vlgmr.msra.gmra.mrb[50].mxu0 %vm452_vm2, %v3297_v20 }
0x1d14   : > { %6336 = vmatprep.mubr.msk.f32.mxu0 %vm6783_vm1, %v6782_v10 }
0x1dde   : > { %v3137_v21 = vpop.f32.mrb[24].mxu1 }
0x1ddf   : > { %v6313_v22 = vpop.f32.mrb[25].mxu1 }
0x1de2   : > { %v3214_v24 = vpop.f32.mrb[48].mxu0  ;;  %v3292_v25 = vpop.f32.mrb[26].mxu1 }
0x1de3   : > { %v3564_v2 = vcombine.low %v3137_v21, %v3214_v24  ;;  %v3374_v26 = vmul.f32 0.35355338, %v3292_v25  ;;  %v6318_v28 = vpop.f32.mrb[49].mxu0  ;;  %v6323_v29 = vpop.f32.mrb[27].mxu1 }
0x1de5   : > { %v3376_v30 = vsel %vm605_vm3, %v3374_v26, -inf }
0x1de6   : > { %3377 = vmax.xlane.f32.xlu1 %v3376_v30  ;;  %v3370_v31 = vpop.f32.mrb[50].mxu0 }
0x1de7   : > { %v3375_v33 = vmul.f32 0.35355338, %v3370_v31  ;;  %v6328_v34 = vpop.f32.mrb[51].mxu0 }
0x1de8   : > { %v6575_v34 = vld [vmem:[%s7824_s8 + $0x40] sm:$0xff]  }
0x1de9   : > { %v3379_v23 = vsel %vm605_vm3, %v3375_v33, -inf }
0x1dea   : > { %3380 = vmax.xlane.f32.xlu0 %v3379_v23  ;;  %v6576_v23 = vld [vmem:[%s7824_s8 + $0x48] sm:$0xff]  }
0x1e73   : > { %v3378_v36 = vpop.xlane.xlu1 %3377 }
0x1e74   : > { %v3382_v37 = vsub.f32 %v3374_v26, %v3378_v36  ;;  %v6577_v36 = vld [vmem:[%s7824_s8 + $0x50] sm:$0xff]  }
0x1e76   : > { %v3384_v38 = vmul.f32 1.442695, %v3382_v37  ;;  %v6578_v37 = vld [vmem:[%s7824_s8 + $0x58] sm:$0xff]  }
0x1e77   : > { %v3381_v39 = vpop.xlane.xlu0 %3380 }
0x1e78   : > { %6663 = vpow2.f32 %v3384_v38  ;;  %v3383_v40 = vsub.f32 %v3375_v33, %v3381_v39  ;;  %v6574_v33 = vld [vmem:[%s7822_s6 + $0x18] sm:$0xff]   ;;  %v6579_v38 = vld [vmem:[%s7824_s8 + $0x60] sm:$0xff]   ;;  %v6580_v39 = vld [vmem:[%s7824_s8 + $0x68] sm:$0xff]  }
0x1e7a   : > { %v3386_v41 = vmul.f32 1.442695, %v3383_v40 }
0x1e7c   : > { %6665 = vpow2.f32 %v3386_v41 }
0x1e82   : > { %v6664_v42 = vpop.eup %6663 }
0x1e83   : > { %v3388_v43 = vsel %vm605_vm3, %v6664_v42, 0.0 }
0x1e84   : > { %3389 = vadd.xlane.f32.xlu0 %v3388_v43  ;;  %v5800_v43 = vld [vmem:[%s7817_s1 + $0x18] sm:$0xff] }
0x1e86   : > { %v6666_v27 = vpop.eup %6665 }
0x1e87   : > { %v3391_v46 = vsel %vm605_vm3, %v6666_v27, 0.0 }
0x1e88   : > { %3392 = vadd.xlane.f32.xlu1 %v3391_v46 }
0x1e99   : > { %3475 = vrot.lane.b32.xlu1 %v7234_v35, %s7890_s12 }
0x1e9a   : > { %3398 = vrot.lane.b32.xlu0 %v7228_v32, %s7890_s12 }
0x1e9d   : > { %3559 = vrot.lane.b32.xlu1 %v3558_v47, %s7891_s26  ;;  %v6571_v47 = vld [vmem:[%s7820_s4 + $0x10] sm:$0xff]  }
0x1e9e   : > { %3565 = vrot.lane.b32.xlu0 %v3564_v2, %s7892_s28 }
0x1f11   : > { %v3390_v48 = vpop.xlane.xlu0 %3389 }
0x1f12   : > { %6667 = vrcp.f32 %v3390_v48 }
0x1f15   : > { %v3393_v49 = vpop.xlane.xlu1 %3392  ;;  %v3399_v50 = vpop.permute.xlu0 %3398 }
0x1f16   : > { %6669 = vrcp.f32 %v3393_v49  ;;  %6330 = vmatpush3.msk.msra.mxu1 %vm634_vm4, %v3399_v50 }
0x1f17   : > { %6339 = vmatprep.subr.bf16.mxu1 %v6782_v10 }
0x1f19   : > { %v3476_v35 = vpop.permute.xlu1 %3475  ;;  %v3566_v61 = vpop.permute.xlu0 %3565 }
0x1f1a   : > { %6335 = vmatpush3.msk.msra.mxu0 %vm634_vm4, %v3476_v35 }
0x1f1b   : > { %6347 = vmatprep.subr.bf16.mxu0 %v6782_v10 }
0x1f1c   : > { %v6668_v32 = vpop.eup %6667 }
0x1f1d   : > { %v3396_v51 = vmul.f32 %v6668_v32, %v6664_v42  ;;  %v3560_v58 = vpop.permute.xlu1 %3559 }
0x1f1e   : > { %v3574_v59 = vsel %vm452_vm2, %v3554_v8, %v3560_v58  ;;  %v5877_v58 = vld [vmem:[%s7825_s9 + $0x1] ss:$0 sm:$0xff] }
0x1f1f   : > { %6332 = vmatmul.mubr.msk.f32.vlgmr.msra.gmra.mrb[28].mxu1 %vm630_vm5, %v3396_v51  ;;  %v3575_v60 = vsel %vm1809_vm6, %v3574_v59, %v3566_v61  ;;  %v6581_v51 = vld [vmem:[%s7824_s8 + $0x70] sm:$0xff]  }
0x1f20   : > { %v6670_v44 = vpop.eup %6669  ;;  %6343 = vmatprep.mubr.msk.bf16.mxu1 %vm6783_vm1, %v6782_v10  ;;  %6340 = vmatpush3.bf16.msra.mxu1 %v6571_v47 }
0x1f21   : > { %v3397_v45 = vmul.f32 %v6670_v44, %v6666_v27  ;;  %6341 = vmatprep.subr.bf16.mxu1 %v6782_v10  ;;  %v3682_v27 = vadd.f32 1.0, %v5800_v43  ;;  %v6582_v44 = vld [vmem:[%s7824_s8 + $0x78] sm:$0xff]  }
0x1f23   : > { %6337 = vmatmul.mubr.msk.f32.vlgmr.msra.gmra.mrb[52].mxu0 %vm630_vm5, %v3397_v45  ;;  %v5856_v45 = vld [vmem:[%s7823_s7 + $0x1] ss:$0 sm:$0xff] }
0x1f24   : > { %6351 = vmatprep.mubr.msk.bf16.mxu0 %vm6783_vm1, %v6782_v10  ;;  %6342 = vmatpush3.bf16.msra.mxu1 %v6572_v52 }
0x1f25   : > { %6355 = vmatprep.subr.bf16.mxu1 %v6782_v10 }
0x1ff2   : > { %v3471_v53 = vpop.f32.mrb[28].mxu1 }
0x1ff3   : > { %v6333_v54 = vpop.f32.mrb[29].mxu1 }
0x1ff6   : > { %v3548_v55 = vpop.f32.mrb[52].mxu0 }
0x1ff7   : > { %v3570_v56 = vcombine.low %v3471_v53, %v3548_v55  ;;  %v6338_v57 = vpop.f32.mrb[53].mxu0 }
0x1ff9   : > { %3571 = vrot.lane.b32.xlu1 %v3570_v56, %s7893_s24 }
0x206b   : > { %v3572_v62 = vpop.permute.xlu1 %3571 }
0x206c   : > { %v3576_v1 = vsel %vm1811_vm7, %v3575_v60, %v3572_v62 }
0x206d   : > { %v3577_v63 = vpack.c.bf16 %v3576_v1, %v3576_v1 }
0x206f   : > { %6344 = vmatmul.mubr.msk.bf16.vlgmr.msra.gmra.mrb[32].mxu1 %vm359_vm0, %v3577_v63 }
0x2070   : > { %6371 = vmatprep.mubr.msk.bf16.mxu1 %vm6783_vm1, %v6782_v10  ;;  %6356 = vmatpush3.bf16.msra.mxu1 %v6575_v34 }
0x2071   : > { %6357 = vmatprep.subr.bf16.mxu1 %v6782_v10 }
0x2074   : > { %6358 = vmatpush3.bf16.msra.mxu1 %v6576_v23 }
0x2075   : > { %6359 = vmatprep.subr.bf16.mxu1 %v6782_v10 }
0x2078   : > { %6360 = vmatpush3.bf16.msra.mxu1 %v6577_v36 }
0x2079   : > { %6361 = vmatprep.subr.bf16.mxu1 %v6782_v10 }
0x207c   : > { %6362 = vmatpush3.bf16.msra.mxu1 %v6578_v37 }
0x207d   : > { %6363 = vmatprep.subr.bf16.mxu1 %v6782_v10 }
0x2080   : > { %6364 = vmatpush3.bf16.msra.mxu1 %v6579_v38  ;;  %v5893_v38 = vld [vmem:[%s7819_s3 + $0x2] ss:$0 sm:$0xff] }
0x2081   : > { %6365 = vmatprep.subr.bf16.mxu1 %v6782_v10 }
0x2084   : > { %6366 = vmatpush3.bf16.msra.mxu1 %v6580_v39 }
0x2085   : > { %6367 = vmatprep.subr.bf16.mxu1 %v6782_v10 }
0x2088   : > { %6368 = vmatpush3.bf16.msra.mxu1 %v6581_v51 }
0x2089   : > { %6369 = vmatprep.subr.bf16.mxu1 %v6782_v10 }
0x208c   : > { %6370 = vmatpush3.bf16.msra.mxu1 %v6582_v44 }
0x208d   : > { %6413 = vmatprep.subr.mxu1 %v6782_v10 }
0x2142   : > { %v3640_v4 = vpop.f32.mrb[32].mxu1 }
0x2143   : > { %v3641_v5 = vadd.f32 %v5847_v3, %v3640_v4  ;;  %v6345_v7 = vpop.f32.mrb[33].mxu1 }
0x2144   : > { %v3643_v8 = vpop.f32.mrb[34].mxu1 }
0x2145   : > { %3647 = vrot.lane.b32.xlu0 %v3641_v5, %s7894_s19  ;;  %v6346_v6 = vpop.f32.mrb[35].mxu1 }
0x21b7   : > { %v3648_v11 = vpop.permute.xlu0 %3647 }
0x21b8   : > { %v3650_v13 = vmul.f32 %v7207_v12, %v3648_v11 }
0x21ba   : > { %3652 = vrot.lane.b32.xlu1 %v3650_v13, %s7894_s19 }
0x222c   : > { %v3653_v14 = vpop.permute.xlu1 %3652 }
0x222d   : > { %v3655_v15 = vadd.f32 %v3653_v14, %v7200_v9 }
0x222f   : > { %v3656_v16 = vsel %vm359_vm0, %v3655_v15, 0.0 }
0x2230   : > { %3657 = vadd.xlane.f32.xlu0 %v3656_v16 }
0x22bd   : > { %v3658_v17 = vpop.xlane.xlu0 %3657 }
0x22be   : > { %v3659_v0 = vmul.f32 0.03125, %v3658_v17 }
0x22c0   : > { %v3660_v18 = vsub.f32 %v3655_v15, %v3659_v0 }
0x22c2   : > { %v3661_v19 = vmul.f32 %v3660_v18, %v3660_v18 }
0x22c4   : > { %v3662_v20 = vsel %vm359_vm0, %v3661_v19, 0.0 }
0x22c5   : > { %3663 = vadd.xlane.f32.xlu1 %v3662_v20  ;;  %v7494_v20 = vld [vmem:[%s7817_s1 + $0x20] sm:$0xff] }
0x22d6   : > { %3685 = vrot.lane.b32.xlu1 %v7207_v12, %s7895_s22  ;;  %v6573_v12 = vld [vmem:[%s7822_s6 + $0x10] sm:$0xff]  }
0x22d7   : > { %6348 = vmatpush3.bf16.msra.mxu0 %v6573_v12 }
0x22d8   : > { %6349 = vmatprep.subr.bf16.mxu0 %v6782_v10 }
0x22db   : > { %6350 = vmatpush3.bf16.msra.mxu0 %v6574_v33 }
0x22dc   : > { %6375 = vmatprep.subr.bf16.mxu0 %v6782_v10 }
0x2352   : > { %v3664_v21 = vpop.xlane.xlu1 %3663 }
0x2353   : > { %v3665_v22 = vmul.f32 0.03125, %v3664_v21  ;;  %v3912_v21 = vadd.f32 1.0, %v7494_v20 }
0x2355   : > { %v3666_v24 = vadd.f32 1e-06, %v3665_v22 }
0x2356   : > { %v3686_v49 = vpop.permute.xlu1 %3685 }
0x2357   : > { %6671 = vrsqrt.f32 %v3666_v24 }
0x2361   : > { %v6672_v25 = vpop.eup %6671 }
0x2362   : > { %v7422_v2 = vmul.f32 %v6672_v25, %v3660_v18 }
0x2364   : > { %v3669_v9 = vsel %vm359_vm0, %v7422_v2, 0.0 }
0x2365   : > { %3670 = vadd.xlane.f32.xlu0 %v3669_v9 }
0x23f2   : > { %v3671_v26 = vpop.xlane.xlu0 %3670 }
0x23f3   : > { %v3672_v28 = vmul.f32 0.03125, %v3671_v26  ;;  %v6583_v26 = vld [vmem:[%s7818_s2 + $0x20] sm:$0xff]  }
0x23f5   : > { %v3673_v29 = vsub.f32 %v7422_v2, %v3672_v28  ;;  %v6584_v28 = vld [vmem:[%s7818_s2 + $0x28] sm:$0xff]  }
0x23f7   : > { %v3674_v30 = vmul.f32 %v3673_v29, %v3673_v29 }
0x23f9   : > { %v3675_v31 = vsel %vm359_vm0, %v3674_v30, 0.0 }
0x23fa   : > { %3676 = vadd.xlane.f32.xlu0 %v3675_v31 }
0x2487   : > { %v3677_v40 = vpop.xlane.xlu0 %3676 }
0x2488   : > { %v3678_v41 = vmul.f32 0.03125, %v3677_v40 }
0x248a   : > { %v3679_v42 = vadd.f32 1e-06, %v3678_v41 }
0x248c   : > { %6673 = vrsqrt.f32 %v3679_v42 }
0x2496   : > { %v6674_v46 = vpop.eup %6673 }
0x2497   : > { %v3681_v48 = vmul.f32 %v6674_v46, %v3673_v29 }
0x2499   : > { %v3683_v50 = vmul.f32 %v3682_v27, %v3681_v48 }
0x249b   : > { %v3688_v35 = vadd.f32 %v3686_v49, %v3683_v50 }
0x249d   : > { %v3689_v32 = vpack.c.bf16 %v3688_v35, %v3688_v35 }
0x249f   : > { %6352 = vmatmul.mubr.msk.bf16.vlgmr.msra.gmra.mrb[56].mxu0 %vm359_vm0, %v3689_v32 }
0x24a0   : > { %6379 = vmatprep.mubr.msk.bf16.mxu0 %vm6783_vm1, %v6782_v10  ;;  %6376 = vmatpush3.bf16.msra.mxu0 %v6583_v26 }
0x24a1   : > { %6377 = vmatprep.subr.bf16.mxu0 %v6782_v10 }
0x24a4   : > { %6378 = vmatpush3.bf16.msra.mxu0 %v6584_v28 }
0x24a5   : > { %6383 = vmatprep.subr.mxu0 %v6782_v10 }
0x2572   : > { %v3752_v47 = vpop.f32.mrb[56].mxu0 }
0x2573   : > { %v3753_v52 = vadd.f32 %v5856_v45, %v3752_v47  ;;  %v6353_v53 = vpop.f32.mrb[57].mxu0 }
0x2574   : > { %v3755_v54 = vpop.f32.mrb[58].mxu0 }
0x2575   : > { %v3758_v55 = vmax.f32 %v3753_v52, 0.0  ;;  %v6354_v56 = vpop.f32.mrb[59].mxu0 }
0x2577   : > { %v3759_v57 = vpack.c.bf16 %v3758_v55, %v3758_v55 }
0x2579   : > { %6372 = vmatmul.mubr.bf16.vlgmr.msra.gmra.mrb[36].mxu1 %v3759_v57 }
0x257a   : > { %6415 = vmatprep.mubr.msk.f32.mxu1 %vm6783_vm1, %v6782_v10 }
0x264c   : > { %v3867_v59 = vpop.f32.mrb[36].mxu1 }
0x264d   : > { %v3868_v61 = vadd.f32 %v5877_v58, %v3867_v59  ;;  %v6373_v60 = vpop.f32.mrb[37].mxu1 }
0x264e   : > { %v3870_v62 = vpop.f32.mrb[38].mxu1 }
0x264f   : > { %3874 = vrot.lane.b32.xlu0 %v3868_v61, %s7895_s22  ;;  %v6374_v1 = vpop.f32.mrb[39].mxu1 }
0x26c1   : > { %v3875_v63 = vpop.permute.xlu0 %3874 }
0x26c2   : > { %v3877_v3 = vmul.f32 %v5800_v43, %v3875_v63 }
0x26c4   : > { %3879 = vrot.lane.b32.xlu1 %v3877_v3, %s7896_s13 }
0x2736   : > { %v3880_v4 = vpop.permute.xlu1 %3879 }
0x2737   : > { %v3882_v5 = vadd.f32 %v3880_v4, %v7422_v2 }
0x2739   : > { %v3883_v7 = vsel %vm359_vm0, %v3882_v5, 0.0 }
0x273a   : > { %3884 = vadd.xlane.f32.xlu1 %v3883_v7 }
0x27c7   : > { %v3885_v8 = vpop.xlane.xlu1 %3884 }
0x27c8   : > { %v3886_v6 = vmul.f32 0.03125, %v3885_v8 }
0x27ca   : > { %v3887_v11 = vsub.f32 %v3882_v5, %v3886_v6 }
0x27cc   : > { %v3888_v13 = vmul.f32 %v3887_v11, %v3887_v11 }
0x27ce   : > { %v3889_v14 = vsel %vm359_vm0, %v3888_v13, 0.0 }
0x27cf   : > { %3890 = vadd.xlane.f32.xlu0 %v3889_v14 }
0x285c   : > { %v3891_v15 = vpop.xlane.xlu0 %3890 }
0x285d   : > { %v3892_v16 = vmul.f32 0.03125, %v3891_v15 }
0x285f   : > { %v3893_v17 = vadd.f32 1e-06, %v3892_v16 }
0x2861   : > { %6675 = vrsqrt.f32 %v3893_v17 }
0x286b   : > { %v6676_v0 = vpop.eup %6675 }
0x286c   : > { %v7487_v18 = vmul.f32 %v6676_v0, %v3887_v11 }
0x286e   : > { %v3899_v19 = vsel %vm359_vm0, %v7487_v18, 0.0 }
0x286f   : > { %3900 = vadd.xlane.f32.xlu0 %v3899_v19 }
0x2885   : > { %3914 = vrot.lane.b32.xlu0 %v3912_v21, %s7896_s13 }
0x28fc   : > { %v3901_v22 = vpop.xlane.xlu0 %3900 }
0x28fd   : > { %v3902_v24 = vmul.f32 0.03125, %v3901_v22 }
0x28ff   : > { %v3903_v25 = vsub.f32 %v7487_v18, %v3902_v24 }
0x2900   : > { %v3915_v33 = vpop.permute.xlu0 %3914 }
0x2901   : > { %v3904_v2 = vmul.f32 %v3903_v25, %v3903_v25 }
0x2903   : > { %v3905_v9 = vsel %vm359_vm0, %v3904_v2, 0.0 }
0x2904   : > { %3906 = vadd.xlane.f32.xlu1 %v3905_v9 }
0x2991   : > { %v3907_v29 = vpop.xlane.xlu1 %3906 }
0x2992   : > { %v3908_v30 = vmul.f32 0.03125, %v3907_v29 }
0x2994   : > { %v3909_v31 = vadd.f32 1e-06, %v3908_v30 }
0x2996   : > { %6677 = vrsqrt.f32 %v3909_v31 }
0x29a0   : > { %v6678_v12 = vpop.eup %6677 }
0x29a1   : > { %v3911_v34 = vmul.f32 %v6678_v12, %v3903_v25 }
0x29a3   : > { %v3917_v23 = vmul.f32 %v3915_v33, %v3911_v34 }
0x29a5   : > { %v3918_v36 = vadd.f32 %v7494_v20, %v3917_v23 }
0x29a7   : > { %v3919_v37 = vpack.c.bf16 %v3918_v36, %v3918_v36 }
0x29a9   : > { %6380 = vmatmul.mubr.msk.bf16.vlgmr.msra.gmra.mrb[60].mxu0 %vm359_vm0, %v3919_v37 }
0x29aa   : > { %6385 = vmatprep.mubr.msk.f32.mxu0 %vm6783_vm1, %v6782_v10 }
0x2a7c   : > { %v3982_v39 = vpop.f32.mrb[60].mxu0 }
0x2a7d   : > { %v7515_v40 = vadd.f32 %v5893_v38, %v3982_v39  ;;  %v6381_v41 = vpop.f32.mrb[61].mxu0 }
0x2a7e   : > { %v3985_v42 = vpop.f32.mrb[62].mxu0 }
0x2a7f   : > { %3990 = vrot.lane.b32.xlu1 %v7515_v40, %s7896_s13  ;;  %v6382_v43 = vpop.f32.mrb[63].mxu0  ;;  %v7521_v27 = vcombine.high %v7515_v40, %v7515_v40 }
0x2a83   : > { %4066 = vrot.lane.b32.xlu1 %v7521_v27, %s7896_s13 }
0x2af1   : > { %v3991_v46 = vpop.permute.xlu1 %3990 }
0x2af2   : > { %6384 = vmatpush3.xpose.msk.msra.mxu0 %vm452_vm2, %v3991_v46 }
0x2af3   : > { %6388 = vmatprep.subr.mxu0 %v6782_v10 }
0x2af5   : > { %6386 = vmatmul.mubr.msk.f32.vlgmr.msra.gmra.mrb[54].mxu0 %vm452_vm2, %v7515_v40  ;;  %v4067_v48 = vpop.permute.xlu1 %4066 }
0x2af6   : > { %6389 = vmatpush3.xpose.msk.msra.mxu0 %vm452_vm2, %v4067_v48  ;;  %6390 = vmatprep.mubr.msk.f32.mxu0 %vm6783_vm1, %v6782_v10 }
0x2af7   : > { %6393 = vmatprep.subr.mxu0 %v6782_v10 }
0x2af9   : > { %6391 = vmatmul.mubr.msk.f32.vlgmr.msra.gmra.mrb[64].mxu0 %vm452_vm2, %v7521_v27 }
0x2afa   : > { %6395 = vmatprep.mubr.msk.f32.mxu0 %vm6783_vm1, %v6782_v10 }
0x2bc8   : > { %v4062_v49 = vpop.f32.mrb[54].mxu0 }
0x2bc9   : > { %v4142_v50 = vmul.f32 0.35355338, %v4062_v49  ;;  %v6387_v35 = vpop.f32.mrb[55].mxu0 }
0x2bcb   : > { %v4144_v32 = vsel %vm605_vm3, %v4142_v50, -inf }
0x2bcc   : > { %4145 = vmax.xlane.f32.xlu0 %v4144_v32  ;;  %v4138_v51 = vpop.f32.mrb[64].mxu0 }
0x2bcd   : > { %v4143_v44 = vmul.f32 0.35355338, %v4138_v51  ;;  %v6392_v45 = vpop.f32.mrb[65].mxu0 }
0x2bcf   : > { %v4147_v47 = vsel %vm605_vm3, %v4143_v44, -inf }
0x2bd0   : > { %4148 = vmax.xlane.f32.xlu1 %v4147_v47 }
0x2be1   : > { %4166 = vrot.lane.b32.xlu1 %v7515_v40, %s7894_s19 }
0x2be5   : > { %4322 = vrot.lane.b32.xlu1 %v7515_v40, %s7882_s20 }
0x2be9   : > { %4320 = vrot.lane.b32.xlu1 %v7515_v40, %s7883_s25 }
0x2bed   : > { %4398 = vrot.lane.b32.xlu1 %v7521_v27, %s7883_s25  ;;  %s6798_s25 = smov [#allocation2]  }
0x2c59   : > { %v4146_v52 = vpop.xlane.xlu0 %4145 }
0x2c5a   : > { %v4150_v53 = vsub.f32 %v4142_v50, %v4146_v52 }
0x2c5c   : > { %v4152_v54 = vmul.f32 1.442695, %v4150_v53 }
0x2c5d   : > { %v4149_v55 = vpop.xlane.xlu1 %4148 }
0x2c5e   : > { %6679 = vpow2.f32 %v4152_v54  ;;  %v4151_v56 = vsub.f32 %v4143_v44, %v4149_v55 }
0x2c60   : > { %v4154_v57 = vmul.f32 1.442695, %v4151_v56 }
0x2c61   : > { %v4167_v58 = vpop.permute.xlu1 %4166 }
0x2c62   : > { %6681 = vpow2.f32 %v4154_v57  ;;  %6394 = vmatpush3.msk.msra.mxu0 %vm634_vm4, %v4167_v58 }
0x2c63   : > { %6398 = vmatprep.subr.mxu0 %v6782_v10 }
0x2c65   : > { %v4323_v8 = vpop.permute.xlu1 %4322 }
0x2c68   : > { %v6680_v59 = vpop.eup %6679 }
0x2c69   : > { %v4156_v61 = vsel %vm605_vm3, %v6680_v59, 0.0  ;;  %v4321_v11 = vpop.permute.xlu1 %4320 }
0x2c6a   : > { %4157 = vadd.xlane.f32.xlu0 %v4156_v61 }
0x2c6c   : > { %v6682_v60 = vpop.eup %6681 }
0x2c6d   : > { %v4159_v62 = vsel %vm605_vm3, %v6682_v60, 0.0  ;;  %v4399_v14 = vpop.permute.xlu1 %4398 }
0x2c6e   : > { %4160 = vadd.xlane.f32.xlu0 %v4159_v62 }
0x2c84   : > { %4243 = vrot.lane.b32.xlu0 %v7521_v27, %s7894_s19 }
0x2c88   : > { %4400 = vrot.lane.b32.xlu0 %v7521_v27, %s7882_s20 }
0x2cf7   : > { %v4158_v1 = vpop.xlane.xlu0 %4157 }
0x2cf8   : > { %6683 = vrcp.f32 %v4158_v1 }
0x2cfb   : > { %v4161_v63 = vpop.xlane.xlu0 %4160 }
0x2cfc   : > { %6685 = vrcp.f32 %v4161_v63 }
0x2cff   : > { %v4244_v5 = vpop.permute.xlu0 %4243 }
0x2d02   : > { %v6684_v3 = vpop.eup %6683 }
0x2d03   : > { %v4164_v4 = vmul.f32 %v6684_v3, %v6680_v59  ;;  %v4401_v13 = vpop.permute.xlu0 %4400 }
0x2d05   : > { %6396 = vmatmul.mubr.msk.f32.vlgmr.msra.gmra.mrb[66].mxu0 %vm630_vm5, %v4164_v4 }
0x2d06   : > { %v6686_v7 = vpop.eup %6685  ;;  %6399 = vmatpush3.msk.msra.mxu0 %vm634_vm4, %v4244_v5  ;;  %6400 = vmatprep.mubr.msk.f32.mxu0 %vm6783_vm1, %v6782_v10 }
0x2d07   : > { %v4165_v6 = vmul.f32 %v6686_v7, %v6682_v60  ;;  %6403 = vmatprep.subr.mxu0 %v6782_v10 }
0x2d09   : > { %6401 = vmatmul.mubr.msk.f32.vlgmr.msra.gmra.mrb[68].mxu0 %vm630_vm5, %v4165_v6 }
0x2d0a   : > { %6405 = vmatprep.mubr.msk.f32.mxu0 %vm6783_vm1, %v6782_v10 }
0x2d0d   : > { %6404 = vmatpush3.xpose.msk.msra.mxu0 %vm452_vm2, %v4323_v8 }
0x2d0e   : > { %6408 = vmatprep.subr.mxu0 %v6782_v10 }
0x2d10   : > { %6406 = vmatmul.mubr.msk.f32.vlgmr.msra.gmra.mrb[70].mxu0 %vm452_vm2, %v4321_v11 }
0x2d11   : > { %6409 = vmatpush3.xpose.msk.msra.mxu0 %vm452_vm2, %v4401_v13  ;;  %6410 = vmatprep.mubr.msk.f32.mxu0 %vm6783_vm1, %v6782_v10 }
0x2d12   : > { %6418 = vmatprep.subr.mxu0 %v6782_v10 }
0x2d14   : > { %6411 = vmatmul.mubr.msk.f32.vlgmr.msra.gmra.mrb[72].mxu0 %vm452_vm2, %v4399_v14 }
0x2d15   : > { %6420 = vmatprep.mubr.msk.f32.mxu0 %vm6783_vm1, %v6782_v10 }
0x2dd8   : > { %v7573_v15 = vpop.f32.mrb[66].mxu0 }
0x2dd9   : > { %v6397_v16 = vpop.f32.mrb[67].mxu0 }
0x2ddc   : > { %v7575_v17 = vpop.f32.mrb[68].mxu0 }
0x2ddd   : > { %v5324_v0 = vcombine.low %v7573_v15, %v7575_v17  ;;  %v6402_v19 = vpop.f32.mrb[69].mxu0 }
0x2de3   : > { %v4394_v21 = vpop.f32.mrb[70].mxu0 }
0x2de4   : > { %v4476_v22 = vmul.f32 0.35355338, %v4394_v21  ;;  %v6407_v24 = vpop.f32.mrb[71].mxu0 }
0x2de6   : > { %v4478_v25 = vsel %vm605_vm3, %v4476_v22, -inf }
0x2de7   : > { %4479 = vmax.xlane.f32.xlu0 %v4478_v25  ;;  %v4472_v2 = vpop.f32.mrb[72].mxu0 }
0x2de8   : > { %v4477_v9 = vmul.f32 0.35355338, %v4472_v2  ;;  %v6412_v26 = vpop.f32.mrb[73].mxu0 }
0x2dea   : > { %v4481_v28 = vsel %vm605_vm3, %v4477_v9, -inf }
0x2deb   : > { %4482 = vmax.xlane.f32.xlu1 %v4481_v28 }
0x2dfc   : > { %4500 = vrot.lane.b32.xlu1 %v7515_v40, %s7884_s11 }
0x2dfd   : > { %4577 = vrot.lane.b32.xlu0 %v7521_v27, %s7884_s11 }
0x2e00   : > { %4656 = vrot.lane.b32.xlu1 %v7515_v40, %s7885_s29 }
0x2e04   : > { %4734 = vrot.lane.b32.xlu1 %v7521_v27, %s7885_s29 }
0x2e08   : > { %4732 = vrot.lane.b32.xlu1 %v7521_v27, %s7886_s30 }
0x2e74   : > { %v4480_v29 = vpop.xlane.xlu0 %4479 }
0x2e75   : > { %v4484_v30 = vsub.f32 %v4476_v22, %v4480_v29 }
0x2e77   : > { %v4486_v31 = vmul.f32 1.442695, %v4484_v30 }
0x2e78   : > { %v4578_v12 = vpop.permute.xlu0 %4577  ;;  %v4483_v33 = vpop.xlane.xlu1 %4482 }
0x2e79   : > { %6687 = vpow2.f32 %v4486_v31  ;;  %v4485_v34 = vsub.f32 %v4477_v9, %v4483_v33  ;;  %6419 = vmatpush3.msk.msra.mxu0 %vm634_vm4, %v4578_v12 }
0x2e7a   : > { %6428 = vmatprep.subr.mxu0 %v6782_v10 }
0x2e7b   : > { %v4488_v23 = vmul.f32 1.442695, %v4485_v34 }
0x2e7c   : > { %v4501_v36 = vpop.permute.xlu1 %4500 }
0x2e7d   : > { %6689 = vpow2.f32 %v4488_v23  ;;  %6414 = vmatpush3.msk.msra.mxu1 %vm634_vm4, %v4501_v36 }
0x2e7e   : > { %6423 = vmatprep.subr.mxu1 %v6782_v10 }
0x2e80   : > { %v4657_v46 = vpop.permute.xlu1 %4656 }
0x2e83   : > { %v6688_v37 = vpop.eup %6687 }
0x2e84   : > { %v4490_v38 = vsel %vm605_vm3, %v6688_v37, 0.0  ;;  %v4735_v35 = vpop.permute.xlu1 %4734 }
0x2e85   : > { %4491 = vadd.xlane.f32.xlu0 %v4490_v38 }
0x2e87   : > { %v6690_v39 = vpop.eup %6689 }
0x2e88   : > { %v4493_v41 = vsel %vm605_vm3, %v6690_v39, 0.0  ;;  %v4733_v44 = vpop.permute.xlu1 %4732 }
0x2e89   : > { %4494 = vadd.xlane.f32.xlu0 %v4493_v41 }
0x2e9f   : > { %4654 = vrot.lane.b32.xlu0 %v7515_v40, %s7886_s30 }
0x2f12   : > { %v4492_v42 = vpop.xlane.xlu0 %4491 }
0x2f13   : > { %6691 = vrcp.f32 %v4492_v42 }
0x2f16   : > { %v4495_v43 = vpop.xlane.xlu0 %4494 }
0x2f17   : > { %6693 = vrcp.f32 %v4495_v43 }
0x2f1a   : > { %v4655_v51 = vpop.permute.xlu0 %4654 }
0x2f1d   : > { %v6692_v48 = vpop.eup %6691 }
0x2f1e   : > { %v4498_v49 = vmul.f32 %v6692_v48, %v6688_v37 }
0x2f20   : > { %6416 = vmatmul.mubr.msk.f32.vlgmr.msra.gmra.mrb[30].mxu1 %vm630_vm5, %v4498_v49 }
0x2f21   : > { %v6694_v50 = vpop.eup %6693  ;;  %6424 = vmatpush3.xpose.msk.msra.mxu1 %vm452_vm2, %v4657_v46  ;;  %6425 = vmatprep.mubr.msk.f32.mxu1 %vm6783_vm1, %v6782_v10 }
0x2f22   : > { %v4499_v32 = vmul.f32 %v6694_v50, %v6690_v39  ;;  %6433 = vmatprep.subr.mxu1 %v6782_v10 }
0x2f24   : > { %6421 = vmatmul.mubr.msk.f32.vlgmr.msra.gmra.mrb[74].mxu0 %vm630_vm5, %v4499_v32  ;;  %6426 = vmatmul.mubr.msk.f32.vlgmr.msra.gmra.mrb[40].mxu1 %vm452_vm2, %v4655_v51 }
0x2f25   : > { %6429 = vmatpush3.xpose.msk.msra.mxu0 %vm452_vm2, %v4735_v35  ;;  %6430 = vmatprep.mubr.msk.f32.mxu0 %vm6783_vm1, %v6782_v10 }
0x2f26   : > { %6438 = vmatprep.subr.mxu0 %v6782_v10  ;;  %6435 = vmatprep.mubr.msk.f32.mxu1 %vm6783_vm1, %v6782_v10 }
0x2f28   : > { %6431 = vmatmul.mubr.msk.f32.vlgmr.msra.gmra.mrb[76].mxu0 %vm452_vm2, %v4733_v44 }
0x2f29   : > { %6440 = vmatprep.mubr.msk.f32.mxu0 %vm6783_vm1, %v6782_v10 }
0x2ff3   : > { %v7615_v45 = vpop.f32.mrb[30].mxu1 }
0x2ff4   : > { %v6417_v47 = vpop.f32.mrb[31].mxu1 }
0x2ff7   : > { %v7617_v52 = vpop.f32.mrb[74].mxu0  ;;  %v4728_v53 = vpop.f32.mrb[40].mxu1 }
0x2ff8   : > { %v5328_v54 = vcombine.low %v7615_v45, %v7617_v52  ;;  %v4810_v55 = vmul.f32 0.35355338, %v4728_v53  ;;  %v6422_v56 = vpop.f32.mrb[75].mxu0  ;;  %v6427_v57 = vpop.f32.mrb[41].mxu1 }
0x2ffa   : > { %v4812_v58 = vsel %vm605_vm3, %v4810_v55, -inf }
0x2ffb   : > { %4813 = vmax.xlane.f32.xlu0 %v4812_v58  ;;  %v4806_v59 = vpop.f32.mrb[76].mxu0 }
0x2ffc   : > { %v4811_v61 = vmul.f32 0.35355338, %v4806_v59  ;;  %v6432_v60 = vpop.f32.mrb[77].mxu0  ;;  %v6586_v59 = vld [vmem:[%s7820_s4 + $0x28] sm:$0xff]  }
0x2ffe   : > { %v4815_v62 = vsel %vm605_vm3, %v4811_v61, -inf }
0x2fff   : > { %4816 = vmax.xlane.f32.xlu1 %v4815_v62 }
0x3010   : > { %4834 = vrot.lane.b32.xlu1 %v7515_v40, %s7887_s18 }
0x3011   : > { %4911 = vrot.lane.b32.xlu0 %v7521_v27, %s7887_s18 }
0x3014   : > { %4990 = vrot.lane.b32.xlu1 %v7515_v40, %s7888_s27 }
0x3018   : > { %5068 = vrot.lane.b32.xlu1 %v7521_v27, %s7888_s27 }
0x301c   : > { %5066 = vrot.lane.b32.xlu1 %v7521_v27, %s7889_s21 }
0x3088   : > { %v4814_v1 = vpop.xlane.xlu0 %4813 }
0x3089   : > { %v4818_v63 = vsub.f32 %v4810_v55, %v4814_v1 }
0x308b   : > { %v4820_v3 = vmul.f32 1.442695, %v4818_v63 }
0x308c   : > { %v4912_v4 = vpop.permute.xlu0 %4911  ;;  %v4817_v5 = vpop.xlane.xlu1 %4816 }
0x308d   : > { %6695 = vpow2.f32 %v4820_v3  ;;  %v4819_v7 = vsub.f32 %v4811_v61, %v4817_v5  ;;  %6439 = vmatpush3.msk.msra.mxu0 %vm634_vm4, %v4912_v4 }
0x308e   : > { %6448 = vmatprep.subr.mxu0 %v6782_v10 }
0x308f   : > { %v4822_v8 = vmul.f32 1.442695, %v4819_v7 }
0x3090   : > { %v4835_v6 = vpop.permute.xlu1 %4834 }
0x3091   : > { %6697 = vpow2.f32 %v4822_v8  ;;  %6434 = vmatpush3.msk.msra.mxu1 %vm634_vm4, %v4835_v6 }
0x3092   : > { %6443 = vmatprep.subr.mxu1 %v6782_v10 }
0x3094   : > { %v4991_v22 = vpop.permute.xlu1 %4990 }
0x3097   : > { %v6696_v11 = vpop.eup %6695 }
0x3098   : > { %v4824_v13 = vsel %vm605_vm3, %v6696_v11, 0.0  ;;  %v5069_v9 = vpop.permute.xlu1 %5068 }
0x3099   : > { %4825 = vadd.xlane.f32.xlu0 %v4824_v13  ;;  %v5934_v13 = vld [vmem:[%s7821_s5 + $0x2] ss:$0 sm:$0xff] }
0x309b   : > { %v6698_v14 = vpop.eup %6697 }
0x309c   : > { %v4827_v16 = vsel %vm605_vm3, %v6698_v14, 0.0  ;;  %v5067_v29 = vpop.permute.xlu1 %5066 }
0x309d   : > { %4828 = vadd.xlane.f32.xlu0 %v4827_v16 }
0x30b3   : > { %4988 = vrot.lane.b32.xlu0 %v7515_v40, %s7889_s21 }
0x3126   : > { %v4826_v19 = vpop.xlane.xlu0 %4825 }
0x3127   : > { %6699 = vrcp.f32 %v4826_v19 }
0x312a   : > { %v4829_v21 = vpop.xlane.xlu0 %4828 }
0x312b   : > { %6701 = vrcp.f32 %v4829_v21 }
0x312e   : > { %v4989_v28 = vpop.permute.xlu0 %4988 }
0x3131   : > { %v6700_v24 = vpop.eup %6699 }
0x3132   : > { %v4832_v25 = vmul.f32 %v6700_v24, %v6696_v11 }
0x3134   : > { %6436 = vmatmul.mubr.msk.f32.vlgmr.msra.gmra.mrb[42].mxu1 %vm630_vm5, %v4832_v25 }
0x3135   : > { %v6702_v2 = vpop.eup %6701  ;;  %6444 = vmatpush3.xpose.msk.msra.mxu1 %vm452_vm2, %v4991_v22  ;;  %6445 = vmatprep.mubr.msk.f32.mxu1 %vm6783_vm1, %v6782_v10 }
0x3136   : > { %v4833_v26 = vmul.f32 %v6702_v2, %v6698_v14  ;;  %6453 = vmatprep.subr.mxu1 %v6782_v10 }
0x3138   : > { %6441 = vmatmul.mubr.msk.f32.vlgmr.msra.gmra.mrb[78].mxu0 %vm630_vm5, %v4833_v26  ;;  %6446 = vmatmul.mubr.msk.f32.vlgmr.msra.gmra.mrb[44].mxu1 %vm452_vm2, %v4989_v28 }
0x3139   : > { %6449 = vmatpush3.xpose.msk.msra.mxu0 %vm452_vm2, %v5069_v9  ;;  %6450 = vmatprep.mubr.msk.f32.mxu0 %vm6783_vm1, %v6782_v10 }
0x313a   : > { %6458 = vmatprep.subr.mxu0 %v6782_v10  ;;  %6455 = vmatprep.mubr.msk.f32.mxu1 %vm6783_vm1, %v6782_v10 }
0x313c   : > { %6451 = vmatmul.mubr.msk.f32.vlgmr.msra.gmra.mrb[80].mxu0 %vm452_vm2, %v5067_v29 }
0x313d   : > { %6460 = vmatprep.mubr.msk.f32.mxu0 %vm6783_vm1, %v6782_v10 }
0x3207   : > { %v4907_v30 = vpop.f32.mrb[42].mxu1 }
0x3208   : > { %v6437_v31 = vpop.f32.mrb[43].mxu1 }
0x320b   : > { %v4984_v12 = vpop.f32.mrb[78].mxu0  ;;  %v5062_v33 = vpop.f32.mrb[44].mxu1 }
0x320c   : > { %v5334_v34 = vcombine.low %v4907_v30, %v4984_v12  ;;  %v5144_v23 = vmul.f32 0.35355338, %v5062_v33  ;;  %v6442_v36 = vpop.f32.mrb[79].mxu0  ;;  %v6447_v37 = vpop.f32.mrb[45].mxu1 }
0x320e   : > { %v5146_v38 = vsel %vm605_vm3, %v5144_v23, -inf }
0x320f   : > { %5147 = vmax.xlane.f32.xlu0 %v5146_v38  ;;  %v5140_v39 = vpop.f32.mrb[80].mxu0 }
0x3210   : > { %v5145_v41 = vmul.f32 0.35355338, %v5140_v39  ;;  %v6452_v42 = vpop.f32.mrb[81].mxu0 }
0x3211   : > { %v6588_v42 = vld [vmem:[%s7822_s6 + $0x28] sm:$0xff]  }
0x3212   : > { %v5149_v43 = vsel %vm605_vm3, %v5145_v41, -inf }
0x3213   : > { %5150 = vmax.xlane.f32.xlu1 %v5149_v43  ;;  %v6590_v43 = vld [vmem:[%s7824_s8 + $0x88] sm:$0xff]  }
0x3224   : > { %5168 = vrot.lane.b32.xlu1 %v7515_v40, %s7890_s12 }
0x3228   : > { %5329 = vrot.lane.b32.xlu1 %v5328_v54, %s7891_s26 }
0x322c   : > { %5335 = vrot.lane.b32.xlu1 %v5334_v34, %s7892_s28 }
0x329c   : > { %v5148_v46 = vpop.xlane.xlu0 %5147 }
0x329d   : > { %v5152_v48 = vsub.f32 %v5144_v23, %v5148_v46  ;;  %v6591_v46 = vld [vmem:[%s7824_s8 + $0x90] sm:$0xff]  }
0x329f   : > { %v5154_v49 = vmul.f32 1.442695, %v5152_v48  ;;  %v6592_v48 = vld [vmem:[%s7824_s8 + $0x98] sm:$0xff]  }
0x32a0   : > { %v5151_v50 = vpop.xlane.xlu1 %5150 }
0x32a1   : > { %6703 = vpow2.f32 %v5154_v49  ;;  %v5153_v35 = vsub.f32 %v5145_v41, %v5151_v50  ;;  %v6587_v41 = vld [vmem:[%s7822_s6 + $0x20] sm:$0xff]   ;;  %v6594_v50 = vld [vmem:[%s7824_s8 + $0xa8] sm:$0xff]  }
0x32a2   : > { %v6593_v49 = vld [vmem:[%s7824_s8 + $0xa0] sm:$0xff]  }
0x32a3   : > { %v5156_v32 = vmul.f32 1.442695, %v5153_v35 }
0x32a4   : > { %v5169_v51 = vpop.permute.xlu1 %5168 }
0x32a5   : > { %6705 = vpow2.f32 %v5156_v32  ;;  %6454 = vmatpush3.msk.msra.mxu1 %vm634_vm4, %v5169_v51 }
0x32a6   : > { %6463 = vmatprep.subr.bf16.mxu1 %v6782_v10 }
0x32a8   : > { %v5330_v3 = vpop.permute.xlu1 %5329 }
0x32a9   : > { %v5344_v5 = vsel %vm452_vm2, %v5324_v0, %v5330_v3 }
0x32ab   : > { %v6704_v40 = vpop.eup %6703 }
0x32ac   : > { %v5158_v44 = vsel %vm605_vm3, %v6704_v40, 0.0  ;;  %v5336_v4 = vpop.permute.xlu1 %5335 }
0x32ad   : > { %5159 = vadd.xlane.f32.xlu0 %v5158_v44  ;;  %v5345_v7 = vsel %vm1809_vm6, %v5344_v5, %v5336_v4 }
0x32af   : > { %v6706_v45 = vpop.eup %6705 }
0x32b0   : > { %v5161_v47 = vsel %vm605_vm3, %v6706_v45, 0.0 }
0x32b1   : > { %5162 = vadd.xlane.f32.xlu0 %v5161_v47 }
0x32c7   : > { %5245 = vrot.lane.b32.xlu0 %v7521_v27, %s7890_s12  ;;  %v6585_v27 = vld [vmem:[%s7820_s4 + $0x20] sm:$0xff]   ;;  %s7900_s12 = sld [smem:[#allocation15_spill]] }
0x32cd   : > { %s7773_s28 = scalar_lea.hbm %s7900_s12, %s5974_s17 }
0x333a   : > { %v5160_v52 = vpop.xlane.xlu0 %5159 }
0x333b   : > { %6707 = vrcp.f32 %v5160_v52 }
0x333e   : > { %v5163_v53 = vpop.xlane.xlu0 %5162 }
0x333f   : > { %6709 = vrcp.f32 %v5163_v53 }
0x3342   : > { %v5246_v54 = vpop.permute.xlu0 %5245 }
0x3343   : > { %6459 = vmatpush3.msk.msra.mxu0 %vm634_vm4, %v5246_v54 }
0x3344   : > { %6471 = vmatprep.subr.bf16.mxu0 %v6782_v10 }
0x3345   : > { %v6708_v55 = vpop.eup %6707 }
0x3346   : > { %v5166_v56 = vmul.f32 %v6708_v55, %v6704_v40  ;;  %v5887_v40 = vld [vmem:[%s7817_s1 + $0x28] sm:$0xff] }
0x3347   : > { %v5452_v44 = vadd.f32 1.0, %v5887_v40 }
0x3348   : > { %6456 = vmatmul.mubr.msk.f32.vlgmr.msra.gmra.mrb[46].mxu1 %vm630_vm5, %v5166_v56  ;;  %v6595_v56 = vld [vmem:[%s7824_s8 + $0xb0] sm:$0xff]  }
0x3349   : > { %v6710_v57 = vpop.eup %6709  ;;  %6467 = vmatprep.mubr.msk.bf16.mxu1 %vm6783_vm1, %v6782_v10  ;;  %6464 = vmatpush3.bf16.msra.mxu1 %v6585_v27 }
0x334a   : > { %v5167_v58 = vmul.f32 %v6710_v57, %v6706_v45  ;;  %6465 = vmatprep.subr.bf16.mxu1 %v6782_v10  ;;  %v6596_v57 = vld [vmem:[%s7824_s8 + $0xb8] sm:$0xff]  }
0x334c   : > { %6461 = vmatmul.mubr.msk.f32.vlgmr.msra.gmra.mrb[82].mxu0 %vm630_vm5, %v5167_v58  ;;  %v5943_v58 = vld [vmem:[%s7823_s7 + $0x2] ss:$0 sm:$0xff] }
0x334d   : > { %6475 = vmatprep.mubr.msk.bf16.mxu0 %vm6783_vm1, %v6782_v10  ;;  %6466 = vmatpush3.bf16.msra.mxu1 %v6586_v59 }
0x334e   : > { %6479 = vmatprep.subr.bf16.mxu1 %v6782_v10  ;;  %6472 = vmatpush3.bf16.msra.mxu0 %v6587_v41 }
0x334f   : > { %6473 = vmatprep.subr.bf16.mxu0 %v6782_v10 }
0x3352   : > { %6474 = vmatpush3.bf16.msra.mxu0 %v6588_v42 }
0x341b   : > { %v5241_v61 = vpop.f32.mrb[46].mxu1 }
0x341c   : > { %v6457_v60 = vpop.f32.mrb[47].mxu1 }
0x341f   : > { %v5318_v62 = vpop.f32.mrb[82].mxu0 }
0x3420   : > { %v5340_v1 = vcombine.low %v5241_v61, %v5318_v62  ;;  %v6462_v63 = vpop.f32.mrb[83].mxu0 }
0x3422   : > { %5341 = vrot.lane.b32.xlu0 %v5340_v1, %s7893_s24  ;;  %s6721_s24 = sshll.u32 %s6798_s25, 4  ;;  %s6722_s24 = int_to_ptr.vmem [resolvable:$false] %s6721_s24 }
0x3423   : > { %s6723_s11 = scalar_lea.vmem %s6722_s24, 256 }
0x3494   : > { %v5342_v8 = vpop.permute.xlu0 %5341 }
0x3495   : > { %v5346_v6 = vsel %vm1811_vm7, %v5345_v7, %v5342_v8 }
0x3496   : > { %v5347_v11 = vpack.c.bf16 %v5346_v6, %v5346_v6 }
0x3498   : > { %6468 = vmatmul.mubr.msk.bf16.vlgmr.msra.gmra.mrb[48].mxu1 %vm359_vm0, %v5347_v11 }
0x3499   : > { %6495 = vmatprep.mubr.msk.bf16.mxu1 %vm6783_vm1, %v6782_v10 }
0x356b   : > { %v5410_v14 = vpop.f32.mrb[48].mxu1 }
0x356c   : > { %v5411_v16 = vadd.f32 %v5934_v13, %v5410_v14  ;;  %v6469_v15 = vpop.f32.mrb[49].mxu1 }
0x356d   : > { %v5413_v17 = vpop.f32.mrb[50].mxu1 }
0x356e   : > { %5417 = vrot.lane.b32.xlu1 %v5411_v16, %s7894_s19  ;;  %v6470_v0 = vpop.f32.mrb[51].mxu1 }
0x35e0   : > { %v5418_v19 = vpop.permute.xlu1 %5417 }
0x35e1   : > { %v5420_v21 = vmul.f32 %v7494_v20, %v5418_v19 }
0x35e3   : > { %5422 = vrot.lane.b32.xlu0 %v5420_v21, %s7894_s19  ;;  %s7897_s19 = sld [smem:[#allocation6_spill]] }
0x35e9   : > { %s348_s14 = sand.u32 1, %s7897_s19  }
0x35ea   : > { %s5668_s26 = scalar_lea.sflag [#allocation3], %s348_s14 }
0x3655   : > { %v5423_v22 = vpop.permute.xlu0 %5422 }
0x3656   : > { %v5425_v24 = vadd.f32 %v5423_v22, %v7487_v18 }
0x3658   : > { %v5426_v25 = vsel %vm359_vm0, %v5425_v24, 0.0 }
0x3659   : > { %5427 = vadd.xlane.f32.xlu1 %v5426_v25 }
0x36e6   : > { %v5428_v2 = vpop.xlane.xlu1 %5427 }
0x36e7   : > { %v5429_v9 = vmul.f32 0.03125, %v5428_v2 }
0x36e9   : > { %v5430_v26 = vsub.f32 %v5425_v24, %v5429_v9 }
0x36eb   : > { %v5431_v28 = vmul.f32 %v5430_v26, %v5430_v26 }
0x36ed   : > { %v5432_v29 = vsel %vm359_vm0, %v5431_v28, 0.0 }
0x36ee   : > { %5433 = vadd.xlane.f32.xlu0 %v5432_v29 }
0x377b   : > { %v5434_v30 = vpop.xlane.xlu0 %5433 }
0x377c   : > { %v5435_v31 = vmul.f32 0.03125, %v5434_v30 }
0x377e   : > { %v5436_v12 = vadd.f32 1e-06, %v5435_v31 }
0x3780   : > { %6711 = vrsqrt.f32 %v5436_v12 }
0x378a   : > { %v6712_v33 = vpop.eup %6711 }
0x378b   : > { %v7707_v34 = vmul.f32 %v6712_v33, %v5430_v26 }
0x378d   : > { %v5439_v18 = vsel %vm359_vm0, %v7707_v34, 0.0 }
0x378e   : > { %5440 = vadd.xlane.f32.xlu0 %v5439_v18 }
0x37a4   : > { %5455 = vrot.lane.b32.xlu0 %v7494_v20, %s7895_s22  ;;  %v6589_v20 = vld [vmem:[%s7824_s8 + $0x80] sm:$0xff]  }
0x37a5   : > { %6480 = vmatpush3.bf16.msra.mxu1 %v6589_v20 }
0x37a6   : > { %6481 = vmatprep.subr.bf16.mxu1 %v6782_v10 }
0x37a9   : > { %6482 = vmatpush3.bf16.msra.mxu1 %v6590_v43 }
0x37aa   : > { %6483 = vmatprep.subr.bf16.mxu1 %v6782_v10 }
0x37ad   : > { %6484 = vmatpush3.bf16.msra.mxu1 %v6591_v46 }
0x37ae   : > { %6485 = vmatprep.subr.bf16.mxu1 %v6782_v10 }
0x37b1   : > { %6486 = vmatpush3.bf16.msra.mxu1 %v6592_v48 }
0x37b2   : > { %6487 = vmatprep.subr.bf16.mxu1 %v6782_v10 }
0x37b5   : > { %6488 = vmatpush3.bf16.msra.mxu1 %v6593_v49 }
0x37b6   : > { %6489 = vmatprep.subr.bf16.mxu1 %v6782_v10 }
0x37b9   : > { %6490 = vmatpush3.bf16.msra.mxu1 %v6594_v50 }
0x37ba   : > { %6491 = vmatprep.subr.bf16.mxu1 %v6782_v10 }
0x37bd   : > { %6492 = vmatpush3.bf16.msra.mxu1 %v6595_v56 }
0x37be   : > { %6493 = vmatprep.subr.bf16.mxu1 %v6782_v10  ;;  %v5964_v10 = vld [vmem:[%s7825_s9 + $0x2] ss:$0 sm:$0xff] }
0x37c1   : > { %6494 = vmatpush3.bf16.msra.mxu1 %v6596_v57 }
0x381b   : > { %v5441_v23 = vpop.xlane.xlu0 %5440 }
0x381c   : > { %v5442_v36 = vmul.f32 0.03125, %v5441_v23 }
0x381e   : > { %v5443_v37 = vsub.f32 %v7707_v34, %v5442_v36 }
0x381f   : > { %v5456_v52 = vpop.permute.xlu0 %5455 }
0x3820   : > { %v5444_v38 = vmul.f32 %v5443_v37, %v5443_v37 }
0x3822   : > { %v5445_v39 = vsel %vm359_vm0, %v5444_v38, 0.0 }
0x3823   : > { %5446 = vadd.xlane.f32.xlu1 %v5445_v39 }
0x38b0   : > { %v5447_v35 = vpop.xlane.xlu1 %5446 }
0x38b1   : > { %v5448_v32 = vmul.f32 0.03125, %v5447_v35 }
0x38b3   : > { %v5449_v51 = vadd.f32 1e-06, %v5448_v32 }
0x38b5   : > { %6713 = vrsqrt.f32 %v5449_v51 }
0x38bf   : > { %v6714_v45 = vpop.eup %6713 }
0x38c0   : > { %v5451_v47 = vmul.f32 %v6714_v45, %v5443_v37 }
0x38c2   : > { %v5453_v53 = vmul.f32 %v5452_v44, %v5451_v47 }
0x38c4   : > { %v5458_v54 = vadd.f32 %v5456_v52, %v5453_v53 }
0x38c6   : > { %v5459_v55 = vpack.c.bf16 %v5458_v54, %v5458_v54 }
0x38c8   : > { %6476 = vmatmul.mubr.msk.bf16.vlgmr.msra.gmra.mrb[84].mxu0 %vm359_vm0, %v5459_v55 }
0x399b   : > { %v5522_v27 = vpop.f32.mrb[84].mxu0 }
0x399c   : > { %v5523_v59 = vadd.f32 %v5943_v58, %v5522_v27  ;;  %v6477_v61 = vpop.f32.mrb[85].mxu0 }
0x399d   : > { %v5525_v60 = vpop.f32.mrb[86].mxu0 }
0x399e   : > { %v5528_v62 = vmax.f32 %v5523_v59, 0.0  ;;  %v6478_v1 = vpop.f32.mrb[87].mxu0 }
0x39a0   : > { %v5529_v63 = vpack.c.bf16 %v5528_v62, %v5528_v62 }
0x39a2   : > { %6496 = vmatmul.mubr.bf16.vlgmr.msra.gmra.mrb[52].mxu1 %v5529_v63 }
0x3a75   : > { %v5637_v3 = vpop.f32.mrb[52].mxu1 }
0x3a76   : > { %v5638_v4 = vadd.f32 %v5964_v10, %v5637_v3  ;;  %v6497_v5 = vpop.f32.mrb[53].mxu1 }
0x3a77   : > { %v5640_v7 = vpop.f32.mrb[54].mxu1 }
0x3a78   : > { %5644 = vrot.lane.b32.xlu1 %v5638_v4, %s7895_s22  ;;  %v6498_v8 = vpop.f32.mrb[55].mxu1 }
0x3aea   : > { %v5645_v6 = vpop.permute.xlu1 %5644 }
0x3aeb   : > { %v5647_v11 = vmul.f32 %v5887_v40, %v5645_v6 }
0x3aed   : > { %5649 = vrot.lane.b32.xlu1 %v5647_v11, %s7896_s13  ;;  %s5744_s13 = sshll.u32 %s348_s14, 3 }
0x3aee   : > { %s350_s23 = scalar_lea.vmem [#allocation2], %s5744_s13 }
0x3aef   : > { %s5681_s0 = sshll.u32 %s350_s23, 4  ;;  %s7775_s0 = int_to_ptr.vmem [resolvable:$true] %s5681_s0 }
0x3af0   : > { %s6717_s20 = scalar_lea.vmem %s7775_s0, 128  ;;  %p6724_p0 = scmp.lt.s32.totalorder %s7775_s0, %s6722_s24 }
0x3af1   : > { %p6718_p11 = scmp.ne.s32.totalorder %s7775_s0, %s6717_s20  ;;  %p6725_p1 = scmp.lt.s32.totalorder %s6723_s11, %s6717_s20 }
0x3af3   : > { %p6719_p12 = pnand %p6718_p11, %p6892_p5  ;;  %p6726_p2 = por %p6725_p1, %p6724_p0 }
0x3af5   : > { %p6720_p13 = pneg %p6719_p12 }
0x3af7   : > { %p6727_p3 = pnand %p6726_p2, %p6720_p13 }
0x3b5f   : > { %v5650_v13 = vpop.permute.xlu1 %5649 }
0x3b60   : > { %v5652_v14 = vadd.f32 %v5650_v13, %v7707_v34 }
0x3b62   : > { %v5653_v16 = vsel %vm359_vm0, %v5652_v14, 0.0 }
0x3b63   : > { %5654 = vadd.xlane.f32.xlu0 %v5653_v16 }
0x3bf0   : > { %v5655_v15 = vpop.xlane.xlu0 %5654 }
0x3bf1   : > { %v5656_v17 = vmul.f32 0.03125, %v5655_v15 }
0x3bf3   : > { %v5657_v0 = vsub.f32 %v5652_v14, %v5656_v17 }
0x3bf5   : > { %v5658_v19 = vmul.f32 %v5657_v0, %v5657_v0 }
0x3bf7   : > { %v5659_v21 = vsel %vm359_vm0, %v5658_v19, 0.0 }
0x3bf8   : > { %5660 = vadd.xlane.f32.xlu1 %v5659_v21 }
0x3c85   : > { %v5661_v22 = vpop.xlane.xlu1 %5660 }
0x3c86   : > { %v5662_v24 = vmul.f32 0.03125, %v5661_v22 }
0x3c88   : > { %v5663_v25 = vadd.f32 1e-06, %v5662_v24 }
0x3c8a   : > { %6715 = vrsqrt.f32 %v5663_v25 }
0x3c94   : > { %v6716_v2 = vpop.eup %6715 }
0x3c95   : > { %v5665_v9 = vmul.f32 %v6716_v2, %v5657_v0 }
0x3c97   : > { %5666 = vst.msk [vmem:[%s350_s23] sm:$0xff] %vm359_vm0, %v5665_v9 }
0x3c98   : > { %6730 = shalt.err (!%p6727_p3)
}
0x3c99   : > { %s6731_s29 = scalar_lea.hbm %s7773_s28, 128  ;;  %s6735_s27 = scalar_lea.hbm %s7900_s12, 256 }
0x3c9a   : > { %p6732_p4 = scmp.ne.s32.totalorder %s7773_s28, %s6731_s29  ;;  %p6736_p9 = scmp.lt.u32.totalorder %s7773_s28, %s7900_s12 }
0x3c9b   : > { %p6737_p10 = scmp.lt.u32.totalorder %s6735_s27, %s6731_s29  ;;  %p6739_p12 = scmp.lt.u32.totalorder %s6731_s29, %s7773_s28 }
0x3c9c   : > { %p6733_p7 = pnand %p6732_p4, %p6892_p5 }
0x3c9d   : > { %p6738_p11 = por %p6737_p10, %p6736_p9 }
0x3c9e   : > { %p6734_p8 = pneg %p6733_p7 }
0x3c9f   : > { %p6740_p13 = por %p6739_p12, %p6738_p11 }
0x3ca1   : > { %p6741_p0 = pnand %p6740_p13, %p6734_p8 }
0x3ca3   : > { %6744 = shalt.err (!%p6741_p0)
}
0x3ca4   : > { %6499 = dma.vmem_to_hbm [thread:$0]  (%p6892_p5), %s7775_s0, 128, %s7773_s28, %s5668_s26  }
0x3ca5 PF: > { %s7901_s10 = sld [smem:[#allocation8_spill]]  ;;  %s7902_s14 = sld [smem:[#allocation5_spill]] }
0x3cab   : > { %p6505_p1 = scmp.ge.s32.totalorder %s7901_s10, 2  ;;  %s5693_s17 = sand.u32 1, %s7902_s14  }
0x3cac   : > { %s5694_s23 = scalar_lea.sflag [#allocation3], %s5693_s17 }
0x3cad   : > { %p6502_p2 = pnand %p6505_p1, %p6896_p6 }
0x3caf   : > { %6762 = dma.done.wait (!%p6502_p2), %s5694_s23, 128  }
0x3cb0   : > { %6764 = vsyncadd (!%p6502_p2), %s5694_s23, 4294967168  ;;  %s7904_s16 = sld [smem:[#allocation10_spill]]  ;;  %s7905_s13 = sld [smem:[#allocation6_spill]] }
0x3cb1   : > { %s7906_s14 = sld [smem:[#allocation7_spill]]  ;;  %s7907_s15 = sld [smem:[#allocation11_spill]] }
0x3cb6   : > { %p20_p3 = scmp.ge.s32.totalorder %s7904_s16, 4  }
0x3cb8   :  { %22 = sbr.rel (!%p20_p3) target bundleno = 6 (0x6), region = 113 }
0x3cbf   :  { %5699 = vsyncpa [#allocation3], 1 }
0x3cc0   :  { %5701 = vsyncpa [#allocation3 + $0x1], 1 }

</bundles_post_ra>
